<compile_context>
chip_gen: v7x
topology: tpu7x:2x2x1
jax: 0.10.0
libtpu: 0.0.40
codegen_flags: <defaults>
</compile_context>

<pallas_src>
import functools
import numpy as np
import jax
import jax.numpy as jnp
from jax import lax
from jax.experimental import pallas as pl
from jax.experimental.pallas import tpu as pltpu


# ----------------------------- Pallas kernel ---------------------------------

def _fla_kernel(x_ref, wqkv_ref, bqkv_ref, pos_ref, inv_scale_ref, hmask_ref,
                wm_ref, bdwc_ref, wproj_ref, bproj_ref, o_ref, *,
                focusing_factor, tap_offsets, mm_dtype, approx_recip):
    f32 = jnp.float32
    x = x_ref[...]                                    # (TB, N, C)
    TB, N, C = x.shape
    M = TB * N
    xf = x.reshape(M, C)                              # N % 8 == 0 -> free reshape

    # Fused qkv projection: one MXU pass with 3C output lanes.  Operands are
    # cast to mm_dtype (bf16 on request); accumulation stays f32.
    qkv = jnp.dot(xf.astype(mm_dtype), wqkv_ref[...].astype(mm_dtype),
                  preferred_element_type=f32) + bqkv_ref[...]
    q = qkv[:, :C]
    k = qkv[:, C:2 * C]
    v = qkv[:, 2 * C:]

    # Positional encoding on k: (N, C) broadcast over the TB windows.
    k = (k.reshape(TB, N, C) + pos_ref[...][None]).reshape(M, C)

    # Focusing kernel function; inv_scale = 1/softplus(scale) precomputed.
    inv_scale = inv_scale_ref[...]                    # (1, C)
    q = (jnp.maximum(q, 0.0) + 1e-6) * inv_scale
    k = (jnp.maximum(k, 0.0) + 1e-6) * inv_scale

    q_norm = jnp.sqrt(jnp.sum(q * q, axis=-1, keepdims=True))
    k_norm = jnp.sqrt(jnp.sum(k * k, axis=-1, keepdims=True))

    if isinstance(focusing_factor, int) and focusing_factor >= 1:
        def _pow(a):                                  # exact small-integer power
            out = a
            for _ in range(focusing_factor - 1):
                out = out * a
            return out
    else:                                             # general fallback (EUP)
        def _pow(a):
            return jnp.power(a, focusing_factor)

    qp = _pow(q)
    kp = _pow(k)
    q = qp * lax.rsqrt(jnp.sum(qp * qp, axis=-1, keepdims=True)) * q_norm
    k = kp * lax.rsqrt(jnp.sum(kp * kp, axis=-1, keepdims=True)) * k_norm

    inv_sqrt_n = float(N) ** (-0.5)
    hmask = hmask_ref[...]                            # (C, C) block-diag ones

    q3 = q.reshape(TB, N, C)
    k3 = k.reshape(TB, N, C)
    v3 = v.reshape(TB, N, C)

    # --- linear attention, whole-C with block-diagonal head mask --------------
    # NOTE: for production head_dim >= 128 switch to head-batched dot_general
    # (the masked CxC form wastes a num_heads factor of MXU FLOPs there).
    kv = jnp.einsum('bnc,bnd->bcd',
                    (k3 * inv_sqrt_n).astype(mm_dtype),
                    (v3 * inv_sqrt_n).astype(mm_dtype),
                    preferred_element_type=f32)       # (TB, C, C)
    kv = kv * hmask[None, :, :]                       # zero cross-head blocks
    attn = jnp.einsum('bnc,bcd->bnd', q3.astype(mm_dtype), kv.astype(mm_dtype),
                      preferred_element_type=f32).reshape(M, C)

    # z = 1 / (q . mean_k summed within head + eps).  Head-sum + broadcast via
    # the block-diagonal matrix, kept in f32 (it is the normalizer).  For
    # production head_dim >= 128 use a per-head reshape+sum instead (saves an
    # N*C*C MXU pass); at these sizes the matmul is negligible and lane-aligned.
    k_mean = jnp.mean(k3, axis=1, keepdims=True)      # (TB, 1, C)
    s = jnp.dot((q3 * k_mean).reshape(M, C), hmask,
                preferred_element_type=f32)           # (M, C)
    if approx_recip:
        attn = attn * pl.reciprocal(s + 1e-6, approx=True)   # EUP slot
    else:
        attn = attn / (s + 1e-6)

    # --- depthwise KxK conv on v: static token-axis rolls + masked FMAs -------
    # wm[t] folds the per-tap per-channel weight with the window-boundary mask,
    # so any cross-window bleed from rolling the flat (TB*N) token axis (and
    # the circular wrap at the ends) is zeroed out.
    dwc = jnp.zeros((TB, N, C), f32)
    for t, off in enumerate(tap_offsets):
        shifted = v if off == 0 else jnp.roll(v, -off, axis=0)
        dwc = dwc + shifted.reshape(TB, N, C) * wm_ref[t]
    y = attn + (dwc + bdwc_ref[...]).reshape(M, C)

    # output projection
    out = jnp.dot(y.astype(mm_dtype), wproj_ref[...].astype(mm_dtype),
                  preferred_element_type=f32) + bproj_ref[...]
    o_ref[...] = out.reshape(TB, N, C).astype(o_ref.dtype)


# ------------------------------ wrapper ---------------------------------------

def _pick_windows_per_step(B, N, target_rows=256):
    """Windows per grid step: fill >= target_rows MXU rows per matmul while
    always keeping >= 2 grid steps (pipeline overlap + v7x dual-TC sharding)."""
    divisors = [d for d in range(1, B + 1) if B % d == 0]
    cands = [d for d in divisors if B // d >= 2] or [B]
    good = [d for d in cands if d * N >= target_rows]
    return min(good) if good else max(cands)


def focused_linear_attention(x, kp, *, num_heads, focusing_factor, kernel_size,
                             windows_per_step=None, matmul_dtype=jnp.float32,
                             approx_recip=None):
    """Pallas forward of FocusedLinearAttention.

    attn_drop / proj_drop are p=0.0 (identity) and the optional `mask` arg of
    the reference forward is unused, so neither appears here.
    """
    del num_heads                      # head structure is encoded in kp["hmask"]
    B, N, C = x.shape
    taps = kernel_size * kernel_size
    tap_offsets = tuple(int(o) for o in kp["tap_offsets"])
    assert len(tap_offsets) == taps

    if approx_recip is None:
        approx_recip = (matmul_dtype != jnp.float32)

    TB = (_pick_windows_per_step(B, N) if windows_per_step is None
          else windows_per_step)
    assert B % TB == 0, "windows_per_step must divide B"

    # Pre-cast the big matmul weights so their DMA bytes + resident VMEM match
    # the requested MXU operand dtype (halved in bf16 mode).
    wqkv = kp["w_qkv3_t"].astype(matmul_dtype)
    wproj = kp["wproj_t"].astype(matmul_dtype)

    kern = functools.partial(_fla_kernel,
                             focusing_factor=focusing_factor,
                             tap_offsets=tap_offsets,
                             mm_dtype=matmul_dtype,
                             approx_recip=approx_recip)

    def const(shape):
        # Grid-invariant operand: fetched once, single-buffered (halves its
        # resident VMEM vs. default double buffering -- matters on v7x 64MiB).
        nd = len(shape)
        return pl.BlockSpec(shape, lambda i, _nd=nd: (0,) * _nd,
                            pipeline_mode=pl.Buffered(1))

    in_specs = [
        pl.BlockSpec((TB, N, C), lambda i: (i, 0, 0)),   # x (streamed)
        const((C, 3 * C)), const((1, 3 * C)),            # fused qkv weight/bias
        const((N, C)),                                    # positional encoding
        const((1, C)),                                    # 1/softplus(scale)
        const((C, C)),                                    # block-diag head mask
        const((taps, N, C)),                              # masked per-tap conv weights
        const((1, C)),                                    # conv bias (full channel)
        const((C, C)), const((1, C)),                     # wproj_t, bproj
    ]

    flops_per_window = (
        2 * N * C * 3 * C          # fused qkv
        + 2 * N * C * C            # kv
        + 2 * N * C * C            # q @ kv
        + 2 * N * C * C            # z head-sum matmul
        + 2 * taps * N * C         # depthwise conv (rolls + FMA)
        + 2 * N * C * C)           # output projection
    weight_bytes = 4 * (C * 3 * C + 3 * C + N * C + C + C * C
                        + taps * N * C + C + C * C + C)
    cost = pl.CostEstimate(flops=B * flops_per_window,
                           transcendentals=B * N * (2 * C + 8),
                           bytes_accessed=2 * B * N * C * 4 + weight_bytes)

    return pl.pallas_call(
        kern,
        out_shape=jax.ShapeDtypeStruct((B, N, C), x.dtype),
        grid_spec=pltpu.PrefetchScalarGridSpec(
            num_scalar_prefetch=0,
            grid=(B // TB,),
            in_specs=in_specs,
            out_specs=pl.BlockSpec((TB, N, C), lambda i: (i, 0, 0)),
        ),
        compiler_params=pltpu.CompilerParams(
            dimension_semantics=("parallel",),
            vmem_limit_bytes=32 * 1024 * 1024),
        cost_estimate=cost,
    )(x, wqkv, kp["b_qkv3"], kp["pos"], kp["inv_scale"], kp["hmask"],
      kp["w_taps_masked"], kp["b_dwc"], wproj, kp["bproj"])


# --------------------------- parameter setup (glue) ----------------------------

def init_params(key, dim, num_heads, window_size, kernel_size):
    N = window_size[0] * window_size[1]
    d = dim // num_heads
    keys = jax.random.split(key, 8)
    return dict(
        w_qkv=jax.random.normal(keys[0], (3 * dim, dim), jnp.float32) * 0.1,
        b_qkv=jax.random.normal(keys[1], (3 * dim,), jnp.float32) * 0.02,
        w_proj=jax.random.normal(keys[2], (dim, dim), jnp.float32) * 0.1,
        b_proj=jax.random.normal(keys[3], (dim,), jnp.float32) * 0.02,
        w_dwc=jax.random.normal(keys[4], (d, 1, kernel_size, kernel_size),
                                jnp.float32) * 0.1,
        b_dwc=jax.random.normal(keys[5], (d,), jnp.float32) * 0.02,
        scale=jax.random.normal(keys[6], (1, 1, dim), jnp.float32) * 0.02,
        pos=jax.random.normal(keys[7], (1, N, dim), jnp.float32) * 0.02,
    )


def build_dwc_taps(w_dwc, b_dwc, H, W, num_heads):
    """Depthwise Conv2d -> per-tap token offsets + (boundary-mask * weight) table.

    For tap t with spatial offset (dy, dx), output token p = y*W + x reads the
    source token p + dy*W + dx iff (y+dy, x+dx) stays inside the window; wm[t]
    holds that validity mask multiplied by the per-channel tap weight, so the
    kernel only needs `roll(v, -(dy*W+dx)) * wm[t]` accumulations.
    """
    d, _, K, _ = w_dwc.shape
    pad = K // 2
    N = H * W
    C = num_heads * d
    taps = K * K
    w = np.asarray(w_dwc, dtype=np.float32)
    offsets = []
    wm = np.zeros((taps, N, C), dtype=np.float32)
    for ky in range(K):
        for kx in range(K):
            t = ky * K + kx
            dy, dx = ky - pad, kx - pad
            offsets.append(dy * W + dx)
            valid = np.zeros((N,), dtype=np.float32)
            for y in range(H):
                for xx in range(W):
                    if 0 <= y + dy < H and 0 <= xx + dx < W:
                        valid[y * W + xx] = 1.0
            w_row = np.tile(w[:, 0, ky, kx], num_heads)   # channel c -> w[c % d]
            wm[t] = valid[:, None] * w_row[None, :]
    b_full = np.tile(np.asarray(b_dwc, dtype=np.float32),
                     num_heads).reshape(1, C)
    return tuple(offsets), jnp.asarray(wm), jnp.asarray(b_full)


def pack_kernel_params(p, dim, num_heads, window_size):
    C = dim
    d = C // num_heads
    H, W = window_size
    tap_offsets, wm, b_dwc_full = build_dwc_taps(p["w_dwc"], p["b_dwc"],
                                                 H, W, num_heads)
    hmask = np.kron(np.eye(num_heads, dtype=np.float32),
                    np.ones((d, d), dtype=np.float32))
    inv_scale = 1.0 / jax.nn.softplus(p["scale"][0])     # (1, C); overflow-safe
    return dict(
        w_qkv3_t=p["w_qkv"].T,                        # (C, 3C), cols = [q|k|v]
        b_qkv3=p["b_qkv"].reshape(1, 3 * C),
        pos=p["pos"][0],                              # (N, C)
        inv_scale=inv_scale,
        hmask=jnp.asarray(hmask),
        tap_offsets=tap_offsets,
        w_taps_masked=wm,
        b_dwc=b_dwc_full,
        wproj_t=p["w_proj"].T,
        bproj=p["b_proj"].reshape(1, C),
    )


# ------------------------- pure-JAX reference (check) --------------------------

def reference_forward(x, p, *, num_heads, focusing_factor, kernel_size):
    B, N, C = x.shape
    h = num_heads
    d = C // h
    qkv = x @ p["w_qkv"].T + p["b_qkv"]
    q, k, v = qkv[..., :C], qkv[..., C:2 * C], qkv[..., 2 * C:]
    k = k + p["pos"]
    q = jnp.maximum(q, 0.0) + 1e-6
    k = jnp.maximum(k, 0.0) + 1e-6
    scale = jax.nn.softplus(p["scale"])
    q = q / scale
    k = k / scale
    qn = jnp.sqrt(jnp.sum(q * q, -1, keepdims=True))
    kn = jnp.sqrt(jnp.sum(k * k, -1, keepdims=True))
    q = q ** focusing_factor
    k = k ** focusing_factor
    q = q / jnp.sqrt(jnp.sum(q * q, -1, keepdims=True)) * qn
    k = k / jnp.sqrt(jnp.sum(k * k, -1, keepdims=True)) * kn
    q = q.reshape(B, N, h, d).transpose(0, 2, 1, 3)
    k = k.reshape(B, N, h, d).transpose(0, 2, 1, 3)
    v = v.reshape(B, N, h, d).transpose(0, 2, 1, 3)
    z = 1.0 / (q @ jnp.swapaxes(k.mean(axis=-2, keepdims=True), -2, -1) + 1e-6)
    kv = (jnp.swapaxes(k, -2, -1) * N ** (-0.5)) @ (v * N ** (-0.5))
    xo = (q @ kv) * z
    Hs = Ws = int(N ** 0.5)
    xo = xo.transpose(0, 2, 1, 3).reshape(B, N, C)
    vimg = v.reshape(B * h, Hs, Ws, d).transpose(0, 3, 1, 2)     # NCHW
    conv = lax.conv_general_dilated(
        vimg, p["w_dwc"], window_strides=(1, 1),
        padding=[(kernel_size // 2,) * 2] * 2,
        dimension_numbers=("NCHW", "OIHW", "NCHW"),
        feature_group_count=d) + p["b_dwc"].reshape(1, d, 1, 1)
    conv = conv.reshape(B, C, N).transpose(0, 2, 1)
    xo = xo + conv
    xo = xo @ p["w_proj"].T + p["b_proj"]
    return xo


# ----------------------------------- main --------------------------------------

if __name__ == "__main__":
    dim = 128                     # multiple of 128 -> lane-dense stores
    num_heads = 4
    window_size = (4, 4)          # N = 16, H = W = 4
    kernel_size = 5
    focusing_factor = 3
    B = 16                        # num_windows * batch -> TB=8, grid=2
    N = window_size[0] * window_size[1]

    key = jax.random.PRNGKey(0)
    kx, kparam = jax.random.split(key)
    x = jax.random.normal(kx, (B, N, dim), jnp.float32)
    params = init_params(kparam, dim, num_heads, window_size, kernel_size)
    kparams = pack_kernel_params(params, dim, num_heads, window_size)

    ref = reference_forward(x, params, num_heads=num_heads,
                            focusing_factor=focusing_factor,
                            kernel_size=kernel_size)

    # f32 MXU-operand path: strict parity with the f32 reference.
    out = jax.block_until_ready(
        focused_linear_attention(x, kparams, num_heads=num_heads,
                                 focusing_factor=focusing_factor,
                                 kernel_size=kernel_size,
                                 matmul_dtype=jnp.float32))
    assert out.shape == (B, N, dim)
    np.testing.assert_allclose(np.asarray(out), np.asarray(ref),
                               rtol=2e-3, atol=2e-3)

    # bf16 MXU-operand path (f32 accumulation, approx reciprocal): validated
    # at a loose tolerance -- bf16 operand rounding propagates through the
    # cubic focusing nonlinearity, so a few-percent deviation is expected.
    out_bf16 = jax.block_until_ready(
        focused_linear_attention(x, kparams, num_heads=num_heads,
                                 focusing_factor=focusing_factor,
                                 kernel_size=kernel_size,
                                 matmul_dtype=jnp.bfloat16))
    np.testing.assert_allclose(np.asarray(out_bf16), np.asarray(ref),
                               rtol=1e-1, atol=1e-1)

    print("KERNEL_OK")
</pallas_src>

<mosaic_0001>
module attributes {stable_mosaic.version = 11 : i64} {
  func.func @_fla_kernel(%arg0: i32, %arg1: memref<8x16x128xf32, #tpu.memory_space<vmem>>, %arg2: memref<128x384xf32, #tpu.memory_space<vmem>>, %arg3: memref<1x384xf32, #tpu.memory_space<vmem>>, %arg4: memref<16x128xf32, #tpu.memory_space<vmem>>, %arg5: memref<1x128xf32, #tpu.memory_space<vmem>>, %arg6: memref<128x128xf32, #tpu.memory_space<vmem>>, %arg7: memref<25x16x128xf32, #tpu.memory_space<vmem>>, %arg8: memref<1x128xf32, #tpu.memory_space<vmem>>, %arg9: memref<128x128xf32, #tpu.memory_space<vmem>>, %arg10: memref<1x128xf32, #tpu.memory_space<vmem>>, %arg11: memref<8x16x128xf32, #tpu.memory_space<vmem>>) attributes {dimension_semantics = [#tpu.dimension_semantics<parallel>], iteration_bounds = array<i64: 2>, scalar_prefetch = 0 : i64, scratch_operands = 0 : i64, tpu.core_type = #tpu.core_type<tc>, window_params = [{transform_indices = @transform_0, window_bounds = array<i64: 8, 16, 128>}, {pipeline_mode = #tpu.pipeline_mode<synchronous>, transform_indices = @transform_1, window_bounds = array<i64: 128, 384>}, {pipeline_mode = #tpu.pipeline_mode<synchronous>, transform_indices = @transform_2, window_bounds = array<i64: 1, 384>}, {pipeline_mode = #tpu.pipeline_mode<synchronous>, transform_indices = @transform_3, window_bounds = array<i64: 16, 128>}, {pipeline_mode = #tpu.pipeline_mode<synchronous>, transform_indices = @transform_4, window_bounds = array<i64: 1, 128>}, {pipeline_mode = #tpu.pipeline_mode<synchronous>, transform_indices = @transform_5, window_bounds = array<i64: 128, 128>}, {pipeline_mode = #tpu.pipeline_mode<synchronous>, transform_indices = @transform_6, window_bounds = array<i64: 25, 16, 128>}, {pipeline_mode = #tpu.pipeline_mode<synchronous>, transform_indices = @transform_7, window_bounds = array<i64: 1, 128>}, {pipeline_mode = #tpu.pipeline_mode<synchronous>, transform_indices = @transform_8, window_bounds = array<i64: 128, 128>}, {pipeline_mode = #tpu.pipeline_mode<synchronous>, transform_indices = @transform_9, window_bounds = array<i64: 1, 128>}, {transform_indices = @transform_10, window_bounds = array<i64: 8, 16, 128>}]} {
    %c0 = arith.constant 0 : index
    %c0_0 = arith.constant 0 : index
    %c0_1 = arith.constant 0 : index
    %0 = vector.load %arg1[%c0, %c0_0, %c0_1] : memref<8x16x128xf32, #tpu.memory_space<vmem>>, vector<8x16x128xf32>
    %1 = vector.shape_cast %0 : vector<8x16x128xf32> to vector<128x128xf32>
    %c0_2 = arith.constant 0 : index
    %c0_3 = arith.constant 0 : index
    %2 = vector.load %arg2[%c0_2, %c0_3] : memref<128x384xf32, #tpu.memory_space<vmem>>, vector<128x384xf32>
    %cst = arith.constant dense<0.000000e+00> : vector<128x384xf32>
    %3 = tpu.matmul %1, %2, %cst {dimension_numbers = #tpu.dot_dimension_numbers<[1], [0], [0], [1], [0, 0, 1, 1], [], []>} : vector<128x128xf32>, vector<128x384xf32>, vector<128x384xf32> -> vector<128x384xf32>
    %c0_4 = arith.constant 0 : index
    %c0_5 = arith.constant 0 : index
    %4 = vector.load %arg3[%c0_4, %c0_5] : memref<1x384xf32, #tpu.memory_space<vmem>>, vector<1x384xf32>
    %5 = vector.broadcast %4 : vector<1x384xf32> to vector<128x384xf32>
    %6 = arith.addf %3, %5 : vector<128x384xf32>
    %7 = vector.extract_strided_slice %6 {offsets = [0, 0], sizes = [128, 128], strides = [1, 1]} : vector<128x384xf32> to vector<128x128xf32>
    %8 = vector.extract_strided_slice %6 {offsets = [0, 128], sizes = [128, 128], strides = [1, 1]} : vector<128x384xf32> to vector<128x128xf32>
    %9 = vector.extract_strided_slice %6 {offsets = [0, 256], sizes = [128, 128], strides = [1, 1]} : vector<128x384xf32> to vector<128x128xf32>
    %10 = vector.shape_cast %8 : vector<128x128xf32> to vector<8x16x128xf32>
    %c0_6 = arith.constant 0 : index
    %c0_7 = arith.constant 0 : index
    %11 = vector.load %arg4[%c0_6, %c0_7] : memref<16x128xf32, #tpu.memory_space<vmem>>, vector<16x128xf32>
    %12 = vector.shape_cast %11 : vector<16x128xf32> to vector<1x16x128xf32>
    %13 = vector.broadcast %12 : vector<1x16x128xf32> to vector<8x16x128xf32>
    %14 = arith.addf %10, %13 : vector<8x16x128xf32>
    %15 = vector.shape_cast %14 : vector<8x16x128xf32> to vector<128x128xf32>
    %c0_8 = arith.constant 0 : index
    %c0_9 = arith.constant 0 : index
    %16 = vector.load %arg5[%c0_8, %c0_9] : memref<1x128xf32, #tpu.memory_space<vmem>>, vector<1x128xf32>
    %cst_10 = arith.constant 0.000000e+00 : f32
    %17 = vector.broadcast %cst_10 : f32 to vector<128x128xf32>
    %18 = arith.maximumf %7, %17 : vector<128x128xf32>
    %cst_11 = arith.constant 9.99999997E-7 : f32
    %19 = vector.broadcast %cst_11 : f32 to vector<128x128xf32>
    %20 = arith.addf %18, %19 : vector<128x128xf32>
    %21 = vector.broadcast %16 : vector<1x128xf32> to vector<128x128xf32>
    %22 = arith.mulf %20, %21 : vector<128x128xf32>
    %cst_12 = arith.constant 0.000000e+00 : f32
    %23 = vector.broadcast %cst_12 : f32 to vector<128x128xf32>
    %24 = arith.maximumf %15, %23 : vector<128x128xf32>
    %cst_13 = arith.constant 9.99999997E-7 : f32
    %25 = vector.broadcast %cst_13 : f32 to vector<128x128xf32>
    %26 = arith.addf %24, %25 : vector<128x128xf32>
    %27 = vector.broadcast %16 : vector<1x128xf32> to vector<128x128xf32>
    %28 = arith.mulf %26, %27 : vector<128x128xf32>
    %29 = arith.mulf %22, %22 : vector<128x128xf32>
    %cst_14 = arith.constant dense<0.000000e+00> : vector<128xf32>
    %30 = vector.multi_reduction <add>, %29, %cst_14 [1] : vector<128x128xf32> to vector<128xf32>
    %31 = vector.shape_cast %30 : vector<128xf32> to vector<128x1xf32>
    %32 = math.sqrt %31 : vector<128x1xf32>
    %33 = arith.mulf %28, %28 : vector<128x128xf32>
    %cst_15 = arith.constant dense<0.000000e+00> : vector<128xf32>
    %34 = vector.multi_reduction <add>, %33, %cst_15 [1] : vector<128x128xf32> to vector<128xf32>
    %35 = vector.shape_cast %34 : vector<128xf32> to vector<128x1xf32>
    %36 = math.sqrt %35 : vector<128x1xf32>
    %37 = arith.mulf %22, %22 : vector<128x128xf32>
    %38 = arith.mulf %37, %22 : vector<128x128xf32>
    %39 = arith.mulf %28, %28 : vector<128x128xf32>
    %40 = arith.mulf %39, %28 : vector<128x128xf32>
    %41 = arith.mulf %38, %38 : vector<128x128xf32>
    %cst_16 = arith.constant dense<0.000000e+00> : vector<128xf32>
    %42 = vector.multi_reduction <add>, %41, %cst_16 [1] : vector<128x128xf32> to vector<128xf32>
    %43 = vector.shape_cast %42 : vector<128xf32> to vector<128x1xf32>
    %44 = math.rsqrt %43 : vector<128x1xf32>
    %45 = vector.broadcast %44 : vector<128x1xf32> to vector<128x128xf32>
    %46 = arith.mulf %38, %45 : vector<128x128xf32>
    %47 = vector.broadcast %32 : vector<128x1xf32> to vector<128x128xf32>
    %48 = arith.mulf %46, %47 : vector<128x128xf32>
    %49 = arith.mulf %40, %40 : vector<128x128xf32>
    %cst_17 = arith.constant dense<0.000000e+00> : vector<128xf32>
    %50 = vector.multi_reduction <add>, %49, %cst_17 [1] : vector<128x128xf32> to vector<128xf32>
    %51 = vector.shape_cast %50 : vector<128xf32> to vector<128x1xf32>
    %52 = math.rsqrt %51 : vector<128x1xf32>
    %53 = vector.broadcast %52 : vector<128x1xf32> to vector<128x128xf32>
    %54 = arith.mulf %40, %53 : vector<128x128xf32>
    %55 = vector.broadcast %36 : vector<128x1xf32> to vector<128x128xf32>
    %56 = arith.mulf %54, %55 : vector<128x128xf32>
    %c0_18 = arith.constant 0 : index
    %c0_19 = arith.constant 0 : index
    %57 = vector.load %arg6[%c0_18, %c0_19] : memref<128x128xf32, #tpu.memory_space<vmem>>, vector<128x128xf32>
    %58 = vector.shape_cast %48 : vector<128x128xf32> to vector<8x16x128xf32>
    %59 = vector.shape_cast %56 : vector<128x128xf32> to vector<8x16x128xf32>
    %60 = vector.shape_cast %9 : vector<128x128xf32> to vector<8x16x128xf32>
    %cst_20 = arith.constant 2.500000e-01 : f32
    %61 = vector.broadcast %cst_20 : f32 to vector<8x16x128xf32>
    %62 = arith.mulf %59, %61 : vector<8x16x128xf32>
    %cst_21 = arith.constant 2.500000e-01 : f32
    %63 = vector.broadcast %cst_21 : f32 to vector<8x16x128xf32>
    %64 = arith.mulf %60, %63 : vector<8x16x128xf32>
    "tpu.trace_start"() <{level = 10 : i32, message = "bnc,bnd->bcd"}> : () -> ()
    %cst_22 = arith.constant dense<0.000000e+00> : vector<8x128x128xf32>
    %65 = tpu.matmul %62, %64, %cst_22 {dimension_numbers = #tpu.dot_dimension_numbers<[1], [1], [2], [2], [0, 0, 0, 2, 1, 2], [0], [0]>} : vector<8x16x128xf32>, vector<8x16x128xf32>, vector<8x128x128xf32> -> vector<8x128x128xf32>
    "tpu.trace_stop"() : () -> ()
    %66 = vector.shape_cast %57 : vector<128x128xf32> to vector<1x128x128xf32>
    %67 = vector.broadcast %66 : vector<1x128x128xf32> to vector<8x128x128xf32>
    %68 = arith.mulf %65, %67 : vector<8x128x128xf32>
    "tpu.trace_start"() <{level = 10 : i32, message = "bnc,bcd->bnd"}> : () -> ()
    %cst_23 = arith.constant dense<0.000000e+00> : vector<8x16x128xf32>
    %69 = tpu.matmul %58, %68, %cst_23 {dimension_numbers = #tpu.dot_dimension_numbers<[2], [1], [1], [2], [0, 0, 0, 1, 1, 2], [0], [0]>} : vector<8x16x128xf32>, vector<8x128x128xf32>, vector<8x16x128xf32> -> vector<8x16x128xf32>
    "tpu.trace_stop"() : () -> ()
    %70 = vector.shape_cast %69 : vector<8x16x128xf32> to vector<128x128xf32>
    %cst_24 = arith.constant dense<0.000000e+00> : vector<8x128xf32>
    %71 = vector.multi_reduction <add>, %59, %cst_24 [1] : vector<8x16x128xf32> to vector<8x128xf32>
    %72 = vector.shape_cast %71 : vector<8x128xf32> to vector<8x1x128xf32>
    %cst_25 = arith.constant 1.600000e+01 : f32
    %73 = vector.broadcast %cst_25 : f32 to vector<8x1x128xf32>
    %74 = arith.divf %72, %73 : vector<8x1x128xf32>
    %75 = vector.broadcast %74 : vector<8x1x128xf32> to vector<8x16x128xf32>
    %76 = arith.mulf %58, %75 : vector<8x16x128xf32>
    %77 = vector.shape_cast %76 : vector<8x16x128xf32> to vector<128x128xf32>
    %cst_26 = arith.constant dense<0.000000e+00> : vector<128x128xf32>
    %78 = tpu.matmul %77, %57, %cst_26 {dimension_numbers = #tpu.dot_dimension_numbers<[1], [0], [0], [1], [0, 0, 1, 1], [], []>} : vector<128x128xf32>, vector<128x128xf32>, vector<128x128xf32> -> vector<128x128xf32>
    %cst_27 = arith.constant 9.99999997E-7 : f32
    %79 = vector.broadcast %cst_27 : f32 to vector<128x128xf32>
    %80 = arith.addf %78, %79 : vector<128x128xf32>
    %81 = arith.divf %70, %80 : vector<128x128xf32>
    %cst_28 = arith.constant 0.000000e+00 : f32
    %82 = vector.broadcast %cst_28 : f32 to vector<8x16x128xf32>
    %83 = vector.extract_strided_slice %9 {offsets = [118, 0], sizes = [10, 128], strides = [1, 1]} : vector<128x128xf32> to vector<10x128xf32>
    %84 = vector.extract_strided_slice %9 {offsets = [0, 0], sizes = [118, 128], strides = [1, 1]} : vector<128x128xf32> to vector<118x128xf32>
    %85 = tpu.concatenate %83, %84 in 0 : vector<10x128xf32>, vector<118x128xf32> -> vector<128x128xf32>
    %86 = vector.shape_cast %85 : vector<128x128xf32> to vector<8x16x128xf32>
    %c0_29 = arith.constant 0 : index
    %c0_30 = arith.constant 0 : index
    %c0_31 = arith.constant 0 : index
    %87 = vector.load %arg7[%c0_29, %c0_30, %c0_31] : memref<25x16x128xf32, #tpu.memory_space<vmem>>, vector<1x16x128xf32>
    %88 = vector.shape_cast %87 : vector<1x16x128xf32> to vector<16x128xf32>
    %89 = vector.shape_cast %88 : vector<16x128xf32> to vector<1x16x128xf32>
    %90 = vector.broadcast %89 : vector<1x16x128xf32> to vector<8x16x128xf32>
    %91 = arith.mulf %86, %90 : vector<8x16x128xf32>
    %92 = arith.addf %82, %91 : vector<8x16x128xf32>
    %93 = vector.extract_strided_slice %9 {offsets = [119, 0], sizes = [9, 128], strides = [1, 1]} : vector<128x128xf32> to vector<9x128xf32>
    %94 = vector.extract_strided_slice %9 {offsets = [0, 0], sizes = [119, 128], strides = [1, 1]} : vector<128x128xf32> to vector<119x128xf32>
    %95 = tpu.concatenate %93, %94 in 0 : vector<9x128xf32>, vector<119x128xf32> -> vector<128x128xf32>
    %96 = vector.shape_cast %95 : vector<128x128xf32> to vector<8x16x128xf32>
    %c1 = arith.constant 1 : index
    %c0_32 = arith.constant 0 : index
    %c0_33 = arith.constant 0 : index
    %97 = vector.load %arg7[%c1, %c0_32, %c0_33] : memref<25x16x128xf32, #tpu.memory_space<vmem>>, vector<1x16x128xf32>
    %98 = vector.shape_cast %97 : vector<1x16x128xf32> to vector<16x128xf32>
    %99 = vector.shape_cast %98 : vector<16x128xf32> to vector<1x16x128xf32>
    %100 = vector.broadcast %99 : vector<1x16x128xf32> to vector<8x16x128xf32>
    %101 = arith.mulf %96, %100 : vector<8x16x128xf32>
    %102 = arith.addf %92, %101 : vector<8x16x128xf32>
    %103 = vector.extract_strided_slice %9 {offsets = [120, 0], sizes = [8, 128], strides = [1, 1]} : vector<128x128xf32> to vector<8x128xf32>
    %104 = vector.extract_strided_slice %9 {offsets = [0, 0], sizes = [120, 128], strides = [1, 1]} : vector<128x128xf32> to vector<120x128xf32>
    %105 = tpu.concatenate %103, %104 in 0 : vector<8x128xf32>, vector<120x128xf32> -> vector<128x128xf32>
    %106 = vector.shape_cast %105 : vector<128x128xf32> to vector<8x16x128xf32>
    %c2 = arith.constant 2 : index
    %c0_34 = arith.constant 0 : index
    %c0_35 = arith.constant 0 : index
    %107 = vector.load %arg7[%c2, %c0_34, %c0_35] : memref<25x16x128xf32, #tpu.memory_space<vmem>>, vector<1x16x128xf32>
    %108 = vector.shape_cast %107 : vector<1x16x128xf32> to vector<16x128xf32>
    %109 = vector.shape_cast %108 : vector<16x128xf32> to vector<1x16x128xf32>
    %110 = vector.broadcast %109 : vector<1x16x128xf32> to vector<8x16x128xf32>
    %111 = arith.mulf %106, %110 : vector<8x16x128xf32>
    %112 = arith.addf %102, %111 : vector<8x16x128xf32>
    %113 = vector.extract_strided_slice %9 {offsets = [121, 0], sizes = [7, 128], strides = [1, 1]} : vector<128x128xf32> to vector<7x128xf32>
    %114 = vector.extract_strided_slice %9 {offsets = [0, 0], sizes = [121, 128], strides = [1, 1]} : vector<128x128xf32> to vector<121x128xf32>
    %115 = tpu.concatenate %113, %114 in 0 : vector<7x128xf32>, vector<121x128xf32> -> vector<128x128xf32>
    %116 = vector.shape_cast %115 : vector<128x128xf32> to vector<8x16x128xf32>
    %c3 = arith.constant 3 : index
    %c0_36 = arith.constant 0 : index
    %c0_37 = arith.constant 0 : index
    %117 = vector.load %arg7[%c3, %c0_36, %c0_37] : memref<25x16x128xf32, #tpu.memory_space<vmem>>, vector<1x16x128xf32>
    %118 = vector.shape_cast %117 : vector<1x16x128xf32> to vector<16x128xf32>
    %119 = vector.shape_cast %118 : vector<16x128xf32> to vector<1x16x128xf32>
    %120 = vector.broadcast %119 : vector<1x16x128xf32> to vector<8x16x128xf32>
    %121 = arith.mulf %116, %120 : vector<8x16x128xf32>
    %122 = arith.addf %112, %121 : vector<8x16x128xf32>
    %123 = vector.extract_strided_slice %9 {offsets = [122, 0], sizes = [6, 128], strides = [1, 1]} : vector<128x128xf32> to vector<6x128xf32>
    %124 = vector.extract_strided_slice %9 {offsets = [0, 0], sizes = [122, 128], strides = [1, 1]} : vector<128x128xf32> to vector<122x128xf32>
    %125 = tpu.concatenate %123, %124 in 0 : vector<6x128xf32>, vector<122x128xf32> -> vector<128x128xf32>
    %126 = vector.shape_cast %125 : vector<128x128xf32> to vector<8x16x128xf32>
    %c4 = arith.constant 4 : index
    %c0_38 = arith.constant 0 : index
    %c0_39 = arith.constant 0 : index
    %127 = vector.load %arg7[%c4, %c0_38, %c0_39] : memref<25x16x128xf32, #tpu.memory_space<vmem>>, vector<1x16x128xf32>
    %128 = vector.shape_cast %127 : vector<1x16x128xf32> to vector<16x128xf32>
    %129 = vector.shape_cast %128 : vector<16x128xf32> to vector<1x16x128xf32>
    %130 = vector.broadcast %129 : vector<1x16x128xf32> to vector<8x16x128xf32>
    %131 = arith.mulf %126, %130 : vector<8x16x128xf32>
    %132 = arith.addf %122, %131 : vector<8x16x128xf32>
    %133 = vector.extract_strided_slice %9 {offsets = [122, 0], sizes = [6, 128], strides = [1, 1]} : vector<128x128xf32> to vector<6x128xf32>
    %134 = vector.extract_strided_slice %9 {offsets = [0, 0], sizes = [122, 128], strides = [1, 1]} : vector<128x128xf32> to vector<122x128xf32>
    %135 = tpu.concatenate %133, %134 in 0 : vector<6x128xf32>, vector<122x128xf32> -> vector<128x128xf32>
    %136 = vector.shape_cast %135 : vector<128x128xf32> to vector<8x16x128xf32>
    %c5 = arith.constant 5 : index
    %c0_40 = arith.constant 0 : index
    %c0_41 = arith.constant 0 : index
    %137 = vector.load %arg7[%c5, %c0_40, %c0_41] : memref<25x16x128xf32, #tpu.memory_space<vmem>>, vector<1x16x128xf32>
    %138 = vector.shape_cast %137 : vector<1x16x128xf32> to vector<16x128xf32>
    %139 = vector.shape_cast %138 : vector<16x128xf32> to vector<1x16x128xf32>
    %140 = vector.broadcast %139 : vector<1x16x128xf32> to vector<8x16x128xf32>
    %141 = arith.mulf %136, %140 : vector<8x16x128xf32>
    %142 = arith.addf %132, %141 : vector<8x16x128xf32>
    %143 = vector.extract_strided_slice %9 {offsets = [123, 0], sizes = [5, 128], strides = [1, 1]} : vector<128x128xf32> to vector<5x128xf32>
    %144 = vector.extract_strided_slice %9 {offsets = [0, 0], sizes = [123, 128], strides = [1, 1]} : vector<128x128xf32> to vector<123x128xf32>
    %145 = tpu.concatenate %143, %144 in 0 : vector<5x128xf32>, vector<123x128xf32> -> vector<128x128xf32>
    %146 = vector.shape_cast %145 : vector<128x128xf32> to vector<8x16x128xf32>
    %c6 = arith.constant 6 : index
    %c0_42 = arith.constant 0 : index
    %c0_43 = arith.constant 0 : index
    %147 = vector.load %arg7[%c6, %c0_42, %c0_43] : memref<25x16x128xf32, #tpu.memory_space<vmem>>, vector<1x16x128xf32>
    %148 = vector.shape_cast %147 : vector<1x16x128xf32> to vector<16x128xf32>
    %149 = vector.shape_cast %148 : vector<16x128xf32> to vector<1x16x128xf32>
    %150 = vector.broadcast %149 : vector<1x16x128xf32> to vector<8x16x128xf32>
    %151 = arith.mulf %146, %150 : vector<8x16x128xf32>
    %152 = arith.addf %142, %151 : vector<8x16x128xf32>
    %153 = vector.extract_strided_slice %9 {offsets = [124, 0], sizes = [4, 128], strides = [1, 1]} : vector<128x128xf32> to vector<4x128xf32>
    %154 = vector.extract_strided_slice %9 {offsets = [0, 0], sizes = [124, 128], strides = [1, 1]} : vector<128x128xf32> to vector<124x128xf32>
    %155 = tpu.concatenate %153, %154 in 0 : vector<4x128xf32>, vector<124x128xf32> -> vector<128x128xf32>
    %156 = vector.shape_cast %155 : vector<128x128xf32> to vector<8x16x128xf32>
    %c7 = arith.constant 7 : index
    %c0_44 = arith.constant 0 : index
    %c0_45 = arith.constant 0 : index
    %157 = vector.load %arg7[%c7, %c0_44, %c0_45] : memref<25x16x128xf32, #tpu.memory_space<vmem>>, vector<1x16x128xf32>
    %158 = vector.shape_cast %157 : vector<1x16x128xf32> to vector<16x128xf32>
    %159 = vector.shape_cast %158 : vector<16x128xf32> to vector<1x16x128xf32>
    %160 = vector.broadcast %159 : vector<1x16x128xf32> to vector<8x16x128xf32>
    %161 = arith.mulf %156, %160 : vector<8x16x128xf32>
    %162 = arith.addf %152, %161 : vector<8x16x128xf32>
    %163 = vector.extract_strided_slice %9 {offsets = [125, 0], sizes = [3, 128], strides = [1, 1]} : vector<128x128xf32> to vector<3x128xf32>
    %164 = vector.extract_strided_slice %9 {offsets = [0, 0], sizes = [125, 128], strides = [1, 1]} : vector<128x128xf32> to vector<125x128xf32>
    %165 = tpu.concatenate %163, %164 in 0 : vector<3x128xf32>, vector<125x128xf32> -> vector<128x128xf32>
    %166 = vector.shape_cast %165 : vector<128x128xf32> to vector<8x16x128xf32>
    %c8 = arith.constant 8 : index
    %c0_46 = arith.constant 0 : index
    %c0_47 = arith.constant 0 : index
    %167 = vector.load %arg7[%c8, %c0_46, %c0_47] : memref<25x16x128xf32, #tpu.memory_space<vmem>>, vector<1x16x128xf32>
    %168 = vector.shape_cast %167 : vector<1x16x128xf32> to vector<16x128xf32>
    %169 = vector.shape_cast %168 : vector<16x128xf32> to vector<1x16x128xf32>
    %170 = vector.broadcast %169 : vector<1x16x128xf32> to vector<8x16x128xf32>
    %171 = arith.mulf %166, %170 : vector<8x16x128xf32>
    %172 = arith.addf %162, %171 : vector<8x16x128xf32>
    %173 = vector.extract_strided_slice %9 {offsets = [126, 0], sizes = [2, 128], strides = [1, 1]} : vector<128x128xf32> to vector<2x128xf32>
    %174 = vector.extract_strided_slice %9 {offsets = [0, 0], sizes = [126, 128], strides = [1, 1]} : vector<128x128xf32> to vector<126x128xf32>
    %175 = tpu.concatenate %173, %174 in 0 : vector<2x128xf32>, vector<126x128xf32> -> vector<128x128xf32>
    %176 = vector.shape_cast %175 : vector<128x128xf32> to vector<8x16x128xf32>
    %c9 = arith.constant 9 : index
    %c0_48 = arith.constant 0 : index
    %c0_49 = arith.constant 0 : index
    %177 = vector.load %arg7[%c9, %c0_48, %c0_49] : memref<25x16x128xf32, #tpu.memory_space<vmem>>, vector<1x16x128xf32>
    %178 = vector.shape_cast %177 : vector<1x16x128xf32> to vector<16x128xf32>
    %179 = vector.shape_cast %178 : vector<16x128xf32> to vector<1x16x128xf32>
    %180 = vector.broadcast %179 : vector<1x16x128xf32> to vector<8x16x128xf32>
    %181 = arith.mulf %176, %180 : vector<8x16x128xf32>
    %182 = arith.addf %172, %181 : vector<8x16x128xf32>
    %183 = vector.extract_strided_slice %9 {offsets = [126, 0], sizes = [2, 128], strides = [1, 1]} : vector<128x128xf32> to vector<2x128xf32>
    %184 = vector.extract_strided_slice %9 {offsets = [0, 0], sizes = [126, 128], strides = [1, 1]} : vector<128x128xf32> to vector<126x128xf32>
    %185 = tpu.concatenate %183, %184 in 0 : vector<2x128xf32>, vector<126x128xf32> -> vector<128x128xf32>
    %186 = vector.shape_cast %185 : vector<128x128xf32> to vector<8x16x128xf32>
    %c10 = arith.constant 10 : index
    %c0_50 = arith.constant 0 : index
    %c0_51 = arith.constant 0 : index
    %187 = vector.load %arg7[%c10, %c0_50, %c0_51] : memref<25x16x128xf32, #tpu.memory_space<vmem>>, vector<1x16x128xf32>
    %188 = vector.shape_cast %187 : vector<1x16x128xf32> to vector<16x128xf32>
    %189 = vector.shape_cast %188 : vector<16x128xf32> to vector<1x16x128xf32>
    %190 = vector.broadcast %189 : vector<1x16x128xf32> to vector<8x16x128xf32>
    %191 = arith.mulf %186, %190 : vector<8x16x128xf32>
    %192 = arith.addf %182, %191 : vector<8x16x128xf32>
    %193 = vector.extract_strided_slice %9 {offsets = [127, 0], sizes = [1, 128], strides = [1, 1]} : vector<128x128xf32> to vector<1x128xf32>
    %194 = vector.extract_strided_slice %9 {offsets = [0, 0], sizes = [127, 128], strides = [1, 1]} : vector<128x128xf32> to vector<127x128xf32>
    %195 = tpu.concatenate %193, %194 in 0 : vector<1x128xf32>, vector<127x128xf32> -> vector<128x128xf32>
    %196 = vector.shape_cast %195 : vector<128x128xf32> to vector<8x16x128xf32>
    %c11 = arith.constant 11 : index
    %c0_52 = arith.constant 0 : index
    %c0_53 = arith.constant 0 : index
    %197 = vector.load %arg7[%c11, %c0_52, %c0_53] : memref<25x16x128xf32, #tpu.memory_space<vmem>>, vector<1x16x128xf32>
    %198 = vector.shape_cast %197 : vector<1x16x128xf32> to vector<16x128xf32>
    %199 = vector.shape_cast %198 : vector<16x128xf32> to vector<1x16x128xf32>
    %200 = vector.broadcast %199 : vector<1x16x128xf32> to vector<8x16x128xf32>
    %201 = arith.mulf %196, %200 : vector<8x16x128xf32>
    %202 = arith.addf %192, %201 : vector<8x16x128xf32>
    %203 = vector.shape_cast %9 : vector<128x128xf32> to vector<8x16x128xf32>
    %c12 = arith.constant 12 : index
    %c0_54 = arith.constant 0 : index
    %c0_55 = arith.constant 0 : index
    %204 = vector.load %arg7[%c12, %c0_54, %c0_55] : memref<25x16x128xf32, #tpu.memory_space<vmem>>, vector<1x16x128xf32>
    %205 = vector.shape_cast %204 : vector<1x16x128xf32> to vector<16x128xf32>
    %206 = vector.shape_cast %205 : vector<16x128xf32> to vector<1x16x128xf32>
    %207 = vector.broadcast %206 : vector<1x16x128xf32> to vector<8x16x128xf32>
    %208 = arith.mulf %203, %207 : vector<8x16x128xf32>
    %209 = arith.addf %202, %208 : vector<8x16x128xf32>
    %210 = vector.extract_strided_slice %9 {offsets = [1, 0], sizes = [127, 128], strides = [1, 1]} : vector<128x128xf32> to vector<127x128xf32>
    %211 = vector.extract_strided_slice %9 {offsets = [0, 0], sizes = [1, 128], strides = [1, 1]} : vector<128x128xf32> to vector<1x128xf32>
    %212 = tpu.concatenate %210, %211 in 0 : vector<127x128xf32>, vector<1x128xf32> -> vector<128x128xf32>
    %213 = vector.shape_cast %212 : vector<128x128xf32> to vector<8x16x128xf32>
    %c13 = arith.constant 13 : index
    %c0_56 = arith.constant 0 : index
    %c0_57 = arith.constant 0 : index
    %214 = vector.load %arg7[%c13, %c0_56, %c0_57] : memref<25x16x128xf32, #tpu.memory_space<vmem>>, vector<1x16x128xf32>
    %215 = vector.shape_cast %214 : vector<1x16x128xf32> to vector<16x128xf32>
    %216 = vector.shape_cast %215 : vector<16x128xf32> to vector<1x16x128xf32>
    %217 = vector.broadcast %216 : vector<1x16x128xf32> to vector<8x16x128xf32>
    %218 = arith.mulf %213, %217 : vector<8x16x128xf32>
    %219 = arith.addf %209, %218 : vector<8x16x128xf32>
    %220 = vector.extract_strided_slice %9 {offsets = [2, 0], sizes = [126, 128], strides = [1, 1]} : vector<128x128xf32> to vector<126x128xf32>
    %221 = vector.extract_strided_slice %9 {offsets = [0, 0], sizes = [2, 128], strides = [1, 1]} : vector<128x128xf32> to vector<2x128xf32>
    %222 = tpu.concatenate %220, %221 in 0 : vector<126x128xf32>, vector<2x128xf32> -> vector<128x128xf32>
    %223 = vector.shape_cast %222 : vector<128x128xf32> to vector<8x16x128xf32>
    %c14 = arith.constant 14 : index
    %c0_58 = arith.constant 0 : index
    %c0_59 = arith.constant 0 : index
    %224 = vector.load %arg7[%c14, %c0_58, %c0_59] : memref<25x16x128xf32, #tpu.memory_space<vmem>>, vector<1x16x128xf32>
    %225 = vector.shape_cast %224 : vector<1x16x128xf32> to vector<16x128xf32>
    %226 = vector.shape_cast %225 : vector<16x128xf32> to vector<1x16x128xf32>
    %227 = vector.broadcast %226 : vector<1x16x128xf32> to vector<8x16x128xf32>
    %228 = arith.mulf %223, %227 : vector<8x16x128xf32>
    %229 = arith.addf %219, %228 : vector<8x16x128xf32>
    %230 = vector.extract_strided_slice %9 {offsets = [2, 0], sizes = [126, 128], strides = [1, 1]} : vector<128x128xf32> to vector<126x128xf32>
    %231 = vector.extract_strided_slice %9 {offsets = [0, 0], sizes = [2, 128], strides = [1, 1]} : vector<128x128xf32> to vector<2x128xf32>
    %232 = tpu.concatenate %230, %231 in 0 : vector<126x128xf32>, vector<2x128xf32> -> vector<128x128xf32>
    %233 = vector.shape_cast %232 : vector<128x128xf32> to vector<8x16x128xf32>
    %c15 = arith.constant 15 : index
    %c0_60 = arith.constant 0 : index
    %c0_61 = arith.constant 0 : index
    %234 = vector.load %arg7[%c15, %c0_60, %c0_61] : memref<25x16x128xf32, #tpu.memory_space<vmem>>, vector<1x16x128xf32>
    %235 = vector.shape_cast %234 : vector<1x16x128xf32> to vector<16x128xf32>
    %236 = vector.shape_cast %235 : vector<16x128xf32> to vector<1x16x128xf32>
    %237 = vector.broadcast %236 : vector<1x16x128xf32> to vector<8x16x128xf32>
    %238 = arith.mulf %233, %237 : vector<8x16x128xf32>
    %239 = arith.addf %229, %238 : vector<8x16x128xf32>
    %240 = vector.extract_strided_slice %9 {offsets = [3, 0], sizes = [125, 128], strides = [1, 1]} : vector<128x128xf32> to vector<125x128xf32>
    %241 = vector.extract_strided_slice %9 {offsets = [0, 0], sizes = [3, 128], strides = [1, 1]} : vector<128x128xf32> to vector<3x128xf32>
    %242 = tpu.concatenate %240, %241 in 0 : vector<125x128xf32>, vector<3x128xf32> -> vector<128x128xf32>
    %243 = vector.shape_cast %242 : vector<128x128xf32> to vector<8x16x128xf32>
    %c16 = arith.constant 16 : index
    %c0_62 = arith.constant 0 : index
    %c0_63 = arith.constant 0 : index
    %244 = vector.load %arg7[%c16, %c0_62, %c0_63] : memref<25x16x128xf32, #tpu.memory_space<vmem>>, vector<1x16x128xf32>
    %245 = vector.shape_cast %244 : vector<1x16x128xf32> to vector<16x128xf32>
    %246 = vector.shape_cast %245 : vector<16x128xf32> to vector<1x16x128xf32>
    %247 = vector.broadcast %246 : vector<1x16x128xf32> to vector<8x16x128xf32>
    %248 = arith.mulf %243, %247 : vector<8x16x128xf32>
    %249 = arith.addf %239, %248 : vector<8x16x128xf32>
    %250 = vector.extract_strided_slice %9 {offsets = [4, 0], sizes = [124, 128], strides = [1, 1]} : vector<128x128xf32> to vector<124x128xf32>
    %251 = vector.extract_strided_slice %9 {offsets = [0, 0], sizes = [4, 128], strides = [1, 1]} : vector<128x128xf32> to vector<4x128xf32>
    %252 = tpu.concatenate %250, %251 in 0 : vector<124x128xf32>, vector<4x128xf32> -> vector<128x128xf32>
    %253 = vector.shape_cast %252 : vector<128x128xf32> to vector<8x16x128xf32>
    %c17 = arith.constant 17 : index
    %c0_64 = arith.constant 0 : index
    %c0_65 = arith.constant 0 : index
    %254 = vector.load %arg7[%c17, %c0_64, %c0_65] : memref<25x16x128xf32, #tpu.memory_space<vmem>>, vector<1x16x128xf32>
    %255 = vector.shape_cast %254 : vector<1x16x128xf32> to vector<16x128xf32>
    %256 = vector.shape_cast %255 : vector<16x128xf32> to vector<1x16x128xf32>
    %257 = vector.broadcast %256 : vector<1x16x128xf32> to vector<8x16x128xf32>
    %258 = arith.mulf %253, %257 : vector<8x16x128xf32>
    %259 = arith.addf %249, %258 : vector<8x16x128xf32>
    %260 = vector.extract_strided_slice %9 {offsets = [5, 0], sizes = [123, 128], strides = [1, 1]} : vector<128x128xf32> to vector<123x128xf32>
    %261 = vector.extract_strided_slice %9 {offsets = [0, 0], sizes = [5, 128], strides = [1, 1]} : vector<128x128xf32> to vector<5x128xf32>
    %262 = tpu.concatenate %260, %261 in 0 : vector<123x128xf32>, vector<5x128xf32> -> vector<128x128xf32>
    %263 = vector.shape_cast %262 : vector<128x128xf32> to vector<8x16x128xf32>
    %c18 = arith.constant 18 : index
    %c0_66 = arith.constant 0 : index
    %c0_67 = arith.constant 0 : index
    %264 = vector.load %arg7[%c18, %c0_66, %c0_67] : memref<25x16x128xf32, #tpu.memory_space<vmem>>, vector<1x16x128xf32>
    %265 = vector.shape_cast %264 : vector<1x16x128xf32> to vector<16x128xf32>
    %266 = vector.shape_cast %265 : vector<16x128xf32> to vector<1x16x128xf32>
    %267 = vector.broadcast %266 : vector<1x16x128xf32> to vector<8x16x128xf32>
    %268 = arith.mulf %263, %267 : vector<8x16x128xf32>
    %269 = arith.addf %259, %268 : vector<8x16x128xf32>
    %270 = vector.extract_strided_slice %9 {offsets = [6, 0], sizes = [122, 128], strides = [1, 1]} : vector<128x128xf32> to vector<122x128xf32>
    %271 = vector.extract_strided_slice %9 {offsets = [0, 0], sizes = [6, 128], strides = [1, 1]} : vector<128x128xf32> to vector<6x128xf32>
    %272 = tpu.concatenate %270, %271 in 0 : vector<122x128xf32>, vector<6x128xf32> -> vector<128x128xf32>
    %273 = vector.shape_cast %272 : vector<128x128xf32> to vector<8x16x128xf32>
    %c19 = arith.constant 19 : index
    %c0_68 = arith.constant 0 : index
    %c0_69 = arith.constant 0 : index
    %274 = vector.load %arg7[%c19, %c0_68, %c0_69] : memref<25x16x128xf32, #tpu.memory_space<vmem>>, vector<1x16x128xf32>
    %275 = vector.shape_cast %274 : vector<1x16x128xf32> to vector<16x128xf32>
    %276 = vector.shape_cast %275 : vector<16x128xf32> to vector<1x16x128xf32>
    %277 = vector.broadcast %276 : vector<1x16x128xf32> to vector<8x16x128xf32>
    %278 = arith.mulf %273, %277 : vector<8x16x128xf32>
    %279 = arith.addf %269, %278 : vector<8x16x128xf32>
    %280 = vector.extract_strided_slice %9 {offsets = [6, 0], sizes = [122, 128], strides = [1, 1]} : vector<128x128xf32> to vector<122x128xf32>
    %281 = vector.extract_strided_slice %9 {offsets = [0, 0], sizes = [6, 128], strides = [1, 1]} : vector<128x128xf32> to vector<6x128xf32>
    %282 = tpu.concatenate %280, %281 in 0 : vector<122x128xf32>, vector<6x128xf32> -> vector<128x128xf32>
    %283 = vector.shape_cast %282 : vector<128x128xf32> to vector<8x16x128xf32>
    %c20 = arith.constant 20 : index
    %c0_70 = arith.constant 0 : index
    %c0_71 = arith.constant 0 : index
    %284 = vector.load %arg7[%c20, %c0_70, %c0_71] : memref<25x16x128xf32, #tpu.memory_space<vmem>>, vector<1x16x128xf32>
    %285 = vector.shape_cast %284 : vector<1x16x128xf32> to vector<16x128xf32>
    %286 = vector.shape_cast %285 : vector<16x128xf32> to vector<1x16x128xf32>
    %287 = vector.broadcast %286 : vector<1x16x128xf32> to vector<8x16x128xf32>
    %288 = arith.mulf %283, %287 : vector<8x16x128xf32>
    %289 = arith.addf %279, %288 : vector<8x16x128xf32>
    %290 = vector.extract_strided_slice %9 {offsets = [7, 0], sizes = [121, 128], strides = [1, 1]} : vector<128x128xf32> to vector<121x128xf32>
    %291 = vector.extract_strided_slice %9 {offsets = [0, 0], sizes = [7, 128], strides = [1, 1]} : vector<128x128xf32> to vector<7x128xf32>
    %292 = tpu.concatenate %290, %291 in 0 : vector<121x128xf32>, vector<7x128xf32> -> vector<128x128xf32>
    %293 = vector.shape_cast %292 : vector<128x128xf32> to vector<8x16x128xf32>
    %c21 = arith.constant 21 : index
    %c0_72 = arith.constant 0 : index
    %c0_73 = arith.constant 0 : index
    %294 = vector.load %arg7[%c21, %c0_72, %c0_73] : memref<25x16x128xf32, #tpu.memory_space<vmem>>, vector<1x16x128xf32>
    %295 = vector.shape_cast %294 : vector<1x16x128xf32> to vector<16x128xf32>
    %296 = vector.shape_cast %295 : vector<16x128xf32> to vector<1x16x128xf32>
    %297 = vector.broadcast %296 : vector<1x16x128xf32> to vector<8x16x128xf32>
    %298 = arith.mulf %293, %297 : vector<8x16x128xf32>
    %299 = arith.addf %289, %298 : vector<8x16x128xf32>
    %300 = vector.extract_strided_slice %9 {offsets = [8, 0], sizes = [120, 128], strides = [1, 1]} : vector<128x128xf32> to vector<120x128xf32>
    %301 = vector.extract_strided_slice %9 {offsets = [0, 0], sizes = [8, 128], strides = [1, 1]} : vector<128x128xf32> to vector<8x128xf32>
    %302 = tpu.concatenate %300, %301 in 0 : vector<120x128xf32>, vector<8x128xf32> -> vector<128x128xf32>
    %303 = vector.shape_cast %302 : vector<128x128xf32> to vector<8x16x128xf32>
    %c22 = arith.constant 22 : index
    %c0_74 = arith.constant 0 : index
    %c0_75 = arith.constant 0 : index
    %304 = vector.load %arg7[%c22, %c0_74, %c0_75] : memref<25x16x128xf32, #tpu.memory_space<vmem>>, vector<1x16x128xf32>
    %305 = vector.shape_cast %304 : vector<1x16x128xf32> to vector<16x128xf32>
    %306 = vector.shape_cast %305 : vector<16x128xf32> to vector<1x16x128xf32>
    %307 = vector.broadcast %306 : vector<1x16x128xf32> to vector<8x16x128xf32>
    %308 = arith.mulf %303, %307 : vector<8x16x128xf32>
    %309 = arith.addf %299, %308 : vector<8x16x128xf32>
    %310 = vector.extract_strided_slice %9 {offsets = [9, 0], sizes = [119, 128], strides = [1, 1]} : vector<128x128xf32> to vector<119x128xf32>
    %311 = vector.extract_strided_slice %9 {offsets = [0, 0], sizes = [9, 128], strides = [1, 1]} : vector<128x128xf32> to vector<9x128xf32>
    %312 = tpu.concatenate %310, %311 in 0 : vector<119x128xf32>, vector<9x128xf32> -> vector<128x128xf32>
    %313 = vector.shape_cast %312 : vector<128x128xf32> to vector<8x16x128xf32>
    %c23 = arith.constant 23 : index
    %c0_76 = arith.constant 0 : index
    %c0_77 = arith.constant 0 : index
    %314 = vector.load %arg7[%c23, %c0_76, %c0_77] : memref<25x16x128xf32, #tpu.memory_space<vmem>>, vector<1x16x128xf32>
    %315 = vector.shape_cast %314 : vector<1x16x128xf32> to vector<16x128xf32>
    %316 = vector.shape_cast %315 : vector<16x128xf32> to vector<1x16x128xf32>
    %317 = vector.broadcast %316 : vector<1x16x128xf32> to vector<8x16x128xf32>
    %318 = arith.mulf %313, %317 : vector<8x16x128xf32>
    %319 = arith.addf %309, %318 : vector<8x16x128xf32>
    %320 = vector.extract_strided_slice %9 {offsets = [10, 0], sizes = [118, 128], strides = [1, 1]} : vector<128x128xf32> to vector<118x128xf32>
    %321 = vector.extract_strided_slice %9 {offsets = [0, 0], sizes = [10, 128], strides = [1, 1]} : vector<128x128xf32> to vector<10x128xf32>
    %322 = tpu.concatenate %320, %321 in 0 : vector<118x128xf32>, vector<10x128xf32> -> vector<128x128xf32>
    %323 = vector.shape_cast %322 : vector<128x128xf32> to vector<8x16x128xf32>
    %c24 = arith.constant 24 : index
    %c0_78 = arith.constant 0 : index
    %c0_79 = arith.constant 0 : index
    %324 = vector.load %arg7[%c24, %c0_78, %c0_79] : memref<25x16x128xf32, #tpu.memory_space<vmem>>, vector<1x16x128xf32>
    %325 = vector.shape_cast %324 : vector<1x16x128xf32> to vector<16x128xf32>
    %326 = vector.shape_cast %325 : vector<16x128xf32> to vector<1x16x128xf32>
    %327 = vector.broadcast %326 : vector<1x16x128xf32> to vector<8x16x128xf32>
    %328 = arith.mulf %323, %327 : vector<8x16x128xf32>
    %329 = arith.addf %319, %328 : vector<8x16x128xf32>
    %c0_80 = arith.constant 0 : index
    %c0_81 = arith.constant 0 : index
    %330 = vector.load %arg8[%c0_80, %c0_81] : memref<1x128xf32, #tpu.memory_space<vmem>>, vector<1x128xf32>
    %331 = vector.shape_cast %330 : vector<1x128xf32> to vector<1x1x128xf32>
    %332 = vector.broadcast %331 : vector<1x1x128xf32> to vector<8x16x128xf32>
    %333 = arith.addf %329, %332 : vector<8x16x128xf32>
    %334 = vector.shape_cast %333 : vector<8x16x128xf32> to vector<128x128xf32>
    %335 = arith.addf %81, %334 : vector<128x128xf32>
    %c0_82 = arith.constant 0 : index
    %c0_83 = arith.constant 0 : index
    %336 = vector.load %arg9[%c0_82, %c0_83] : memref<128x128xf32, #tpu.memory_space<vmem>>, vector<128x128xf32>
    %cst_84 = arith.constant dense<0.000000e+00> : vector<128x128xf32>
    %337 = tpu.matmul %335, %336, %cst_84 {dimension_numbers = #tpu.dot_dimension_numbers<[1], [0], [0], [1], [0, 0, 1, 1], [], []>} : vector<128x128xf32>, vector<128x128xf32>, vector<128x128xf32> -> vector<128x128xf32>
    %c0_85 = arith.constant 0 : index
    %c0_86 = arith.constant 0 : index
    %338 = vector.load %arg10[%c0_85, %c0_86] : memref<1x128xf32, #tpu.memory_space<vmem>>, vector<1x128xf32>
    %339 = vector.broadcast %338 : vector<1x128xf32> to vector<128x128xf32>
    %340 = arith.addf %337, %339 : vector<128x128xf32>
    %341 = vector.shape_cast %340 : vector<128x128xf32> to vector<8x16x128xf32>
    %c0_87 = arith.constant 0 : index
    %c0_88 = arith.constant 0 : index
    %c0_89 = arith.constant 0 : index
    %342 = vector.load %arg11[%c0_87, %c0_88, %c0_89] : memref<8x16x128xf32, #tpu.memory_space<vmem>>, vector<8x16x128xf32>
    tpu.vector_store %arg11[%c0_87, %c0_88, %c0_89], %341 {strides = array<i32>} : memref<8x16x128xf32, #tpu.memory_space<vmem>>, vector<8x16x128xf32>,
    return
  }
  func.func @transform_0(%arg0: i32) -> (i32, i32, i32) {
    %c0_i32 = arith.constant 0 : i32
    %c0_i32_0 = arith.constant 0 : i32
    %c0_i32_1 = arith.constant 0 : i32
    return %arg0, %c0_i32, %c0_i32_0 : i32, i32, i32
  }
  func.func @transform_1(%arg0: i32) -> (i32, i32) {
    %c0_i32 = arith.constant 0 : i32
    %c0_i32_0 = arith.constant 0 : i32
    %c0_i32_1 = arith.constant 0 : i32
    return %c0_i32, %c0_i32_0 : i32, i32
  }
  func.func @transform_2(%arg0: i32) -> (i32, i32) {
    %c0_i32 = arith.constant 0 : i32
    %c0_i32_0 = arith.constant 0 : i32
    %c0_i32_1 = arith.constant 0 : i32
    return %c0_i32, %c0_i32_0 : i32, i32
  }
  func.func @transform_3(%arg0: i32) -> (i32, i32) {
    %c0_i32 = arith.constant 0 : i32
    %c0_i32_0 = arith.constant 0 : i32
    %c0_i32_1 = arith.constant 0 : i32
    return %c0_i32, %c0_i32_0 : i32, i32
  }
  func.func @transform_4(%arg0: i32) -> (i32, i32) {
    %c0_i32 = arith.constant 0 : i32
    %c0_i32_0 = arith.constant 0 : i32
    %c0_i32_1 = arith.constant 0 : i32
    return %c0_i32, %c0_i32_0 : i32, i32
  }
  func.func @transform_5(%arg0: i32) -> (i32, i32) {
    %c0_i32 = arith.constant 0 : i32
    %c0_i32_0 = arith.constant 0 : i32
    %c0_i32_1 = arith.constant 0 : i32
    return %c0_i32, %c0_i32_0 : i32, i32
  }
  func.func @transform_6(%arg0: i32) -> (i32, i32, i32) {
    %c0_i32 = arith.constant 0 : i32
    %c0_i32_0 = arith.constant 0 : i32
    %c0_i32_1 = arith.constant 0 : i32
    %c0_i32_2 = arith.constant 0 : i32
    return %c0_i32, %c0_i32_0, %c0_i32_1 : i32, i32, i32
  }
  func.func @transform_7(%arg0: i32) -> (i32, i32) {
    %c0_i32 = arith.constant 0 : i32
    %c0_i32_0 = arith.constant 0 : i32
    %c0_i32_1 = arith.constant 0 : i32
    return %c0_i32, %c0_i32_0 : i32, i32
  }
  func.func @transform_8(%arg0: i32) -> (i32, i32) {
    %c0_i32 = arith.constant 0 : i32
    %c0_i32_0 = arith.constant 0 : i32
    %c0_i32_1 = arith.constant 0 : i32
    return %c0_i32, %c0_i32_0 : i32, i32
  }
  func.func @transform_9(%arg0: i32) -> (i32, i32) {
    %c0_i32 = arith.constant 0 : i32
    %c0_i32_0 = arith.constant 0 : i32
    %c0_i32_1 = arith.constant 0 : i32
    return %c0_i32, %c0_i32_0 : i32, i32
  }
  func.func @transform_10(%arg0: i32) -> (i32, i32, i32) {
    %c0_i32 = arith.constant 0 : i32
    %c0_i32_0 = arith.constant 0 : i32
    %c0_i32_1 = arith.constant 0 : i32
    return %arg0, %c0_i32, %c0_i32_0 : i32, i32, i32
  }
}

</mosaic_0001>

<bundles_post_ra>
// kernel: tpu_custom_call.1
= control target key start
LH: loop header
LB: loop body
LE: loop exit
PB: predicated region body
PF: predicated region fallthrough
CT: control target
= control target key end

     0   :  { %s11890_s0 = inlined_call_operand.hbm [shape: f32[16,16,128], index: 0, kind: input, shape index: {}]   ;;  %s11891_s1 = inlined_call_operand.hbm [shape: f32[128,384], index: 1, kind: input, shape index: {}]   ;;  %s11892_s2 = inlined_call_operand.vmem [shape: f32[1,384], index: 2, kind: input, shape index: {}]   ;;  %s11893_s3 = inlined_call_operand.hbm [shape: f32[16,128], index: 3, kind: input, shape index: {}]   ;;  %s11894_s4 = inlined_call_operand.vmem [shape: f32[1,128], index: 4, kind: input, shape index: {}]   ;;  %s11895_s5 = inlined_call_operand.hbm [shape: f32[128,128], index: 5, kind: input, shape index: {}]   ;;  %s11896_s6 = inlined_call_operand.hbm [shape: f32[25,16,128], index: 6, kind: input, shape index: {}]   ;;  %s11897_s7 = inlined_call_operand.vmem [shape: f32[1,128], index: 7, kind: input, shape index: {}]   ;;  %s11898_s8 = inlined_call_operand.hbm [shape: f32[128,128], index: 8, kind: input, shape index: {}]   ;;  %s11899_s9 = inlined_call_operand.vmem [shape: f32[1,128], index: 9, kind: input, shape index: {}]   ;;  %s11900_s10 = inlined_call_operand.hbm [shape: f32[16,16,128], index: 10, kind: output, shape index: {}]  }
   0x1   :  { %12179 = sst [smem:[#allocation100_spill]] %s11891_s1 }
   0x2   :  { %12180 = sst [smem:[#allocation101_spill]] %s11899_s9 }
   0x3   :  { %12181 = sst [smem:[#allocation102_spill]] %s11900_s10 }
   0x4   :  { %15 = vsyncpa [#allocation3], 0 }
   0x5   :  { %17 = vsyncpa [#allocation3 + $0x1], 0 }
   0x6   :  { %18 = vsyncpa [#allocation6], 0 }
   0x7   :  { %19 = vsyncpa [#allocation9], 0 }
   0x8   :  { %20 = vsyncpa [#allocation12], 0 }
   0x9   :  { %21 = vsyncpa [#allocation4], 0 }
   0xa   :  { %23 = vsyncpa [#allocation4 + $0x1], 0  ;;  %s8225_s13 = smov 0   ;;  %s8227_s14 = smov 0  }
   0xb   :  { %s8229_s15 = smov 0   ;;  %s8231_s16 = smov 0  }
   0xc LB: > { %s8156_s17 = smov [#allocation5]   ;;  %s8246_s19 = sadd.s32 4294967295, %s8154_s16   ;;  %s8154_s16 = sphi %s8231_s16, %s12747_s16   ;;  %s8150_s15 = sphi %s8229_s15, %s12746_s15   ;;  %s8146_s14 = sphi %s8227_s14, %s12745_s14   ;;  %s8142_s13 = sphi %s8225_s13, %s12744_s13  }
   0xd   : > { %s287_s18 = sshll.u32 %s8156_s17, 4  ;;  %p5941_p0 = scmp.ge.s32.totalorder %s8154_s16, 1  ;;  %s8251_s18 = int_to_ptr.vmem [resolvable:$true] %s287_s18 }
   0xe   : > { %p11902_p1 = scmp.eq.s32.totalorder %s8246_s19, 0  ;;  %p275_p2 = scmp.lt.s32.totalorder %s8154_s16, 3 }
   0xf   : > { %s8157_s22 = smov [#allocation8]   ;;  %s8158_s24 = smov [#allocation7]  }
  0x10   : > { %p8253_p3 = pnand %p5941_p0, %p275_p2  ;;  %s319_s23 = sshll.u32 %s8157_s22, 4  ;;  %s8266_s23 = int_to_ptr.vmem [resolvable:$true] %s319_s23 }
  0x11   : > { %s8268_s25 = sshll.u32 %s8158_s24, 4  ;;  %s12184_s1 = sld [smem:[#allocation100_spill]]  ;;  %s304_s25 = int_to_ptr.vmem [resolvable:$true] %s8268_s25 }
  0x12   : > { %s12182_s20 = scalar_select %p8253_p3, 1, 0 }
  0x13   : > { %p7599_p5 = pneg %p8253_p3 }
  0x15   : > { %p8262_p6 = pnand %p7599_p5, %p11902_p1 }
  0x17   : > { %s7906_s28 = scalar_lea.hbm %s12184_s1, 6144  ;;  %p8278_p8 = pneg %p8262_p6 }
  0x18   : > { %p7907_p7 = scmp.ne.s32.totalorder %s12184_s1, %s7906_s28  ;;  %p7913_p11 = scmp.lt.u32.totalorder %s7906_s28, %s12184_s1 }
  0x1a   : > { %p7909_p9 = pnand %p8278_p8, %p7907_p7 }
  0x1c   : > { %p7910_p10 = pneg %p7909_p9 }
  0x1e   : > { %p7915_p12 = pnand %p7913_p11, %p7910_p10 }
  0x20   : > { %7918 = shalt.err (!%p7915_p12)
}
  0x21   : > { %s7919_s22 = scalar_lea.vmem %s8251_s18, 6144  ;;  %p7927_p5 = scmp.lt.s32.totalorder %s8251_s18, %s8251_s18 }
  0x22   : > { %p7920_p13 = scmp.ne.s32.totalorder %s8251_s18, %s7919_s22  ;;  %p7928_p4 = scmp.lt.s32.totalorder %s7919_s22, %s7919_s22 }
  0x24   : > { %p7922_p0 = pnand %p7920_p13, %p8278_p8  ;;  %p7929_p7 = por %p7928_p4, %p7927_p5 }
  0x26   : > { %p7923_p2 = pneg %p7922_p0 }
  0x28   : > { %p7930_p9 = pnand %p7929_p7, %p7923_p2 }
  0x2a   : > { %7933 = shalt.err (!%p7930_p9)
}
  0x2b   : > { %s8159_s24 = smov 384   ;;  %s8160_s26 = smov 24  }
  0x2c   : > { %7602 = dma.hbm_to_vmem [thread:$0]  (!%p8262_p6), %s12184_s1, 6144, %s8251_s18, [#allocation6], %s8159_s24, %s8159_s24, %s8160_s26  }
  0x2d   : > { %s7934_s12 = scalar_lea.hbm %s11895_s5, 2048 }
  0x2e   : > { %p7935_p4 = scmp.ne.s32.totalorder %s11895_s5, %s7934_s12  ;;  %p7941_p12 = scmp.lt.u32.totalorder %s7934_s12, %s11895_s5 }
  0x30   : > { %p7937_p10 = pnand %p7935_p4, %p8278_p8 }
  0x32   : > { %p7938_p11 = pneg %p7937_p10 }
  0x34   : > { %p7943_p13 = pnand %p7941_p12, %p7938_p11 }
  0x36   : > { %7946 = shalt.err (!%p7943_p13)
}
  0x37   : > { %s7947_s18 = scalar_lea.vmem %s8266_s23, 2048  ;;  %p7955_p7 = scmp.lt.s32.totalorder %s8266_s23, %s8266_s23 }
  0x38   : > { %p7948_p0 = scmp.ne.s32.totalorder %s8266_s23, %s7947_s18  ;;  %p7956_p9 = scmp.lt.s32.totalorder %s7947_s18, %s7947_s18 }
  0x3a   : > { %p7950_p2 = pnand %p7948_p0, %p8278_p8  ;;  %p7957_p4 = por %p7956_p9, %p7955_p7 }
  0x3c   : > { %p7951_p5 = pneg %p7950_p2 }
  0x3e   : > { %p7958_p10 = pnand %p7957_p4, %p7951_p5 }
  0x40   : > { %7961 = shalt.err (!%p7958_p10)
}
  0x41   : > { %s11904_s10 = smov 128   ;;  %s8162_s9 = smov 8  }
  0x42   : > { %7608 = dma.hbm_to_vmem [thread:$0]  (!%p8262_p6), %s11895_s5, 2048, %s8266_s23, [#allocation9], %s11904_s10, %s11904_s10, %s8162_s9  }
  0x43   : > { %s7962_s29 = scalar_lea.hbm %s11893_s3, 256 }
  0x44   : > { %p7963_p11 = scmp.ne.s32.totalorder %s11893_s3, %s7962_s29  ;;  %p7969_p0 = scmp.lt.u32.totalorder %s7962_s29, %s11893_s3 }
  0x46   : > { %p7965_p12 = pnand %p7963_p11, %p8278_p8 }
  0x48   : > { %p7966_p13 = pneg %p7965_p12 }
  0x4a   : > { %p7971_p2 = pnand %p7969_p0, %p7966_p13 }
  0x4c   : > { %7974 = shalt.err (!%p7971_p2)
}
  0x4d   : > { %s7975_s18 = scalar_lea.vmem %s304_s25, 256  ;;  %p7983_p4 = scmp.lt.s32.totalorder %s304_s25, %s304_s25 }
  0x4e   : > { %p7976_p5 = scmp.ne.s32.totalorder %s304_s25, %s7975_s18  ;;  %p7984_p10 = scmp.lt.s32.totalorder %s7975_s18, %s7975_s18 }
  0x50   : > { %p7978_p7 = pnand %p7976_p5, %p8278_p8  ;;  %p7985_p1 = por %p7984_p10, %p7983_p4 }
  0x52   : > { %p7979_p9 = pneg %p7978_p7 }
  0x54   : > { %p7986_p3 = pnand %p7985_p1, %p7979_p9 }
  0x56   : > { %7989 = shalt.err (!%p7986_p3)
}
  0x57   : > { %7605 = dma.hbm_to_vmem [thread:$0]  (!%p8262_p6), %s11893_s3, 256, %s304_s25, [#allocation6], %s11904_s10, %s11904_s10, %s8162_s9  }
  0x58   : > { %s8163_s26 = smov [#allocation10]   ;;  %s8164_s28 = smov [#allocation11]  }
  0x59   : > { %s332_s27 = sshll.u32 %s8163_s26, 4  ;;  %s348_s29 = sshll.u32 %s8164_s28, 4  ;;  %s333_s27 = int_to_ptr.vmem [resolvable:$true] %s332_s27  ;;  %s349_s29 = int_to_ptr.vmem [resolvable:$true] %s348_s29 }
  0x5a   : > { %s7990_s17 = scalar_lea.hbm %s11896_s6, 6400 }
  0x5b   : > { %p7991_p1 = scmp.ne.s32.totalorder %s11896_s6, %s7990_s17  ;;  %p7997_p12 = scmp.lt.u32.totalorder %s7990_s17, %s11896_s6 }
  0x5d   : > { %p7993_p3 = pnand %p7991_p1, %p8278_p8 }
  0x5f   : > { %p7994_p11 = pneg %p7993_p3 }
  0x61   : > { %p7999_p13 = pnand %p7997_p12, %p7994_p11 }
  0x63   : > { %8002 = shalt.err (!%p7999_p13)
}
  0x64   : > { %s8003_s25 = scalar_lea.vmem %s333_s27, 6400  ;;  %p8011_p7 = scmp.lt.s32.totalorder %s333_s27, %s333_s27 }
  0x65   : > { %p8004_p0 = scmp.ne.s32.totalorder %s333_s27, %s8003_s25  ;;  %p8012_p9 = scmp.lt.s32.totalorder %s8003_s25, %s8003_s25 }
  0x67   : > { %p8006_p2 = pnand %p8004_p0, %p8278_p8  ;;  %p8013_p4 = por %p8012_p9, %p8011_p7 }
  0x69   : > { %p8007_p5 = pneg %p8006_p2 }
  0x6b   : > { %p8014_p10 = pnand %p8013_p4, %p8007_p5 }
  0x6d   : > { %8017 = shalt.err (!%p8014_p10)
}
  0x6e   : > { %7611 = dma.hbm_to_vmem [thread:$0]  (!%p8262_p6), %s11896_s6, 6400, %s333_s27, [#allocation9], %s11904_s10, %s11904_s10, %s8162_s9  }
  0x6f   : > { %s8018_s30 = scalar_lea.hbm %s11898_s8, 2048 }
  0x70   : > { %p8019_p1 = scmp.ne.s32.totalorder %s11898_s8, %s8018_s30  ;;  %p8025_p12 = scmp.lt.u32.totalorder %s8018_s30, %s11898_s8 }
  0x72   : > { %p8021_p3 = pnand %p8019_p1, %p8278_p8 }
  0x74   : > { %p8022_p11 = pneg %p8021_p3 }
  0x76   : > { %p8027_p13 = pnand %p8025_p12, %p8022_p11 }
  0x78   : > { %8030 = shalt.err (!%p8027_p13)
}
  0x79   : > { %s8031_s23 = scalar_lea.vmem %s349_s29, 2048  ;;  %p8039_p7 = scmp.lt.s32.totalorder %s349_s29, %s349_s29 }
  0x7a   : > { %p8032_p0 = scmp.ne.s32.totalorder %s349_s29, %s8031_s23  ;;  %p8040_p9 = scmp.lt.s32.totalorder %s8031_s23, %s8031_s23 }
  0x7c   : > { %p8034_p2 = pnand %p8032_p0, %p8278_p8  ;;  %p8041_p4 = por %p8040_p9, %p8039_p7 }
  0x7e   : > { %p8035_p5 = pneg %p8034_p2 }
  0x80   : > { %p8042_p10 = pnand %p8041_p4, %p8035_p5 }
  0x82   : > { %8045 = shalt.err (!%p8042_p10)
}
  0x83   : > { %7614 = dma.hbm_to_vmem [thread:$0]  (!%p8262_p6), %s11898_s8, 2048, %s349_s29, [#allocation12], %s11904_s10, %s11904_s10, %s8162_s9  }
  0x84   : > { %s5940_s21 = sadd.s32 4294967294, %s8154_s16   ;;  %s8391_s11 = sadd.s32 1, %s8154_s16  }
  0x85   : > { %s36_s1 = sadd.s32 1, %s8150_s15  ;;  %s33_s24 = ssub.s32 %s8154_s16, %s8391_s11 }
  0x86   : > { %p43_p8 = scmp.ne.s32.totalorder %s8150_s15, %s8146_s14  ;;  %p34_p1 = scmp.eq.s32.totalorder %s33_s24, 0 }
  0x87   : > { %p44_p3 = scmp.eq.s32.totalorder %s8154_s16, 0  ;;  %p49_p11 = scmp.ne.s32.totalorder %s8146_s14, %s8142_s13 }
  0x88   : > { %p262_p12 = scmp.eq.s32.totalorder %s8246_s19, 1  ;;  %p12186_p0 = scmp.eq.s32.totalorder %s8246_s19, 0 }
  0x89   : > { %s8403_s26 = scalar_select %p34_p1, %s8150_s15, %s36_s1  }
  0x8a   : > { %p45_p13 = por %p44_p3, %p43_p8  ;;  %p8407_p2 = por %p12186_p0, %p49_p11 }
  0x8b   : > { %p8411_p6 = por %p262_p12, %p43_p8  ;;  %p268_p5 = scmp.eq.s32.totalorder %s5940_s21, 1 }
  0x8c   : > { %p7628_p7 = scmp.lt.s32.totalorder %s8154_s16, 2  ;;  %s365_s30 = sand.u32 1, %s8150_s15  }
  0x8d   : > { %s12188_s29 = scalar_select %p8411_p6, 1, 0 }
  0x8e   : > { %p8417_p9 = por %p268_p5, %p49_p11  ;;  %s5948_s17 = sshll.u32 %s365_s30, 7 }
  0x8f   : > { %s6098_s22 = sshll.u32 %s8154_s16, 11  ;;  %s369_s25 = scalar_lea.vmem [#allocation2], %s5948_s17 }
  0x90   : > { %s12189_s12 = scalar_select %p8417_p9, 1, 0 }
  0x91   : > { %s8425_s27 = scalar_lea.hbm %s11890_s0, %s6098_s22  ;;  %s377_s1 = sshll.u32 %s369_s25, 4  ;;  %s8431_s1 = int_to_ptr.vmem [resolvable:$true] %s377_s1 }
  0x92   : > { %p8427_p4 = pnand %p7628_p7, %p45_p13  ;;  %s8433_s24 = scalar_lea.sflag [#allocation3], %s365_s30 }
  0x93   : > { %s8046_s10 = scalar_lea.hbm %s8425_s27, 2048  ;;  %s8051_s18 = scalar_lea.hbm %s11890_s0, 4096 }
  0x94   : > { %p8047_p10 = scmp.ne.s32.totalorder %s8425_s27, %s8046_s10  ;;  %p8048_p8 = pneg %p8427_p4 }
  0x95   : > { %p8052_p11 = scmp.lt.u32.totalorder %s8425_s27, %s11890_s0  ;;  %p8053_p12 = scmp.lt.u32.totalorder %s8051_s18, %s8046_s10 }
  0x96   : > { %p8049_p1 = pnand %p8048_p8, %p8047_p10  ;;  %p8055_p0 = scmp.lt.u32.totalorder %s8046_s10, %s8425_s27 }
  0x97   : > { %p8054_p13 = por %p8053_p12, %p8052_p11 }
  0x98   : > { %p8050_p3 = pneg %p8049_p1 }
  0x99   : > { %p8056_p5 = por %p8055_p0, %p8054_p13 }
  0x9b   : > { %p8057_p7 = pnand %p8056_p5, %p8050_p3 }
  0x9d   : > { %8060 = shalt.err (!%p8057_p7)
}
  0x9e   : > { %s8061_s30 = scalar_lea.vmem %s8431_s1, 2048  ;;  %s8165_s17 = smov [#allocation2]  }
  0x9f   : > { %p8062_p10 = scmp.ne.s32.totalorder %s8431_s1, %s8061_s30  ;;  %s8066_s22 = sshll.u32 %s8165_s17, 4  ;;  %s8067_s22 = int_to_ptr.vmem [resolvable:$false] %s8066_s22 }
  0xa0   : > { %s8068_s23 = scalar_lea.vmem %s8067_s22, 4096  ;;  %p8069_p6 = scmp.lt.s32.totalorder %s8431_s1, %s8067_s22 }
  0xa1   : > { %p8064_p1 = pnand %p8062_p10, %p8048_p8  ;;  %p8070_p11 = scmp.lt.s32.totalorder %s8068_s23, %s8061_s30 }
  0xa3   : > { %p8065_p9 = pneg %p8064_p1  ;;  %p8071_p12 = por %p8070_p11, %p8069_p6 }
  0xa5   : > { %p8072_p13 = pnand %p8071_p12, %p8065_p9 }
  0xa7   : > { %8075 = shalt.err (!%p8072_p13)
}
  0xa8   : > { %s12191_s10 = smov 128   ;;  %p12192_p8 = scmp.ne.s32.totalorder %s12182_s20, 0 }
  0xa9   : > { %7618 = dma.hbm_to_vmem [thread:$0]  (!%p8427_p4), %s8425_s27, 2048, %s8431_s1, %s8433_s24, %s12191_s10, %s12191_s10, %s8162_s9  }
  0xaa   : > { %389 = sbr.rel (%p12192_p8) target bundleno = 1753 (0x6d9), region = 60 }
  0xb1   : > { %s8467_s18 = sand.u32 1, %s8146_s14  }
  0xb2   : > { %s5953_s25 = sshll.u32 %s8467_s18, 7  ;;  %s392_s30 = scalar_lea.sflag [#allocation3], %s8467_s18 }
  0xb3   : > { %s8473_s21 = scalar_lea.vmem [#allocation2], %s5953_s25 }
  0xb4   : > { %8121 = dma.done.wait (%p8407_p2), %s392_s30, 2048  }
  0xb5   : > { %8123 = vsyncadd (%p8407_p2), %s392_s30, 4294965248  ;;  %p12193_p6 = scmp.eq.s32.totalorder %s8246_s19, 0 }
  0xb7   : > { %8125 = dma.done.wait (%p12193_p6), [#allocation6], 6400   ;;  %p12194_p9 = pmov %p12193_p6 }
  0xb8   : > { %p12195_p4 = pmov %p12193_p6 }
  0xb9   : > { %8127 = vsyncadd (%p12194_p9), [#allocation6], 4294960896 }
  0xba   : > { %8129 = dma.done.wait (%p12195_p4), [#allocation9], 8448   ;;  %p12196_p3 = pmov %p12195_p4 }
  0xbc   : > { %8131 = vsyncadd (%p12196_p3), [#allocation9], 4294958848  ;;  %p12197_p0 = pmov %p12196_p3 }
  0xbe   : > { %8133 = dma.done.wait (%p12197_p0), [#allocation12], 2048   ;;  %p12198_p5 = pmov %p12197_p0 }
  0xbf   : > { %v8166_v0 = vmov 0.0   ;;  %v471_v1 = vld [vmem:[#allocation5 + $0x8] sm:$0xff]  ;;  %v474_v2 = vld [vmem:[#allocation5 + $0x20] sm:$0xff]  ;;  %v473_v5 = vld [vmem:[#allocation5 + $0x18] sm:$0xff]  ;;  %s12739_s30 = sld [smem:[#allocation101_spill]]  ;;  %s12740_s27 = sld [smem:[#allocation102_spill]] }
  0xc0   : > { %8135 = vsyncadd (%p12198_p5), [#allocation12], 4294965248  ;;  %599 = vmatprep.mubr.f32.mxu0 %v8166_v0  ;;  %v470_v3 = vld [vmem:[#allocation5] sm:$0xff]  ;;  %v7157_v4 = vpack.c.bf16 %v474_v2, %v471_v1  ;;  %v477_v6 = vld [vmem:[#allocation5 + $0x38] sm:$0xff]  ;;  %p12741_p7 = scmp.ne.s32.totalorder %s12188_s29, 0  ;;  %s8167_s17 = smov [#allocation13]  }
  0xc1   : > { %v480_v7 = vld [vmem:[#allocation5 + $0x50] sm:$0xff]  ;;  %v7159_v8 = vpack.c.bf16 %v473_v5, %v470_v3  ;;  %v479_v11 = vld [vmem:[#allocation5 + $0x48] sm:$0xff]  ;;  %v486_v13 = vld [vmem:[#allocation5 + $0x80] sm:$0xff]  ;;  %s8080_s22 = sshll.u32 %s8167_s17, 4  ;;  %s8081_s22 = int_to_ptr.vmem [resolvable:$false] %s8080_s22 }
  0xc2   : > { %v7161_v9 = vpack.c.bf16 %v480_v7, %v477_v6  ;;  %v476_v10 = vld [vmem:[#allocation5 + $0x30] sm:$0xff]  ;;  %v483_v12 = vld [vmem:[#allocation5 + $0x68] sm:$0xff]  ;;  %7158 = vmatprep.subr.bf16.mxu0 %v7157_v4  ;;  %v482_v16 = vld [vmem:[#allocation5 + $0x60] sm:$0xff]  ;;  %s8082_s23 = scalar_lea.vmem %s8081_s22, 4096 }
  0xc3   : > { %7160 = vmatpush1.bf16.msra.mxu0 %v7159_v8  ;;  %v7163_v14 = vpack.c.bf16 %v479_v11, %v476_v10  ;;  %v7165_v15 = vpack.c.bf16 %v486_v13, %v483_v12  ;;  %v485_v17 = vld [vmem:[#allocation5 + $0x78] sm:$0xff]  ;;  %v492_v19 = vld [vmem:[#allocation5 + $0xb0] sm:$0xff]  ;;  %v491_v23 = vld [vmem:[#allocation5 + $0xa8] sm:$0xff] }
  0xc4   : > { %7162 = vmatprep.subr.bf16.mxu0 %v7161_v9  ;;  %v489_v18 = vld [vmem:[#allocation5 + $0x98] sm:$0xff]  ;;  %v7167_v20 = vpack.c.bf16 %v485_v17, %v482_v16  ;;  %v488_v22 = vld [vmem:[#allocation5 + $0x90] sm:$0xff]  ;;  %v495_v24 = vld [vmem:[#allocation5 + $0xc8] sm:$0xff] }
  0xc5   : > { %v7169_v21 = vpack.c.bf16 %v492_v19, %v489_v18  ;;  %v498_v25 = vld [vmem:[#allocation5 + $0xe0] sm:$0xff]  ;;  %v7171_v27 = vpack.c.bf16 %v491_v23, %v488_v22  ;;  %v497_v30 = vld [vmem:[#allocation5 + $0xd8] sm:$0xff]  ;;  %v504_v32 = vld [vmem:[#allocation5 + $0x110] sm:$0xff] }
  0xc6   : > { %v454_v26 = vld [vmem:[%s8473_s21] sm:$0xff]  ;;  %v7173_v28 = vpack.c.bf16 %v498_v25, %v495_v24  ;;  %v501_v31 = vld [vmem:[#allocation5 + $0xf8] sm:$0xff]  ;;  %v500_v35 = vld [vmem:[#allocation5 + $0xf0] sm:$0xff]  ;;  %v520_v25 = vlaneseq }
  0xc7   : > { %7164 = vmatpush1.bf16.msra.mxu0 %v7163_v14  ;;  %6517 = vmatprep.mubr.f32.mxu1 %v454_v26  ;;  %v494_v29 = vld [vmem:[#allocation5 + $0xc0] sm:$0xff]  ;;  %v7177_v34 = vpack.c.bf16 %v504_v32, %v501_v31  ;;  %v503_v36 = vld [vmem:[#allocation5 + $0x108] sm:$0xff]  ;;  %v509_v42 = vld [vmem:[#allocation5 + $0x138] sm:$0xff] }
  0xc8   : > { %7166 = vmatprep.subr.bf16.mxu0 %v7165_v15  ;;  %v7175_v33 = vpack.c.bf16 %v497_v30, %v494_v29  ;;  %v507_v37 = vld [vmem:[#allocation5 + $0x128] sm:$0xff]  ;;  %v510_v38 = vld [vmem:[#allocation5 + $0x140] sm:$0xff]  ;;  %v7179_v39 = vpack.c.bf16 %v503_v36, %v500_v35  ;;  %v513_v43 = vld [vmem:[#allocation5 + $0x158] sm:$0xff] }
  0xc9   : > { %v7181_v40 = vpack.c.bf16 %v510_v38, %v507_v37  ;;  %v506_v41 = vld [vmem:[#allocation5 + $0x120] sm:$0xff]  ;;  %v516_v44 = vld [vmem:[#allocation5 + $0x170] sm:$0xff]  ;;  %v515_v48 = vld [vmem:[#allocation5 + $0x168] sm:$0xff] }
  0xca   : > { %v7183_v45 = vpack.c.bf16 %v509_v42, %v506_v41  ;;  %v7185_v46 = vpack.c.bf16 %v516_v44, %v513_v43  ;;  %v512_v47 = vld [vmem:[#allocation5 + $0x150] sm:$0xff]  ;;  %v8495_v50 = vld [vmem:[%s8473_s21 + $0x8] sm:$0xff]  ;;  %v8505_v52 = vld [vmem:[%s8473_s21 + $0x18] sm:$0xff] }
  0xcb   : > { %7168 = vmatpush1.bf16.msra.mxu0 %v7167_v20  ;;  %v7187_v49 = vpack.c.bf16 %v515_v48, %v512_v47  ;;  %v8500_v51 = vld [vmem:[%s8473_s21 + $0x10] sm:$0xff]  ;;  %v8510_v53 = vld [vmem:[%s8473_s21 + $0x20] sm:$0xff]  ;;  %v8515_v54 = vld [vmem:[%s8473_s21 + $0x28] sm:$0xff] }
  0xcc   : > { %7170 = vmatprep.subr.bf16.mxu0 %v7169_v21  ;;  %v8520_v55 = vld [vmem:[%s8473_s21 + $0x30] sm:$0xff]  ;;  %v8525_v56 = vld [vmem:[%s8473_s21 + $0x38] sm:$0xff]  ;;  %v8530_v57 = vld [vmem:[%s8473_s21 + $0x40] sm:$0xff] }
  0xcd   : > { %v8535_v58 = vld [vmem:[%s8473_s21 + $0x48] sm:$0xff]  ;;  %v8540_v59 = vld [vmem:[%s8473_s21 + $0x50] sm:$0xff]  ;;  %v8545_v60 = vld [vmem:[%s8473_s21 + $0x58] sm:$0xff] }
  0xce   : > { %v466_v61 = vld [vmem:[%s8473_s21 + $0x60] sm:$0xff]  ;;  %v467_v62 = vld [vmem:[%s8473_s21 + $0x68] sm:$0xff]  ;;  %v468_v63 = vld [vmem:[%s8473_s21 + $0x70] sm:$0xff] }
  0xcf   : > { %7172 = vmatpush1.bf16.msra.mxu0 %v7171_v27  ;;  %v469_v1 = vld [vmem:[%s8473_s21 + $0x78] sm:$0xff]  ;;  %v472_v2 = vld [vmem:[#allocation5 + $0x10] sm:$0xff]  ;;  %v475_v3 = vld [vmem:[#allocation5 + $0x28] sm:$0xff]  ;;  %s11821_s21 = scalar_lea.vmem [#allocation13], %s5953_s25  ;;  %s6100_s25 = sshll.u32 %s8246_s19, 11 }
  0xd0   : > { %7174 = vmatprep.subr.bf16.mxu0 %v7173_v28  ;;  %v7189_v4 = vpack.c.bf16 %v475_v3, %v472_v2  ;;  %v478_v5 = vld [vmem:[#allocation5 + $0x40] sm:$0xff]  ;;  %v481_v6 = vld [vmem:[#allocation5 + $0x58] sm:$0xff]  ;;  %v484_v8 = vld [vmem:[#allocation5 + $0x70] sm:$0xff]  ;;  %s5819_s20 = sshll.u32 %s11821_s21, 4  ;;  %s11842_s1 = scalar_lea.hbm %s12740_s27, %s6100_s25  ;;  %s11844_s20 = int_to_ptr.vmem [resolvable:$true] %s5819_s20 }
  0xd1   : > { %v7193_v7 = vpack.c.bf16 %v481_v6, %v478_v5  ;;  %v487_v9 = vld [vmem:[#allocation5 + $0x88] sm:$0xff]  ;;  %v490_v11 = vld [vmem:[#allocation5 + $0xa0] sm:$0xff]  ;;  %v493_v12 = vld [vmem:[#allocation5 + $0xb8] sm:$0xff]  ;;  %s5805_s19 = scalar_lea.sflag [#allocation4], %s8467_s18  ;;  %s8076_s24 = scalar_lea.vmem %s11844_s20, 2048 }
  0xd2   : > { %7190 = vmatprep.subr.bf16.mxu1 %v7189_v4  ;;  %v7197_v10 = vpack.c.bf16 %v487_v9, %v484_v8  ;;  %v496_v13 = vld [vmem:[#allocation5 + $0xd0] sm:$0xff]  ;;  %v499_v14 = vld [vmem:[#allocation5 + $0xe8] sm:$0xff]  ;;  %v502_v16 = vld [vmem:[#allocation5 + $0x100] sm:$0xff]  ;;  %p8077_p2 = scmp.ne.s32.totalorder %s11844_s20, %s8076_s24  ;;  %p8083_p11 = scmp.lt.s32.totalorder %s11844_s20, %s8081_s22 }
  0xd3   : > { %7176 = vmatpush1.bf16.msra.mxu0 %v7175_v33  ;;  %7192 = vmatpush3.bf16.msra.mxu1 %v7189_v4  ;;  %v7205_v15 = vpack.c.bf16 %v499_v14, %v496_v13  ;;  %v505_v17 = vld [vmem:[#allocation5 + $0x118] sm:$0xff]  ;;  %v508_v19 = vld [vmem:[#allocation5 + $0x130] sm:$0xff]  ;;  %v511_v20 = vld [vmem:[#allocation5 + $0x148] sm:$0xff]  ;;  %p8084_p12 = scmp.lt.s32.totalorder %s8082_s23, %s8076_s24 }
  0xd4   : > { %7178 = vmatprep.subr.bf16.mxu0 %v7177_v34  ;;  %7194 = vmatprep.subr.bf16.mxu1 %v7193_v7  ;;  %v7209_v18 = vpack.c.bf16 %v505_v17, %v502_v16  ;;  %v7213_v21 = vpack.c.bf16 %v511_v20, %v508_v19  ;;  %v514_v22 = vld [vmem:[#allocation5 + $0x160] sm:$0xff]  ;;  %v517_v23 = vld [vmem:[#allocation5 + $0x178] sm:$0xff]  ;;  %v8593_v44 = vld [vmem:[#allocation7 + $0x8] sm:$0xff]  ;;  %p8078_p10 = pnand %p8077_p2, %p12741_p7 }
  0xd5   : > { %v7217_v24 = vpack.c.bf16 %v517_v23, %v514_v22  ;;  %v8573_v28 = vld [vmem:[%s11892_s2] sm:$0x7]  ;;  %p8085_p13 = por %p8084_p12, %p8083_p11 }
  0xd6   : > { %v8583_v35 = vld [vmem:[#allocation7] sm:$0xff]  ;;  %p8079_p1 = pneg %p8078_p10 }
  0xd7   : > { %7180 = vmatpush1.bf16.msra.mxu0 %v7179_v39  ;;  %7196 = vmatpush3.bf16.msra.mxu1 %v7193_v7  ;;  %v8589_v38 = vld [vmem:[%s11894_s4] ss:$0 sm:$0xff] }
  0xd8   : > { %7182 = vmatprep.subr.bf16.mxu0 %v7181_v40  ;;  %7198 = vmatprep.subr.bf16.mxu1 %v7197_v10  ;;  %p8086_p8 = pnand %p8085_p13, %p8079_p1 }
  0xdb   : > { %7184 = vmatpush1.bf16.msra.mxu0 %v7183_v45  ;;  %7200 = vmatpush3.bf16.msra.mxu1 %v7197_v10 }
  0xdc   : > { %7186 = vmatprep.subr.bf16.mxu0 %v7185_v46 }
  0xdf   : > { %7188 = vmatpush1.bf16.msra.mxu0 %v7187_v49 }
  0xe2   : > { %600 = vmatmul.mubr.f32.vlgmr.msra.gmra.mrb[0].mxu0 %v454_v26  ;;  %v8567_v26 = vshrl.u32 %v520_v25, 7 }
  0xe3   : > { %605 = vmatprep.mubr.f32.mxu0 %v8166_v0 }
  0xe4   : > { %v522_v27 = vsub.s32 0, %v8567_v26  ;;  %v526_v29 = vsub.s32 1, %v8567_v26 }
  0xe6   : > { %606 = vmatmul.mubr.f32.gmra.mrb[2].mxu0 %v8495_v50  ;;  %v8577_v30 = vrot.slane %v8573_v28, %v522_v27  ;;  %v8580_v31 = vrot.slane %v8573_v28, %v526_v29 }
  0xe7   : > { %611 = vmatprep.mubr.f32.mxu0 %v8166_v0 }
  0xea   : > { %612 = vmatmul.mubr.f32.gmra.mrb[4].mxu0 %v8500_v51 }
  0xeb   : > { %617 = vmatprep.mubr.f32.mxu0 %v8166_v0 }
  0xee   : > { %618 = vmatmul.mubr.f32.gmra.mrb[6].mxu0 %v8505_v52 }
  0xef   : > { %623 = vmatprep.mubr.f32.mxu0 %v8166_v0 }
  0xf2   : > { %624 = vmatmul.mubr.f32.gmra.mrb[8].mxu0 %v8510_v53 }
  0xf3   : > { %629 = vmatprep.mubr.f32.mxu0 %v8166_v0 }
  0xf6   : > { %630 = vmatmul.mubr.f32.gmra.mrb[10].mxu0 %v8515_v54 }
  0xf7   : > { %635 = vmatprep.mubr.f32.mxu0 %v8166_v0 }
  0xfa   : > { %636 = vmatmul.mubr.f32.gmra.mrb[12].mxu0 %v8520_v55 }
  0xfb   : > { %641 = vmatprep.mubr.f32.mxu0 %v8166_v0 }
  0xfe   : > { %642 = vmatmul.mubr.f32.gmra.mrb[14].mxu0 %v8525_v56 }
  0xff   : > { %647 = vmatprep.mubr.f32.mxu0 %v8166_v0 }
 0x102   : > { %648 = vmatmul.mubr.f32.gmra.mrb[16].mxu0 %v8530_v57 }
 0x103   : > { %653 = vmatprep.mubr.f32.mxu0 %v8166_v0 }
 0x106   : > { %654 = vmatmul.mubr.f32.gmra.mrb[18].mxu0 %v8535_v58 }
 0x107   : > { %659 = vmatprep.mubr.f32.mxu0 %v8166_v0 }
 0x10a   : > { %660 = vmatmul.mubr.f32.gmra.mrb[20].mxu0 %v8540_v59 }
 0x10b   : > { %665 = vmatprep.mubr.f32.mxu0 %v8166_v0 }
 0x10e   : > { %666 = vmatmul.mubr.f32.gmra.mrb[22].mxu0 %v8545_v60 }
 0x10f   : > { %671 = vmatprep.mubr.f32.mxu0 %v8166_v0 }
 0x112   : > { %672 = vmatmul.mubr.f32.gmra.mrb[24].mxu0 %v466_v61 }
 0x113   : > { %677 = vmatprep.mubr.f32.mxu0 %v8166_v0 }
 0x116   : > { %678 = vmatmul.mubr.f32.gmra.mrb[26].mxu0 %v467_v62 }
 0x117   : > { %683 = vmatprep.mubr.f32.mxu0 %v8166_v0 }
 0x11a   : > { %684 = vmatmul.mubr.f32.gmra.mrb[28].mxu0 %v468_v63 }
 0x11b   : > { %689 = vmatprep.mubr.f32.mxu0 %v8166_v0  ;;  %v7201_v0 = vpack.c.bf16 %v493_v12, %v490_v11 }
 0x11d   : > { %7202 = vmatprep.subr.bf16.mxu1 %v7201_v0 }
 0x11e   : > { %690 = vmatmul.mubr.f32.gmra.mrb[30].mxu0 %v469_v1  ;;  %7204 = vmatpush3.bf16.msra.mxu1 %v7201_v0 }
 0x11f   : > { %7206 = vmatprep.subr.bf16.mxu1 %v7205_v15 }
 0x122   : > { %7208 = vmatpush3.bf16.msra.mxu1 %v7205_v15 }
 0x123   : > { %7210 = vmatprep.subr.bf16.mxu1 %v7209_v18 }
 0x126   : > { %7212 = vmatpush3.bf16.msra.mxu1 %v7209_v18 }
 0x127   : > { %7214 = vmatprep.subr.bf16.mxu1 %v7213_v21 }
 0x12a   : > { %7216 = vmatpush3.bf16.msra.mxu1 %v7213_v21 }
 0x12b   : > { %7218 = vmatprep.subr.bf16.mxu1 %v7217_v24 }
 0x12e   : > { %7220 = vmatpush3.bf16.msra.mxu1 %v7217_v24 }
 0x131   : > { %6518 = vmatmul.mubr.f32.vlgmr.msra.gmra.mrb[0].mxu1 %v8495_v50 }
 0x132   : > { %6520 = vmatprep.mubr.f32.mxu1 %v8500_v51 }
 0x135   : > { %6521 = vmatmul.mubr.f32.gmra.mrb[2].mxu1 %v8505_v52 }
 0x136   : > { %6523 = vmatprep.mubr.f32.mxu1 %v8510_v53 }
 0x139   : > { %6524 = vmatmul.mubr.f32.gmra.mrb[4].mxu1 %v8515_v54 }
 0x13a   : > { %6526 = vmatprep.mubr.f32.mxu1 %v8520_v55 }
 0x13d   : > { %6527 = vmatmul.mubr.f32.gmra.mrb[6].mxu1 %v8525_v56 }
 0x13e   : > { %6529 = vmatprep.mubr.f32.mxu1 %v8530_v57 }
 0x141   : > { %6530 = vmatmul.mubr.f32.gmra.mrb[8].mxu1 %v8535_v58 }
 0x142   : > { %6532 = vmatprep.mubr.f32.mxu1 %v8540_v59 }
 0x145   : > { %6533 = vmatmul.mubr.f32.gmra.mrb[10].mxu1 %v8545_v60 }
 0x146   : > { %6535 = vmatprep.mubr.f32.mxu1 %v466_v61 }
 0x149   : > { %6536 = vmatmul.mubr.f32.gmra.mrb[12].mxu1 %v467_v62 }
 0x14a   : > { %6538 = vmatprep.mubr.f32.mxu1 %v468_v63 }
 0x14d   : > { %6539 = vmatmul.mubr.f32.gmra.mrb[14].mxu1 %v469_v1 }
 0x1b5   : > { %v601_v32 = vpop.f32.mrb[0].mxu0 }
 0x1b6   : > { %v602_v33 = vadd.f32 %v601_v32, %v8577_v30  ;;  %v603_v34 = vpop.f32.mrb[1].mxu0 }
 0x1b7   : > { %v604_v36 = vadd.f32 %v603_v34, %v8580_v31 }
 0x1b8   : > { %v860_v37 = vmax.f32 %v602_v33, 0.0 }
 0x1b9   : > { %v843_v39 = vadd.f32 %v8583_v35, %v604_v36  ;;  %v607_v40 = vpop.f32.mrb[2].mxu0 }
 0x1ba   : > { %v876_v41 = vadd.f32 1e-06, %v860_v37  ;;  %v608_v42 = vadd.f32 %v607_v40, %v8577_v30  ;;  %v609_v43 = vpop.f32.mrb[3].mxu0 }
 0x1bb   : > { %v914_v45 = vmax.f32 %v843_v39, 0.0  ;;  %v610_v46 = vadd.f32 %v609_v43, %v8580_v31 }
 0x1bc   : > { %v8597_v47 = vmul.f32 %v8589_v38, %v876_v41  ;;  %v861_v48 = vmax.f32 %v608_v42, 0.0 }
 0x1bd   : > { %v930_v49 = vadd.f32 1e-06, %v914_v45  ;;  %v844_v50 = vadd.f32 %v8593_v44, %v610_v46  ;;  %v613_v51 = vpop.f32.mrb[4].mxu0 }
 0x1be   : > { %v877_v52 = vadd.f32 1e-06, %v861_v48  ;;  %v614_v53 = vadd.f32 %v613_v51, %v8577_v30  ;;  %v615_v54 = vpop.f32.mrb[5].mxu0 }
 0x1bf   : > { %v915_v55 = vmax.f32 %v844_v50, 0.0  ;;  %v616_v56 = vadd.f32 %v615_v54, %v8580_v31  ;;  %v946_v57 = vmul.f32 %v8589_v38, %v930_v49 }
 0x1c0   : > { %v8604_v58 = vmul.f32 %v8589_v38, %v877_v52  ;;  %v862_v59 = vmax.f32 %v614_v53, 0.0 }
 0x1c1   : > { %v931_v60 = vadd.f32 1e-06, %v915_v55  ;;  %v845_v61 = vadd.f32 %v8583_v35, %v616_v56  ;;  %v619_v62 = vpop.f32.mrb[6].mxu0  ;;  %v1122_v63 = vmul.f32 %v946_v57, %v946_v57 }
 0x1c2   : > { %v878_v1 = vadd.f32 1e-06, %v862_v59  ;;  %v620_v2 = vadd.f32 %v619_v62, %v8577_v30  ;;  %v621_v3 = vpop.f32.mrb[7].mxu0 }
 0x1c3   : > { %v916_v4 = vmax.f32 %v845_v61, 0.0  ;;  %v622_v5 = vadd.f32 %v621_v3, %v8580_v31  ;;  %1138 = vadd.xlane.f32.xlu0 %v1122_v63  ;;  %v947_v6 = vmul.f32 %v8589_v38, %v931_v60  ;;  %v8610_v7 = vmul.f32 %v1122_v63, %v946_v57 }
 0x1c4   : > { %v8613_v8 = vmul.f32 %v8589_v38, %v878_v1  ;;  %v863_v9 = vmax.f32 %v620_v2, 0.0 }
 0x1c5   : > { %v932_v10 = vadd.f32 1e-06, %v916_v4  ;;  %v846_v11 = vadd.f32 %v8593_v44, %v622_v5  ;;  %v625_v12 = vpop.f32.mrb[8].mxu0  ;;  %v1123_v0 = vmul.f32 %v947_v6, %v947_v6  ;;  %v1410_v13 = vmul.f32 %v8610_v7, %v8610_v7 }
 0x1c6   : > { %v879_v14 = vadd.f32 1e-06, %v863_v9  ;;  %v626_v15 = vadd.f32 %v625_v12, %v8577_v30  ;;  %v627_v16 = vpop.f32.mrb[9].mxu0 }
 0x1c7   : > { %v917_v17 = vmax.f32 %v846_v11, 0.0  ;;  %v628_v18 = vadd.f32 %v627_v16, %v8580_v31  ;;  %1140 = vadd.xlane.f32.xlu0 %v1123_v0  ;;  %1426 = vadd.xlane.f32.xlu1 %v1410_v13  ;;  %v948_v19 = vmul.f32 %v8589_v38, %v932_v10  ;;  %v8621_v20 = vmul.f32 %v1123_v0, %v947_v6 }
 0x1c8   : > { %v8624_v21 = vmul.f32 %v8589_v38, %v879_v14  ;;  %v864_v22 = vmax.f32 %v626_v15, 0.0 }
 0x1c9   : > { %v933_v23 = vadd.f32 1e-06, %v917_v17  ;;  %v847_v24 = vadd.f32 %v8583_v35, %v628_v18  ;;  %v631_v25 = vpop.f32.mrb[10].mxu0  ;;  %v1124_v27 = vmul.f32 %v948_v19, %v948_v19  ;;  %v1411_v29 = vmul.f32 %v8621_v20, %v8621_v20 }
 0x1ca   : > { %v880_v32 = vadd.f32 1e-06, %v864_v22  ;;  %v632_v33 = vadd.f32 %v631_v25, %v8577_v30  ;;  %v633_v34 = vpop.f32.mrb[11].mxu0 }
 0x1cb   : > { %v918_v36 = vmax.f32 %v847_v24, 0.0  ;;  %v634_v37 = vadd.f32 %v633_v34, %v8580_v31  ;;  %1142 = vadd.xlane.f32.xlu0 %v1124_v27  ;;  %1428 = vadd.xlane.f32.xlu1 %v1411_v29  ;;  %v8631_v39 = vmul.f32 %v1124_v27, %v948_v19  ;;  %v949_v40 = vmul.f32 %v8589_v38, %v933_v23 }
 0x1cc   : > { %v8635_v41 = vmul.f32 %v8589_v38, %v880_v32  ;;  %v865_v42 = vmax.f32 %v632_v33, 0.0 }
 0x1cd   : > { %v934_v43 = vadd.f32 1e-06, %v918_v36  ;;  %v848_v45 = vadd.f32 %v8593_v44, %v634_v37  ;;  %v637_v46 = vpop.f32.mrb[12].mxu0  ;;  %v1412_v48 = vmul.f32 %v8631_v39, %v8631_v39  ;;  %v1125_v49 = vmul.f32 %v949_v40, %v949_v40 }
 0x1ce   : > { %v881_v50 = vadd.f32 1e-06, %v865_v42  ;;  %v638_v51 = vadd.f32 %v637_v46, %v8577_v30  ;;  %v639_v52 = vpop.f32.mrb[13].mxu0 }
 0x1cf   : > { %v919_v53 = vmax.f32 %v848_v45, 0.0  ;;  %v640_v54 = vadd.f32 %v639_v52, %v8580_v31  ;;  %1430 = vadd.xlane.f32.xlu0 %v1412_v48  ;;  %1144 = vadd.xlane.f32.xlu1 %v1125_v49  ;;  %v950_v55 = vmul.f32 %v8589_v38, %v934_v43  ;;  %v8643_v56 = vmul.f32 %v1125_v49, %v949_v40 }
 0x1d0   : > { %v8646_v57 = vmul.f32 %v8589_v38, %v881_v50  ;;  %v866_v59 = vmax.f32 %v638_v51, 0.0 }
 0x1d1   : > { %v935_v60 = vadd.f32 1e-06, %v919_v53  ;;  %v849_v61 = vadd.f32 %v8583_v35, %v640_v54  ;;  %v643_v62 = vpop.f32.mrb[14].mxu0  ;;  %v1126_v63 = vmul.f32 %v950_v55, %v950_v55  ;;  %v1413_v1 = vmul.f32 %v8643_v56, %v8643_v56 }
 0x1d2   : > { %v882_v2 = vadd.f32 1e-06, %v866_v59  ;;  %v644_v3 = vadd.f32 %v643_v62, %v8577_v30  ;;  %v645_v4 = vpop.f32.mrb[15].mxu0 }
 0x1d3   : > { %v920_v5 = vmax.f32 %v849_v61, 0.0  ;;  %v646_v6 = vadd.f32 %v645_v4, %v8580_v31  ;;  %1146 = vadd.xlane.f32.xlu0 %v1126_v63  ;;  %1432 = vadd.xlane.f32.xlu1 %v1413_v1  ;;  %v8653_v9 = vmul.f32 %v1126_v63, %v950_v55  ;;  %v951_v10 = vmul.f32 %v8589_v38, %v935_v60 }
 0x1d4   : > { %v8657_v11 = vmul.f32 %v8589_v38, %v882_v2  ;;  %v867_v12 = vmax.f32 %v644_v3, 0.0 }
 0x1d5   : > { %v936_v0 = vadd.f32 1e-06, %v920_v5  ;;  %v850_v13 = vadd.f32 %v8593_v44, %v646_v6  ;;  %v649_v14 = vpop.f32.mrb[16].mxu0  ;;  %v1414_v15 = vmul.f32 %v8653_v9, %v8653_v9  ;;  %v1127_v16 = vmul.f32 %v951_v10, %v951_v10 }
 0x1d6   : > { %v883_v17 = vadd.f32 1e-06, %v867_v12  ;;  %v650_v18 = vadd.f32 %v649_v14, %v8577_v30  ;;  %v651_v19 = vpop.f32.mrb[17].mxu0 }
 0x1d7   : > { %v921_v22 = vmax.f32 %v850_v13, 0.0  ;;  %v652_v23 = vadd.f32 %v651_v19, %v8580_v31  ;;  %1434 = vadd.xlane.f32.xlu0 %v1414_v15  ;;  %1148 = vadd.xlane.f32.xlu1 %v1127_v16  ;;  %v952_v24 = vmul.f32 %v8589_v38, %v936_v0  ;;  %v8665_v25 = vmul.f32 %v1127_v16, %v951_v10 }
 0x1d8   : > { %v8668_v27 = vmul.f32 %v8589_v38, %v883_v17  ;;  %v868_v29 = vmax.f32 %v650_v18, 0.0 }
 0x1d9   : > { %v937_v32 = vadd.f32 1e-06, %v921_v22  ;;  %v851_v33 = vadd.f32 %v8583_v35, %v652_v23  ;;  %v655_v34 = vpop.f32.mrb[18].mxu0  ;;  %v1128_v36 = vmul.f32 %v952_v24, %v952_v24  ;;  %v1415_v37 = vmul.f32 %v8665_v25, %v8665_v25 }
 0x1da   : > { %v884_v40 = vadd.f32 1e-06, %v868_v29  ;;  %v656_v42 = vadd.f32 %v655_v34, %v8577_v30  ;;  %v657_v43 = vpop.f32.mrb[19].mxu0 }
 0x1db   : > { %v922_v45 = vmax.f32 %v851_v33, 0.0  ;;  %v658_v46 = vadd.f32 %v657_v43, %v8580_v31  ;;  %1150 = vadd.xlane.f32.xlu0 %v1128_v36  ;;  %1436 = vadd.xlane.f32.xlu1 %v1415_v37  ;;  %v8675_v48 = vmul.f32 %v1128_v36, %v952_v24  ;;  %v953_v49 = vmul.f32 %v8589_v38, %v937_v32 }
 0x1dc   : > { %v8679_v50 = vmul.f32 %v8589_v38, %v884_v40  ;;  %v869_v51 = vmax.f32 %v656_v42, 0.0 }
 0x1dd   : > { %v938_v52 = vadd.f32 1e-06, %v922_v45  ;;  %v852_v53 = vadd.f32 %v8593_v44, %v658_v46  ;;  %v1416_v54 = vmul.f32 %v8675_v48, %v8675_v48  ;;  %v1129_v55 = vmul.f32 %v953_v49, %v953_v49  ;;  %v661_v59 = vpop.f32.mrb[20].mxu0 }
 0x1de   : > { %v885_v60 = vadd.f32 1e-06, %v869_v51  ;;  %v662_v61 = vadd.f32 %v661_v59, %v8577_v30  ;;  %v663_v62 = vpop.f32.mrb[21].mxu0 }
 0x1df   : > { %v923_v63 = vmax.f32 %v852_v53, 0.0  ;;  %1438 = vadd.xlane.f32.xlu0 %v1416_v54  ;;  %1152 = vadd.xlane.f32.xlu1 %v1129_v55  ;;  %v664_v1 = vadd.f32 %v663_v62, %v8580_v31  ;;  %v954_v2 = vmul.f32 %v8589_v38, %v938_v52  ;;  %v8687_v3 = vmul.f32 %v1129_v55, %v953_v49 }
 0x1e0   : > { %v8690_v4 = vmul.f32 %v8589_v38, %v885_v60  ;;  %v870_v5 = vmax.f32 %v662_v61, 0.0 }
 0x1e1   : > { %v939_v6 = vadd.f32 1e-06, %v923_v63  ;;  %v853_v10 = vadd.f32 %v8583_v35, %v664_v1  ;;  %v667_v12 = vpop.f32.mrb[22].mxu0  ;;  %v1130_v0 = vmul.f32 %v954_v2, %v954_v2  ;;  %v1417_v13 = vmul.f32 %v8687_v3, %v8687_v3 }
 0x1e2   : > { %v886_v14 = vadd.f32 1e-06, %v870_v5  ;;  %v668_v15 = vadd.f32 %v667_v12, %v8577_v30  ;;  %v669_v16 = vpop.f32.mrb[23].mxu0 }
 0x1e3   : > { %v924_v17 = vmax.f32 %v853_v10, 0.0  ;;  %1154 = vadd.xlane.f32.xlu0 %v1130_v0  ;;  %1440 = vadd.xlane.f32.xlu1 %v1417_v13  ;;  %v670_v18 = vadd.f32 %v669_v16, %v8580_v31  ;;  %v8697_v19 = vmul.f32 %v1130_v0, %v954_v2  ;;  %v955_v22 = vmul.f32 %v8589_v38, %v939_v6 }
 0x1e4   : > { %v8701_v23 = vmul.f32 %v8589_v38, %v886_v14  ;;  %v871_v24 = vmax.f32 %v668_v15, 0.0 }
 0x1e5   : > { %v940_v29 = vadd.f32 1e-06, %v924_v17  ;;  %v854_v32 = vadd.f32 %v8593_v44, %v670_v18  ;;  %v673_v33 = vpop.f32.mrb[24].mxu0  ;;  %v1418_v34 = vmul.f32 %v8697_v19, %v8697_v19  ;;  %v1131_v36 = vmul.f32 %v955_v22, %v955_v22 }
 0x1e6   : > { %v887_v37 = vadd.f32 1e-06, %v871_v24  ;;  %v674_v40 = vadd.f32 %v673_v33, %v8577_v30  ;;  %v675_v42 = vpop.f32.mrb[25].mxu0 }
 0x1e7   : > { %v925_v43 = vmax.f32 %v854_v32, 0.0  ;;  %v676_v45 = vadd.f32 %v675_v42, %v8580_v31  ;;  %1442 = vadd.xlane.f32.xlu0 %v1418_v34  ;;  %1156 = vadd.xlane.f32.xlu1 %v1131_v36  ;;  %v8708_v46 = vmul.f32 %v1131_v36, %v955_v22  ;;  %v956_v49 = vmul.f32 %v8589_v38, %v940_v29 }
 0x1e8   : > { %v8712_v51 = vmul.f32 %v8589_v38, %v887_v37  ;;  %v872_v52 = vmax.f32 %v674_v40, 0.0 }
 0x1e9   : > { %v941_v53 = vadd.f32 1e-06, %v925_v43  ;;  %v855_v54 = vadd.f32 %v8583_v35, %v676_v45  ;;  %v679_v55 = vpop.f32.mrb[26].mxu0  ;;  %v1419_v59 = vmul.f32 %v8708_v46, %v8708_v46  ;;  %v1132_v2 = vmul.f32 %v956_v49, %v956_v49 }
 0x1ea   : > { %v888_v60 = vadd.f32 1e-06, %v872_v52  ;;  %v680_v61 = vadd.f32 %v679_v55, %v8577_v30  ;;  %v681_v62 = vpop.f32.mrb[27].mxu0 }
 0x1eb   : > { %v926_v63 = vmax.f32 %v855_v54, 0.0  ;;  %1444 = vadd.xlane.f32.xlu1 %v1419_v59  ;;  %v682_v1 = vadd.f32 %v681_v62, %v8580_v31  ;;  %v957_v5 = vmul.f32 %v8589_v38, %v941_v53  ;;  %v8725_v17 = vmul.f32 %v1132_v2, %v956_v49 }
 0x1ec   : > { %v8721_v6 = vmul.f32 %v8589_v38, %v888_v60  ;;  %v873_v10 = vmax.f32 %v680_v61, 0.0 }
 0x1ed   : > { %v942_v12 = vadd.f32 1e-06, %v926_v63  ;;  %v856_v0 = vadd.f32 %v8593_v44, %v682_v1  ;;  %v685_v13 = vpop.f32.mrb[28].mxu0  ;;  %v1133_v29 = vmul.f32 %v957_v5, %v957_v5  ;;  %v1420_v49 = vmul.f32 %v8725_v17, %v8725_v17 }
 0x1ee   : > { %v889_v14 = vadd.f32 1e-06, %v873_v10  ;;  %v686_v15 = vadd.f32 %v685_v13, %v8577_v30  ;;  %v687_v16 = vpop.f32.mrb[29].mxu0 }
 0x1ef   : > { %v927_v18 = vmax.f32 %v856_v0, 0.0  ;;  %v688_v22 = vadd.f32 %v687_v16, %v8580_v31  ;;  %1158 = vadd.xlane.f32.xlu1 %v1132_v2  ;;  %v958_v24 = vmul.f32 %v8589_v38, %v942_v12  ;;  %v8736_v52 = vmul.f32 %v1133_v29, %v957_v5 }
 0x1f0   : > { %v8730_v32 = vmul.f32 %v8589_v38, %v889_v14  ;;  %v874_v33 = vmax.f32 %v686_v15, 0.0 }
 0x1f1   : > { %v943_v34 = vadd.f32 1e-06, %v927_v18  ;;  %v857_v36 = vadd.f32 %v8583_v35, %v688_v22  ;;  %v691_v37 = vpop.f32.mrb[30].mxu0  ;;  %v1134_v40 = vmul.f32 %v958_v24, %v958_v24  ;;  %v1421_v2 = vmul.f32 %v8736_v52, %v8736_v52 }
 0x1f2   : > { %v890_v42 = vadd.f32 1e-06, %v874_v33  ;;  %v692_v43 = vadd.f32 %v691_v37, %v8577_v30  ;;  %v693_v45 = vpop.f32.mrb[31].mxu0 }
 0x1f3   : > { %v928_v53 = vmax.f32 %v857_v36, 0.0  ;;  %v694_v54 = vadd.f32 %v693_v45, %v8580_v31  ;;  %1162 = vadd.xlane.f32.xlu0 %v1134_v40  ;;  %1160 = vadd.xlane.f32.xlu1 %v1133_v29  ;;  %v8739_v55 = vmul.f32 %v1134_v40, %v958_v24  ;;  %v959_v35 = vmul.f32 %v8589_v38, %v943_v34 }
 0x1f4   : > { %v8743_v59 = vmul.f32 %v8589_v38, %v890_v42  ;;  %v875_v60 = vmax.f32 %v692_v43, 0.0  ;;  %v530_v40 = vsub.s32 2, %v8567_v26 }
 0x1f5   : > { %v944_v30 = vadd.f32 1e-06, %v928_v53  ;;  %v858_v61 = vadd.f32 %v8593_v44, %v694_v54  ;;  %v1422_v62 = vmul.f32 %v8739_v55, %v8739_v55  ;;  %v1135_v5 = vmul.f32 %v959_v35, %v959_v35 }
 0x1f6   : > { %v891_v63 = vadd.f32 1e-06, %v875_v60  ;;  %v8772_v54 = vrot.slane %v8573_v28, %v530_v40 }
 0x1f7   : > { %v929_v1 = vmax.f32 %v858_v61, 0.0  ;;  %1450 = vadd.xlane.f32.xlu0 %v1422_v62  ;;  %1446 = vadd.xlane.f32.xlu1 %v1420_v49  ;;  %v960_v31 = vmul.f32 %v8589_v38, %v944_v30  ;;  %v8757_v14 = vmul.f32 %v1135_v5, %v959_v35 }
 0x1f8   : > { %v8752_v10 = vmul.f32 %v8589_v38, %v891_v63 }
 0x1f9   : > { %v945_v12 = vadd.f32 1e-06, %v929_v1  ;;  %v1136_v0 = vmul.f32 %v960_v31, %v960_v31  ;;  %v1423_v22 = vmul.f32 %v8757_v14, %v8757_v14 }
 0x1fb   : > { %1166 = vadd.xlane.f32.xlu0 %v1136_v0  ;;  %1448 = vadd.xlane.f32.xlu1 %v1421_v2  ;;  %v8754_v44 = vmul.f32 %v1136_v0, %v960_v31  ;;  %v961_v13 = vmul.f32 %v8589_v38, %v945_v12 }
 0x1fd   : > { %v1424_v15 = vmul.f32 %v8754_v44, %v8754_v44  ;;  %v1137_v16 = vmul.f32 %v961_v13, %v961_v13 }
 0x1ff   : > { %1454 = vadd.xlane.f32.xlu0 %v1424_v15  ;;  %1164 = vadd.xlane.f32.xlu1 %v1135_v5  ;;  %v8761_v18 = vmul.f32 %v1137_v16, %v961_v13 }
 0x201   : > { %v1425_v24 = vmul.f32 %v8761_v18, %v8761_v18 }
 0x203   : > { %1456 = vadd.xlane.f32.xlu0 %v1425_v24  ;;  %1452 = vadd.xlane.f32.xlu1 %v1423_v22 }
 0x204   : > { %v6519_v35 = vpop.f32.mrb[0].mxu1 }
 0x205   : > { %v762_v1 = vpop.f32.mrb[1].mxu1  ;;  %v8779_v12 = vadd.f32 %v6519_v35, %v8772_v54 }
 0x206   : > { %v8782_v0 = vadd.f32 %v762_v1, %v8772_v54 }
 0x207   : > { %1168 = vadd.xlane.f32.xlu1 %v1137_v16  ;;  %12199 = vst [vmem:[#allocation19_spill] sm:$0xff] %v8779_v12 }
 0x208   : > { %12200 = vst [vmem:[#allocation20_spill] sm:$0xff] %v8782_v0 }
 0x250   : > { %v1139_v38 = vpop.xlane.xlu0 %1138 }
 0x251   : > { %7679 = vrsqrt.f32 %v1139_v38  ;;  %vm1172_vm0 = vcmp.eq.f32.partialorder %v1139_v38, inf  ;;  %v1175_v26 = vand.u32 2147483648, %v1139_v38  ;;  %vm1174_vm1 = vcmp.eq.f32.partialorder %v1139_v38, 0.0 }
 0x254   : > { %v1141_v29 = vpop.xlane.xlu0 %1140  ;;  %v1427_v33 = vpop.xlane.xlu1 %1426 }
 0x255   : > { %7681 = vrsqrt.f32 %v1141_v29  ;;  %vm1179_vm2 = vcmp.eq.f32.partialorder %v1141_v29, inf  ;;  %v1182_v24 = vand.u32 2147483648, %v1141_v29  ;;  %vm1181_vm5 = vcmp.eq.f32.partialorder %v1141_v29, 0.0 }
 0x256   : > { %7683 = vrsqrt.f32 %v1427_v33 }
 0x258   : > { %v1143_v34 = vpop.xlane.xlu0 %1142  ;;  %v1429_v36 = vpop.xlane.xlu1 %1428 }
 0x259   : > { %7685 = vrsqrt.f32 %v1143_v34  ;;  %vm1186_vm3 = vcmp.eq.f32.partialorder %v1143_v34, inf  ;;  %v1189_v5 = vand.u32 2147483648, %v1143_v34  ;;  %vm1188_vm4 = vcmp.eq.f32.partialorder %v1143_v34, 0.0 }
 0x25a   : > { %7687 = vrsqrt.f32 %v1429_v36 }
 0x25b   : > { %v7680_v37 = vpop.eup %7679 }
 0x25c   : > { %v1431_v42 = vpop.xlane.xlu0 %1430  ;;  %v8768_v43 = vpop.xlane.xlu1 %1144  ;;  %v1171_v45 = vmul.f32 %v7680_v37, %v1139_v38 }
 0x25d   : > { %7689 = vrsqrt.f32 %v1431_v42  ;;  %vm1193_vm6 = vcmp.eq.f32.partialorder %v8768_v43, inf  ;;  %v1196_v35 = vand.u32 2147483648, %v8768_v43  ;;  %vm1195_vm7 = vcmp.eq.f32.partialorder %v8768_v43, 0.0 }
 0x25e   : > { %7691 = vrsqrt.f32 %v8768_v43  ;;  %v1173_v53 = vsel %vm1172_vm0, %v1139_v38, %v1171_v45  ;;  %v1538_v45 = vmul.f32 0.25, %v8782_v0 }
 0x25f   : > { %v7682_v49 = vpop.eup %7681  ;;  %v1176_v31 = vsel %vm1174_vm1, %v1175_v26, %v1173_v53 }
 0x260   : > { %v7684_v60 = vpop.eup %7683  ;;  %v1178_v30 = vmul.f32 %v7682_v49, %v1141_v29  ;;  %v8774_v61 = vpop.xlane.xlu0 %1146  ;;  %v1539_v49 = vmul.f32 0.25, %v8779_v12 }
 0x261   : > { %v1433_v62 = vpop.xlane.xlu1 %1432  ;;  %7693 = vrsqrt.f32 %v8774_v61  ;;  %v1474_v63 = vmul.f32 %v7684_v60, %v8610_v7  ;;  %vm1200_vm8 = vcmp.eq.f32.partialorder %v8774_v61, inf  ;;  %vm1202_vm9 = vcmp.eq.f32.partialorder %v8774_v61, 0.0 }
 0x262   : > { %7695 = vrsqrt.f32 %v1433_v62  ;;  %v1180_v22 = vsel %vm1179_vm2, %v1141_v29, %v1178_v30 }
 0x263   : > { %v7686_v2 = vpop.eup %7685  ;;  %v1490_v28 = vmul.f32 %v1474_v63, %v1176_v31  ;;  %v1183_v40 = vsel %vm1181_vm5, %v1182_v24, %v1180_v22 }
 0x264   : > { %v7688_v13 = vpop.eup %7687  ;;  %v1435_v15 = vpop.xlane.xlu0 %1434  ;;  %v1185_v7 = vmul.f32 %v7686_v2, %v1143_v34  ;;  %v7221_v2 = vpack.c.bf16 %v1539_v49, %v1538_v45 }
 0x265   : > { %v8784_v16 = vpop.xlane.xlu1 %1148  ;;  %7697 = vrsqrt.f32 %v1435_v15  ;;  %v1522_v38 = vmul.f32 0.25, %v1490_v28  ;;  %v1475_v33 = vmul.f32 %v7688_v13, %v8621_v20 }
 0x266   : > { %7699 = vrsqrt.f32 %v8784_v16  ;;  %v1187_v36 = vsel %vm1186_vm3, %v1143_v34, %v1185_v7  ;;  %7222 = vmatprep.subr.bf16.mxu1 %v7221_v2  ;;  %vm1207_vm10 = vcmp.eq.f32.partialorder %v8784_v16, inf  ;;  %vm1209_vm11 = vcmp.eq.f32.partialorder %v8784_v16, 0.0 }
 0x267   : > { %v7690_v37 = vpop.eup %7689  ;;  %1554 = vxpose.xlu0.b32.start [1/2] (short) %v1522_v38, 128  ;;  %v1190_v42 = vsel %vm1188_vm4, %v1189_v5, %v1187_v36  ;;  %v1491_v60 = vmul.f32 %v1475_v33, %v1183_v40  ;;  %7224 = vmatpush3.bf16.msra.mxu1 %v7221_v2  ;;  %v1203_v38 = vand.u32 2147483648, %v8774_v61  ;;  %v1210_v36 = vand.u32 2147483648, %v8784_v16  ;;  %v8828_v2 = vpop.f32.mrb[2].mxu1 }
 0x268   : > { %v7692_v53 = vpop.eup %7691  ;;  %v8793_v30 = vpop.xlane.xlu0 %1150  ;;  %v1476_v20 = vmul.f32 %v7690_v37, %v8631_v39 }
 0x269   : > { %v1437_v29 = vpop.xlane.xlu1 %1436  ;;  %v1192_v34 = vmul.f32 %v7692_v53, %v8768_v43  ;;  %7701 = vrsqrt.f32 %v8793_v30  ;;  %v8799_v62 = vadd.f32 %v1491_v60, %v1490_v28  ;;  %v1523_v26 = vmul.f32 0.25, %v1491_v60 }
 0x26a   : > { %7703 = vrsqrt.f32 %v1437_v29  ;;  %v1492_v63 = vmul.f32 %v1476_v20, %v1190_v42  ;;  %vm1214_vm12 = vcmp.eq.f32.partialorder %v8793_v30, inf  ;;  %vm1216_vm13 = vcmp.eq.f32.partialorder %v8793_v30, 0.0 }
 0x26b   : > { %12201 = vst [vmem:[#allocation21_spill] sm:$0xff] %v8799_v62  ;;  %v7694_v1 = vpop.eup %7693  ;;  %v1194_v31 = vsel %vm1193_vm6, %v8768_v43, %v1192_v34  ;;  %1555 = vxpose.xlu0.b32.end [2/2] (short) %v1523_v26, 128 }
 0x26c   : > { %v7696_v5 = vpop.eup %7695  ;;  %v1439_v13 = vpop.xlane.xlu0 %1438  ;;  %v1524_v39 = vmul.f32 0.25, %v1492_v63  ;;  %v1197_v22 = vsel %vm1195_vm7, %v1196_v35, %v1194_v31  ;;  %v1199_v7 = vmul.f32 %v7694_v1, %v8774_v61 }
 0x26d   : > { %v8802_v15 = vpop.xlane.xlu1 %1152  ;;  %7705 = vrsqrt.f32 %v1439_v13  ;;  %v1477_v28 = vmul.f32 %v7696_v5, %v8643_v56 }
 0x26e   : > { %7707 = vrsqrt.f32 %v8802_v15  ;;  %1780 = vxpose.xlu1.b32.start [1/2] (short) %v1524_v39, 128  ;;  %v1201_v40 = vsel %vm1200_vm8, %v8774_v61, %v1199_v7  ;;  %v1217_v61 = vand.u32 2147483648, %v8793_v30  ;;  %vm1221_vm14 = vcmp.eq.f32.partialorder %v8802_v15, inf }
 0x26f   : > { %v7698_v43 = vpop.eup %7697  ;;  %v1493_v24 = vmul.f32 %v1477_v28, %v1197_v22  ;;  %v1204_v26 = vsel %vm1202_vm9, %v1203_v38, %v1201_v40  ;;  %v1224_v22 = vand.u32 2147483648, %v8802_v15  ;;  %vm1223_vm15 = vcmp.eq.f32.partialorder %v8802_v15, 0.0 }
 0x270   : > { %v7700_v33 = vpop.eup %7699  ;;  %v8812_v37 = vpop.xlane.xlu0 %1154  ;;  %v1478_v35 = vmul.f32 %v7698_v43, %v8653_v9 }
 0x271   : > { %v1441_v56 = vpop.xlane.xlu1 %1440  ;;  %v1206_v42 = vmul.f32 %v7700_v33, %v8784_v16  ;;  %v8817_v45 = vadd.f32 %v1493_v24, %v1492_v63  ;;  %7709 = vrsqrt.f32 %v8812_v37  ;;  %v1525_v49 = vmul.f32 0.25, %v1493_v24  ;;  %v772_v9 = vpop.f32.mrb[3].mxu1 }
 0x272   : > { %7711 = vrsqrt.f32 %v1441_v56  ;;  %v8832_v5 = vmul.f32 %v1478_v35, %v1204_v26  ;;  %v6525_v39 = vpop.f32.mrb[4].mxu1  ;;  %vm1228_vm0 = vcmp.eq.f32.partialorder %v8812_v37, inf  ;;  %vm1230_vm1 = vcmp.eq.f32.partialorder %v8812_v37, 0.0 }
 0x273   : > { %12202 = vst [vmem:[#allocation22_spill] sm:$0xff] %v8817_v45  ;;  %v7702_v53 = vpop.eup %7701  ;;  %1781 = vxpose.xlu1.b32.end [2/2] (short) %v1525_v49, 128  ;;  %v1208_v60 = vsel %vm1207_vm10, %v8784_v16, %v1206_v42  ;;  %v8842_v28 = vadd.f32 %v6525_v39, %v8772_v54  ;;  %v782_v43 = vpop.f32.mrb[5].mxu1 }
 0x274   : > { %v7704_v29 = vpop.eup %7703  ;;  %v1443_v20 = vpop.xlane.xlu0 %1442  ;;  %v1211_v1 = vsel %vm1209_vm11, %v1210_v36, %v1208_v60  ;;  %v1213_v31 = vmul.f32 %v7702_v53, %v8793_v30  ;;  %v8853_v56 = vadd.f32 %v782_v43, %v8772_v54 }
 0x275   : > { %v8822_v34 = vpop.xlane.xlu1 %1156  ;;  %7713 = vrsqrt.f32 %v1443_v20  ;;  %v1479_v63 = vmul.f32 %v7704_v29, %v8665_v25  ;;  %12203 = vst [vmem:[#allocation23_spill] sm:$0xff] %v8842_v28  ;;  %v6528_v36 = vpop.f32.mrb[6].mxu1 }
 0x276   : > { %7715 = vrsqrt.f32 %v8822_v34  ;;  %v1215_v33 = vsel %vm1214_vm12, %v8793_v30, %v1213_v31  ;;  %12205 = vst [vmem:[#allocation25_spill] sm:$0xff] %v8853_v56  ;;  %v8856_v40 = vadd.f32 %v6528_v36, %v8772_v54  ;;  %v792_v42 = vpop.f32.mrb[7].mxu1  ;;  %vm1235_vm2 = vcmp.eq.f32.partialorder %v8822_v34, inf }
 0x277   : > { %v7706_v16 = vpop.eup %7705  ;;  %v8834_v13 = vmul.f32 %v1479_v63, %v1211_v1  ;;  %v8863_v60 = vadd.f32 %v792_v42, %v8772_v54  ;;  %v6531_v29 = vpop.f32.mrb[8].mxu1  ;;  %v1218_v63 = vsel %vm1216_vm13, %v1217_v61, %v1215_v33  ;;  %vm1237_vm3 = vcmp.eq.f32.partialorder %v8822_v34, 0.0 }
 0x278   : > { %v7708_v25 = vpop.eup %7707  ;;  %12206 = vst [vmem:[#allocation26_spill] sm:$0xff] %v8856_v40  ;;  %v1480_v53 = vmul.f32 %v7706_v16, %v8675_v48  ;;  %v8873_v48 = vadd.f32 %v6531_v29, %v8772_v54  ;;  %v802_v16 = vpop.f32.mrb[9].mxu1 }
 0x279   : > { %v1445_v7 = vpop.xlane.xlu1 %1444  ;;  %v1220_v24 = vmul.f32 %v7708_v25, %v8802_v15  ;;  %v8847_v38 = vadd.f32 %v8834_v13, %v8832_v5  ;;  %12207 = vst [vmem:[#allocation27_spill] sm:$0xff] %v8863_v60  ;;  %v6534_v25 = vpop.f32.mrb[10].mxu1  ;;  %v8881_v30 = vadd.f32 %v802_v16, %v8772_v54 }
 0x27a   : > { %7717 = vrsqrt.f32 %v1445_v7  ;;  %12208 = vst [vmem:[#allocation28_spill] sm:$0xff] %v8873_v48  ;;  %v1231_v7 = vand.u32 2147483648, %v8812_v37 }
 0x27b   : > { %12204 = vst [vmem:[#allocation24_spill] sm:$0xff] %v8847_v38  ;;  %v7710_v49 = vpop.eup %7709  ;;  %v1222_v35 = vsel %vm1221_vm14, %v8802_v15, %v1220_v24  ;;  %12209 = vst [vmem:[#allocation29_spill] sm:$0xff] %v8881_v30  ;;  %v812_v15 = vpop.f32.mrb[11].mxu1  ;;  %v8889_v24 = vadd.f32 %v6534_v25, %v8772_v54 }
 0x27c   : > { %v7712_v20 = vpop.eup %7711  ;;  %v1227_v26 = vmul.f32 %v7710_v49, %v8812_v37  ;;  %v1225_v31 = vsel %vm1223_vm15, %v1224_v22, %v1222_v35  ;;  %v8883_v22 = vmul.f32 %v1480_v53, %v1218_v63  ;;  %v6537_v33 = vpop.f32.mrb[12].mxu1  ;;  %v8900_v35 = vadd.f32 %v812_v15, %v8772_v54 }
 0x27d   : > { %v8866_v1 = vpop.xlane.xlu1 %1158  ;;  %v1481_v39 = vmul.f32 %v7712_v20, %v8687_v3  ;;  %v1238_v3 = vand.u32 2147483648, %v8822_v34  ;;  %12210 = vst [vmem:[#allocation30_spill] sm:$0xff] %v8889_v24  ;;  %v8903_v29 = vadd.f32 %v6537_v33, %v8772_v54  ;;  %v822_v16 = vpop.f32.mrb[13].mxu1 }
 0x27e   : > { %7719 = vrsqrt.f32 %v8866_v1  ;;  %v1229_v53 = vsel %vm1228_vm0, %v8812_v37, %v1227_v26  ;;  %12211 = vst [vmem:[#allocation31_spill] sm:$0xff] %v8900_v35  ;;  %v6540_v25 = vpop.f32.mrb[14].mxu1  ;;  %vm1242_vm4 = vcmp.eq.f32.partialorder %v8866_v1, inf  ;;  %vm1244_vm6 = vcmp.eq.f32.partialorder %v8866_v1, 0.0 }
 0x27f   : > { %v7714_v61 = vpop.eup %7713  ;;  %v8885_v43 = vmul.f32 %v1481_v39, %v1225_v31  ;;  %12212 = vst [vmem:[#allocation32_spill] sm:$0xff] %v8903_v29  ;;  %v8912_v31 = vadd.f32 %v772_v9, %v8772_v54  ;;  %v8918_v39 = vadd.f32 %v8828_v2, %v8772_v54  ;;  %v1232_v33 = vsel %vm1230_vm1, %v1231_v7, %v1229_v53  ;;  %v832_v12 = vpop.f32.mrb[15].mxu1 }
 0x280   : > { %v7716_v36 = vpop.eup %7715  ;;  %v8892_v42 = vpop.xlane.xlu0 %1162  ;;  %v1482_v26 = vmul.f32 %v7714_v61, %v8697_v19  ;;  %v8926_v9 = vadd.f32 %v822_v16, %v8772_v54  ;;  %v8930_v2 = vadd.f32 %v6540_v25, %v8772_v54  ;;  %v8933_v38 = vadd.f32 %v832_v12, %v8772_v54 }
 0x281   : > { %v8894_v49 = vpop.xlane.xlu1 %1160  ;;  %v1234_v20 = vmul.f32 %v7716_v36, %v8822_v34  ;;  %v8908_v63 = vadd.f32 %v8885_v43, %v8883_v22  ;;  %12214 = vst [vmem:[#allocation34_spill] sm:$0xff] %v8912_v31  ;;  %12215 = vst [vmem:[#allocation35_spill] sm:$0xff] %v8918_v39  ;;  %v1540_v37 = vmul.f32 0.25, %v8912_v31  ;;  %v1541_v53 = vmul.f32 0.25, %v8918_v39 }
 0x282   : > { %7721 = vrsqrt.f32 %v8894_v49  ;;  %12216 = vst [vmem:[#allocation36_spill] sm:$0xff] %v8926_v9  ;;  %12217 = vst [vmem:[#allocation37_spill] sm:$0xff] %v8930_v2  ;;  %v8936_v7 = vmul.f32 %v1482_v26, %v1232_v33  ;;  %vm1249_vm5 = vcmp.eq.f32.partialorder %v8894_v49, inf  ;;  %vm1251_vm7 = vcmp.eq.f32.partialorder %v8894_v49, 0.0 }
 0x283   : > { %12213 = vst [vmem:[#allocation33_spill] sm:$0xff] %v8908_v63  ;;  %v1236_v36 = vsel %vm1235_vm2, %v8822_v34, %v1234_v20  ;;  %12218 = vst [vmem:[#allocation38_spill] sm:$0xff] %v8933_v38  ;;  %v8948_v54 = vpack.c.bf16 %v1541_v53, %v1540_v37  ;;  %vm1256_vm8 = vcmp.eq.f32.partialorder %v8892_v42, inf  ;;  %vm1258_vm9 = vcmp.eq.f32.partialorder %v8892_v42, 0.0 }
 0x284   : > { %v7718_v15 = vpop.eup %7717  ;;  %v1451_v0 = vpop.xlane.xlu0 %1450  ;;  %v1239_v19 = vsel %vm1237_vm3, %v1238_v3, %v1236_v36  ;;  %vm1586_vm0 = vcmask 130048  }
 0x285   : > { %v1447_v63 = vpop.xlane.xlu1 %1446  ;;  %v1483_v61 = vmul.f32 %v7718_v15, %v8708_v46  ;;  %7226 = vmatprep.subr.bf16.mxu0 %v8948_v54  ;;  %7573 = vmatprep.subr.bf16.mxu1 %v8948_v54 }
 0x286   : > { %7723 = vrsqrt.f32 %v1447_v63  ;;  %7228 = vmatpush3.bf16.msra.mxu0 %v8948_v54 }
 0x287   : > { %v8938_v34 = vmul.f32 %v1483_v61, %v1239_v19  ;;  %7725 = vrsqrt.f32 %v8892_v42  ;;  %v1245_v19 = vand.u32 2147483648, %v8866_v1  ;;  %v1252_v61 = vand.u32 2147483648, %v8894_v49 }
 0x288   : > { %v8942_v3 = vpop.xlane.xlu0 %1166  ;;  %v7720_v12 = vpop.eup %7719 }
 0x289   : > { %v1449_v46 = vpop.xlane.xlu1 %1448  ;;  %v8946_v20 = vadd.f32 %v8938_v34, %v8936_v7  ;;  %v1241_v25 = vmul.f32 %v7720_v12, %v8866_v1  ;;  %vm1270_vm12 = vcmp.eq.f32.partialorder %v8942_v3, inf  ;;  %vm1272_vm13 = vcmp.eq.f32.partialorder %v8942_v3, 0.0 }
 0x28a   : > { %7727 = vrsqrt.f32 %v1449_v46 }
 0x28b   : > { %12219 = vst [vmem:[#allocation39_spill] sm:$0xff] %v8946_v20  ;;  %7729 = vrsqrt.f32 %v1451_v0  ;;  %v1243_v37 = vsel %vm1242_vm4, %v8866_v1, %v1241_v25 }
 0x28c   : > { %v7722_v63 = vpop.eup %7721  ;;  %v1455_v16 = vpop.xlane.xlu0 %1454  ;;  %7731 = vrsqrt.f32 %v8942_v3  ;;  %v1246_v31 = vsel %vm1244_vm6, %v1245_v19, %v1243_v37 }
 0x28d   : > { %v1165_v26 = vpop.xlane.xlu1 %1164  ;;  %v1248_v15 = vmul.f32 %v7722_v63, %v8894_v49 }
 0x28e   : > { %7733 = vrsqrt.f32 %v1165_v26  ;;  %vm1263_vm10 = vcmp.eq.f32.partialorder %v1165_v26, inf  ;;  %vm1265_vm11 = vcmp.eq.f32.partialorder %v1165_v26, 0.0 }
 0x28f   : > { %v1250_v53 = vsel %vm1249_vm5, %v8894_v49, %v1248_v15 }
 0x290   : > { %v7724_v33 = vpop.eup %7723  ;;  %v1457_v0 = vpop.xlane.xlu0 %1456  ;;  %v1253_v20 = vsel %vm1251_vm7, %v1252_v61, %v1250_v53 }
 0x291   : > { %v1453_v36 = vpop.xlane.xlu1 %1452  ;;  %v7726_v46 = vpop.eup %7725  ;;  %v1484_v12 = vmul.f32 %v7724_v33, %v8725_v17  ;;  %v1259_v17 = vand.u32 2147483648, %v8892_v42 }
 0x292   : > { %7735 = vrsqrt.f32 %v1453_v36  ;;  %v1255_v45 = vmul.f32 %v7726_v46, %v8892_v42 }
 0x293   : > { %7737 = vrsqrt.f32 %v1455_v16  ;;  %v1500_v49 = vmul.f32 %v1484_v12, %v1246_v31  ;;  %v1266_v16 = vand.u32 2147483648, %v1165_v26 }
 0x294   : > { %v7728_v63 = vpop.eup %7727  ;;  %7739 = vrsqrt.f32 %v1457_v0  ;;  %v1257_v61 = vsel %vm1256_vm8, %v8892_v42, %v1255_v45 }
 0x295   : > { %v1169_v39 = vpop.xlane.xlu1 %1168  ;;  %v1485_v25 = vmul.f32 %v7728_v63, %v8736_v52  ;;  %v7730_v1 = vpop.eup %7729  ;;  %v1273_v63 = vand.u32 2147483648, %v8942_v3 }
 0x296   : > { %7741 = vrsqrt.f32 %v1169_v39  ;;  %v7732_v15 = vpop.eup %7731  ;;  %v1486_v0 = vmul.f32 %v7730_v1, %v8739_v55  ;;  %vm1277_vm14 = vcmp.eq.f32.partialorder %v1169_v39, inf  ;;  %vm1279_vm15 = vcmp.eq.f32.partialorder %v1169_v39, 0.0 }
 0x297   : > { %v1501_v62 = vmul.f32 %v1485_v25, %v1253_v20  ;;  %v1269_v52 = vmul.f32 %v7732_v15, %v8942_v3  ;;  %v1260_v20 = vsel %vm1258_vm9, %v1259_v17, %v1257_v61 }
 0x298   : > { %v7734_v36 = vpop.eup %7733  ;;  %v8980_v42 = vmul.f32 %v1486_v0, %v1260_v20 }
 0x299   : > { %v1262_v33 = vmul.f32 %v7734_v36, %v1165_v26  ;;  %v8970_v19 = vadd.f32 %v1501_v62, %v1500_v49  ;;  %v1271_v36 = vsel %vm1270_vm12, %v8942_v3, %v1269_v52  ;;  %v1526_v3 = vmul.f32 0.25, %v8832_v5 }
 0x29a   : > { %v1274_v17 = vsel %vm1272_vm13, %v1273_v63, %v1271_v36  ;;  %v1544_v5 = vmul.f32 0.25, %v8863_v60 }
 0x29b   : > { %v1264_v37 = vsel %vm1263_vm10, %v1165_v26, %v1262_v33  ;;  %v1280_v26 = vand.u32 2147483648, %v1169_v39 }
 0x29c   : > { %v7736_v31 = vpop.eup %7735  ;;  %v1267_v53 = vsel %vm1265_vm11, %v1266_v16, %v1264_v37  ;;  %v1527_v37 = vmul.f32 0.25, %v8834_v13  ;;  %v1530_v13 = vmul.f32 0.25, %v8936_v7  ;;  %v1549_v7 = vmul.f32 0.25, %v8889_v24 }
 0x29d   : > { %v7738_v46 = vpop.eup %7737  ;;  %v1487_v12 = vmul.f32 %v7736_v31, %v8757_v14  ;;  %v1528_v31 = vmul.f32 0.25, %v8883_v22  ;;  %v1543_v22 = vmul.f32 0.25, %v8842_v28 }
 0x29e   : > { %v7740_v25 = vpop.eup %7739  ;;  %v1488_v15 = vmul.f32 %v7738_v46, %v8754_v44  ;;  %v1533_v46 = vmul.f32 0.25, %v1501_v62  ;;  %v1548_v62 = vmul.f32 0.25, %v8900_v35  ;;  %v12228_v35 = vld [vmem:[#allocation24_spill] sm:$0xff] }
 0x29f   : > { %v8982_v55 = vmul.f32 %v1487_v12, %v1267_v53  ;;  %v1489_v33 = vmul.f32 %v7740_v25, %v8761_v18  ;;  %v1529_v18 = vmul.f32 0.25, %v8885_v43  ;;  %v1532_v53 = vmul.f32 0.25, %v1500_v49 }
 0x2a0   : > { %v7742_v45 = vpop.eup %7741  ;;  %v8991_v52 = vmul.f32 %v1488_v15, %v1274_v17  ;;  %v1542_v12 = vmul.f32 0.25, %v8853_v56  ;;  %v1531_v43 = vmul.f32 0.25, %v8938_v34  ;;  %v9018_v34 = vpack.c.bf16 %v1549_v7, %v1548_v62  ;;  %v12230_v56 = vld [vmem:[#allocation33_spill] sm:$0xff] }
 0x2a1   : > { %v1276_v1 = vmul.f32 %v7742_v45, %v1169_v39  ;;  %v8987_v14 = vadd.f32 %v8982_v55, %v8980_v42 }
 0x2a2   : > { %v9009_v25 = vpack.c.bf16 %v1543_v22, %v1542_v12 }
 0x2a3   : > { %v1278_v16 = vsel %vm1277_vm14, %v1169_v39, %v1276_v1  ;;  %v1545_v39 = vmul.f32 0.25, %v8856_v40 }
 0x2a4   : > { %v1281_v61 = vsel %vm1279_vm15, %v1280_v26, %v1278_v16  ;;  %2005 = vxpose.xlu0.b32.start [1/2] (short) %v1526_v3, 128 }
 0x2a5   : > { %v8993_v0 = vmul.f32 %v1489_v33, %v1281_v61  ;;  %v7233_v20 = vpack.c.bf16 %v1545_v39, %v1544_v5 }
 0x2a7   : > { %v8997_v44 = vadd.f32 %v8993_v0, %v8991_v52  ;;  %7234 = vmatprep.subr.bf16.mxu0 %v7233_v20 }
 0x2a8   : > { %2006 = vxpose.xlu0.b32.end [2/2] (short) %v1527_v37, 128 }
 0x2ac   : > { %2230 = vxpose.xlu1.b32.start [1/2] (short) %v1528_v31, 128 }
 0x2b0   : > { %2231 = vxpose.xlu1.b32.end [2/2] (short) %v1529_v18, 128 }
 0x2e1   : > { %2680 = vxpose.xlu0.b32.start [1/2] (short) %v1532_v53, 128 }
 0x2e5   : > { %2681 = vxpose.xlu0.b32.end [2/2] (short) %v1533_v46, 128 }
 0x2e7   : > { %v1570_v63 = vpop.trf.xlu0 }
 0x2e8   : > { %6545 = vmatprep.mubr.msk.f32.mxu1 %vm1586_vm0, %v1570_v63 }
 0x2e9   : > { %2455 = vxpose.xlu1.b32.start [1/2] (short) %v1530_v13, 128 }
 0x2eb   : > { %v1571_v36 = vpop.trf.xlu0 }
 0x2ec   : > { %6546 = vmatmul.mubr.msk.f32.vlgmr.msra.gmra.mrb[16].mxu1 %vm1586_vm0, %v1571_v36  ;;  %v1534_v36 = vmul.f32 0.25, %v8980_v42 }
 0x2ed   : > { %2456 = vxpose.xlu1.b32.end [2/2] (short) %v1531_v43, 128  ;;  %7574 = vmatpush3.bf16.msra.mxu1 %v8948_v54 }
 0x2ee   : > { %7230 = vmatprep.subr.bf16.mxu1 %v9009_v25 }
 0x2ef   : > { %v1796_v49 = vpop.trf.xlu1  ;;  %v1572_v45 = vpop.trf.xlu0 }
 0x2f0   : > { %6573 = vmatprep.mubr.msk.f32.mxu0 %vm1586_vm0, %v1796_v49  ;;  %6548 = vmatprep.mubr.msk.f32.mxu1 %vm1586_vm0, %v1572_v45  ;;  %v1535_v49 = vmul.f32 0.25, %v8982_v55  ;;  %v1537_v55 = vmul.f32 0.25, %v8993_v0 }
 0x2f3   : > { %v1797_v26 = vpop.trf.xlu1  ;;  %v1573_v1 = vpop.trf.xlu0 }
 0x2f4   : > { %6574 = vmatmul.mubr.msk.f32.vlgmr.msra.gmra.mrb[32].mxu0 %vm1586_vm0, %v1797_v26  ;;  %6549 = vmatmul.mubr.msk.f32.gmra.mrb[18].mxu1 %vm1586_vm0, %v1573_v1  ;;  %v1546_v26 = vmul.f32 0.25, %v8881_v30  ;;  %v1547_v1 = vmul.f32 0.25, %v8873_v48 }
 0x2f5   : > { %7236 = vmatpush3.bf16.msra.mxu0 %v7233_v20 }
 0x2f6   : > { %7242 = vmatprep.subr.bf16.mxu0 %v9018_v34 }
 0x2f7   : > { %v1798_v54 = vpop.trf.xlu1  ;;  %v1574_v15 = vpop.trf.xlu0 }
 0x2f8   : > { %6576 = vmatprep.mubr.msk.f32.mxu0 %vm1586_vm0, %v1798_v54  ;;  %6551 = vmatprep.mubr.msk.f32.mxu1 %vm1586_vm0, %v1574_v15  ;;  %v1536_v15 = vmul.f32 0.25, %v8991_v52 }
 0x2fb   : > { %v1799_v17 = vpop.trf.xlu1  ;;  %v1575_v16 = vpop.trf.xlu0 }
 0x2fc   : > { %6577 = vmatmul.mubr.msk.f32.gmra.mrb[34].mxu0 %vm1586_vm0, %v1799_v17  ;;  %6552 = vmatmul.mubr.msk.f32.gmra.mrb[20].mxu1 %vm1586_vm0, %v1575_v16  ;;  %v7237_v17 = vpack.c.bf16 %v1547_v1, %v1546_v26 }
 0x2ff   : > { %v1800_v33 = vpop.trf.xlu1  ;;  %v1576_v3 = vpop.trf.xlu0 }
 0x300   : > { %6579 = vmatprep.mubr.msk.f32.mxu0 %vm1586_vm0, %v1800_v33  ;;  %6554 = vmatprep.mubr.msk.f32.mxu1 %vm1586_vm0, %v1576_v3 }
 0x303   : > { %v1801_v61 = vpop.trf.xlu1  ;;  %v1577_v37 = vpop.trf.xlu0 }
 0x304   : > { %6580 = vmatmul.mubr.msk.f32.gmra.mrb[36].mxu0 %vm1586_vm0, %v1801_v61  ;;  %6555 = vmatmul.mubr.msk.f32.gmra.mrb[22].mxu1 %vm1586_vm0, %v1577_v37  ;;  %v1550_v37 = vmul.f32 0.25, %v8926_v9 }
 0x307   : > { %v1802_v31 = vpop.trf.xlu1  ;;  %v1578_v18 = vpop.trf.xlu0 }
 0x308   : > { %6582 = vmatprep.mubr.msk.f32.mxu0 %vm1586_vm0, %v1802_v31  ;;  %6557 = vmatprep.mubr.msk.f32.mxu1 %vm1586_vm0, %v1578_v18 }
 0x30b   : > { %v1803_v5 = vpop.trf.xlu1  ;;  %v1579_v39 = vpop.trf.xlu0 }
 0x30c   : > { %6583 = vmatmul.mubr.msk.f32.gmra.mrb[38].mxu0 %vm1586_vm0, %v1803_v5  ;;  %6558 = vmatmul.mubr.msk.f32.gmra.mrb[24].mxu1 %vm1586_vm0, %v1579_v39 }
 0x30f   : > { %v1804_v20 = vpop.trf.xlu1  ;;  %v1580_v53 = vpop.trf.xlu0 }
 0x310   : > { %6560 = vmatprep.mubr.msk.f32.mxu1 %vm1586_vm0, %v1580_v53 }
 0x313   : > { %v1805_v46 = vpop.trf.xlu1  ;;  %v1581_v13 = vpop.trf.xlu0 }
 0x314   : > { %6561 = vmatmul.mubr.msk.f32.gmra.mrb[26].mxu1 %vm1586_vm0, %v1581_v13 }
 0x317   : > { %v1806_v12 = vpop.trf.xlu1  ;;  %v1582_v22 = vpop.trf.xlu0 }
 0x318   : > { %6563 = vmatprep.mubr.msk.f32.mxu1 %vm1586_vm0, %v1582_v22 }
 0x31b   : > { %v1807_v63 = vpop.trf.xlu1  ;;  %v1583_v43 = vpop.trf.xlu0 }
 0x31c   : > { %6564 = vmatmul.mubr.msk.f32.gmra.mrb[28].mxu1 %vm1586_vm0, %v1583_v43  ;;  %v1552_v43 = vmul.f32 0.25, %v8933_v38 }
 0x31f   : > { %v1808_v62 = vpop.trf.xlu1  ;;  %v1584_v7 = vpop.trf.xlu0  ;;  %2905 = vxpose.xlu0.b32.start [1/2] (short) %v1534_v36, 128  ;;  %v1553_v36 = vmul.f32 0.25, %v8930_v2 }
 0x320   : > { %6566 = vmatprep.mubr.msk.f32.mxu1 %vm1586_vm0, %v1584_v7 }
 0x321   : > { %v7249_v7 = vpack.c.bf16 %v1553_v36, %v1552_v43 }
 0x323   : > { %v1809_v45 = vpop.trf.xlu1  ;;  %v1585_v54 = vpop.trf.xlu0  ;;  %2906 = vxpose.xlu0.b32.end [2/2] (short) %v1535_v49, 128 }
 0x324   : > { %6567 = vmatmul.mubr.msk.f32.gmra.mrb[30].mxu1 %vm1586_vm0, %v1585_v54 }
 0x325   : > { %6585 = vmatprep.mubr.msk.f32.mxu1 %vm1586_vm0, %v1804_v20 }
 0x327   : > { %v1810_v42 = vpop.trf.xlu1  ;;  %3130 = vxpose.xlu1.b32.start [1/2] (short) %v1536_v15, 128  ;;  %v2021_v16 = vpop.trf.xlu0 }
 0x328   : > { %6586 = vmatmul.mubr.msk.f32.vlgmr.msra.gmra.mrb[32].mxu1 %vm1586_vm0, %v1805_v46 }
 0x329   : > { %6588 = vmatprep.mubr.msk.f32.mxu1 %vm1586_vm0, %v1806_v12  ;;  %7232 = vmatpush3.bf16.msra.mxu1 %v9009_v25  ;;  %v1551_v25 = vmul.f32 0.25, %v8903_v29 }
 0x32a   : > { %7238 = vmatprep.subr.bf16.mxu1 %v7237_v17 }
 0x32b   : > { %3131 = vxpose.xlu1.b32.end [2/2] (short) %v1537_v55, 128  ;;  %v1811_v33 = vpop.trf.xlu1  ;;  %v2022_v3 = vpop.trf.xlu0  ;;  %v9062_v5 = vpack.c.bf16 %v1551_v25, %v1550_v37 }
 0x32c   : > { %6589 = vmatmul.mubr.msk.f32.gmra.mrb[34].mxu1 %vm1586_vm0, %v1807_v63 }
 0x32d   : > { %6591 = vmatprep.mubr.msk.f32.mxu1 %vm1586_vm0, %v1808_v62 }
 0x32f   : > { %v2246_v52 = vpop.trf.xlu1  ;;  %v2023_v61 = vpop.trf.xlu0 }
 0x330   : > { %6629 = vmatprep.mubr.msk.f32.mxu0 %vm1586_vm0, %v2246_v52  ;;  %6592 = vmatmul.mubr.msk.f32.gmra.mrb[36].mxu1 %vm1586_vm0, %v1809_v45 }
 0x331   : > { %6594 = vmatprep.mubr.msk.f32.mxu1 %vm1586_vm0, %v1810_v42 }
 0x333   : > { %v2247_v0 = vpop.trf.xlu1  ;;  %v2024_v31 = vpop.trf.xlu0 }
 0x334   : > { %6630 = vmatmul.mubr.msk.f32.vlgmr.msra.gmra.mrb[40].mxu0 %vm1586_vm0, %v2247_v0  ;;  %6595 = vmatmul.mubr.msk.f32.gmra.mrb[38].mxu1 %vm1586_vm0, %v1811_v33 }
 0x335   : > { %7244 = vmatpush3.bf16.msra.mxu0 %v9018_v34  ;;  %6601 = vmatprep.mubr.msk.f32.mxu1 %vm1586_vm0, %v2021_v16 }
 0x336   : > { %7250 = vmatprep.subr.bf16.mxu0 %v7249_v7 }
 0x337   : > { %v2248_v18 = vpop.trf.xlu1  ;;  %v2025_v39 = vpop.trf.xlu0 }
 0x338   : > { %6632 = vmatprep.mubr.msk.f32.mxu0 %vm1586_vm0, %v2248_v18  ;;  %6602 = vmatmul.mubr.msk.f32.vlgmr.msra.gmra.mrb[40].mxu1 %vm1586_vm0, %v2022_v3 }
 0x339   : > { %6604 = vmatprep.mubr.msk.f32.mxu1 %vm1586_vm0, %v2023_v61  ;;  %7240 = vmatpush3.bf16.msra.mxu1 %v7237_v17 }
 0x33a   : > { %7246 = vmatprep.subr.bf16.mxu1 %v9062_v5 }
 0x33b   : > { %v2249_v20 = vpop.trf.xlu1  ;;  %v2026_v53 = vpop.trf.xlu0 }
 0x33c   : > { %6633 = vmatmul.mubr.msk.f32.gmra.mrb[42].mxu0 %vm1586_vm0, %v2249_v20  ;;  %6605 = vmatmul.mubr.msk.f32.gmra.mrb[42].mxu1 %vm1586_vm0, %v2024_v31 }
 0x33d   : > { %6607 = vmatprep.mubr.msk.f32.mxu1 %vm1586_vm0, %v2025_v39 }
 0x33f   : > { %v2250_v34 = vpop.trf.xlu1  ;;  %v2027_v46 = vpop.trf.xlu0 }
 0x340   : > { %6635 = vmatprep.mubr.msk.f32.mxu0 %vm1586_vm0, %v2250_v34  ;;  %6608 = vmatmul.mubr.msk.f32.gmra.mrb[44].mxu1 %vm1586_vm0, %v2026_v53 }
 0x341   : > { %6610 = vmatprep.mubr.msk.f32.mxu1 %vm1586_vm0, %v2027_v46 }
 0x343   : > { %v2251_v13 = vpop.trf.xlu1  ;;  %v2028_v12 = vpop.trf.xlu0 }
 0x344   : > { %6636 = vmatmul.mubr.msk.f32.gmra.mrb[44].mxu0 %vm1586_vm0, %v2251_v13  ;;  %6611 = vmatmul.mubr.msk.f32.gmra.mrb[46].mxu1 %vm1586_vm0, %v2028_v12 }
 0x347   : > { %v2252_v22 = vpop.trf.xlu1  ;;  %v2029_v63 = vpop.trf.xlu0 }
 0x348   : > { %6638 = vmatprep.mubr.msk.f32.mxu0 %vm1586_vm0, %v2252_v22  ;;  %6613 = vmatprep.mubr.msk.f32.mxu1 %vm1586_vm0, %v2029_v63 }
 0x34b   : > { %v2253_v62 = vpop.trf.xlu1  ;;  %v2030_v49 = vpop.trf.xlu0 }
 0x34c   : > { %6639 = vmatmul.mubr.msk.f32.gmra.mrb[46].mxu0 %vm1586_vm0, %v2253_v62  ;;  %6614 = vmatmul.mubr.msk.f32.gmra.mrb[48].mxu1 %vm1586_vm0, %v2030_v49  ;;  %v963_v62 = vmul.f32 %v8604_v58, %v8604_v58 }
 0x34f   : > { %v2254_v45 = vpop.trf.xlu1  ;;  %v2031_v26 = vpop.trf.xlu0 }
 0x350   : > { %6641 = vmatprep.mubr.msk.f32.mxu0 %vm1586_vm0, %v2254_v45  ;;  %6616 = vmatprep.mubr.msk.f32.mxu1 %vm1586_vm0, %v2031_v26  ;;  %v967_v45 = vmul.f32 %v8646_v57, %v8646_v57 }
 0x353   : > { %v2255_v1 = vpop.trf.xlu1  ;;  %v2032_v54 = vpop.trf.xlu0 }
 0x354   : > { %6642 = vmatmul.mubr.msk.f32.gmra.mrb[48].mxu0 %vm1586_vm0, %v2255_v1  ;;  %6617 = vmatmul.mubr.msk.f32.gmra.mrb[50].mxu1 %vm1586_vm0, %v2032_v54  ;;  %v9125_v54 = vmul.f32 %v963_v62, %v8604_v58 }
 0x357   : > { %v2256_v15 = vpop.trf.xlu1  ;;  %v2033_v42 = vpop.trf.xlu0 }
 0x358   : > { %6644 = vmatprep.mubr.msk.f32.mxu0 %vm1586_vm0, %v2256_v15  ;;  %6619 = vmatprep.mubr.msk.f32.mxu1 %vm1586_vm0, %v2033_v42 }
 0x35b   : > { %v2257_v17 = vpop.trf.xlu1  ;;  %v2034_v16 = vpop.trf.xlu0 }
 0x35c   : > { %6645 = vmatmul.mubr.msk.f32.gmra.mrb[50].mxu0 %vm1586_vm0, %v2257_v17  ;;  %6620 = vmatmul.mubr.msk.f32.gmra.mrb[52].mxu1 %vm1586_vm0, %v2034_v16  ;;  %v1315_v17 = vmul.f32 %v9125_v54, %v9125_v54  ;;  %v966_v16 = vmul.f32 %v8635_v41, %v8635_v41 }
 0x35f   : > { %v2258_v55 = vpop.trf.xlu1  ;;  %v2035_v33 = vpop.trf.xlu0 }
 0x360   : > { %6647 = vmatprep.mubr.msk.f32.mxu0 %vm1586_vm0, %v2258_v55  ;;  %6622 = vmatprep.mubr.msk.f32.mxu1 %vm1586_vm0, %v2035_v33 }
 0x363   : > { %v2259_v3 = vpop.trf.xlu1  ;;  %v2036_v52 = vpop.trf.xlu0 }
 0x364   : > { %6648 = vmatmul.mubr.msk.f32.gmra.mrb[52].mxu0 %vm1586_vm0, %v2259_v3  ;;  %6623 = vmatmul.mubr.msk.f32.gmra.mrb[54].mxu1 %vm1586_vm0, %v2036_v52  ;;  %v9143_v3 = vmul.f32 %v966_v16, %v8635_v41 }
 0x367   : > { %v2260_v61 = vpop.trf.xlu1  ;;  %v2696_v0 = vpop.trf.xlu0 }
 0x368   : > { %6650 = vmatprep.mubr.msk.f32.mxu0 %vm1586_vm0, %v2260_v61 }
 0x36b   : > { %v2261_v37 = vpop.trf.xlu1  ;;  %v2697_v25 = vpop.trf.xlu0 }
 0x36c   : > { %6651 = vmatmul.mubr.msk.f32.gmra.mrb[54].mxu0 %vm1586_vm0, %v2261_v37  ;;  %v1318_v37 = vmul.f32 %v9143_v3, %v9143_v3 }
 0x36d   : > { %6685 = vmatprep.mubr.msk.f32.mxu0 %vm1586_vm0, %v2696_v0 }
 0x36f   : > { %v2471_v31 = vpop.trf.xlu1  ;;  %v2698_v18 = vpop.trf.xlu0 }
 0x370   : > { %6686 = vmatmul.mubr.msk.f32.vlgmr.msra.gmra.mrb[56].mxu0 %vm1586_vm0, %v2697_v25  ;;  %6657 = vmatprep.mubr.msk.f32.mxu1 %vm1586_vm0, %v2471_v31  ;;  %v970_v25 = vmul.f32 %v8679_v50, %v8679_v50 }
 0x371   : > { %6688 = vmatprep.mubr.msk.f32.mxu0 %vm1586_vm0, %v2698_v18  ;;  %7252 = vmatpush3.bf16.msra.mxu0 %v7249_v7 }
 0x373   : > { %v2472_v39 = vpop.trf.xlu1  ;;  %v2699_v20 = vpop.trf.xlu0 }
 0x374   : > { %6658 = vmatmul.mubr.msk.f32.vlgmr.msra.gmra.mrb[56].mxu1 %vm1586_vm0, %v2472_v39  ;;  %6689 = vmatmul.mubr.msk.f32.gmra.mrb[58].mxu0 %vm1586_vm0, %v2699_v20  ;;  %v9161_v39 = vmul.f32 %v970_v25, %v8679_v50 }
 0x375   : > { %7248 = vmatpush3.bf16.msra.mxu1 %v9062_v5  ;;  %v962_v5 = vmul.f32 %v8597_v47, %v8597_v47 }
 0x377   : > { %v2473_v53 = vpop.trf.xlu1  ;;  %v2700_v34 = vpop.trf.xlu0  ;;  %v9116_v7 = vmul.f32 %v962_v5, %v8597_v47  ;;  %v9128_v47 = vmul.f32 %v967_v45, %v8646_v57  ;;  %v971_v57 = vmul.f32 %v8690_v4, %v8690_v4 }
 0x378   : > { %6660 = vmatprep.mubr.msk.f32.mxu1 %vm1586_vm0, %v2473_v53  ;;  %6691 = vmatprep.mubr.msk.f32.mxu0 %vm1586_vm0, %v2700_v34 }
 0x379   : > { %v1314_v1 = vmul.f32 %v9116_v7, %v9116_v7  ;;  %v1319_v58 = vmul.f32 %v9128_v47, %v9128_v47  ;;  %v9146_v61 = vmul.f32 %v971_v57, %v8690_v4  ;;  %v965_v4 = vmul.f32 %v8624_v21, %v8624_v21 }
 0x37b   : > { %v2474_v46 = vpop.trf.xlu1  ;;  %v2701_v13 = vpop.trf.xlu0  ;;  %v1323_v41 = vmul.f32 %v9146_v61, %v9146_v61  ;;  %v9164_v53 = vmul.f32 %v965_v4, %v8624_v21  ;;  %v975_v21 = vmul.f32 %v8730_v32, %v8730_v32 }
 0x37c   : > { %6661 = vmatmul.mubr.msk.f32.gmra.mrb[58].mxu1 %vm1586_vm0, %v2474_v46  ;;  %6692 = vmatmul.mubr.msk.f32.gmra.mrb[60].mxu0 %vm1586_vm0, %v2701_v13  ;;  %v1322_v46 = vmul.f32 %v9161_v39, %v9161_v39  ;;  %v964_v13 = vmul.f32 %v8613_v8, %v8613_v8 }
 0x37d   : > { %v1317_v50 = vmul.f32 %v9164_v53, %v9164_v53 }
 0x37f   : > { %v2475_v12 = vpop.trf.xlu1  ;;  %v2702_v22 = vpop.trf.xlu0 }
 0x380   : > { %6663 = vmatprep.mubr.msk.f32.mxu1 %vm1586_vm0, %v2475_v12  ;;  %6694 = vmatprep.mubr.msk.f32.mxu0 %vm1586_vm0, %v2702_v22 }
 0x383   : > { %v2476_v63 = vpop.trf.xlu1  ;;  %v2703_v43 = vpop.trf.xlu0 }
 0x384   : > { %6664 = vmatmul.mubr.msk.f32.gmra.mrb[60].mxu1 %vm1586_vm0, %v2476_v63  ;;  %6695 = vmatmul.mubr.msk.f32.gmra.mrb[62].mxu0 %vm1586_vm0, %v2703_v43  ;;  %v9179_v63 = vmul.f32 %v964_v13, %v8613_v8  ;;  %v9183_v43 = vmul.f32 %v975_v21, %v8730_v32  ;;  %v969_v32 = vmul.f32 %v8668_v27, %v8668_v27 }
 0x386   : > { %v1327_v8 = vmul.f32 %v9183_v43, %v9183_v43 }
 0x387   : > { %v2477_v36 = vpop.trf.xlu1  ;;  %v2704_v49 = vpop.trf.xlu0 }
 0x388   : > { %6666 = vmatprep.mubr.msk.f32.mxu1 %vm1586_vm0, %v2477_v36  ;;  %6697 = vmatprep.mubr.msk.f32.mxu0 %vm1586_vm0, %v2704_v49  ;;  %v974_v49 = vmul.f32 %v8721_v6, %v8721_v6 }
 0x389   : > { %978 = vadd.xlane.f32.xlu0 %v962_v5 }
 0x38a   : > { %980 = vadd.xlane.f32.xlu1 %v963_v62  ;;  %v1316_v62 = vmul.f32 %v9179_v63, %v9179_v63 }
 0x38b   : > { %v2478_v26 = vpop.trf.xlu1  ;;  %v2705_v15 = vpop.trf.xlu0 }
 0x38c   : > { %6667 = vmatmul.mubr.msk.f32.gmra.mrb[62].mxu1 %vm1586_vm0, %v2478_v26  ;;  %6698 = vmatmul.mubr.msk.f32.gmra.mrb[64].mxu0 %vm1586_vm0, %v2705_v15 }
 0x38d   : > { %1330 = vadd.xlane.f32.xlu0 %v1314_v1  ;;  %v9196_v1 = vmul.f32 %v974_v49, %v8721_v6 }
 0x38e   : > { %988 = vadd.xlane.f32.xlu1 %v967_v45 }
 0x38f   : > { %v2479_v42 = vpop.trf.xlu1  ;;  %v2706_v55 = vpop.trf.xlu0 }
 0x390   : > { %6669 = vmatprep.mubr.msk.f32.mxu1 %vm1586_vm0, %v2479_v42  ;;  %6700 = vmatprep.mubr.msk.f32.mxu0 %vm1586_vm0, %v2706_v55  ;;  %v9200_v42 = vmul.f32 %v969_v32, %v8668_v27  ;;  %v968_v55 = vmul.f32 %v8657_v11, %v8657_v11  ;;  %v973_v27 = vmul.f32 %v8712_v51, %v8712_v51 }
 0x391   : > { %1332 = vadd.xlane.f32.xlu0 %v1315_v17 }
 0x392   : > { %1340 = vadd.xlane.f32.xlu1 %v1319_v58  ;;  %v1321_v6 = vmul.f32 %v9200_v42, %v9200_v42 }
 0x393   : > { %v2480_v33 = vpop.trf.xlu1  ;;  %v2707_v52 = vpop.trf.xlu0 }
 0x394   : > { %6670 = vmatmul.mubr.msk.f32.gmra.mrb[64].mxu1 %vm1586_vm0, %v2480_v33  ;;  %6701 = vmatmul.mubr.msk.f32.gmra.mrb[66].mxu0 %vm1586_vm0, %v2707_v52  ;;  %v9215_v33 = vmul.f32 %v968_v55, %v8657_v11 }
 0x395   : > { %986 = vadd.xlane.f32.xlu0 %v966_v16  ;;  %v1326_v16 = vmul.f32 %v9196_v1, %v9196_v1 }
 0x396   : > { %996 = vadd.xlane.f32.xlu1 %v971_v57  ;;  %12220 = vst [vmem:[#allocation40_spill] sm:$0xff] %v9215_v33 }
 0x397   : > { %v2481_v0 = vpop.trf.xlu1  ;;  %v2708_v31 = vpop.trf.xlu0 }
 0x398   : > { %6672 = vmatprep.mubr.msk.f32.mxu1 %vm1586_vm0, %v2481_v0  ;;  %6703 = vmatprep.mubr.msk.f32.mxu0 %vm1586_vm0, %v2708_v31  ;;  %v9218_v0 = vmul.f32 %v973_v27, %v8712_v51  ;;  %v972_v31 = vmul.f32 %v8701_v23, %v8701_v23  ;;  %v977_v51 = vmul.f32 %v8752_v10, %v8752_v10 }
 0x399   : > { %1338 = vadd.xlane.f32.xlu0 %v1318_v37 }
 0x39a   : > { %1348 = vadd.xlane.f32.xlu1 %v1323_v41  ;;  %12221 = vst [vmem:[#allocation41_spill] sm:$0xff] %v9218_v0  ;;  %v1325_v11 = vmul.f32 %v9218_v0, %v9218_v0 }
 0x39b   : > { %v2482_v18 = vpop.trf.xlu1  ;;  %v2709_v20 = vpop.trf.xlu0 }
 0x39c   : > { %6673 = vmatmul.mubr.msk.f32.gmra.mrb[66].mxu1 %vm1586_vm0, %v2482_v18  ;;  %6704 = vmatmul.mubr.msk.f32.gmra.mrb[68].mxu0 %vm1586_vm0, %v2709_v20  ;;  %v9233_v18 = vmul.f32 %v972_v31, %v8701_v23  ;;  %v976_v23 = vmul.f32 %v8743_v59, %v8743_v59 }
 0x39d   : > { %994 = vadd.xlane.f32.xlu0 %v970_v25  ;;  %v1320_v25 = vmul.f32 %v9215_v33, %v9215_v33 }
 0x39e   : > { %984 = vadd.xlane.f32.xlu1 %v965_v4  ;;  %12222 = vst [vmem:[#allocation42_spill] sm:$0xff] %v9233_v18 }
 0x39f   : > { %v2483_v34 = vpop.trf.xlu1  ;;  %v2710_v12 = vpop.trf.xlu0 }
 0x3a0   : > { %6675 = vmatprep.mubr.msk.f32.mxu1 %vm1586_vm0, %v2483_v34  ;;  %6706 = vmatprep.mubr.msk.f32.mxu0 %vm1586_vm0, %v2710_v12  ;;  %v9236_v34 = vmul.f32 %v977_v51, %v8752_v10  ;;  %v9242_v12 = vld [vmem:[#allocation8] sm:$0xff] }
 0x3a1   : > { %1346 = vadd.xlane.f32.xlu0 %v1322_v46  ;;  %v9240_v46 = vld [vmem:[#allocation8 + $0x8] sm:$0xff] }
 0x3a2   : > { %1336 = vadd.xlane.f32.xlu1 %v1317_v50  ;;  %12223 = vst [vmem:[#allocation43_spill] sm:$0xff] %v9236_v34  ;;  %v1324_v50 = vmul.f32 %v9233_v18, %v9233_v18 }
 0x3a3   : > { %v2484_v22 = vpop.trf.xlu1  ;;  %v2711_v5 = vpop.trf.xlu0 }
 0x3a4   : > { %6676 = vmatmul.mubr.msk.f32.gmra.mrb[68].mxu1 %vm1586_vm0, %v2484_v22  ;;  %6707 = vmatmul.mubr.msk.f32.gmra.mrb[70].mxu0 %vm1586_vm0, %v2711_v5  ;;  %v1329_v22 = vmul.f32 %v9236_v34, %v9236_v34 }
 0x3a5   : > { %982 = vadd.xlane.f32.xlu0 %v964_v13 }
 0x3a6   : > { %1004 = vadd.xlane.f32.xlu1 %v975_v21 }
 0x3a7   : > { %v2485_v36 = vpop.trf.xlu1  ;;  %v2921_v45 = vpop.trf.xlu0 }
 0x3a8   : > { %6678 = vmatprep.mubr.msk.f32.mxu1 %vm1586_vm0, %v2485_v36 }
 0x3a9   : > { %1334 = vadd.xlane.f32.xlu0 %v1316_v62 }
 0x3aa   : > { %1356 = vadd.xlane.f32.xlu1 %v1327_v8 }
 0x3ab   : > { %v2486_v26 = vpop.trf.xlu1  ;;  %v2922_v15 = vpop.trf.xlu0 }
 0x3ac   : > { %6679 = vmatmul.mubr.msk.f32.gmra.mrb[70].mxu1 %vm1586_vm0, %v2486_v26  ;;  %v9259_v26 = vld [vmem:[#allocation8 + $0x18] sm:$0xff] }
 0x3ad   : > { %1002 = vadd.xlane.f32.xlu0 %v974_v49  ;;  %6713 = vmatprep.mubr.msk.f32.mxu1 %vm1586_vm0, %v2921_v45  ;;  %v9255_v45 = vmul.f32 %v976_v23, %v8743_v59 }
 0x3ae   : > { %992 = vadd.xlane.f32.xlu1 %v969_v32 }
 0x3af   : > { %v3146_v17 = vpop.trf.xlu1  ;;  %v2923_v58 = vpop.trf.xlu0  ;;  %12224 = vst [vmem:[#allocation44_spill] sm:$0xff] %v9255_v45 }
 0x3b0   : > { %6714 = vmatmul.mubr.msk.f32.vlgmr.msra.gmra.mrb[72].mxu1 %vm1586_vm0, %v2922_v15  ;;  %6741 = vmatprep.mubr.msk.f32.mxu0 %vm1586_vm0, %v3146_v17  ;;  %v9261_v17 = vld [vmem:[#allocation8 + $0x10] sm:$0xff] }
 0x3b1   : > { %1354 = vadd.xlane.f32.xlu0 %v1326_v16  ;;  %6716 = vmatprep.mubr.msk.f32.mxu1 %vm1586_vm0, %v2923_v58  ;;  %v1328_v16 = vmul.f32 %v9255_v45, %v9255_v45 }
 0x3b2   : > { %1344 = vadd.xlane.f32.xlu1 %v1321_v6 }
 0x3b3   : > { %v3147_v57 = vpop.trf.xlu1  ;;  %v2924_v52 = vpop.trf.xlu0 }
 0x3b4   : > { %6742 = vmatmul.mubr.msk.f32.vlgmr.msra.gmra.mrb[72].mxu0 %vm1586_vm0, %v3147_v57  ;;  %6717 = vmatmul.mubr.msk.f32.gmra.mrb[74].mxu1 %vm1586_vm0, %v2924_v52 }
 0x3b5   : > { %990 = vadd.xlane.f32.xlu0 %v968_v55 }
 0x3b6   : > { %1000 = vadd.xlane.f32.xlu1 %v973_v27 }
 0x3b7   : > { %v3148_v37 = vpop.trf.xlu1  ;;  %v2925_v41 = vpop.trf.xlu0 }
 0x3b8   : > { %6744 = vmatprep.mubr.msk.f32.mxu0 %vm1586_vm0, %v3148_v37  ;;  %6719 = vmatprep.mubr.msk.f32.mxu1 %vm1586_vm0, %v2925_v41 }
 0x3b9   : > { %1342 = vadd.xlane.f32.xlu0 %v1320_v25 }
 0x3ba   : > { %1352 = vadd.xlane.f32.xlu1 %v1325_v11 }
 0x3bb   : > { %v3149_v4 = vpop.trf.xlu1  ;;  %v2926_v20 = vpop.trf.xlu0 }
 0x3bc   : > { %6745 = vmatmul.mubr.msk.f32.gmra.mrb[74].mxu0 %vm1586_vm0, %v3149_v4  ;;  %6720 = vmatmul.mubr.msk.f32.gmra.mrb[76].mxu1 %vm1586_vm0, %v2926_v20  ;;  %v9273_v4 = vld [vmem:[#allocation8 + $0x28] sm:$0xff] }
 0x3bd   : > { %998 = vadd.xlane.f32.xlu0 %v972_v31 }
 0x3be   : > { %1008 = vadd.xlane.f32.xlu1 %v977_v51 }
 0x3bf   : > { %v3150_v13 = vpop.trf.xlu1  ;;  %v6547_v21 = vpop.f32.mrb[16].mxu1 }
 0x3c0   : > { %v2927_v10 = vpop.trf.xlu0  ;;  %6747 = vmatprep.mubr.msk.f32.mxu0 %vm1586_vm0, %v3150_v13  ;;  %v3356_v5 = vmul.f32 %v6547_v21, %v9240_v46  ;;  %v1701_v36 = vpop.f32.mrb[17].mxu1  ;;  %v9275_v13 = vld [vmem:[#allocation8 + $0x20] sm:$0xff] }
 0x3c1   : > { %6722 = vmatprep.mubr.msk.f32.mxu1 %vm1586_vm0, %v2927_v10  ;;  %1350 = vadd.xlane.f32.xlu0 %v1324_v50  ;;  %v3355_v62 = vmul.f32 %v1701_v36, %v9242_v12  ;;  %12225 = vst [vmem:[#allocation45_spill] sm:$0xff] %v9275_v13 }
 0x3c2   : > { %1360 = vadd.xlane.f32.xlu1 %v1329_v22 }
 0x3c3   : > { %v3151_v49 = vpop.trf.xlu1  ;;  %v7253_v8 = vpack.c.bf16 %v3356_v5, %v3355_v62 }
 0x3c4   : > { %v2928_v32 = vpop.trf.xlu0  ;;  %6748 = vmatmul.mubr.msk.f32.gmra.mrb[76].mxu0 %vm1586_vm0, %v3151_v49 }
 0x3c5   : > { %6723 = vmatmul.mubr.msk.f32.gmra.mrb[78].mxu1 %vm1586_vm0, %v2928_v32  ;;  %1006 = vadd.xlane.f32.xlu0 %v976_v23 }
 0x3c6   : > { %7254 = vmatprep.subr.bf16.mxu1 %v7253_v8 }
 0x3c7   : > { %7256 = vmatpush3.bf16.msra.mxu1 %v7253_v8  ;;  %v3152_v15 = vpop.trf.xlu1  ;;  %v6575_v55 = vpop.f32.mrb[32].mxu0 }
 0x3c8   : > { %v6550_v59 = vpop.f32.mrb[18].mxu1  ;;  %v2929_v58 = vpop.trf.xlu0  ;;  %6750 = vmatprep.mubr.msk.f32.mxu0 %vm1586_vm0, %v3152_v15  ;;  %v3372_v6 = vmul.f32 %v6575_v55, %v9240_v46  ;;  %v9285_v55 = vld [vmem:[#allocation8 + $0x38] sm:$0xff] }
 0x3c9   : > { %v3358_v27 = vmul.f32 %v6550_v59, %v9259_v26  ;;  %v1711_v57 = vpop.f32.mrb[19].mxu1  ;;  %6725 = vmatprep.mubr.msk.f32.mxu1 %vm1586_vm0, %v2929_v58  ;;  %1358 = vadd.xlane.f32.xlu0 %v1328_v16  ;;  %v1926_v52 = vpop.f32.mrb[33].mxu0  ;;  %v9287_v58 = vld [vmem:[#allocation8 + $0x30] sm:$0xff] }
 0x3ca   : > { %v3357_v37 = vmul.f32 %v1711_v57, %v9261_v17  ;;  %v3371_v25 = vmul.f32 %v1926_v52, %v9242_v12 }
 0x3cb   : > { %v3153_v31 = vpop.trf.xlu1 }
 0x3cc   : > { %v7257_v41 = vpack.c.bf16 %v3358_v27, %v3357_v37  ;;  %v2930_v11 = vpop.trf.xlu0  ;;  %6751 = vmatmul.mubr.msk.f32.gmra.mrb[78].mxu0 %vm1586_vm0, %v3153_v31  ;;  %v7285_v51 = vpack.c.bf16 %v3372_v6, %v3371_v25 }
 0x3cd   : > { %6726 = vmatmul.mubr.msk.f32.gmra.mrb[80].mxu1 %vm1586_vm0, %v2930_v11 }
 0x3ce   : > { %7258 = vmatprep.subr.bf16.mxu1 %v7257_v41  ;;  %7286 = vmatprep.subr.bf16.mxu0 %v7285_v51 }
 0x3cf   : > { %7260 = vmatpush3.bf16.msra.mxu1 %v7257_v41  ;;  %v3154_v20 = vpop.trf.xlu1  ;;  %7288 = vmatpush3.bf16.msra.mxu0 %v7285_v51  ;;  %v6578_v50 = vpop.f32.mrb[34].mxu0 }
 0x3d0   : > { %v6553_v23 = vpop.f32.mrb[20].mxu1  ;;  %v2931_v21 = vpop.trf.xlu0  ;;  %6753 = vmatprep.mubr.msk.f32.mxu0 %vm1586_vm0, %v3154_v20  ;;  %v3374_v10 = vmul.f32 %v6578_v50, %v9259_v26 }
 0x3d1   : > { %v3360_v22 = vmul.f32 %v6553_v23, %v9273_v4  ;;  %v1721_v5 = vpop.f32.mrb[21].mxu1  ;;  %6728 = vmatprep.mubr.msk.f32.mxu1 %vm1586_vm0, %v2931_v21  ;;  %v1936_v36 = vpop.f32.mrb[35].mxu0  ;;  %v9297_v21 = vld [vmem:[#allocation8 + $0x48] sm:$0xff] }
 0x3d2   : > { %v3359_v62 = vmul.f32 %v1721_v5, %v9275_v13  ;;  %v3373_v49 = vmul.f32 %v1936_v36, %v9261_v17 }
 0x3d3   : > { %v3155_v8 = vpop.trf.xlu1 }
 0x3d4   : > { %v7261_v32 = vpack.c.bf16 %v3360_v22, %v3359_v62  ;;  %v2932_v15 = vpop.trf.xlu0  ;;  %6754 = vmatmul.mubr.msk.f32.gmra.mrb[80].mxu0 %vm1586_vm0, %v3155_v8  ;;  %v7289_v16 = vpack.c.bf16 %v3374_v10, %v3373_v49  ;;  %v9299_v22 = vld [vmem:[#allocation8 + $0x40] sm:$0xff] }
 0x3d5   : > { %6729 = vmatmul.mubr.msk.f32.gmra.mrb[82].mxu1 %vm1586_vm0, %v2932_v15 }
 0x3d6   : > { %7262 = vmatprep.subr.bf16.mxu1 %v7261_v32  ;;  %7290 = vmatprep.subr.bf16.mxu0 %v7289_v16 }
 0x3d7   : > { %7264 = vmatpush3.bf16.msra.mxu1 %v7261_v32  ;;  %v3156_v59 = vpop.trf.xlu1  ;;  %7292 = vmatpush3.bf16.msra.mxu0 %v7289_v16  ;;  %v6581_v6 = vpop.f32.mrb[36].mxu0 }
 0x3d8   : > { %v6556_v27 = vpop.f32.mrb[22].mxu1  ;;  %v2933_v57 = vpop.trf.xlu0  ;;  %6756 = vmatprep.mubr.msk.f32.mxu0 %vm1586_vm0, %v3156_v59  ;;  %v3376_v52 = vmul.f32 %v6581_v6, %v9273_v4 }
 0x3d9   : > { %v3362_v37 = vmul.f32 %v6556_v27, %v9285_v55  ;;  %v1731_v25 = vpop.f32.mrb[23].mxu1  ;;  %6731 = vmatprep.mubr.msk.f32.mxu1 %vm1586_vm0, %v2933_v57  ;;  %v1946_v31 = vpop.f32.mrb[37].mxu0 }
 0x3da   : > { %v3361_v41 = vmul.f32 %v1731_v25, %v9287_v58  ;;  %v3375_v11 = vmul.f32 %v1946_v31, %v9275_v13  ;;  %v9311_v31 = vld [vmem:[#allocation8 + $0x50] sm:$0xff] }
 0x3db   : > { %v3157_v51 = vpop.trf.xlu1 }
 0x3dc   : > { %v7265_v20 = vpack.c.bf16 %v3362_v37, %v3361_v41  ;;  %v2934_v50 = vpop.trf.xlu0  ;;  %6757 = vmatmul.mubr.msk.f32.gmra.mrb[82].mxu0 %vm1586_vm0, %v3157_v51  ;;  %v7293_v23 = vpack.c.bf16 %v3376_v52, %v3375_v11  ;;  %v9309_v37 = vld [vmem:[#allocation8 + $0x58] sm:$0xff] }
 0x3dd   : > { %6732 = vmatmul.mubr.msk.f32.gmra.mrb[84].mxu1 %vm1586_vm0, %v2934_v50 }
 0x3de   : > { %7266 = vmatprep.subr.bf16.mxu1 %v7265_v20  ;;  %7294 = vmatprep.subr.bf16.mxu0 %v7293_v23 }
 0x3df   : > { %7268 = vmatpush3.bf16.msra.mxu1 %v7265_v20  ;;  %v3158_v10 = vpop.trf.xlu1  ;;  %7296 = vmatpush3.bf16.msra.mxu0 %v7293_v23  ;;  %v6584_v5 = vpop.f32.mrb[38].mxu0 }
 0x3e0   : > { %v6559_v36 = vpop.f32.mrb[24].mxu1  ;;  %v2935_v62 = vpop.trf.xlu0  ;;  %6759 = vmatprep.mubr.msk.f32.mxu0 %vm1586_vm0, %v3158_v10  ;;  %v3378_v49 = vmul.f32 %v6584_v5, %v9285_v55  ;;  %v9317_v10 = vld [vmem:[#allocation8 + $0x68] sm:$0xff]  ;;  %v9319_v5 = vld [vmem:[#allocation8 + $0x60] sm:$0xff] }
 0x3e1   : > { %v3364_v8 = vmul.f32 %v6559_v36, %v9297_v21  ;;  %v1741_v32 = vpop.f32.mrb[25].mxu1  ;;  %6734 = vmatprep.mubr.msk.f32.mxu1 %vm1586_vm0, %v2935_v62  ;;  %v1956_v15 = vpop.f32.mrb[39].mxu0 }
 0x3e2   : > { %v3363_v16 = vmul.f32 %v1741_v32, %v9299_v22  ;;  %v3377_v59 = vmul.f32 %v1956_v15, %v9287_v58  ;;  %v9323_v15 = vld [vmem:[#allocation8 + $0x78] sm:$0xff] }
 0x3e3   : > { %v3159_v6 = vpop.trf.xlu1 }
 0x3e4   : > { %v7269_v27 = vpack.c.bf16 %v3364_v8, %v3363_v16  ;;  %v2936_v57 = vpop.trf.xlu0  ;;  %6760 = vmatmul.mubr.msk.f32.gmra.mrb[84].mxu0 %vm1586_vm0, %v3159_v6  ;;  %v7297_v52 = vpack.c.bf16 %v3378_v49, %v3377_v59  ;;  %v9325_v16 = vld [vmem:[#allocation8 + $0x70] sm:$0xff] }
 0x3e5   : > { %6735 = vmatmul.mubr.msk.f32.gmra.mrb[86].mxu1 %vm1586_vm0, %v2936_v57 }
 0x3e6   : > { %7270 = vmatprep.subr.bf16.mxu1 %v7269_v27  ;;  %7298 = vmatprep.subr.bf16.mxu0 %v7297_v52 }
 0x3e7   : > { %7272 = vmatpush3.bf16.msra.mxu1 %v7269_v27  ;;  %v3160_v25 = vpop.trf.xlu1  ;;  %7300 = vmatpush3.bf16.msra.mxu0 %v7297_v52  ;;  %v6562_v41 = vpop.f32.mrb[26].mxu1 }
 0x3e8   : > { %6762 = vmatprep.mubr.msk.f32.mxu0 %vm1586_vm0, %v3160_v25  ;;  %v3366_v11 = vmul.f32 %v6562_v41, %v9309_v37  ;;  %v1751_v51 = vpop.f32.mrb[27].mxu1 }
 0x3e9   : > { %v3365_v20 = vmul.f32 %v1751_v51, %v9311_v31 }
 0x3eb   : > { %v3161_v50 = vpop.trf.xlu1  ;;  %v7273_v23 = vpack.c.bf16 %v3366_v11, %v3365_v20 }
 0x3ec   : > { %6763 = vmatmul.mubr.msk.f32.gmra.mrb[86].mxu0 %vm1586_vm0, %v3161_v50 }
 0x3ed   : > { %7274 = vmatprep.subr.bf16.mxu1 %v7273_v23 }
 0x3ee   : > { %7276 = vmatpush3.bf16.msra.mxu1 %v7273_v23 }
 0x3ef   : > { %v6565_v36 = vpop.f32.mrb[28].mxu1 }
 0x3f0   : > { %v3368_v62 = vmul.f32 %v6565_v36, %v9317_v10  ;;  %v1761_v49 = vpop.f32.mrb[29].mxu1 }
 0x3f1   : > { %v3367_v8 = vmul.f32 %v1761_v49, %v9319_v5 }
 0x3f3   : > { %v7277_v32 = vpack.c.bf16 %v3368_v62, %v3367_v8 }
 0x3f5   : > { %7278 = vmatprep.subr.bf16.mxu1 %v7277_v32 }
 0x3f6   : > { %7280 = vmatpush3.bf16.msra.mxu1 %v7277_v32 }
 0x3f7   : > { %v6568_v59 = vpop.f32.mrb[30].mxu1 }
 0x3f8   : > { %v3370_v6 = vmul.f32 %v6568_v59, %v9323_v15  ;;  %v1771_v27 = vpop.f32.mrb[31].mxu1 }
 0x3f9   : > { %v3369_v57 = vmul.f32 %v1771_v27, %v9325_v16 }
 0x3fb   : > { %v7281_v52 = vpack.c.bf16 %v3370_v6, %v3369_v57  ;;  %v6587_v25 = vpop.f32.mrb[32].mxu1 }
 0x3fc   : > { %v3380_v41 = vmul.f32 %v6587_v25, %v9297_v21  ;;  %v1966_v11 = vpop.f32.mrb[33].mxu1 }
 0x3fd   : > { %7282 = vmatprep.subr.bf16.mxu1 %v7281_v52  ;;  %v3379_v51 = vmul.f32 %v1966_v11, %v9299_v22  ;;  %v12226_v11 = vld [vmem:[#allocation21_spill] sm:$0xff] }
 0x3fe   : > { %7284 = vmatpush3.bf16.msra.mxu1 %v7281_v52 }
 0x3ff   : > { %v7301_v20 = vpack.c.bf16 %v3380_v41, %v3379_v51  ;;  %v6590_v50 = vpop.f32.mrb[34].mxu1  ;;  %v4084_v51 = vrot.slane %v12226_v11, 4 }
 0x400   : > { %v3382_v23 = vmul.f32 %v6590_v50, %v9309_v37  ;;  %v1976_v36 = vpop.f32.mrb[35].mxu1 }
 0x401   : > { %7302 = vmatprep.subr.bf16.mxu0 %v7301_v20  ;;  %v3381_v62 = vmul.f32 %v1976_v36, %v9311_v31 }
 0x402   : > { %7304 = vmatpush3.bf16.msra.mxu0 %v7301_v20 }
 0x403   : > { %v7305_v49 = vpack.c.bf16 %v3382_v23, %v3381_v62  ;;  %v6593_v8 = vpop.f32.mrb[36].mxu1 }
 0x404   : > { %v3384_v32 = vmul.f32 %v6593_v8, %v9317_v10  ;;  %v1986_v59 = vpop.f32.mrb[37].mxu1 }
 0x405   : > { %v3383_v6 = vmul.f32 %v1986_v59, %v9319_v5  ;;  %7306 = vmatprep.subr.bf16.mxu0 %v7305_v49 }
 0x406   : > { %7308 = vmatpush3.bf16.msra.mxu0 %v7305_v49 }
 0x407   : > { %v6631_v27 = vpop.f32.mrb[40].mxu0  ;;  %v7309_v57 = vpack.c.bf16 %v3384_v32, %v3383_v6  ;;  %v6596_v52 = vpop.f32.mrb[38].mxu1  ;;  %v4085_v32 = vadd.f32 %v4084_v51, %v12226_v11 }
 0x408   : > { %v3404_v25 = vmul.f32 %v6631_v27, %v9240_v46  ;;  %v2376_v41 = vpop.f32.mrb[41].mxu0  ;;  %v3386_v50 = vmul.f32 %v6596_v52, %v9323_v15  ;;  %v1996_v20 = vpop.f32.mrb[39].mxu1  ;;  %v12227_v27 = vld [vmem:[#allocation22_spill] sm:$0xff] }
 0x409   : > { %v3403_v23 = vmul.f32 %v2376_v41, %v9242_v12  ;;  %v3385_v36 = vmul.f32 %v1996_v20, %v9325_v16  ;;  %7310 = vmatprep.subr.bf16.mxu0 %v7309_v57  ;;  %v4091_v24 = vrot.slane %v12227_v27, 4  ;;  %v4098_v41 = vrot.slane %v12228_v35, 4 }
 0x40a   : > { %7312 = vmatpush3.bf16.msra.mxu0 %v7309_v57  ;;  %v4086_v51 = vrot.slane %v4085_v32, 2 }
 0x40b   : > { %v9340_v62 = vpack.c.bf16 %v3404_v25, %v3403_v23  ;;  %v7313_v49 = vpack.c.bf16 %v3386_v50, %v3385_v36  ;;  %v6603_v8 = vpop.f32.mrb[40].mxu1 }
 0x40c   : > { %v3388_v59 = vmul.f32 %v6603_v8, %v9240_v46  ;;  %v2151_v6 = vpop.f32.mrb[41].mxu1  ;;  %v4092_v8 = vadd.f32 %v4091_v24, %v12227_v27  ;;  %v4087_v28 = vadd.f32 %v4086_v51, %v4085_v32  ;;  %v4105_v24 = vrot.slane %v12230_v56, 4 }
 0x40d   : > { %v3387_v52 = vmul.f32 %v2151_v6, %v9242_v12  ;;  %7314 = vmatprep.subr.bf16.mxu0 %v7313_v49 }
 0x40e   : > { %7316 = vmatpush3.bf16.msra.mxu0 %v7313_v49  ;;  %v4099_v49 = vadd.f32 %v4098_v41, %v12228_v35  ;;  %v4088_v9 = vrot.slane %v4087_v28, 1 }
 0x40f   : > { %v6634_v20 = vpop.f32.mrb[42].mxu0  ;;  %v9347_v48 = vpack.c.bf16 %v3388_v59, %v3387_v52  ;;  %v6606_v57 = vpop.f32.mrb[42].mxu1  ;;  %7350 = vmatprep.subr.bf16.mxu0 %v9340_v62  ;;  %v12229_v59 = vld [vmem:[#allocation39_spill] sm:$0xff] }
 0x410   : > { %v3406_v25 = vmul.f32 %v6634_v20, %v9259_v26  ;;  %v2386_v11 = vpop.f32.mrb[43].mxu0  ;;  %v3390_v50 = vmul.f32 %v6606_v57, %v9259_v26  ;;  %v2161_v23 = vpop.f32.mrb[43].mxu1  ;;  %v4112_v52 = vrot.slane %v12229_v59, 4  ;;  %v4100_v29 = vrot.slane %v4099_v49, 2 }
 0x411   : > { %v3405_v36 = vmul.f32 %v2386_v11, %v9261_v17  ;;  %v3389_v6 = vmul.f32 %v2161_v23, %v9261_v17  ;;  %7318 = vmatprep.subr.bf16.mxu1 %v9347_v48  ;;  %v4093_v11 = vrot.slane %v4092_v8, 2 }
 0x412   : > { %v4113_v35 = vadd.f32 %v4112_v52, %v12229_v59  ;;  %v4106_v59 = vadd.f32 %v4105_v24, %v12230_v56  ;;  %v4101_v38 = vadd.f32 %v4100_v29, %v4099_v49 }
 0x413   : > { %v9358_v30 = vpack.c.bf16 %v3406_v25, %v3405_v36  ;;  %v9360_v20 = vpack.c.bf16 %v3390_v50, %v3389_v6  ;;  %v6609_v40 = vpop.f32.mrb[44].mxu1  ;;  %v4094_v2 = vadd.f32 %v4093_v11, %v4092_v8 }
 0x414   : > { %v3392_v57 = vmul.f32 %v6609_v40, %v9273_v4  ;;  %v2171_v60 = vpop.f32.mrb[45].mxu1  ;;  %v4114_v45 = vrot.slane %v4113_v35, 2 }
 0x415   : > { %v3391_v27 = vmul.f32 %v2171_v60, %v9275_v13  ;;  %v4095_v0 = vrot.slane %v4094_v2, 1 }
 0x416   : > { %v9365_v23 = vpop.xlane.xlu0 %978  ;;  %v9386_v8 = vadd.f32 %v4114_v45, %v4113_v35 }
 0x417   : > { %7743 = vrsqrt.f32 %v9365_v23  ;;  %v9369_v41 = vpop.xlane.xlu1 %980  ;;  %v6637_v25 = vpop.f32.mrb[44].mxu0  ;;  %v9371_v50 = vpack.c.bf16 %v3392_v57, %v3391_v27  ;;  %v9397_v35 = vadd.f32 %v4095_v0, %v4094_v2  ;;  %vm1012_vm1 = vcmp.eq.f32.partialorder %v9365_v23, inf }
 0x418   : > { %v6612_v40 = vpop.f32.mrb[46].mxu1  ;;  %7745 = vrsqrt.f32 %v9369_v41  ;;  %v2396_v32 = vpop.f32.mrb[45].mxu0  ;;  %v3408_v60 = vmul.f32 %v6637_v25, %v9273_v4  ;;  %v4089_v25 = vadd.f32 %v4088_v9, %v4087_v28  ;;  %vm1019_vm2 = vcmp.eq.f32.partialorder %v9369_v41, inf }
 0x419   : > { %v3394_v51 = vmul.f32 %v6612_v40, %v9285_v55  ;;  %v2181_v36 = vpop.f32.mrb[47].mxu1  ;;  %v3407_v6 = vmul.f32 %v2396_v32, %v9275_v13  ;;  %v4107_v32 = vrot.slane %v4106_v59, 2  ;;  %vm1021_vm3 = vcmp.eq.f32.partialorder %v9369_v41, 0.0 }
 0x41a   : > { %v3393_v52 = vmul.f32 %v2181_v36, %v9287_v58  ;;  %v1331_v34 = vpop.xlane.xlu0 %1330  ;;  %v4102_v36 = vrot.slane %v4101_v38, 1  ;;  %v9391_v9 = vmul.f32 0.0625, %v4089_v25  ;;  %v4116_v25 = vrot.slane %v9386_v8, 1 }
 0x41b   : > { %7747 = vrsqrt.f32 %v1331_v34  ;;  %v9379_v57 = vpop.xlane.xlu1 %988  ;;  %v9381_v27 = vpack.c.bf16 %v3408_v60, %v3407_v6  ;;  %vm1014_vm4 = vcmp.eq.f32.partialorder %v9365_v23, 0.0 }
 0x41c   : > { %v9383_v40 = vpack.c.bf16 %v3394_v51, %v3393_v52  ;;  %7749 = vrsqrt.f32 %v9379_v57  ;;  %vm1047_vm5 = vcmp.eq.f32.partialorder %v9379_v57, inf  ;;  %vm1049_vm6 = vcmp.eq.f32.partialorder %v9379_v57, 0.0 }
 0x41e   : > { %v1333_v18 = vpop.xlane.xlu0 %1332 }
 0x41f   : > { %7751 = vrsqrt.f32 %v1333_v18  ;;  %v1341_v56 = vpop.xlane.xlu1 %1340  ;;  %v6640_v24 = vpop.f32.mrb[46].mxu0 }
 0x420   : > { %v6615_v34 = vpop.f32.mrb[48].mxu1  ;;  %7753 = vrsqrt.f32 %v1341_v56  ;;  %v2406_v11 = vpop.f32.mrb[47].mxu0  ;;  %v3410_v51 = vmul.f32 %v6640_v24, %v9285_v55  ;;  %v9399_v56 = vadd.f32 %v4107_v32, %v4106_v59  ;;  %v4126_v24 = vrot.slane %v8987_v14, 4 }
 0x421   : > { %v7744_v60 = vpop.eup %7743  ;;  %v3396_v29 = vmul.f32 %v6615_v34, %v9297_v21  ;;  %v2191_v49 = vpop.f32.mrb[49].mxu1  ;;  %v3409_v28 = vmul.f32 %v2406_v11, %v9287_v58  ;;  %v4103_v58 = vadd.f32 %v4102_v36, %v4101_v38  ;;  %v1015_v32 = vand.u32 2147483648, %v9365_v23 }
 0x422   : > { %v7746_v6 = vpop.eup %7745  ;;  %v3395_v18 = vmul.f32 %v2191_v49, %v9299_v22  ;;  %v9394_v52 = vpop.xlane.xlu0 %986  ;;  %v1011_v45 = vmul.f32 %v7744_v60, %v9365_v23  ;;  %v1022_v49 = vand.u32 2147483648, %v9369_v41 }
 0x423   : > { %7755 = vrsqrt.f32 %v9394_v52  ;;  %v9403_v55 = vpop.xlane.xlu1 %996  ;;  %v1018_v0 = vmul.f32 %v7746_v6, %v9369_v41  ;;  %v9414_v60 = vpack.c.bf16 %v3410_v51, %v3409_v28  ;;  %vm1040_vm7 = vcmp.eq.f32.partialorder %v9394_v52, inf }
 0x424   : > { %v9407_v11 = vpack.c.bf16 %v3396_v29, %v3395_v18  ;;  %7757 = vrsqrt.f32 %v9403_v55  ;;  %v1013_v59 = vsel %vm1012_vm1, %v9365_v23, %v1011_v45  ;;  %vm1075_vm8 = vcmp.eq.f32.partialorder %v9403_v55, inf }
 0x425   : > { %v7748_v2 = vpop.eup %7747  ;;  %12231 = vst [vmem:[#allocation21_spill] sm:$0xff] %v9414_v60  ;;  %v1016_v45 = vsel %vm1014_vm4, %v1015_v32, %v1013_v59  ;;  %vm1042_vm9 = vcmp.eq.f32.partialorder %v9394_v52, 0.0  ;;  %vm1077_vm10 = vcmp.eq.f32.partialorder %v9403_v55, 0.0 }
 0x426   : > { %v7750_v38 = vpop.eup %7749  ;;  %v1339_v36 = vpop.xlane.xlu0 %1338  ;;  %v1378_v29 = vmul.f32 %v7748_v2, %v9116_v7  ;;  %v1020_v7 = vsel %vm1019_vm2, %v9369_v41, %v1018_v0  ;;  %v9459_v41 = vadd.f32 %v4116_v25, %v9386_v8 }
 0x427   : > { %v1046_v6 = vmul.f32 %v7750_v38, %v9379_v57  ;;  %7759 = vrsqrt.f32 %v1339_v36  ;;  %v1349_v18 = vpop.xlane.xlu1 %1348  ;;  %v6643_v34 = vpop.f32.mrb[48].mxu0  ;;  %v1050_v36 = vand.u32 2147483648, %v9379_v57 }
 0x428   : > { %v6618_v51 = vpop.f32.mrb[50].mxu1  ;;  %7761 = vrsqrt.f32 %v1349_v18  ;;  %v1394_v28 = vmul.f32 %v1378_v29, %v1016_v45  ;;  %v3412_v33 = vmul.f32 %v6643_v34, %v9297_v21  ;;  %v2416_v13 = vpop.f32.mrb[49].mxu0 }
 0x429   : > { %v7752_v60 = vpop.eup %7751  ;;  %v3398_v23 = vmul.f32 %v6618_v51, %v9309_v37  ;;  %v2201_v2 = vpop.f32.mrb[51].mxu1  ;;  %v3411_v38 = vmul.f32 %v2416_v13, %v9299_v22  ;;  %v1048_v59 = vsel %vm1047_vm5, %v9379_v57, %v1046_v6  ;;  %v4127_v51 = vadd.f32 %v4126_v24, %v8987_v14 }
 0x42a   : > { %v7754_v32 = vpop.eup %7753  ;;  %v1379_v29 = vmul.f32 %v7752_v60, %v9125_v54  ;;  %v3397_v21 = vmul.f32 %v2201_v2, %v9311_v31  ;;  %6797 = vmatprep.mubr.f32.mxu1 %v1394_v28  ;;  %v9433_v34 = vpop.xlane.xlu0 %994  ;;  %v9436_v18 = vmul.f32 %v9391_v9, %v1394_v28  ;;  %v1023_v54 = vsel %vm1021_vm3, %v1022_v49, %v1020_v7 }
 0x42b   : > { %7763 = vrsqrt.f32 %v9433_v34  ;;  %v9439_v0 = vpop.xlane.xlu1 %984  ;;  %v9441_v13 = vpack.c.bf16 %v3412_v33, %v3411_v38  ;;  %v1383_v22 = vmul.f32 %v7754_v32, %v9128_v47  ;;  %v1051_v60 = vsel %vm1049_vm6, %v1050_v36, %v1048_v59 }
 0x42c   : > { %12232 = vst [vmem:[#allocation22_spill] sm:$0xff] %v9436_v18  ;;  %v9445_v6 = vpack.c.bf16 %v3398_v23, %v3397_v21  ;;  %7765 = vrsqrt.f32 %v9439_v0  ;;  %v1395_v28 = vmul.f32 %v1379_v29, %v1023_v54  ;;  %v4142_v33 = vmul.f32 0.0625, %v4103_v58 }
 0x42d   : > { %v7756_v45 = vpop.eup %7755  ;;  %v9451_v2 = vmul.f32 %v1383_v22, %v1051_v60  ;;  %v9455_v47 = vmul.f32 0.0625, %v9397_v35  ;;  %v4109_v23 = vrot.slane %v9399_v56, 1  ;;  %v12233_v35 = vrot.slane %v8970_v19, 4 }
 0x42e   : > { %v7758_v38 = vpop.eup %7757  ;;  %v1347_v18 = vpop.xlane.xlu0 %1346  ;;  %v1039_v57 = vmul.f32 %v7756_v45, %v9394_v52  ;;  %6798 = vmatmul.mubr.f32.vlgmr.msra.gmra.mrb[88].mxu1 %v1395_v28  ;;  %v9463_v58 = vmul.f32 %v9391_v9, %v1395_v28  ;;  %vm1068_vm11 = vcmp.eq.f32.partialorder %v9433_v34, inf  ;;  %vm1033_vm12 = vcmp.eq.f32.partialorder %v9439_v0, inf }
 0x42f   : > { %v1074_v49 = vmul.f32 %v7758_v38, %v9403_v55  ;;  %7767 = vrsqrt.f32 %v1347_v18  ;;  %v1337_v14 = vpop.xlane.xlu1 %1336  ;;  %v6646_v24 = vpop.f32.mrb[50].mxu0  ;;  %v9466_v7 = vmul.f32 %v4142_v33, %v9451_v2  ;;  %v9471_v59 = vadd.f32 %v12233_v35, %v8970_v19  ;;  %7320 = vmatpush3.bf16.msra.mxu1 %v9347_v48 }
 0x430   : > { %v6621_v8 = vpop.f32.mrb[52].mxu1  ;;  %7769 = vrsqrt.f32 %v1337_v14  ;;  %v3414_v25 = vmul.f32 %v6646_v24, %v9309_v37  ;;  %v2426_v32 = vpop.f32.mrb[51].mxu0  ;;  %7322 = vmatprep.subr.bf16.mxu1 %v9360_v20  ;;  %v1041_v21 = vsel %vm1040_vm7, %v9394_v52, %v1039_v57  ;;  %v4128_v18 = vrot.slane %v4127_v51, 2 }
 0x431   : > { %v7760_v36 = vpop.eup %7759  ;;  %v3400_v9 = vmul.f32 %v6621_v8, %v9317_v10  ;;  %v2211_v29 = vpop.f32.mrb[53].mxu1  ;;  %v3413_v19 = vmul.f32 %v2426_v32, %v9311_v31  ;;  %v1043_v37 = vand.u32 2147483648, %v9394_v52  ;;  %v1076_v31 = vsel %vm1075_vm8, %v9403_v55, %v1074_v49 }
 0x432   : > { %v7762_v22 = vpop.eup %7761  ;;  %v3399_v48 = vmul.f32 %v2211_v29, %v9319_v5  ;;  %v9482_v54 = vpop.xlane.xlu0 %982  ;;  %v1382_v60 = vmul.f32 %v7760_v36, %v9143_v3  ;;  %v1078_v38 = vand.u32 2147483648, %v9403_v55  ;;  %v4121_v35 = vrot.slane %v9471_v59, 2 }
 0x433   : > { %7771 = vrsqrt.f32 %v9482_v54  ;;  %v9487_v45 = vpop.xlane.xlu1 %1004  ;;  %v9490_v28 = vpack.c.bf16 %v3414_v25, %v3413_v19  ;;  %7324 = vmatpush3.bf16.msra.mxu1 %v9360_v20  ;;  %v1044_v14 = vsel %vm1042_vm9, %v1043_v37, %v1041_v21  ;;  %v1387_v52 = vmul.f32 %v7762_v22, %v9146_v61 }
 0x434   : > { %v9494_v57 = vpack.c.bf16 %v3400_v9, %v3399_v48  ;;  %7773 = vrsqrt.f32 %v9487_v45  ;;  %7326 = vmatprep.subr.bf16.mxu1 %v9371_v50  ;;  %v1398_v24 = vmul.f32 %v1382_v60, %v1044_v14  ;;  %v1079_v20 = vsel %vm1077_vm10, %v1078_v38, %v1076_v31 }
 0x435   : > { %v7764_v3 = vpop.eup %7763  ;;  %v9504_v32 = vadd.f32 %v4128_v18, %v4127_v51  ;;  %v9507_v55 = vmul.f32 %v1387_v52, %v1079_v20  ;;  %vm1035_vm13 = vcmp.eq.f32.partialorder %v9439_v0, 0.0  ;;  %v1036_v31 = vand.u32 2147483648, %v9439_v0 }
 0x436   : > { %v7766_v49 = vpop.eup %7765  ;;  %v1335_v8 = vpop.xlane.xlu0 %1334  ;;  %v1067_v25 = vmul.f32 %v7764_v3, %v9433_v34  ;;  %6867 = vmatprep.mubr.f32.mxu1 %v1398_v24  ;;  %v9509_v61 = vmul.f32 %v4142_v33, %v1398_v24  ;;  %v1071_v14 = vand.u32 2147483648, %v9433_v34  ;;  %vm1070_vm14 = vcmp.eq.f32.partialorder %v9433_v34, 0.0 }
 0x437   : > { %v1032_v36 = vmul.f32 %v7766_v49, %v9439_v0  ;;  %7775 = vrsqrt.f32 %v1335_v8  ;;  %v1357_v9 = vpop.xlane.xlu1 %1356  ;;  %v6649_v29 = vpop.f32.mrb[52].mxu0  ;;  %7328 = vmatpush3.bf16.msra.mxu1 %v9371_v50  ;;  %vm1026_vm15 = vcmp.eq.f32.partialorder %v9482_v54, inf  ;;  %vm1103_vm0 = vcmp.eq.f32.partialorder %v9487_v45, inf }
 0x438   : > { %v6624_v21 = vpop.f32.mrb[54].mxu1  ;;  %7777 = vrsqrt.f32 %v1357_v9  ;;  %v3416_v51 = vmul.f32 %v6649_v29, %v9317_v10  ;;  %v2436_v19 = vpop.f32.mrb[53].mxu0  ;;  %7330 = vmatprep.subr.bf16.mxu1 %v9383_v40  ;;  %v1069_v60 = vsel %vm1068_vm11, %v9433_v34, %v1067_v25  ;;  %v9550_v34 = vadd.f32 %v4121_v35, %v9471_v59 }
 0x439   : > { %v7768_v18 = vpop.eup %7767  ;;  %v1034_v22 = vsel %vm1033_vm12, %v9439_v0, %v1032_v36  ;;  %v3402_v48 = vmul.f32 %v6624_v21, %v9323_v15  ;;  %v2221_v33 = vpop.f32.mrb[55].mxu1  ;;  %v3415_v37 = vmul.f32 %v2436_v19, %v9319_v5  ;;  %v9547_v36 = vmul.f32 0.0625, %v9459_v41 }
 0x43a   : > { %v7770_v50 = vpop.eup %7769  ;;  %v3401_v10 = vmul.f32 %v2221_v33, %v9325_v16  ;;  %v9524_v38 = vpop.xlane.xlu0 %1002  ;;  %v1386_v3 = vmul.f32 %v7768_v18, %v9161_v39  ;;  %v1037_v8 = vsel %vm1035_vm13, %v1036_v31, %v1034_v22  ;;  %v1072_v39 = vsel %vm1070_vm14, %v1071_v14, %v1069_v60 }
 0x43b   : > { %v1381_v24 = vmul.f32 %v7770_v50, %v9164_v53  ;;  %7779 = vrsqrt.f32 %v9524_v38  ;;  %v9530_v5 = vpop.xlane.xlu1 %992  ;;  %v9532_v52 = vpack.c.bf16 %v3416_v51, %v3415_v37  ;;  %7332 = vmatpush3.bf16.msra.mxu1 %v9383_v40  ;;  %12234 = vst [vmem:[#allocation24_spill] sm:$0xff] %v9547_v36  ;;  %v4130_v0 = vrot.slane %v9504_v32, 1 }
 0x43c   : > { %v9535_v49 = vpack.c.bf16 %v3402_v48, %v3401_v10  ;;  %7781 = vrsqrt.f32 %v9530_v5  ;;  %7334 = vmatprep.subr.bf16.mxu1 %v9407_v11  ;;  %v9544_v20 = vmul.f32 %v1386_v3, %v1072_v39  ;;  %v9569_v22 = vadd.f32 %v4109_v23, %v9399_v56 }
 0x43d   : > { %v7772_v25 = vpop.eup %7771  ;;  %v9542_v53 = vmul.f32 %v1381_v24, %v1037_v8  ;;  %v4133_v33 = vrot.slane %v8997_v44, 4  ;;  %v4123_v60 = vrot.slane %v9550_v34, 1  ;;  %v1029_v31 = vand.u32 2147483648, %v9482_v54 }
 0x43e   : > { %v7774_v40 = vpop.eup %7773  ;;  %v1355_v9 = vpop.xlane.xlu0 %1354  ;;  %v1025_v29 = vmul.f32 %v7772_v25, %v9482_v54  ;;  %v9561_v41 = vmul.f32 %v9547_v36, %v9544_v20  ;;  %v9582_v23 = vadd.f32 %v4130_v0, %v9504_v32  ;;  %vm1028_vm1 = vcmp.eq.f32.partialorder %v9482_v54, 0.0 }
 0x43f   : > { %v1102_v21 = vmul.f32 %v7774_v40, %v9487_v45  ;;  %7783 = vrsqrt.f32 %v1355_v9  ;;  %v1345_v51 = vpop.xlane.xlu1 %1344  ;;  %v6652_v19 = vpop.f32.mrb[54].mxu0  ;;  %v9557_v18 = vmul.f32 %v9455_v47, %v9542_v53  ;;  %7336 = vmatpush3.bf16.msra.mxu1 %v9407_v11  ;;  %v1106_v24 = vand.u32 2147483648, %v9487_v45 }
 0x440   : > { %7785 = vrsqrt.f32 %v1345_v51  ;;  %v3418_v59 = vmul.f32 %v6652_v19, %v9323_v15  ;;  %v2446_v35 = vpop.f32.mrb[55].mxu0  ;;  %7338 = vmatprep.subr.bf16.mxu1 %v9445_v6  ;;  %v1027_v11 = vsel %vm1026_vm15, %v9482_v54, %v1025_v29  ;;  %vm1096_vm2 = vcmp.eq.f32.partialorder %v9524_v38, inf }
 0x441   : > { %v7776_v48 = vpop.eup %7775  ;;  %v3417_v37 = vmul.f32 %v2446_v35, %v9325_v16  ;;  %v1104_v3 = vsel %vm1103_vm0, %v9487_v45, %v1102_v21  ;;  %v1030_v8 = vsel %vm1028_vm1, %v1029_v31, %v1027_v11  ;;  %vm1105_vm3 = vcmp.eq.f32.partialorder %v9487_v45, 0.0 }
 0x442   : > { %v7778_v15 = vpop.eup %7777  ;;  %v9577_v50 = vpop.xlane.xlu0 %990  ;;  %v1380_v56 = vmul.f32 %v7776_v48, %v9179_v63  ;;  %vm1061_vm4 = vcmp.eq.f32.partialorder %v9530_v5, inf  ;;  %v1107_v29 = vsel %vm1105_vm3, %v1106_v24, %v1104_v3  ;;  %v1064_v31 = vand.u32 2147483648, %v9530_v5 }
 0x443   : > { %7787 = vrsqrt.f32 %v9577_v50  ;;  %v9585_v10 = vpack.c.bf16 %v3418_v59, %v3417_v37  ;;  %v6687_v16 = vpop.f32.mrb[56].mxu0  ;;  %v9587_v14 = vpop.xlane.xlu1 %1000  ;;  %7340 = vmatpush3.bf16.msra.mxu1 %v9445_v6  ;;  %v1391_v0 = vmul.f32 %v7778_v15, %v9183_v43  ;;  %vm1063_vm5 = vcmp.eq.f32.partialorder %v9530_v5, 0.0 }
 0x444   : > { %v3436_v63 = vmul.f32 %v6687_v16, %v9240_v46  ;;  %7789 = vrsqrt.f32 %v9587_v14  ;;  %v2826_v32 = vpop.f32.mrb[57].mxu0  ;;  %7342 = vmatprep.subr.bf16.mxu1 %v9494_v57  ;;  %v1396_v40 = vmul.f32 %v1380_v56, %v1030_v8  ;;  %vm1098_vm6 = vcmp.eq.f32.partialorder %v9524_v38, 0.0 }
 0x445   : > { %v7780_v39 = vpop.eup %7779  ;;  %v3435_v25 = vmul.f32 %v2826_v32, %v9242_v12  ;;  %v9614_v11 = vmul.f32 %v1391_v0, %v1107_v29  ;;  %vm1054_vm7 = vcmp.eq.f32.partialorder %v9577_v50, inf  ;;  %vm1056_vm8 = vcmp.eq.f32.partialorder %v9577_v50, 0.0 }
 0x446   : > { %v7782_v54 = vpop.eup %7781  ;;  %v1343_v6 = vpop.xlane.xlu0 %1342  ;;  %v1095_v9 = vmul.f32 %v7780_v39, %v9524_v38  ;;  %6832 = vmatprep.mubr.f32.mxu0 %v1396_v40  ;;  %v9606_v35 = vmul.f32 %v9455_v47, %v1396_v40  ;;  %vm1089_vm9 = vcmp.eq.f32.partialorder %v9587_v14, inf  ;;  %vm1091_vm10 = vcmp.eq.f32.partialorder %v9587_v14, 0.0 }
 0x447   : > { %v1060_v21 = vmul.f32 %v7782_v54, %v9530_v5  ;;  %v9603_v51 = vpack.c.bf16 %v3436_v63, %v3435_v25  ;;  %7791 = vrsqrt.f32 %v1343_v6  ;;  %v1353_v19 = vpop.xlane.xlu1 %1352  ;;  %v6659_v59 = vpop.f32.mrb[56].mxu1  ;;  %7344 = vmatpush3.bf16.msra.mxu1 %v9494_v57  ;;  %6833 = vmatmul.mubr.f32.vlgmr.msra.gmra.mrb[88].mxu0 %v9542_v53  ;;  %vm4343_vm15 = vcmask 1041408  }
 0x448   : > { %v6690_v45 = vpop.f32.mrb[58].mxu0  ;;  %7793 = vrsqrt.f32 %v1353_v19  ;;  %v3420_v48 = vmul.f32 %v6659_v59, %v9240_v46  ;;  %v2601_v43 = vpop.f32.mrb[57].mxu1  ;;  %v1097_v37 = vsel %vm1096_vm2, %v9524_v38, %v1095_v9  ;;  %7346 = vmatprep.subr.bf16.mxu1 %v9535_v49  ;;  %7352 = vmatpush3.bf16.msra.mxu0 %v9340_v62  ;;  %v1099_v62 = vand.u32 2147483648, %v9524_v38  ;;  %v9674_v19 = vld [vmem:[#allocation8 + $0x10] sm:$0xff] }
 0x449   : > { %v7784_v15 = vpop.eup %7783  ;;  %v3438_v47 = vmul.f32 %v6690_v45, %v9259_v26  ;;  %v2836_v57 = vpop.f32.mrb[59].mxu0  ;;  %v3419_v53 = vmul.f32 %v2601_v43, %v9242_v12  ;;  %v1062_v46 = vsel %vm1061_vm4, %v9530_v5, %v1060_v21  ;;  %7354 = vmatprep.subr.bf16.mxu0 %v9358_v30  ;;  %v4124_v5 = vadd.f32 %v4123_v60, %v9550_v34  ;;  %v12236_v43 = vld [vmem:[#allocation21_spill] sm:$0xff] }
 0x44a   : > { %v7786_v56 = vpop.eup %7785  ;;  %v3437_v16 = vmul.f32 %v2836_v57, %v9261_v17  ;;  %v9626_v3 = vpop.xlane.xlu0 %998  ;;  %v1390_v26 = vmul.f32 %v7784_v15, %v9196_v1  ;;  %v1065_v17 = vsel %vm1063_vm5, %v1064_v31, %v1062_v46  ;;  %v1100_v32 = vsel %vm1098_vm6, %v1099_v62, %v1097_v37  ;;  %v12237_v37 = vld [vmem:[#allocation45_spill] sm:$0xff] }
 0x44b   : > { %7795 = vrsqrt.f32 %v9626_v3  ;;  %v7381_v12 = vpack.c.bf16 %v3420_v48, %v3419_v53  ;;  %v1385_v24 = vmul.f32 %v7786_v56, %v9200_v42  ;;  %7348 = vmatpush3.bf16.msra.mxu1 %v9535_v49  ;;  %v9643_v1 = vadd.f32 %v4133_v33, %v8997_v44  ;;  %v12240_v46 = vld [vmem:[#allocation41_spill] sm:$0xff] }
 0x44c   : > { %v9634_v63 = vpack.c.bf16 %v3438_v47, %v3437_v16  ;;  %7356 = vmatpush3.bf16.msra.mxu0 %v9358_v30  ;;  %v9648_v38 = vmul.f32 %v1390_v26, %v1100_v32  ;;  %v4143_v49 = vmul.f32 0.0625, %v9569_v22  ;;  %v4146_v44 = vmul.f32 0.0625, %v9582_v23  ;;  %v9665_v23 = vld [vmem:[#allocation8 + $0x18] sm:$0xff] }
 0x44d   : > { %v7788_v8 = vpop.eup %7787  ;;  %7382 = vmatprep.subr.bf16.mxu1 %v7381_v12  ;;  %v9646_v42 = vmul.f32 %v1385_v24, %v1065_v17  ;;  %7358 = vmatprep.subr.bf16.mxu0 %v9381_v27  ;;  %v1092_v60 = vand.u32 2147483648, %v9587_v14  ;;  %v4145_v17 = vmul.f32 0.0625, %v4124_v5  ;;  %vm1082_vm11 = vcmp.eq.f32.partialorder %v9626_v3, inf  ;;  %v9708_v5 = vld [vmem:[#allocation8 + $0x28] sm:$0xff] }
 0x44e   : > { %v7790_v39 = vpop.eup %7789  ;;  %v1351_v25 = vpop.xlane.xlu0 %1350  ;;  %v1053_v34 = vmul.f32 %v7788_v8, %v9577_v50  ;;  %6868 = vmatmul.mubr.f32.vlgmr.msra.gmra.mrb[90].mxu1 %v9451_v2  ;;  %v9669_v2 = vmul.f32 %v4146_v44, %v9648_v38  ;;  %v9687_v47 = vmul.f32 %v4146_v44, %v9614_v11  ;;  %vm1084_vm12 = vcmp.eq.f32.partialorder %v9626_v3, 0.0 }
 0x44f   : > { %v1088_v30 = vmul.f32 %v7790_v39, %v9587_v14  ;;  %7797 = vrsqrt.f32 %v1351_v25  ;;  %v6662_v22 = vpop.f32.mrb[58].mxu1  ;;  %v9660_v33 = vmul.f32 %v4143_v49, %v9646_v42  ;;  %6937 = vmatprep.mubr.f32.mxu1 %v9544_v20  ;;  %v6693_v40 = vpop.f32.mrb[60].mxu0  ;;  %7384 = vmatpush3.bf16.msra.mxu1 %v7381_v12  ;;  %v1057_v20 = vand.u32 2147483648, %v9577_v50 }
 0x450   : > { %v1055_v54 = vsel %vm1054_vm7, %v9577_v50, %v1053_v34  ;;  %v3422_v6 = vmul.f32 %v9665_v23, %v6662_v22  ;;  %v2611_v9 = vpop.f32.mrb[59].mxu1  ;;  %12235 = vst [vmem:[#allocation39_spill] sm:$0xff] %v9669_v2  ;;  %7360 = vmatpush3.bf16.msra.mxu0 %v9381_v27  ;;  %v3440_v0 = vmul.f32 %v6693_v40, %v9273_v4  ;;  %v2846_v21 = vpop.f32.mrb[61].mxu0  ;;  %v12238_v27 = vld [vmem:[#allocation40_spill] sm:$0xff]  ;;  %12239 = vst [vmem:[#allocation33_spill] sm:$0xff] %v9687_v47  ;;  %vm4441_vm0 = vcmask 1040384  }
 0x451   : > { %v7792_v29 = vpop.eup %7791  ;;  %v3421_v59 = vmul.f32 %v9674_v19, %v2611_v9  ;;  %v1090_v45 = vsel %vm1089_vm9, %v9587_v14, %v1088_v30  ;;  %7362 = vmatprep.subr.bf16.mxu0 %v12236_v43  ;;  %v3439_v15 = vmul.f32 %v2846_v21, %v12237_v37  ;;  %v1058_v57 = vsel %vm1056_vm8, %v1057_v20, %v1055_v54  ;;  %v9713_v40 = vld [vmem:[#allocation8 + $0x38] sm:$0xff]  ;;  %v9721_v21 = vld [vmem:[#allocation8 + $0x30] sm:$0xff] }
 0x452   : > { %v7794_v48 = vpop.eup %7793  ;;  %v9682_v31 = vpop.xlane.xlu0 %1006  ;;  %v1384_v4 = vmul.f32 %v7792_v29, %v12238_v27  ;;  %v1093_v26 = vsel %vm1091_vm10, %v1092_v60, %v1090_v45  ;;  %v4135_v12 = vrot.slane %v9643_v1, 2  ;;  %v1085_v9 = vand.u32 2147483648, %v9626_v3  ;;  %v9717_v29 = vld [vmem:[#allocation8 + $0x20] sm:$0xff] }
 0x453   : > { %7799 = vrsqrt.f32 %v9682_v31  ;;  %v7385_v53 = vpack.c.bf16 %v3422_v6, %v3421_v59  ;;  %v1389_v56 = vmul.f32 %v7794_v48, %v12240_v46  ;;  %v9693_v16 = vpack.c.bf16 %v3440_v0, %v3439_v15 }
 0x454   : > { %v1400_v62 = vmul.f32 %v1384_v4, %v1058_v57  ;;  %7364 = vmatpush3.bf16.msra.mxu0 %v12236_v43  ;;  %v4136_v60 = vadd.f32 %v4135_v12, %v9643_v1  ;;  %vm1110_vm13 = vcmp.eq.f32.partialorder %v9682_v31, inf  ;;  %vm1112_vm14 = vcmp.eq.f32.partialorder %v9682_v31, 0.0 }
 0x455   : > { %v7796_v24 = vpop.eup %7795  ;;  %7386 = vmatprep.subr.bf16.mxu1 %v7385_v53  ;;  %v9697_v14 = vmul.f32 %v1389_v56, %v1093_v26  ;;  %7366 = vmatprep.subr.bf16.mxu0 %v9441_v13  ;;  %vm4563_vm1 = vcmask 1046528   ;;  %vm4648_vm2 = vcmask 1045504   ;;  %vm4768_vm3 = vcmask 1044480  }
 0x456   : > { %6902 = vmatprep.mubr.f32.mxu0 %v1400_v62  ;;  %v1359_v50 = vpop.xlane.xlu0 %1358  ;;  %v1081_v32 = vmul.f32 %v7796_v24, %v9626_v3  ;;  %v9701_v8 = vmul.f32 %v4143_v49, %v1400_v62  ;;  %7388 = vmatpush3.bf16.msra.mxu1 %v7385_v53  ;;  %v4137_v37 = vrot.slane %v4136_v60, 1  ;;  %vm4853_vm4 = vcmask 1043456  }
 0x457   : > { %7801 = vrsqrt.f32 %v1359_v50  ;;  %v6665_v39 = vpop.f32.mrb[60].mxu1  ;;  %v9705_v25 = vmul.f32 %v4145_v17, %v9697_v14  ;;  %v6696_v34 = vpop.f32.mrb[62].mxu0  ;;  %v1113_v50 = vand.u32 2147483648, %v9682_v31  ;;  %vm4938_vm5 = vcmask 1042432  }
 0x458   : > { %v1083_v44 = vsel %vm1082_vm11, %v9626_v3, %v1081_v32  ;;  %v3424_v30 = vmul.f32 %v9708_v5, %v6665_v39  ;;  %v2621_v22 = vpop.f32.mrb[61].mxu1  ;;  %7368 = vmatpush3.bf16.msra.mxu0 %v9441_v13  ;;  %v3442_v54 = vmul.f32 %v9713_v40, %v6696_v34  ;;  %v2856_v6 = vpop.f32.mrb[63].mxu0  ;;  %v12242_v13 = vld [vmem:[#allocation42_spill] sm:$0xff]  ;;  %v4138_v62 = vadd.f32 %v4137_v37, %v4136_v60  ;;  %v9743_v32 = vld [vmem:[#allocation8 + $0x40] sm:$0xff]  ;;  %v12244_v34 = vld [vmem:[#allocation44_spill] sm:$0xff] }
 0x459   : > { %12241 = vst [vmem:[#allocation21_spill] sm:$0xff] %v9705_v25  ;;  %v7798_v49 = vpop.eup %7797  ;;  %v3423_v0 = vmul.f32 %v9717_v29, %v2621_v22  ;;  %7370 = vmatprep.subr.bf16.mxu0 %v9490_v28  ;;  %v3441_v1 = vmul.f32 %v9721_v21, %v2856_v6  ;;  %v1086_v59 = vsel %vm1084_vm12, %v1085_v9, %v1083_v44 }
 0x45a   : > { %v1388_v20 = vmul.f32 %v7798_v49, %v12242_v13  ;;  %v9750_v49 = vmul.f32 0.0625, %v4138_v62 }
 0x45b   : > { %v7389_v45 = vpack.c.bf16 %v3424_v30, %v3423_v0  ;;  %v9726_v48 = vpack.c.bf16 %v3442_v54, %v3441_v1  ;;  %v9761_v1 = vld [vmem:[#allocation8 + $0x58] sm:$0xff] }
 0x45c   : > { %v1404_v43 = vmul.f32 %v1388_v20, %v1086_v59  ;;  %7372 = vmatpush3.bf16.msra.mxu0 %v9490_v28  ;;  %v9737_v28 = vld [vmem:[#allocation8 + $0x48] sm:$0xff]  ;;  %12245 = vst [vmem:[#allocation40_spill] sm:$0xff] %v9750_v49  ;;  %v9766_v59 = vld [vmem:[#allocation8 + $0x50] sm:$0xff] }
 0x45d   : > { %v7800_v15 = vpop.eup %7799  ;;  %7390 = vmatprep.subr.bf16.mxu1 %v7389_v45  ;;  %7374 = vmatprep.subr.bf16.mxu0 %v9532_v52 }
 0x45e   : > { %7392 = vmatpush3.bf16.msra.mxu1 %v7389_v45  ;;  %v1109_v27 = vmul.f32 %v7800_v15, %v9682_v31  ;;  %v9731_v4 = vmul.f32 %v4145_v17, %v1404_v43 }
 0x45f   : > { %v6668_v3 = vpop.f32.mrb[62].mxu1  ;;  %v6699_v57 = vpop.f32.mrb[64].mxu0 }
 0x460   : > { %12243 = vst [vmem:[#allocation45_spill] sm:$0xff] %v9731_v4  ;;  %v3426_v53 = vmul.f32 %v9713_v40, %v6668_v3  ;;  %v2631_v46 = vpop.f32.mrb[63].mxu1  ;;  %v1111_v56 = vsel %vm1110_vm13, %v9682_v31, %v1109_v27  ;;  %7376 = vmatpush3.bf16.msra.mxu0 %v9532_v52  ;;  %v3444_v12 = vmul.f32 %v9737_v28, %v6699_v57  ;;  %v2866_v24 = vpop.f32.mrb[65].mxu0  ;;  %v9773_v3 = vld [vmem:[#allocation8 + $0x68] sm:$0xff]  ;;  %v12275_v4 = vld [vmem:[#allocation43_spill] sm:$0xff] }
 0x461   : > { %v7802_v26 = vpop.eup %7801  ;;  %v3425_v17 = vmul.f32 %v9721_v21, %v2631_v46  ;;  %7378 = vmatprep.subr.bf16.mxu0 %v9585_v10  ;;  %v3443_v39 = vmul.f32 %v9743_v32, %v2866_v24  ;;  %v1114_v30 = vsel %vm1112_vm14, %v1113_v50, %v1111_v56  ;;  %v9783_v50 = vld [vmem:[#allocation8 + $0x78] sm:$0xff] }
 0x462   : > { %v1392_v44 = vmul.f32 %v7802_v26, %v12244_v34 }
 0x463   : > { %v7393_v52 = vpack.c.bf16 %v3426_v53, %v3425_v17  ;;  %v7429_v22 = vpack.c.bf16 %v3444_v12, %v3443_v39 }
 0x464   : > { %v9748_v60 = vmul.f32 %v1392_v44, %v1114_v30  ;;  %7380 = vmatpush3.bf16.msra.mxu0 %v9585_v10 }
 0x465   : > { %7394 = vmatprep.subr.bf16.mxu1 %v7393_v52  ;;  %7414 = vmatprep.subr.bf16.mxu0 %v9603_v51 }
 0x466   : > { %7396 = vmatpush3.bf16.msra.mxu1 %v7393_v52  ;;  %v9756_v54 = vmul.f32 %v9750_v49, %v9748_v60  ;;  %v9787_v52 = vld [vmem:[#allocation8 + $0x70] sm:$0xff] }
 0x467   : > { %v6671_v31 = vpop.f32.mrb[64].mxu1  ;;  %6903 = vmatmul.mubr.f32.vlgmr.msra.gmra.mrb[90].mxu0 %v9646_v42  ;;  %v6702_v6 = vpop.f32.mrb[66].mxu0 }
 0x468   : > { %12246 = vst [vmem:[#allocation41_spill] sm:$0xff] %v9756_v54  ;;  %v3428_v9 = vmul.f32 %v9737_v28, %v6671_v31  ;;  %v2641_v0 = vpop.f32.mrb[65].mxu1  ;;  %7416 = vmatpush3.bf16.msra.mxu0 %v9603_v51  ;;  %6972 = vmatprep.mubr.f32.mxu0 %v1404_v43  ;;  %v3446_v10 = vmul.f32 %v9761_v1, %v6702_v6  ;;  %v2876_v13 = vpop.f32.mrb[67].mxu0 }
 0x469   : > { %v3427_v20 = vmul.f32 %v9743_v32, %v2641_v0  ;;  %7418 = vmatprep.subr.bf16.mxu0 %v9634_v63  ;;  %v3445_v42 = vmul.f32 %v9766_v59, %v2876_v13 }
 0x46b   : > { %v7397_v45 = vpack.c.bf16 %v3428_v9, %v3427_v20  ;;  %v7433_v37 = vpack.c.bf16 %v3446_v10, %v3445_v42  ;;  %v9792_v20 = vld [vmem:[#allocation8 + $0x8] sm:$0xff] }
 0x46c   : > { %7420 = vmatpush3.bf16.msra.mxu0 %v9634_v63  ;;  %v9778_v63 = vld [vmem:[#allocation8 + $0x60] sm:$0xff] }
 0x46d   : > { %7398 = vmatprep.subr.bf16.mxu1 %v7397_v45  ;;  %7422 = vmatprep.subr.bf16.mxu0 %v9693_v16 }
 0x46e   : > { %7400 = vmatpush3.bf16.msra.mxu1 %v7397_v45 }
 0x46f   : > { %v6674_v51 = vpop.f32.mrb[66].mxu1  ;;  %v6705_v43 = vpop.f32.mrb[68].mxu0 }
 0x470   : > { %v3430_v15 = vmul.f32 %v9761_v1, %v6674_v51  ;;  %v2651_v27 = vpop.f32.mrb[67].mxu1  ;;  %7424 = vmatpush3.bf16.msra.mxu0 %v9693_v16  ;;  %v3448_v57 = vmul.f32 %v9773_v3, %v6705_v43  ;;  %v2886_v53 = vpop.f32.mrb[69].mxu0 }
 0x471   : > { %v3429_v46 = vmul.f32 %v9766_v59, %v2651_v27  ;;  %7426 = vmatprep.subr.bf16.mxu0 %v9726_v48  ;;  %v3447_v56 = vmul.f32 %v9778_v63, %v2886_v53 }
 0x473   : > { %v7401_v62 = vpack.c.bf16 %v3430_v15, %v3429_v46  ;;  %v7437_v26 = vpack.c.bf16 %v3448_v57, %v3447_v56 }
 0x474   : > { %7428 = vmatpush3.bf16.msra.mxu0 %v9726_v48 }
 0x475   : > { %7402 = vmatprep.subr.bf16.mxu1 %v7401_v62  ;;  %7430 = vmatprep.subr.bf16.mxu0 %v7429_v22 }
 0x476   : > { %7404 = vmatpush3.bf16.msra.mxu1 %v7401_v62 }
 0x477   : > { %v6677_v16 = vpop.f32.mrb[68].mxu1  ;;  %v6708_v12 = vpop.f32.mrb[70].mxu0 }
 0x478   : > { %v3432_v24 = vmul.f32 %v9773_v3, %v6677_v16  ;;  %v2661_v17 = vpop.f32.mrb[69].mxu1  ;;  %7432 = vmatpush3.bf16.msra.mxu0 %v7429_v22  ;;  %v3450_v39 = vmul.f32 %v9783_v50, %v6708_v12  ;;  %v2896_v34 = vpop.f32.mrb[71].mxu0 }
 0x479   : > { %v3431_v44 = vmul.f32 %v9778_v63, %v2661_v17  ;;  %7434 = vmatprep.subr.bf16.mxu0 %v7433_v37  ;;  %v3449_v48 = vmul.f32 %v9787_v52, %v2896_v34 }
 0x47b   : > { %v7405_v30 = vpack.c.bf16 %v3432_v24, %v3431_v44  ;;  %v7441_v31 = vpack.c.bf16 %v3450_v39, %v3449_v48 }
 0x47c   : > { %7436 = vmatpush3.bf16.msra.mxu0 %v7433_v37  ;;  %v9795_v37 = vld [vmem:[#allocation8] sm:$0xff] }
 0x47d   : > { %7406 = vmatprep.subr.bf16.mxu1 %v7405_v30  ;;  %7438 = vmatprep.subr.bf16.mxu0 %v7437_v26 }
 0x47e   : > { %7408 = vmatpush3.bf16.msra.mxu1 %v7405_v30 }
 0x47f   : > { %v6680_v6 = vpop.f32.mrb[70].mxu1 }
 0x480   : > { %v3434_v22 = vmul.f32 %v9783_v50, %v6680_v6  ;;  %v2671_v9 = vpop.f32.mrb[71].mxu1  ;;  %7440 = vmatpush3.bf16.msra.mxu0 %v7437_v26 }
 0x481   : > { %v3433_v0 = vmul.f32 %v9787_v52, %v2671_v9  ;;  %7442 = vmatprep.subr.bf16.mxu0 %v7441_v31 }
 0x483   : > { %v7409_v10 = vpack.c.bf16 %v3434_v22, %v3433_v0  ;;  %v6715_v13 = vpop.f32.mrb[72].mxu1 }
 0x484   : > { %v3452_v42 = vmul.f32 %v9792_v20, %v6715_v13  ;;  %v3051_v45 = vpop.f32.mrb[73].mxu1  ;;  %7444 = vmatpush3.bf16.msra.mxu0 %v7441_v31 }
 0x485   : > { %v3451_v51 = vmul.f32 %v9795_v37, %v3051_v45  ;;  %7410 = vmatprep.subr.bf16.mxu1 %v7409_v10 }
 0x486   : > { %7412 = vmatpush3.bf16.msra.mxu1 %v7409_v10 }
 0x487   : > { %v7445_v43 = vpack.c.bf16 %v3452_v42, %v3451_v51  ;;  %v6743_v15 = vpop.f32.mrb[72].mxu0  ;;  %6973 = vmatmul.mubr.f32.vlgmr.msra.gmra.mrb[92].mxu0 %v9697_v14  ;;  %v6718_v27 = vpop.f32.mrb[74].mxu1 }
 0x488   : > { %v3468_v57 = vmul.f32 %v9792_v20, %v6743_v15  ;;  %v3276_v53 = vpop.f32.mrb[73].mxu0  ;;  %7042 = vmatprep.mubr.f32.mxu0 %v9748_v60  ;;  %v3454_v46 = vmul.f32 %v9665_v23, %v6718_v27  ;;  %v3061_v56 = vpop.f32.mrb[75].mxu1 }
 0x489   : > { %6938 = vmatmul.mubr.f32.vlgmr.msra.gmra.mrb[92].mxu1 %v9507_v55  ;;  %v3467_v62 = vmul.f32 %v9795_v37, %v3276_v53  ;;  %v3453_v26 = vmul.f32 %v9674_v19, %v3061_v56  ;;  %7446 = vmatprep.subr.bf16.mxu1 %v7445_v43 }
 0x48a   : > { %7007 = vmatprep.mubr.f32.mxu1 %v9648_v38  ;;  %7448 = vmatpush3.bf16.msra.mxu1 %v7445_v43 }
 0x48b   : > { %v7477_v14 = vpack.c.bf16 %v3468_v57, %v3467_v62  ;;  %v7449_v16 = vpack.c.bf16 %v3454_v46, %v3453_v26  ;;  %v12247_v26 = vld [vmem:[#allocation38_spill] sm:$0xff] }
 0x48d   : > { %7478 = vmatprep.subr.bf16.mxu0 %v7477_v14  ;;  %7450 = vmatprep.subr.bf16.mxu1 %v7449_v16 }
 0x48e   : > { %7480 = vmatpush3.bf16.msra.mxu0 %v7477_v14  ;;  %7452 = vmatpush3.bf16.msra.mxu1 %v7449_v16  ;;  %v11952_v14 = vrot.slane %v12247_v26, 6 }
 0x48f   : > { %v6746_v60 = vpop.f32.mrb[74].mxu0  ;;  %v6721_v12 = vpop.f32.mrb[76].mxu1 }
 0x490   : > { %v3470_v24 = vmul.f32 %v9665_v23, %v6746_v60  ;;  %v3286_v17 = vpop.f32.mrb[75].mxu0  ;;  %v3456_v39 = vmul.f32 %v9708_v5, %v6721_v12  ;;  %v3071_v34 = vpop.f32.mrb[77].mxu1  ;;  %v12248_v60 = vld [vmem:[#allocation37_spill] sm:$0xff] }
 0x491   : > { %v3469_v44 = vmul.f32 %v9674_v19, %v3286_v17  ;;  %v3455_v48 = vmul.f32 %v9717_v29, %v3071_v34  ;;  %v4345_v12 = vrot.slane %v12248_v60, 6  ;;  %v4443_v17 = vrot.slane %v12248_v60, 7 }
 0x493   : > { %v7481_v38 = vpack.c.bf16 %v3470_v24, %v3469_v44  ;;  %v7453_v30 = vpack.c.bf16 %v3456_v39, %v3455_v48  ;;  %v11951_v24 = vrot.slane %v12247_v26, 7  ;;  %v9825_v44 = vsel %vm4343_vm15, %v11952_v14, %v4345_v12  ;;  %v9827_v48 = vld [vmem:[#allocation10] sm:$0xff] }
 0x494   : > { %12249 = vst [vmem:[#allocation42_spill] sm:$0xff] %v9825_v44  ;;  %v12263_v26 = vrot.slane %v12248_v60, 3 }
 0x495   : > { %7482 = vmatprep.subr.bf16.mxu0 %v7481_v38  ;;  %7454 = vmatprep.subr.bf16.mxu1 %v7453_v30 }
 0x496   : > { %7484 = vmatpush3.bf16.msra.mxu0 %v7481_v38  ;;  %7456 = vmatpush3.bf16.msra.mxu1 %v7453_v30  ;;  %v9832_v38 = vsel %vm4441_vm0, %v11951_v24, %v4443_v17  ;;  %v9834_v30 = vld [vmem:[#allocation10 + $0x10] sm:$0xff] }
 0x497   : > { %v6749_v31 = vpop.f32.mrb[76].mxu0  ;;  %12250 = vst [vmem:[#allocation44_spill] sm:$0xff] %v9832_v38 }
 0x498   : > { %v6724_v6 = vpop.f32.mrb[78].mxu1  ;;  %v3472_v22 = vmul.f32 %v9708_v5, %v6749_v31  ;;  %v3296_v9 = vpop.f32.mrb[77].mxu0 }
 0x499   : > { %v3458_v0 = vmul.f32 %v9713_v40, %v6724_v6  ;;  %v3081_v10 = vpop.f32.mrb[79].mxu1  ;;  %v3471_v13 = vmul.f32 %v9717_v29, %v3296_v9 }
 0x49a   : > { %v3457_v42 = vmul.f32 %v9721_v21, %v3081_v10 }
 0x49b   : > { %v7485_v45 = vpack.c.bf16 %v3472_v22, %v3471_v13 }
 0x49c   : > { %v7457_v51 = vpack.c.bf16 %v3458_v0, %v3457_v42  ;;  %v4409_v42 = vmul.f32 %v9827_v48, %v9825_v44 }
 0x49d   : > { %7486 = vmatprep.subr.bf16.mxu0 %v7485_v45 }
 0x49e   : > { %7458 = vmatprep.subr.bf16.mxu1 %v7457_v51  ;;  %7488 = vmatpush3.bf16.msra.mxu0 %v7485_v45  ;;  %v4494_v45 = vmul.f32 %v9834_v30, %v9832_v38 }
 0x49f   : > { %7460 = vmatpush3.bf16.msra.mxu1 %v7457_v51  ;;  %v6752_v43 = vpop.f32.mrb[78].mxu0 }
 0x4a0   : > { %v6727_v15 = vpop.f32.mrb[80].mxu1  ;;  %v3474_v27 = vmul.f32 %v9713_v40, %v6752_v43  ;;  %v3306_v57 = vpop.f32.mrb[79].mxu0  ;;  %v9844_v43 = vld [vmem:[#allocation10 + $0x20] sm:$0xff] }
 0x4a1   : > { %v3460_v53 = vmul.f32 %v9737_v28, %v6727_v15  ;;  %v3091_v46 = vpop.f32.mrb[81].mxu1  ;;  %v3473_v56 = vmul.f32 %v9721_v21, %v3306_v57  ;;  %v11950_v15 = vrot.slane %v12248_v60, 1 }
 0x4a2   : > { %v3459_v62 = vmul.f32 %v9743_v32, %v3091_v46  ;;  %v9848_v46 = vpop.xlane.xlu1 %1008 }
 0x4a3   : > { %v7489_v16 = vpack.c.bf16 %v3474_v27, %v3473_v56  ;;  %v12251_v27 = vld [vmem:[#allocation20_spill] sm:$0xff]  ;;  %7803 = vrsqrt.f32 %v9848_v46  ;;  %vm1117_vm6 = vcmp.eq.f32.partialorder %v9848_v46, inf  ;;  %vm1119_vm7 = vcmp.eq.f32.partialorder %v9848_v46, 0.0 }
 0x4a4   : > { %v7461_v39 = vpack.c.bf16 %v3460_v53, %v3459_v62  ;;  %v11953_v57 = vrot.slane %v12251_v27, 1  ;;  %v11954_v56 = vrot.slane %v12251_v27, 6  ;;  %v11955_v62 = vrot.slane %v12251_v27, 7 }
 0x4a5   : > { %7490 = vmatprep.subr.bf16.mxu0 %v7489_v16  ;;  %v11967_v25 = vrot.slane %v12251_v27, 4 }
 0x4a6   : > { %7462 = vmatprep.subr.bf16.mxu1 %v7461_v39  ;;  %7492 = vmatpush3.bf16.msra.mxu0 %v7489_v16  ;;  %v4510_v16 = vadd.f32 %v4494_v45, %v4409_v42  ;;  %v1361_v14 = vpop.xlane.xlu1 %1360 }
 0x4a7   : > { %7464 = vmatpush3.bf16.msra.mxu1 %v7461_v39  ;;  %v6755_v34 = vpop.f32.mrb[80].mxu0  ;;  %v4529_v39 = vmul.f32 %v9844_v43, %v12248_v60  ;;  %7805 = vrsqrt.f32 %v1361_v14 }
 0x4a8   : > { %v6730_v31 = vpop.f32.mrb[82].mxu1  ;;  %v3476_v6 = vmul.f32 %v9737_v28, %v6755_v34  ;;  %v3316_v22 = vpop.f32.mrb[81].mxu0 }
 0x4a9   : > { %v3462_v9 = vmul.f32 %v9761_v1, %v6730_v31  ;;  %v3101_v0 = vpop.f32.mrb[83].mxu1  ;;  %v3475_v10 = vmul.f32 %v9743_v32, %v3316_v22  ;;  %v9859_v31 = vsel %vm4563_vm1, %v11950_v15, %v11953_v57  ;;  %v9876_v15 = vsel %vm4441_vm0, %v4443_v17, %v11955_v62  ;;  %v9882_v57 = vld [vmem:[#allocation10 + $0x8] sm:$0xff]  ;;  %v9884_v22 = vld [vmem:[#allocation10 + $0x18] sm:$0xff] }
 0x4aa   : > { %v3461_v13 = vmul.f32 %v9766_v59, %v3101_v0  ;;  %12252 = vst [vmem:[#allocation46_spill] sm:$0xff] %v9859_v31  ;;  %12254 = vst [vmem:[#allocation48_spill] sm:$0xff] %v9876_v15  ;;  %v4545_v24 = vadd.f32 %v4529_v39, %v4510_v16  ;;  %v4495_v39 = vmul.f32 %v9884_v22, %v9876_v15 }
 0x4ab   : > { %v7493_v51 = vpack.c.bf16 %v3476_v6, %v3475_v10  ;;  %v9861_v6 = vld [vmem:[#allocation10 + $0x30] sm:$0xff] }
 0x4ac   : > { %v7465_v53 = vpack.c.bf16 %v3462_v9, %v3461_v13  ;;  %v11956_v9 = vrot.slane %v12251_v27, 2 }
 0x4ad   : > { %7494 = vmatprep.subr.bf16.mxu0 %v7493_v51 }
 0x4ae   : > { %7466 = vmatprep.subr.bf16.mxu1 %v7465_v53  ;;  %7496 = vmatpush3.bf16.msra.mxu0 %v7493_v51 }
 0x4af   : > { %7468 = vmatpush3.bf16.msra.mxu1 %v7465_v53  ;;  %v6758_v34 = vpop.f32.mrb[82].mxu0  ;;  %v9871_v53 = vsel %vm4343_vm15, %v4345_v12, %v11954_v56  ;;  %v12255_v12 = vrot.slane %v12248_v60, 2  ;;  %v9893_v56 = vld [vmem:[#allocation10 + $0x40] sm:$0xff] }
 0x4b0   : > { %v6733_v0 = vpop.f32.mrb[84].mxu1  ;;  %v3478_v10 = vmul.f32 %v9761_v1, %v6758_v34  ;;  %v3326_v13 = vpop.f32.mrb[83].mxu0  ;;  %12253 = vst [vmem:[#allocation47_spill] sm:$0xff] %v9871_v53  ;;  %v4410_v16 = vmul.f32 %v9882_v57, %v9871_v53 }
 0x4b1   : > { %v3464_v42 = vmul.f32 %v9773_v3, %v6733_v0  ;;  %v3111_v45 = vpop.f32.mrb[85].mxu1  ;;  %v3477_v51 = vmul.f32 %v9766_v59, %v3326_v13  ;;  %v4614_v0 = vmul.f32 %v9861_v6, %v9859_v31  ;;  %v9891_v17 = vsel %vm4648_vm2, %v12255_v12, %v11956_v9  ;;  %v9902_v31 = vld [vmem:[#allocation10 + $0x50] sm:$0xff] }
 0x4b2   : > { %v3463_v34 = vmul.f32 %v9778_v63, %v3111_v45  ;;  %12256 = vst [vmem:[#allocation49_spill] sm:$0xff] %v9891_v17  ;;  %v4699_v12 = vmul.f32 %v9893_v56, %v9891_v17  ;;  %v4511_v49 = vadd.f32 %v4495_v39, %v4410_v16 }
 0x4b3   : > { %v7497_v13 = vpack.c.bf16 %v3478_v10, %v3477_v51  ;;  %v12257_v10 = vld [vmem:[#allocation19_spill] sm:$0xff]  ;;  %v4630_v62 = vadd.f32 %v4614_v0, %v4545_v24 }
 0x4b4   : > { %v7469_v45 = vpack.c.bf16 %v3464_v42, %v3463_v34  ;;  %12258 = vst [vmem:[#allocation19_spill] sm:$0xff] %v9902_v31  ;;  %v12259_v54 = vrot.slane %v12257_v10, 1 }
 0x4b5   : > { %7498 = vmatprep.subr.bf16.mxu0 %v7497_v13  ;;  %v4715_v39 = vadd.f32 %v4699_v12, %v4630_v62  ;;  %v7509_v62 = vpack.c.bf16 %v9792_v20, %v9795_v37  ;;  %v9937_v12 = vld [vmem:[#allocation10 + $0x38] sm:$0xff] }
 0x4b6   : > { %7470 = vmatprep.subr.bf16.mxu1 %v7469_v45  ;;  %7500 = vmatpush3.bf16.msra.mxu0 %v7497_v13  ;;  %v9907_v13 = vld [vmem:[#allocation10 + $0x28] sm:$0xff] }
 0x4b7   : > { %7472 = vmatpush3.bf16.msra.mxu1 %v7469_v45  ;;  %v6761_v9 = vpop.f32.mrb[84].mxu0  ;;  %v4530_v51 = vmul.f32 %v9907_v13, %v12251_v27 }
 0x4b8   : > { %v6736_v38 = vpop.f32.mrb[86].mxu1  ;;  %v3480_v44 = vmul.f32 %v9773_v3, %v6761_v9  ;;  %v3336_v14 = vpop.f32.mrb[85].mxu0  ;;  %v12260_v9 = vrot.slane %v12251_v27, 1 }
 0x4b9   : > { %v3466_v24 = vmul.f32 %v9783_v50, %v6736_v38  ;;  %v3121_v0 = vpop.f32.mrb[87].mxu1  ;;  %v3479_v45 = vmul.f32 %v9778_v63, %v3336_v14  ;;  %v4734_v38 = vmul.f32 %v9902_v31, %v9891_v17  ;;  %v12262_v14 = vrot.slane %v12251_v27, 3 }
 0x4ba   : > { %v3465_v34 = vmul.f32 %v9787_v52, %v3121_v0  ;;  %v9920_v16 = vsel %vm4563_vm1, %v12260_v9, %v12259_v54  ;;  %v9931_v0 = vld [vmem:[#allocation10 + $0x60] sm:$0xff]  ;;  %v7804_v54 = vpop.eup %7803  ;;  %v12268_v17 = vrot.slane %v12248_v60, 4 }
 0x4bb   : > { %12261 = vst [vmem:[#allocation50_spill] sm:$0xff] %v9920_v16  ;;  %v7501_v47 = vpack.c.bf16 %v3480_v44, %v3479_v45  ;;  %v9929_v42 = vsel %vm4768_vm3, %v12263_v26, %v12262_v14  ;;  %v4546_v44 = vadd.f32 %v4530_v51, %v4511_v49  ;;  %v4615_v26 = vmul.f32 %v9937_v12, %v9920_v16 }
 0x4bc   : > { %12264 = vst [vmem:[#allocation51_spill] sm:$0xff] %v9929_v42  ;;  %v7473_v9 = vpack.c.bf16 %v3466_v24, %v3465_v34  ;;  %v12265_v45 = vrot.slane %v12257_v10, 2  ;;  %v12266_v14 = vrot.slane %v12251_v27, 2  ;;  %v4750_v34 = vadd.f32 %v4734_v38, %v4715_v39  ;;  %v7806_v39 = vpop.eup %7805 }
 0x4bd   : > { %7502 = vmatprep.subr.bf16.mxu0 %v7501_v47  ;;  %v4819_v20 = vmul.f32 %v9931_v0, %v9929_v42  ;;  %v1116_v51 = vmul.f32 %v7804_v54, %v9848_v46  ;;  %v7513_v54 = vpack.c.bf16 %v9665_v23, %v9674_v19  ;;  %v4631_v49 = vadd.f32 %v4615_v26, %v4546_v44  ;;  %v12274_v44 = vld [vmem:[#allocation22_spill] sm:$0xff] }
 0x4be   : > { %v9946_v2 = vsel %vm4648_vm2, %v12266_v14, %v12265_v45  ;;  %7474 = vmatprep.subr.bf16.mxu1 %v7473_v9  ;;  %7504 = vmatpush3.bf16.msra.mxu0 %v7501_v47  ;;  %v9958_v45 = vsel %vm4853_vm4, %v12268_v17, %v11967_v25  ;;  %v9960_v47 = vld [vmem:[#allocation10 + $0x70] sm:$0xff]  ;;  %v12271_v42 = vrot.slane %v12251_v27, 5  ;;  %v12272_v23 = vrot.slane %v12248_v60, 5 }
 0x4bf   : > { %12267 = vst [vmem:[#allocation52_spill] sm:$0xff] %v9946_v2  ;;  %7476 = vmatpush3.bf16.msra.mxu1 %v7473_v9  ;;  %v6764_v24 = vpop.f32.mrb[86].mxu0  ;;  %12269 = vst [vmem:[#allocation53_spill] sm:$0xff] %v9958_v45  ;;  %v9965_v9 = vld [vmem:[#allocation10 + $0x48] sm:$0xff]  ;;  %v4835_v25 = vadd.f32 %v4819_v20, %v4750_v34  ;;  %v1118_v26 = vsel %vm1117_vm6, %v9848_v46, %v1116_v51  ;;  %v1393_v36 = vmul.f32 %v7806_v39, %v12275_v4  ;;  %v10080_v60 = vld [vmem:[#allocation10 + $0xd0] sm:$0xff] }
 0x4c0   : > { %12270 = vst [vmem:[#allocation54_spill] sm:$0xff] %v9960_v47  ;;  %v3482_v38 = vmul.f32 %v9783_v50, %v6764_v24  ;;  %v3346_v14 = vpop.f32.mrb[87].mxu0  ;;  %7510 = vmatprep.subr.bf16.mxu1 %v7509_v62  ;;  %v4700_v17 = vmul.f32 %v9965_v9, %v9946_v2  ;;  %v4904_v24 = vmul.f32 %v9960_v47, %v9958_v45  ;;  %v1120_v34 = vand.u32 2147483648, %v9848_v46 }
 0x4c1   : > { %v3481_v37 = vmul.f32 %v9787_v52, %v3346_v14  ;;  %v9979_v19 = vsel %vm4938_vm5, %v12272_v23, %v12271_v42  ;;  %v7517_v20 = vpack.c.bf16 %v9708_v5, %v9717_v29  ;;  %v11973_v45 = vrot.slane %v12257_v10, 3  ;;  %v9999_v29 = vld [vmem:[#allocation10 + $0x90] sm:$0xff]  ;;  %12288 = vst [vmem:[#allocation59_spill] sm:$0xff] %v10080_v60 }
 0x4c2   : > { %7008 = vmatmul.mubr.f32.vlgmr.msra.gmra.mrb[94].mxu1 %v9614_v11  ;;  %12273 = vst [vmem:[#allocation55_spill] sm:$0xff] %v9979_v19  ;;  %v9984_v11 = vld [vmem:[#allocation10 + $0x80] sm:$0xff]  ;;  %v1121_v42 = vsel %vm1119_vm7, %v1120_v34, %v1118_v26  ;;  %v4716_v39 = vadd.f32 %v4700_v17, %v4631_v49  ;;  %12278 = vst [vmem:[#allocation56_spill] sm:$0xff] %v9999_v29  ;;  %v7521_v46 = vpack.c.bf16 %v9713_v40, %v9721_v21  ;;  %v10012_v49 = vld [vmem:[#allocation10 + $0x68] sm:$0xff] }
 0x4c3   : > { %v7505_v14 = vpack.c.bf16 %v3482_v38, %v3481_v37  ;;  %7512 = vmatpush3.bf16.msra.mxu1 %v7509_v62  ;;  %7077 = vmatprep.mubr.f32.mxu1 %v12274_v44  ;;  %12276 = vst [vmem:[#allocation22_spill] sm:$0xff] %v9984_v11  ;;  %v9991_v62 = vld [vmem:[#allocation10 + $0x58] sm:$0xff]  ;;  %v4920_v37 = vadd.f32 %v4904_v24, %v4835_v25  ;;  %v12279_v25 = vrot.slane %v12251_v27, 3  ;;  %12280 = vst [vmem:[#allocation57_spill] sm:$0xff] %v10012_v49  ;;  %v10018_v21 = vld [vmem:[#allocation10 + $0xa0] sm:$0xff] }
 0x4c4   : > { %7514 = vmatprep.subr.bf16.mxu1 %v7513_v54  ;;  %12277 = vst [vmem:[#allocation43_spill] sm:$0xff] %v9991_v62  ;;  %v4989_v4 = vmul.f32 %v9984_v11, %v9979_v19  ;;  %v9995_v51 = vmul.f32 %v1393_v36, %v1121_v42  ;;  %v4735_v5 = vmul.f32 %v9991_v62, %v9946_v2  ;;  %v11971_v36 = vrot.slane %v12257_v10, 4  ;;  %v10032_v42 = vld [vmem:[#allocation10 + $0x78] sm:$0xff] }
 0x4c5   : > { %7506 = vmatprep.subr.bf16.mxu0 %v7505_v14  ;;  %v10008_v38 = vsel %vm4768_vm3, %v12279_v25, %v11973_v45  ;;  %v5024_v17 = vmul.f32 %v9999_v29, %v9871_v53  ;;  %12281 = vst [vmem:[#allocation58_spill] sm:$0xff] %v10018_v21  ;;  %v7525_v23 = vpack.c.bf16 %v9737_v28, %v9743_v32  ;;  %v12282_v44 = vrot.slane %v12251_v27, 4  ;;  %v10069_v45 = vld [vmem:[#allocation10 + $0xc0] sm:$0xff]  ;;  %v10078_v19 = vld [vmem:[#allocation10 + $0x98] sm:$0xff] }
 0x4c6   : > { %7508 = vmatpush3.bf16.msra.mxu0 %v7505_v14  ;;  %v4751_v24 = vadd.f32 %v4735_v5, %v4716_v39  ;;  %v4820_v40 = vmul.f32 %v10012_v49, %v10008_v38  ;;  %v4448_v14 = vrot.slane %v12257_v10, 7  ;;  %v11972_v34 = vrot.slane %v12257_v10, 5  ;;  %v10038_v39 = vld [vmem:[#allocation10 + $0xb0] sm:$0xff] }
 0x4c7   : > { %7516 = vmatpush3.bf16.msra.mxu1 %v7513_v54  ;;  %v5005_v54 = vadd.f32 %v4989_v4, %v4920_v37  ;;  %v10028_v26 = vsel %vm4853_vm4, %v12282_v44, %v11971_v36  ;;  %v5059_v4 = vmul.f32 %v10018_v21, %v9871_v53  ;;  %v7529_v5 = vpack.c.bf16 %v9761_v1, %v9766_v59 }
 0x4c8   : > { %7518 = vmatprep.subr.bf16.mxu1 %v7517_v20  ;;  %v4836_v28 = vadd.f32 %v4820_v40, %v4751_v24  ;;  %v4905_v32 = vmul.f32 %v10032_v42, %v10028_v26  ;;  %v12283_v25 = vrot.slane %v12251_v27, 7  ;;  %v10059_v40 = vld [vmem:[#allocation10 + $0x88] sm:$0xff]  ;;  %v5094_v59 = vmul.f32 %v10038_v39, %v9876_v15 }
 0x4c9   : > { %7043 = vmatmul.mubr.f32.vlgmr.msra.gmra.mrb[94].mxu0 %v9995_v51  ;;  %v5040_v37 = vadd.f32 %v5024_v17, %v5005_v54  ;;  %v12284_v54 = vrot.slane %v12251_v27, 5  ;;  %v12285_v17 = vrot.slane %v12251_v27, 6 }
 0x4ca   : > { %v10045_v44 = vsel %vm4441_vm0, %v12283_v25, %v4448_v14 }
 0x4cb   : > { %7520 = vmatpush3.bf16.msra.mxu1 %v7517_v20  ;;  %v4364_v20 = vrot.slane %v12257_v10, 6  ;;  %v5075_v1 = vadd.f32 %v5059_v4, %v5040_v37  ;;  %v4496_v36 = vmul.f32 %v9834_v30, %v10045_v44  ;;  %v7533_v37 = vpack.c.bf16 %v9773_v3, %v9778_v63  ;;  %v12286_v4 = vld [vmem:[#allocation34_spill] sm:$0xff] }
 0x4cc   : > { %7522 = vmatprep.subr.bf16.mxu1 %v7521_v46  ;;  %12287 = vst [vmem:[#allocation34_spill] sm:$0xff] %v10078_v19  ;;  %v7537_v3 = vpack.c.bf16 %v9783_v50, %v9787_v52  ;;  %v12289_v63 = vrot.slane %v12257_v10, 1 }
 0x4cd   : > { %v10057_v24 = vsel %vm4343_vm15, %v12285_v17, %v4364_v20  ;;  %v4567_v17 = vrot.slane %v12286_v4, 1  ;;  %v5110_v15 = vadd.f32 %v5094_v59, %v5075_v1 }
 0x4ce   : > { %v4411_v25 = vmul.f32 %v9827_v48, %v10057_v24 }
 0x4cf   : > { %7524 = vmatpush3.bf16.msra.mxu1 %v7521_v46  ;;  %v10052_v46 = vsel %vm4938_vm5, %v12284_v54, %v11972_v34  ;;  %v4921_v54 = vadd.f32 %v4905_v32, %v4836_v28  ;;  %v4531_v28 = vmul.f32 %v9844_v43, %v12257_v10  ;;  %v10087_v1 = vsel %vm4563_vm1, %v12289_v63, %v4567_v17  ;;  %v10098_v63 = vld [vmem:[#allocation10 + $0xa8] sm:$0xff] }
 0x4d0   : > { %7526 = vmatprep.subr.bf16.mxu1 %v7525_v23  ;;  %v4990_v34 = vmul.f32 %v10059_v40, %v10052_v46  ;;  %v4512_v53 = vadd.f32 %v4496_v36, %v4411_v25  ;;  %v5025_v36 = vmul.f32 %v10078_v19, %v10057_v24  ;;  %v4616_v52 = vmul.f32 %v9861_v6, %v10087_v1 }
 0x4d1   : > { %12290 = vst [vmem:[#allocation60_spill] sm:$0xff] %v10098_v63 }
 0x4d2   : > { %v5006_v32 = vadd.f32 %v4990_v34, %v4921_v54  ;;  %v5164_v34 = vmul.f32 %v10080_v60, %v9920_v16  ;;  %v4547_v50 = vadd.f32 %v4531_v28, %v4512_v53  ;;  %v12293_v54 = vrot.slane %v12286_v4, 6 }
 0x4d3   : > { %7528 = vmatpush3.bf16.msra.mxu1 %v7525_v23  ;;  %v5129_v23 = vmul.f32 %v10069_v45, %v12251_v27  ;;  %v10100_v27 = vld [vmem:[#allocation10 + $0xe0] sm:$0xff]  ;;  %v12294_v60 = vrot.slane %v12286_v4, 7 }
 0x4d4   : > { %7530 = vmatprep.subr.bf16.mxu1 %v7529_v5  ;;  %12291 = vst [vmem:[#allocation61_spill] sm:$0xff] %v10100_v27  ;;  %v5041_v25 = vadd.f32 %v5025_v36, %v5006_v32  ;;  %v5199_v28 = vmul.f32 %v10100_v27, %v9946_v2  ;;  %v10116_v16 = vsel %vm4343_vm15, %v4364_v20, %v12293_v54  ;;  %v10125_v36 = vld [vmem:[#allocation10 + $0xb8] sm:$0xff]  ;;  %v12300_v27 = vrot.slane %v12286_v4, 3 }
 0x4d5   : > { %v5145_v59 = vadd.f32 %v5129_v23, %v5110_v15  ;;  %v12292_v15 = vrot.slane %v12257_v10, 2  ;;  %v10121_v19 = vsel %vm4441_vm0, %v4448_v14, %v12294_v60  ;;  %12295 = vst [vmem:[#allocation62_spill] sm:$0xff] %v10125_v36  ;;  %v5095_v20 = vmul.f32 %v10125_v36, %v10045_v44  ;;  %v10145_v36 = vld [vmem:[#allocation10 + $0x100] sm:$0xff] }
 0x4d6   : > { %v4412_v54 = vmul.f32 %v9882_v57, %v10116_v16  ;;  %v4497_v60 = vmul.f32 %v9884_v22, %v10121_v19  ;;  %12299 = vst [vmem:[#allocation64_spill] sm:$0xff] %v10145_v36 }
 0x4d7   : > { %7532 = vmatpush3.bf16.msra.mxu1 %v7529_v5  ;;  %v11985_v5 = vrot.slane %v12286_v4, 2  ;;  %v5180_v53 = vadd.f32 %v5164_v34, %v5145_v59  ;;  %v10127_v59 = vld [vmem:[#allocation10 + $0xf0] sm:$0xff]  ;;  %v10143_v34 = vld [vmem:[#allocation10 + $0xc8] sm:$0xff] }
 0x4d8   : > { %7534 = vmatprep.subr.bf16.mxu1 %v7533_v37  ;;  %12296 = vst [vmem:[#allocation63_spill] sm:$0xff] %v10127_v59 }
 0x4d9   : > { %v10107_v23 = vsel %vm4648_vm2, %v12292_v15, %v11985_v5  ;;  %v4632_v15 = vadd.f32 %v4616_v52, %v4547_v50  ;;  %v5215_v14 = vadd.f32 %v5199_v28, %v5180_v53  ;;  %v12297_v50 = vld [vmem:[#allocation35_spill] sm:$0xff]  ;;  %v11995_v28 = vrot.slane %v12286_v4, 4 }
 0x4da   : > { %v4701_v32 = vmul.f32 %v9893_v56, %v10107_v23  ;;  %12298 = vst [vmem:[#allocation35_spill] sm:$0xff] %v10143_v34 }
 0x4db   : > { %7536 = vmatpush3.bf16.msra.mxu1 %v7533_v37  ;;  %v5060_v37 = vmul.f32 %v10098_v63, %v10057_v24 }
 0x4dc   : > { %7538 = vmatprep.subr.bf16.mxu1 %v7537_v3 }
 0x4dd   : > { %v5076_v5 = vadd.f32 %v5060_v37, %v5041_v25  ;;  %v4717_v25 = vadd.f32 %v4701_v32, %v4632_v15  ;;  %v4736_v37 = vmul.f32 %v9902_v31, %v10107_v23  ;;  %v4513_v15 = vadd.f32 %v4497_v60, %v4412_v54  ;;  %v10171_v60 = vld [vmem:[#allocation10 + $0xd8] sm:$0xff] }
 0x4de   : > { %v4532_v32 = vmul.f32 %v9907_v13, %v12286_v4  ;;  %v12302_v31 = vrot.slane %v12297_v50, 1  ;;  %12303 = vst [vmem:[#allocation65_spill] sm:$0xff] %v10171_v60 }
 0x4df   : > { %7540 = vmatpush3.bf16.msra.mxu1 %v7537_v3  ;;  %v5234_v3 = vmul.f32 %v10127_v59, %v9946_v2  ;;  %v5111_v52 = vadd.f32 %v5095_v20, %v5076_v5  ;;  %v5269_v59 = vmul.f32 %v10145_v36, %v10008_v38  ;;  %v11998_v5 = vrot.slane %v12297_v50, 2 }
 0x4e0   : > { %v4752_v20 = vadd.f32 %v4736_v37, %v4717_v25  ;;  %v12305_v38 = vrot.slane %v12257_v10, 4 }
 0x4e1   : > { %v5250_v2 = vadd.f32 %v5234_v3, %v5215_v14  ;;  %v4548_v3 = vadd.f32 %v4532_v32, %v4513_v15 }
 0x4e2   : > { %7078 = vmatmul.mubr.f32.vlgmr.msra.gmra.mrb[96].mxu1 %v9463_v58  ;;  %v12301_v58 = vrot.slane %v12257_v10, 3  ;;  %v10180_v14 = vsel %vm4853_vm4, %v12305_v38, %v11995_v28  ;;  %v12306_v38 = vrot.slane %v12286_v4, 2 }
 0x4e3   : > { %7080 = vmatprep.mubr.f32.mxu1 %v9606_v35  ;;  %v5130_v35 = vmul.f32 %v10143_v34, %v12257_v10  ;;  %v5285_v37 = vadd.f32 %v5269_v59, %v5250_v2  ;;  %v4906_v32 = vmul.f32 %v9960_v47, %v10180_v14  ;;  %v10203_v2 = vld [vmem:[#allocation10 + $0x120] sm:$0xff]  ;;  %v12311_v59 = vld [vmem:[#allocation32_spill] sm:$0xff] }
 0x4e4   : > { %v10152_v53 = vsel %vm4768_vm3, %v12301_v58, %v12300_v27  ;;  %v10165_v27 = vsel %vm4563_vm1, %v4567_v17, %v12302_v31  ;;  %v5165_v17 = vmul.f32 %v10171_v60, %v10087_v1  ;;  %12310 = vst [vmem:[#allocation69_spill] sm:$0xff] %v10203_v2 }
 0x4e5   : > { %v4821_v54 = vmul.f32 %v9931_v0, %v10152_v53  ;;  %v5146_v31 = vadd.f32 %v5130_v35, %v5111_v52  ;;  %v4617_v25 = vmul.f32 %v9937_v12, %v10165_v27  ;;  %v10195_v52 = vsel %vm4648_vm2, %v12306_v38, %v11998_v5  ;;  %v12308_v35 = vld [vmem:[#allocation36_spill] sm:$0xff] }
 0x4e6   : > { %7081 = vmatmul.mubr.f32.gmra.mrb[98].mxu1 %v9557_v18  ;;  %v10173_v18 = vld [vmem:[#allocation10 + $0x110] sm:$0xff]  ;;  %12307 = vst [vmem:[#allocation67_spill] sm:$0xff] %v10195_v52  ;;  %v12312_v5 = vrot.slane %v12286_v4, 5  ;;  %v4702_v47 = vmul.f32 %v9965_v9, %v10195_v52 }
 0x4e7   : > { %7083 = vmatprep.mubr.f32.mxu1 %v9509_v61  ;;  %12304 = vst [vmem:[#allocation66_spill] sm:$0xff] %v10173_v18  ;;  %v5304_v58 = vmul.f32 %v10173_v18, %v10028_v26  ;;  %v4837_v15 = vadd.f32 %v4821_v54, %v4752_v20  ;;  %v5181_v18 = vadd.f32 %v5165_v17, %v5146_v31  ;;  %v12005_v54 = vrot.slane %v12311_v59, 7 }
 0x4e8   : > { %v4633_v28 = vadd.f32 %v4617_v25, %v4548_v3  ;;  %v5339_v31 = vmul.f32 %v10203_v2, %v10052_v46  ;;  %v12316_v25 = vrot.slane %v12311_v59, 6  ;;  %v12319_v46 = vld [vmem:[#allocation24_spill] sm:$0xff]  ;;  %v4737_v2 = vmul.f32 %v9991_v62, %v10195_v52 }
 0x4e9   : > { %v5320_v26 = vadd.f32 %v5304_v58, %v5285_v37  ;;  %v4922_v61 = vadd.f32 %v4906_v32, %v4837_v15  ;;  %v4157_v58 = vmul.f32 %v12319_v46, %v9507_v55  ;;  %v12320_v15 = vrot.slane %v12308_v35, 7 }
 0x4ea   : > { %7084 = vmatmul.mubr.f32.gmra.mrb[100].mxu1 %v9466_v7  ;;  %v10201_v7 = vld [vmem:[#allocation10 + $0xe8] sm:$0xff]  ;;  %v4718_v17 = vadd.f32 %v4702_v47, %v4633_v28  ;;  %v12323_v46 = vrot.slane %v12286_v4, 3  ;;  %v12324_v28 = vld [vmem:[#allocation45_spill] sm:$0xff]  ;;  %v12327_v47 = vrot.slane %v12297_v50, 6  ;;  %v12341_v62 = vrot.slane %v12286_v4, 5 }
 0x4eb   : > { %7086 = vmatprep.mubr.f32.mxu1 %v9701_v8  ;;  %12309 = vst [vmem:[#allocation68_spill] sm:$0xff] %v10201_v7  ;;  %v5200_v38 = vmul.f32 %v10201_v7, %v10107_v23  ;;  %v12313_v8 = vrot.slane %v12257_v10, 5  ;;  %v10224_v7 = vld [vmem:[#allocation10 + $0xf8] sm:$0xff]  ;;  %v10246_v32 = vsel %vm4441_vm0, %v12320_v15, %v12005_v54  ;;  %v5355_v55 = vadd.f32 %v5339_v31, %v5320_v26  ;;  %v10263_v54 = vld [vmem:[#allocation10 + $0x108] sm:$0xff] }
 0x4ec   : > { %12314 = vst [vmem:[#allocation70_spill] sm:$0xff] %v10224_v7  ;;  %12321 = vst [vmem:[#allocation24_spill] sm:$0xff] %v10246_v32  ;;  %v5026_v26 = vmul.f32 %v9999_v29, %v10116_v16  ;;  %v12329_v31 = vrot.slane %v12297_v50, 7 }
 0x4ed   : > { %v10214_v20 = vsel %vm4938_vm5, %v12313_v8, %v12312_v5  ;;  %v10226_v5 = vld [vmem:[#allocation10 + $0x130] sm:$0xff]  ;;  %v5216_v8 = vadd.f32 %v5200_v38, %v5181_v18  ;;  %v12322_v38 = vrot.slane %v12297_v50, 3  ;;  %12325 = vst [vmem:[#allocation45_spill] sm:$0xff] %v10263_v54 }
 0x4ee   : > { %7087 = vmatmul.mubr.f32.gmra.mrb[102].mxu1 %v9660_v33  ;;  %12315 = vst [vmem:[#allocation71_spill] sm:$0xff] %v10226_v5  ;;  %v4991_v3 = vmul.f32 %v9984_v11, %v10214_v20  ;;  %v12317_v33 = vrot.slane %v12308_v35, 6  ;;  %v5374_v18 = vmul.f32 %v10226_v5, %v10057_v24  ;;  %v5270_v35 = vmul.f32 %v10263_v54, %v10152_v53 }
 0x4ef   : > { %7089 = vmatprep.mubr.f32.mxu1 %v9561_v41  ;;  %v5235_v41 = vmul.f32 %v10224_v7, %v10107_v23  ;;  %v10259_v15 = vsel %vm4768_vm3, %v12323_v46, %v12322_v38  ;;  %v4508_v46 = vmul.f32 %v9834_v30, %v10246_v32  ;;  %v12333_v32 = vrot.slane %v12297_v50, 4  ;;  %v12339_v7 = vld [vmem:[#allocation33_spill] sm:$0xff] }
 0x4f0   : > { %v10235_v37 = vsel %vm4343_vm15, %v12317_v33, %v12316_v25  ;;  %v10265_v25 = vld [vmem:[#allocation10 + $0x140] sm:$0xff]  ;;  %v12340_v11 = vrot.slane %v12297_v50, 5 }
 0x4f1   : > { %12318 = vst [vmem:[#allocation72_spill] sm:$0xff] %v10235_v37  ;;  %12326 = vst [vmem:[#allocation73_spill] sm:$0xff] %v10265_v25  ;;  %v5251_v33 = vadd.f32 %v5235_v41, %v5216_v8  ;;  %v4423_v38 = vmul.f32 %v9827_v48, %v10235_v37  ;;  %v12330_v8 = vrot.slane %v12286_v4, 7  ;;  %v4822_v41 = vmul.f32 %v10012_v49, %v10259_v15  ;;  %v12332_v37 = vld [vmem:[#allocation21_spill] sm:$0xff] }
 0x4f2   : > { %7090 = vmatmul.mubr.f32.gmra.mrb[104].mxu1 %v4157_v58  ;;  %v5007_v58 = vadd.f32 %v4991_v3, %v4922_v61  ;;  %v12328_v61 = vrot.slane %v12286_v4, 6  ;;  %v10328_v54 = vsel %vm4938_vm5, %v12341_v62, %v12340_v11 }
 0x4f3   : > { %7092 = vmatprep.mubr.f32.mxu1 %v12324_v28  ;;  %v4753_v28 = vadd.f32 %v4737_v2, %v4718_v17  ;;  %v10288_v53 = vsel %vm4441_vm0, %v12330_v8, %v12329_v31  ;;  %v5390_v2 = vadd.f32 %v5374_v18, %v5355_v55  ;;  %v5409_v17 = vmul.f32 %v10265_v25, %v10057_v24  ;;  %v12335_v31 = vld [vmem:[#allocation39_spill] sm:$0xff]  ;;  %v12338_v25 = vld [vmem:[#allocation25_spill] sm:$0xff] }
 0x4f4   : > { %v10281_v3 = vsel %vm4343_vm15, %v12328_v61, %v12327_v47  ;;  %12331 = vst [vmem:[#allocation74_spill] sm:$0xff] %v10288_v53  ;;  %v12334_v47 = vrot.slane %v12286_v4, 4  ;;  %v10304_v8 = vld [vmem:[#allocation10 + $0x150] sm:$0xff]  ;;  %v5042_v5 = vadd.f32 %v5026_v26, %v5007_v58  ;;  %v4524_v55 = vadd.f32 %v4508_v46, %v4423_v38  ;;  %v12342_v58 = vld [vmem:[#allocation41_spill] sm:$0xff]  ;;  %v12345_v38 = vld [vmem:[#allocation40_spill] sm:$0xff] }
 0x4f5   : > { %12336 = vst [vmem:[#allocation21_spill] sm:$0xff] %v10304_v8  ;;  %v4413_v18 = vmul.f32 %v9827_v48, %v10281_v3  ;;  %v4838_v26 = vadd.f32 %v4822_v41, %v4753_v28  ;;  %v5286_v24 = vadd.f32 %v5270_v35, %v5251_v33  ;;  %v5425_v29 = vadd.f32 %v5409_v17, %v5390_v2  ;;  %v10331_v28 = vld [vmem:[#allocation10 + $0x160] sm:$0xff]  ;;  %v10335_v35 = vld [vmem:[#allocation10 + $0x118] sm:$0xff]  ;;  %v10392_v33 = vld [vmem:[#allocation10 + $0x128] sm:$0xff] }
 0x4f6   : > { %7093 = vmatmul.mubr.f32.gmra.mrb[106].mxu1 %v12332_v37  ;;  %v10300_v61 = vsel %vm4853_vm4, %v12334_v47, %v12333_v32  ;;  %v5061_v37 = vmul.f32 %v10018_v21, %v10116_v16  ;;  %v4498_v32 = vmul.f32 %v9834_v30, %v10288_v53  ;;  %v4543_v47 = vmul.f32 %v9844_v43, %v12311_v59 }
 0x4f7   : > { %7095 = vmatprep.mubr.f32.mxu1 %v12335_v31  ;;  %v12337_v31 = vld [vmem:[#allocation38_spill] sm:$0xff]  ;;  %v4907_v21 = vmul.f32 %v10032_v42, %v10300_v61  ;;  %v5444_v49 = vmul.f32 %v10304_v8, %v10045_v44  ;;  %12343 = vst [vmem:[#allocation39_spill] sm:$0xff] %v10331_v28  ;;  %12344 = vst [vmem:[#allocation25_spill] sm:$0xff] %v10335_v35  ;;  %v4454_v44 = vrot.slane %v12338_v25, 7  ;;  %v12347_v17 = vrot.slane %v12338_v25, 1 }
 0x4f8   : > { %v5077_v41 = vadd.f32 %v5061_v37, %v5042_v5  ;;  %v4163_v46 = vmul.f32 %v12345_v38, %v9995_v51  ;;  %v5305_v11 = vmul.f32 %v10335_v35, %v10180_v14  ;;  %v4514_v62 = vadd.f32 %v4498_v32, %v4413_v18  ;;  %v10345_v5 = vld [vmem:[#allocation10 + $0x170] sm:$0xff]  ;;  %v10359_v32 = vld [vmem:[#allocation10 + $0x180] sm:$0xff]  ;;  %12359 = vst [vmem:[#allocation78_spill] sm:$0xff] %v10392_v33 }
 0x4f9   : > { %v4533_v2 = vmul.f32 %v9844_v43, %v12297_v50  ;;  %12346 = vst [vmem:[#allocation33_spill] sm:$0xff] %v10345_v5  ;;  %v12348_v37 = vrot.slane %v12297_v50, 1  ;;  %v4923_v8 = vadd.f32 %v4907_v21, %v4838_v26  ;;  %v4992_v51 = vmul.f32 %v10059_v40, %v10328_v54  ;;  %12350 = vst [vmem:[#allocation40_spill] sm:$0xff] %v10359_v32 }
 0x4fa   : > { %7096 = vmatmul.mubr.f32.gmra.mrb[108].mxu1 %v12339_v7  ;;  %v5096_v7 = vmul.f32 %v10038_v39, %v10121_v19  ;;  %v5460_v14 = vadd.f32 %v5444_v49, %v5425_v29  ;;  %v5479_v18 = vmul.f32 %v10331_v28, %v12257_v10  ;;  %v10361_v38 = vadd.f32 %v4543_v47, %v4524_v55 }
 0x4fb   : > { %7098 = vmatprep.mubr.f32.mxu1 %v12342_v58  ;;  %v10352_v58 = vsel %vm4563_vm1, %v12348_v37, %v12347_v17  ;;  %v12352_v35 = vrot.slane %v12337_v31, 1  ;;  %v12353_v17 = vrot.slane %v12311_v59, 1  ;;  %v5131_v26 = vmul.f32 %v10069_v45, %v12286_v4 }
 0x4fc   : > { %12349 = vst [vmem:[#allocation41_spill] sm:$0xff] %v10352_v58  ;;  %12351 = vst [vmem:[#allocation75_spill] sm:$0xff] %v10361_v38  ;;  %v5112_v21 = vadd.f32 %v5096_v7, %v5077_v41  ;;  %v12355_v29 = vrot.slane %v12338_v25, 6  ;;  %v12356_v49 = vrot.slane %v12297_v50, 6  ;;  %v12357_v55 = vrot.slane %v12297_v50, 7 }
 0x4fd   : > { %v10368_v37 = vsel %vm4563_vm1, %v12353_v17, %v12352_v35  ;;  %v5514_v35 = vmul.f32 %v10345_v5, %v10087_v1  ;;  %v4549_v41 = vadd.f32 %v4533_v2, %v4514_v62  ;;  %v4618_v7 = vmul.f32 %v9861_v6, %v10352_v58  ;;  %v12362_v1 = vld [vmem:[#allocation34_spill] sm:$0xff]  ;;  %v10407_v2 = vld [vmem:[#allocation10 + $0x138] sm:$0xff] }
 0x4fe   : > { %7099 = vmatmul.mubr.f32.gmra.mrb[110].mxu1 %v4163_v46  ;;  %12354 = vst [vmem:[#allocation76_spill] sm:$0xff] %v10368_v37  ;;  %v10377_v10 = vsel %vm4343_vm15, %v12356_v49, %v12355_v29  ;;  %v10382_v47 = vsel %vm4441_vm0, %v12357_v55, %v4454_v44  ;;  %v5321_v46 = vadd.f32 %v5305_v11, %v5286_v24  ;;  %v12360_v29 = vrot.slane %v12338_v25, 2 }
 0x4ff   : > { %v10390_v17 = vmul.f32 %v10359_v32, %v10107_v23  ;;  %v12361_v49 = vrot.slane %v12297_v50, 2  ;;  %v5008_v38 = vadd.f32 %v4992_v51, %v4923_v8  ;;  %v5027_v24 = vmul.f32 %v12362_v1, %v10281_v3  ;;  %12364 = vst [vmem:[#allocation79_spill] sm:$0xff] %v10407_v2  ;;  %v12366_v51 = vld [vmem:[#allocation59_spill] sm:$0xff]  ;;  %v10428_v32 = vld [vmem:[#allocation10 + $0x158] sm:$0xff] }
 0x500   : > { %v5495_v62 = vadd.f32 %v5479_v18, %v5460_v14  ;;  %v5340_v23 = vmul.f32 %v10392_v33, %v10214_v20  ;;  %v4414_v37 = vmul.f32 %v9882_v57, %v10377_v10  ;;  %v4499_v59 = vmul.f32 %v9884_v22, %v10382_v47  ;;  %v10421_v18 = vld [vmem:[#allocation10 + $0x148] sm:$0xff]  ;;  %v12368_v20 = vld [vmem:[#allocation23_spill] sm:$0xff]  ;;  %12369 = vst [vmem:[#allocation82_spill] sm:$0xff] %v10428_v32 }
 0x501   : > { %12358 = vst [vmem:[#allocation77_spill] sm:$0xff] %v10390_v17  ;;  %v10399_v55 = vsel %vm4648_vm2, %v12361_v49, %v12360_v29  ;;  %v10403_v11 = vpop.f32.mrb[88].mxu1  ;;  %v5147_v8 = vadd.f32 %v5131_v26, %v5112_v21  ;;  %v5166_v49 = vmul.f32 %v12366_v51, %v10165_v27  ;;  %v10419_v14 = vmul.f32 %v10407_v2, %v10116_v16  ;;  %v12371_v26 = vld [vmem:[#allocation61_spill] sm:$0xff] }
 0x502   : > { %12363 = vst [vmem:[#allocation34_spill] sm:$0xff] %v10403_v11  ;;  %v10413_v29 = vpop.f32.mrb[89].mxu1  ;;  %12367 = vst [vmem:[#allocation81_spill] sm:$0xff] %v10421_v18  ;;  %v4573_v11 = vrot.slane %v12368_v20, 1  ;;  %v10426_v31 = vmul.f32 %v10421_v18, %v10116_v16  ;;  %v4634_v5 = vadd.f32 %v4618_v7, %v4549_v41  ;;  %v4703_v21 = vmul.f32 %v9893_v56, %v10399_v55 }
 0x503   : > { %12365 = vst [vmem:[#allocation80_spill] sm:$0xff] %v10413_v29  ;;  %v10435_v29 = vmul.f32 %v10428_v32, %v10121_v19  ;;  %v4776_v28 = vrot.slane %v12338_v25, 3  ;;  %v5043_v2 = vadd.f32 %v5027_v24, %v5008_v38  ;;  %v5062_v51 = vmul.f32 %v10098_v63, %v10281_v3 }
 0x504   : > { %v10440_v16 = vadd.f32 %v5514_v35, %v5495_v62  ;;  %v4515_v18 = vadd.f32 %v4499_v59, %v4414_v37  ;;  %v4534_v41 = vmul.f32 %v9907_v13, %v12338_v25  ;;  %v5182_v33 = vadd.f32 %v5166_v49, %v5147_v8  ;;  %v12374_v59 = vld [vmem:[#allocation19_spill] sm:$0xff] }
 0x505   : > { %12370 = vst [vmem:[#allocation83_spill] sm:$0xff] %v10435_v29  ;;  %v5201_v17 = vmul.f32 %v12371_v26, %v10195_v52  ;;  %v12372_v19 = vrot.slane %v12338_v25, 1  ;;  %v4658_v38 = vrot.slane %v12368_v20, 2  ;;  %v10453_v24 = vadd.f32 %v5340_v23, %v5321_v46  ;;  %v12378_v26 = vld [vmem:[#allocation62_spill] sm:$0xff] }
 0x506   : > { %v4719_v35 = vadd.f32 %v4703_v21, %v4634_v5  ;;  %v4738_v37 = vmul.f32 %v12374_v59, %v10399_v55  ;;  %v12375_v62 = vrot.slane %v12368_v20, 7  ;;  %v12377_v49 = vrot.slane %v12297_v50, 3  ;;  %v12379_v5 = vld [vmem:[#allocation63_spill] sm:$0xff] }
 0x507   : > { %v10450_v32 = vsel %vm4563_vm1, %v12372_v19, %v4573_v11  ;;  %v5078_v19 = vadd.f32 %v5062_v51, %v5043_v2  ;;  %v5097_v63 = vmul.f32 %v12378_v26, %v10288_v53  ;;  %v4861_v46 = vrot.slane %v12338_v25, 4  ;;  %v10481_v51 = vld [vmem:[#allocation10 + $0x168] sm:$0xff] }
 0x508   : > { %12373 = vst [vmem:[#allocation84_spill] sm:$0xff] %v10450_v32  ;;  %v10460_v8 = vsel %vm4441_vm0, %v4454_v44, %v12375_v62  ;;  %v10465_v7 = vsel %vm4768_vm3, %v12377_v49, %v4776_v28  ;;  %v5236_v23 = vmul.f32 %v12379_v5, %v10195_v52  ;;  %v4550_v21 = vadd.f32 %v4534_v41, %v4515_v18 }
 0x509   : > { %12376 = vst [vmem:[#allocation19_spill] sm:$0xff] %v10460_v8  ;;  %v4619_v29 = vmul.f32 %v9937_v12, %v10450_v32  ;;  %v12380_v44 = vrot.slane %v12368_v20, 6  ;;  %v12381_v62 = vrot.slane %v12338_v25, 6  ;;  %v5217_v2 = vadd.f32 %v5201_v17, %v5182_v33  ;;  %12382 = vst [vmem:[#allocation85_spill] sm:$0xff] %v10481_v51  ;;  %v12385_v17 = vld [vmem:[#allocation27_spill] sm:$0xff] }
 0x50a   : > { %v12383_v26 = vrot.slane %v12338_v25, 2  ;;  %v4500_v41 = vmul.f32 %v9834_v30, %v10460_v8  ;;  %v10494_v5 = vmul.f32 %v10481_v51, %v12286_v4  ;;  %v4823_v33 = vmul.f32 %v9931_v0, %v10465_v7  ;;  %v12387_v8 = vld [vmem:[#allocation54_spill] sm:$0xff] }
 0x50b   : > { %v10479_v49 = vsel %vm4343_vm15, %v12381_v62, %v12380_v44  ;;  %v4754_v44 = vadd.f32 %v4738_v37, %v4719_v35  ;;  %v5113_v32 = vadd.f32 %v5097_v63, %v5078_v19  ;;  %v12386_v52 = vrot.slane %v12297_v50, 4 }
 0x50c   : > { %v10486_v53 = vsel %vm4648_vm2, %v12383_v26, %v4658_v38  ;;  %v4415_v18 = vmul.f32 %v9827_v48, %v10479_v49  ;;  %12384 = vst [vmem:[#allocation86_spill] sm:$0xff] %v10494_v5  ;;  %v5132_v26 = vmul.f32 %v10143_v34, %v12297_v50  ;;  %v4946_v30 = vrot.slane %v12338_v25, 5 }
 0x50d   : > { %v10504_v48 = vsel %vm4853_vm4, %v12386_v52, %v4861_v46  ;;  %v5167_v4 = vmul.f32 %v10171_v60, %v10352_v58  ;;  %v4635_v35 = vadd.f32 %v4619_v29, %v4550_v21  ;;  %v4704_v37 = vmul.f32 %v9965_v9, %v10486_v53 }
 0x50e   : > { %v4778_v62 = vrot.slane %v12368_v20, 3  ;;  %v5252_v63 = vadd.f32 %v5236_v23, %v5217_v2  ;;  %v5271_v19 = vmul.f32 %v10145_v36, %v10259_v15  ;;  %v4516_v51 = vadd.f32 %v4500_v41, %v4415_v18  ;;  %v12390_v23 = vld [vmem:[#allocation66_spill] sm:$0xff]  ;;  %v12391_v15 = vld [vmem:[#allocation43_spill] sm:$0xff]  ;;  %v12401_v36 = vld [vmem:[#allocation57_spill] sm:$0xff] }
 0x50f   : > { %v4535_v52 = vmul.f32 %v9844_v43, %v12368_v20  ;;  %v4839_v34 = vadd.f32 %v4823_v33, %v4754_v44  ;;  %v4908_v5 = vmul.f32 %v12387_v8, %v10504_v48  ;;  %v12388_v60 = vrot.slane %v12385_v17, 1 }
 0x510   : > { %v5148_v58 = vadd.f32 %v5132_v26, %v5113_v32  ;;  %v5306_v2 = vmul.f32 %v12390_v23, %v10300_v61  ;;  %v4739_v18 = vmul.f32 %v12391_v15, %v10486_v53  ;;  %v12392_v43 = vrot.slane %v12297_v50, 5  ;;  %v10538_v32 = vld [vmem:[#allocation10 + $0x178] sm:$0xff] }
 0x511   : > { %v10521_v29 = vsel %vm4563_vm1, %v4573_v11, %v12388_v60  ;;  %v4720_v44 = vadd.f32 %v4704_v37, %v4635_v35  ;;  %v10534_v33 = vsel %vm4768_vm3, %v4776_v28, %v4778_v62  ;;  %12394 = vst [vmem:[#allocation43_spill] sm:$0xff] %v10538_v32  ;;  %v5287_v26 = vadd.f32 %v5271_v19, %v5252_v63  ;;  %v12396_v28 = vld [vmem:[#allocation22_spill] sm:$0xff] }
 0x512   : > { %12389 = vst [vmem:[#allocation27_spill] sm:$0xff] %v10521_v29  ;;  %v10531_v41 = vsel %vm4938_vm5, %v12392_v43, %v4946_v30  ;;  %12393 = vst [vmem:[#allocation54_spill] sm:$0xff] %v10534_v33  ;;  %v4551_v61 = vadd.f32 %v4535_v52, %v4516_v51  ;;  %v4620_v21 = vmul.f32 %v9861_v6, %v10521_v29  ;;  %v4863_v23 = vrot.slane %v12368_v20, 4  ;;  %v12399_v51 = vld [vmem:[#allocation68_spill] sm:$0xff]  ;;  %v12400_v6 = vld [vmem:[#allocation69_spill] sm:$0xff] }
 0x513   : > { %v10545_v43 = vmul.f32 %v10538_v32, %v10165_v27  ;;  %v4924_v35 = vadd.f32 %v4908_v5, %v4839_v34  ;;  %v4993_v37 = vmul.f32 %v12396_v28, %v10531_v41  ;;  %v12397_v60 = vrot.slane %v12385_v17, 2 }
 0x514   : > { %v5183_v63 = vadd.f32 %v5167_v4, %v5148_v58  ;;  %v5202_v19 = vmul.f32 %v12399_v51, %v10399_v55  ;;  %v5341_v52 = vmul.f32 %v12400_v6, %v10328_v54  ;;  %v4824_v27 = vmul.f32 %v12401_v36, %v10534_v33  ;;  %v12416_v51 = vld [vmem:[#allocation58_spill] sm:$0xff] }
 0x515   : > { %12395 = vst [vmem:[#allocation87_spill] sm:$0xff] %v10545_v43  ;;  %v10552_v11 = vsel %vm4648_vm2, %v4658_v38, %v12397_v60  ;;  %v4755_v32 = vadd.f32 %v4739_v18, %v4720_v44  ;;  %v12402_v5 = vrot.slane %v12385_v17, 6  ;;  %v12403_v29 = vrot.slane %v12368_v20, 6 }
 0x516   : > { %12398 = vst [vmem:[#allocation22_spill] sm:$0xff] %v10552_v11  ;;  %v12404_v58 = vrot.slane %v12385_v17, 7  ;;  %v12405_v4 = vrot.slane %v12368_v20, 7  ;;  %v5322_v54 = vadd.f32 %v5306_v2, %v5287_v26  ;;  %v4636_v6 = vadd.f32 %v4620_v21, %v4551_v61  ;;  %v12412_v61 = vld [vmem:[#allocation26_spill] sm:$0xff] }
 0x517   : > { %v10566_v38 = vsel %vm4343_vm15, %v12403_v29, %v12402_v5  ;;  %v4705_v18 = vmul.f32 %v9893_v56, %v10552_v11  ;;  %v10578_v44 = vsel %vm4853_vm4, %v4861_v46, %v4863_v23  ;;  %v5391_v34 = vadd.f32 %v10419_v14, %v10453_v24  ;;  %v12408_v5 = vld [vmem:[#allocation56_spill] sm:$0xff] }
 0x518   : > { %v10573_v60 = vsel %vm4441_vm0, %v12405_v4, %v12404_v58  ;;  %12407 = vst [vmem:[#allocation88_spill] sm:$0xff] %v10578_v44  ;;  %v5009_v29 = vadd.f32 %v4993_v37, %v4924_v35  ;;  %v5028_v33 = vmul.f32 %v12408_v5, %v10377_v10  ;;  %v5218_v43 = vadd.f32 %v5202_v19, %v5183_v63  ;;  %v12409_v58 = vld [vmem:[#allocation70_spill] sm:$0xff]  ;;  %v12414_v19 = vld [vmem:[#allocation71_spill] sm:$0xff]  ;;  %v5621_v35 = vld [vmem:[#allocation11 + $0x8] sm:$0xff] }
 0x519   : > { %12406 = vst [vmem:[#allocation57_spill] sm:$0xff] %v10573_v60  ;;  %v5237_v2 = vmul.f32 %v12409_v58, %v10399_v55  ;;  %v4416_v21 = vmul.f32 %v9882_v57, %v10566_v38  ;;  %v4501_v56 = vmul.f32 %v9884_v22, %v10573_v60  ;;  %v4840_v46 = vadd.f32 %v4824_v27, %v4755_v32 }
 0x51a   : > { %v4909_v14 = vmul.f32 %v10032_v42, %v10578_v44  ;;  %v12410_v24 = vrot.slane %v12368_v20, 5  ;;  %v10599_v37 = vpop.f32.mrb[88].mxu0  ;;  %v5357_v63 = vadd.f32 %v5341_v52, %v5322_v54  ;;  %v5376_v57 = vmul.f32 %v12414_v19, %v10281_v3  ;;  %v5620_v54 = vld [vmem:[#allocation11] sm:$0xff] }
 0x51b   : > { %12413 = vst [vmem:[#allocation26_spill] sm:$0xff] %v10599_v37  ;;  %v4721_v4 = vadd.f32 %v4705_v18, %v4636_v6  ;;  %v4740_v22 = vmul.f32 %v12374_v59, %v10552_v11  ;;  %v10605_v32 = vpop.f32.mrb[89].mxu0  ;;  %v5044_v27 = vadd.f32 %v5028_v33, %v5009_v29  ;;  %v5063_v44 = vmul.f32 %v12416_v51, %v10377_v10  ;;  %v5622_v37 = vld [vmem:[#allocation11 + $0x10] sm:$0xff]  ;;  %v5625_v11 = vld [vmem:[#allocation11 + $0x28] sm:$0xff] }
 0x51c   : > { %v10596_v26 = vsel %vm4938_vm5, %v4946_v30, %v12410_v24  ;;  %12415 = vst [vmem:[#allocation89_spill] sm:$0xff] %v10605_v32  ;;  %v12417_v30 = vrot.slane %v12385_v17, 3  ;;  %v5253_v6 = vadd.f32 %v5237_v2, %v5218_v43  ;;  %v4517_v18 = vadd.f32 %v4501_v56, %v4416_v21  ;;  %v5623_v32 = vld [vmem:[#allocation11 + $0x18] sm:$0xff]  ;;  %v5624_v2 = vld [vmem:[#allocation11 + $0x20] sm:$0xff]  ;;  %v12420_v21 = vld [vmem:[#allocation45_spill] sm:$0xff] }
 0x51d   : > { %12411 = vst [vmem:[#allocation56_spill] sm:$0xff] %v10596_v26  ;;  %v4994_v59 = vmul.f32 %v10059_v40, %v10596_v26  ;;  %v4536_v33 = vmul.f32 %v9907_v13, %v12385_v17  ;;  %v7541_v29 = vpack.c.bf16 %v5621_v35, %v5620_v54  ;;  %v4925_v19 = vadd.f32 %v4909_v14, %v4840_v46 }
 0x51e   : > { %v10612_v24 = vsel %vm4768_vm3, %v4778_v62, %v12417_v30  ;;  %v12418_v58 = vrot.slane %v12412_v61, 1  ;;  %v12419_v62 = vrot.slane %v12385_v17, 1  ;;  %v12076_v52 = vrot.slane %v12412_v61, 2 }
 0x51f   : > { %v7545_v43 = vpack.c.bf16 %v5623_v32, %v5622_v37  ;;  %v5272_v56 = vmul.f32 %v12420_v21, %v10465_v7  ;;  %v4756_v26 = vadd.f32 %v4740_v22, %v4721_v4  ;;  %v4825_v13 = vmul.f32 %v9931_v0, %v10612_v24  ;;  %7542 = vmatprep.subr.bf16.mxu0 %v7541_v29  ;;  %v12422_v7 = vld [vmem:[#allocation73_spill] sm:$0xff] }
 0x520   : > { %v10624_v30 = vsel %vm4563_vm1, %v12419_v62, %v12418_v58  ;;  %v5079_v46 = vadd.f32 %v5063_v44, %v5044_v27  ;;  %v5098_v14 = vmul.f32 %v10038_v39, %v10382_v47  ;;  %v12421_v58 = vrot.slane %v12385_v17, 4  ;;  %7544 = vmatpush3.bf16.msra.mxu0 %v7541_v29 }
 0x521   : > { %v12077_v37 = vrot.slane %v12385_v17, 5  ;;  %v5426_v32 = vadd.f32 %v10426_v31, %v5391_v34  ;;  %v5411_v4 = vmul.f32 %v12422_v7, %v10281_v3  ;;  %v4552_v22 = vadd.f32 %v4536_v33, %v4517_v18  ;;  %v10644_v44 = vpop.f32.mrb[90].mxu1  ;;  %7546 = vmatprep.subr.bf16.mxu0 %v7545_v43 }
 0x522   : > { %v10636_v35 = vsel %vm4853_vm4, %v4863_v23, %v12421_v58  ;;  %v4621_v0 = vmul.f32 %v9937_v12, %v10624_v30  ;;  %12423 = vst [vmem:[#allocation58_spill] sm:$0xff] %v10644_v44  ;;  %v7549_v27 = vpack.c.bf16 %v5625_v11, %v5624_v2  ;;  %v5010_v54 = vadd.f32 %v4994_v59, %v4925_v19  ;;  %v10655_v3 = vpop.f32.mrb[91].mxu1  ;;  %v12427_v12 = vld [vmem:[#allocation25_spill] sm:$0xff] }
 0x523   : > { %v5029_v23 = vmul.f32 %v12362_v1, %v10479_v49  ;;  %v12424_v29 = vrot.slane %v12385_v17, 2  ;;  %12426 = vst [vmem:[#allocation90_spill] sm:$0xff] %v10655_v3  ;;  %v5288_v34 = vadd.f32 %v5272_v56, %v5253_v6  ;;  %v5307_v18 = vmul.f32 %v12427_v12, %v10504_v48  ;;  %v12429_v6 = vld [vmem:[#allocation77_spill] sm:$0xff] }
 0x524   : > { %v4841_v33 = vadd.f32 %v4825_v13, %v4756_v26  ;;  %v4910_v11 = vmul.f32 %v12387_v8, %v10636_v35  ;;  %v5392_v19 = vadd.f32 %v5376_v57, %v5357_v63  ;;  %v5114_v59 = vadd.f32 %v5098_v14, %v5079_v46  ;;  %7548 = vmatpush3.bf16.msra.mxu0 %v7545_v43  ;;  %v12430_v26 = vld [vmem:[#allocation83_spill] sm:$0xff]  ;;  %v10673_v13 = vld [vmem:[#allocation10 + $0x188] sm:$0xff] }
 0x525   : > { %v10653_v31 = vsel %vm4648_vm2, %v12424_v29, %v12076_v52  ;;  %v5133_v62 = vmul.f32 %v10069_v45, %v12338_v25  ;;  %v12428_v2 = vrot.slane %v12368_v20, 5  ;;  %v5565_v48 = vadd.f32 %v12429_v6, %v10440_v16  ;;  %12431 = vst [vmem:[#allocation25_spill] sm:$0xff] %v10673_v13  ;;  %7550 = vmatprep.subr.bf16.mxu0 %v7549_v27  ;;  %v10680_v57 = vld [vmem:[%s11897_s7] ss:$0 sm:$0xff]  ;;  %v12434_v16 = vld [vmem:[#allocation60_spill] sm:$0xff]  ;;  %v12436_v52 = vld [vmem:[#allocation74_spill] sm:$0xff] }
 0x526   : > { %12425 = vst [vmem:[#allocation45_spill] sm:$0xff] %v10653_v31  ;;  %v5461_v56 = vadd.f32 %v12430_v26, %v5426_v32  ;;  %v4637_v8 = vadd.f32 %v4621_v0, %v4552_v22  ;;  %v4706_v63 = vmul.f32 %v9965_v9, %v10653_v31  ;;  %12432 = vst [vmem:[#allocation77_spill] sm:$0xff] %v10680_v57  ;;  %v12433_v46 = vld [vmem:[#allocation67_spill] sm:$0xff]  ;;  %v12435_v22 = vld [vmem:[#allocation78_spill] sm:$0xff] }
 0x527   : > { %v10668_v58 = vsel %vm4938_vm5, %v12428_v2, %v12077_v37  ;;  %v5550_v43 = vmul.f32 %v10673_v13, %v12433_v46  ;;  %v5045_v14 = vadd.f32 %v5029_v23, %v5010_v54  ;;  %v5064_v29 = vmul.f32 %v12434_v16, %v10479_v49  ;;  %v12437_v37 = vld [vmem:[#allocation21_spill] sm:$0xff]  ;;  %v12438_v46 = vld [vmem:[#allocation84_spill] sm:$0xff]  ;;  %v12439_v54 = vld [vmem:[#allocation59_spill] sm:$0xff] }
 0x528   : > { %v5323_v2 = vadd.f32 %v5307_v18, %v5288_v34  ;;  %v5342_v0 = vmul.f32 %v12435_v22, %v10531_v41  ;;  %v4926_v9 = vadd.f32 %v4910_v11, %v4841_v33  ;;  %v4995_v6 = vmul.f32 %v12396_v28, %v10668_v58  ;;  %7552 = vmatpush3.bf16.msra.mxu0 %v7549_v27  ;;  %v12441_v34 = vld [vmem:[#allocation86_spill] sm:$0xff]  ;;  %v12442_v28 = vld [vmem:[#allocation19_spill] sm:$0xff] }
 0x529   : > { %v5427_v26 = vadd.f32 %v5411_v4, %v5392_v19  ;;  %v5446_v3 = vmul.f32 %v12437_v37, %v12436_v52  ;;  %v5149_v44 = vadd.f32 %v5133_v62, %v5114_v59  ;;  %v5168_v23 = vmul.f32 %v12439_v54, %v12438_v46  ;;  %v12443_v4 = vld [vmem:[#allocation62_spill] sm:$0xff] }
 0x52a   : > { %v10696_v7 = vadd.f32 %v10680_v57, %v5565_v48  ;;  %v5496_v18 = vadd.f32 %v12441_v34, %v5461_v56  ;;  %v4722_v32 = vadd.f32 %v4706_v63, %v4637_v8  ;;  %v4741_v41 = vmul.f32 %v12391_v15, %v10653_v31  ;;  %v12446_v48 = vld [vmem:[#allocation79_spill] sm:$0xff] }
 0x52b   : > { %v5080_v33 = vadd.f32 %v5064_v29, %v5045_v14  ;;  %v5099_v11 = vmul.f32 %v12443_v4, %v12442_v28  ;;  %v12444_v52 = vrot.slane %v12412_v61, 3  ;;  %v12445_v19 = vrot.slane %v12385_v17, 3  ;;  %v12447_v14 = vld [vmem:[#allocation39_spill] sm:$0xff] }
 0x52c   : > { %12440 = vst [vmem:[#allocation83_spill] sm:$0xff] %v10696_v7  ;;  %v12081_v27 = vrot.slane %v12412_v61, 4  ;;  %v5358_v62 = vadd.f32 %v5342_v0, %v5323_v2  ;;  %v5377_v56 = vmul.f32 %v12446_v48, %v10377_v10  ;;  %v5011_v8 = vadd.f32 %v4995_v6, %v4926_v9  ;;  %v12448_v7 = vld [vmem:[#allocation61_spill] sm:$0xff]  ;;  %v12449_v6 = vld [vmem:[#allocation35_spill] sm:$0xff] }
 0x52d   : > { %v10708_v59 = vsel %vm4768_vm3, %v12445_v19, %v12444_v52  ;;  %v5030_v15 = vmul.f32 %v12408_v5, %v10566_v38  ;;  %v5462_v63 = vadd.f32 %v5446_v3, %v5427_v26  ;;  %v5481_v29 = vmul.f32 %v12447_v14, %v12297_v50  ;;  %v12453_v2 = vld [vmem:[#allocation41_spill] sm:$0xff]  ;;  %v12455_v48 = vld [vmem:[#allocation63_spill] sm:$0xff] }
 0x52e   : > { %v5184_v34 = vadd.f32 %v5168_v23, %v5149_v44  ;;  %v5203_v57 = vmul.f32 %v12448_v7, %v10486_v53  ;;  %v4757_v52 = vadd.f32 %v4741_v41, %v4722_v32  ;;  %v4826_v19 = vmul.f32 %v12401_v36, %v10708_v59  ;;  %v12451_v36 = vld [vmem:[#allocation81_spill] sm:$0xff] }
 0x52f   : > { %v5115_v9 = vadd.f32 %v5099_v11, %v5080_v33  ;;  %v5134_v5 = vmul.f32 %v12449_v6, %v12368_v20  ;;  %v12450_v50 = vrot.slane %v12385_v17, 4  ;;  %v5393_v32 = vadd.f32 %v5377_v56, %v5358_v62  ;;  %v12452_v33 = vld [vmem:[#allocation87_spill] sm:$0xff]  ;;  %v12454_v14 = vld [vmem:[#allocation33_spill] sm:$0xff] }
 0x530   : > { %v5412_v26 = vmul.f32 %v12451_v36, %v10377_v10  ;;  %v5046_v23 = vadd.f32 %v5030_v15, %v5011_v8  ;;  %v5065_v41 = vmul.f32 %v12416_v51, %v10566_v38  ;;  %v5531_v11 = vadd.f32 %v12452_v33, %v5496_v18 }
 0x531   : > { %v10730_v44 = vsel %vm4853_vm4, %v12450_v50, %v12081_v27  ;;  %v5497_v0 = vadd.f32 %v5481_v29, %v5462_v63  ;;  %v5516_v20 = vmul.f32 %v12454_v14, %v12453_v2  ;;  %v5238_v50 = vmul.f32 %v12455_v48, %v10486_v53  ;;  %v12460_v29 = vld [vmem:[#allocation27_spill] sm:$0xff]  ;;  %v12464_v14 = vld [vmem:[#allocation82_spill] sm:$0xff] }
 0x532   : > { %v4842_v27 = vadd.f32 %v4826_v19, %v4757_v52  ;;  %v12456_v3 = vrot.slane %v12412_v61, 6  ;;  %v12457_v62 = vrot.slane %v12385_v17, 6  ;;  %v12458_v56 = vrot.slane %v12412_v61, 7  ;;  %v12461_v52 = vld [vmem:[#allocation65_spill] sm:$0xff] }
 0x533   : > { %v12459_v51 = vrot.slane %v12385_v17, 7  ;;  %v4911_v8 = vmul.f32 %v10032_v42, %v10730_v44  ;;  %v5219_v15 = vadd.f32 %v5203_v57, %v5184_v34  ;;  %v5150_v63 = vadd.f32 %v5134_v5, %v5115_v9  ;;  %v12466_v34 = vld [vmem:[#allocation40_spill] sm:$0xff]  ;;  %v10777_v5 = vld [vmem:[#allocation10] sm:$0xff] }
 0x534   : > { %v10747_v10 = vsel %vm4343_vm15, %v12457_v62, %v12456_v3  ;;  %v5169_v19 = vmul.f32 %v12461_v52, %v12460_v29  ;;  %v12462_v2 = vrot.slane %v12412_v61, 5  ;;  %v12463_v3 = vrot.slane %v12385_v17, 5  ;;  %12467 = vst [vmem:[#allocation60_spill] sm:$0xff] %v10777_v5 }
 0x535   : > { %v10754_v18 = vsel %vm4441_vm0, %v12459_v51, %v12458_v56  ;;  %v5428_v62 = vadd.f32 %v5412_v26, %v5393_v32  ;;  %v5447_v56 = vmul.f32 %v12464_v14, %v10382_v47  ;;  %v5081_v51 = vadd.f32 %v5065_v41, %v5046_v23  ;;  %v12469_v26 = vld [vmem:[#allocation29_spill] sm:$0xff] }
 0x536   : > { %v10765_v33 = vsel %vm4938_vm5, %v12463_v3, %v12462_v2  ;;  %v5100_v42 = vmul.f32 %v10038_v39, %v10573_v60  ;;  %v10771_v57 = vadd.f32 %v5550_v43, %v5531_v11  ;;  %v10775_v9 = vmul.f32 %v12466_v34, %v10399_v55  ;;  %v10781_v3 = vld [vmem:[#allocation10 + $0x10] sm:$0xff]  ;;  %v12470_v11 = vld [vmem:[#allocation22_spill] sm:$0xff]  ;;  %v12471_v34 = vld [vmem:[#allocation68_spill] sm:$0xff] }
 0x537   : > { %v4417_v2 = vmul.f32 %v10777_v5, %v10747_v10  ;;  %12468 = vst [vmem:[#allocation78_spill] sm:$0xff] %v10781_v3  ;;  %v4502_v47 = vmul.f32 %v10781_v3, %v10754_v18  ;;  %v10785_v32 = vadd.f32 %v5516_v20, %v5497_v0  ;;  %v12089_v39 = vrot.slane %v12469_v26, 1  ;;  %v12472_v60 = vld [vmem:[#allocation54_spill] sm:$0xff]  ;;  %v12473_v5 = vld [vmem:[#allocation64_spill] sm:$0xff] }
 0x538   : > { %12465 = vst [vmem:[#allocation67_spill] sm:$0xff] %v10771_v57  ;;  %v4927_v43 = vadd.f32 %v4911_v8, %v4842_v27  ;;  %v4996_v23 = vmul.f32 %v10059_v40, %v10765_v33  ;;  %v5254_v55 = vadd.f32 %v5238_v50, %v5219_v15  ;;  %v5185_v41 = vadd.f32 %v5169_v19, %v5150_v63  ;;  %v12474_v57 = vld [vmem:[#allocation85_spill] sm:$0xff]  ;;  %v5627_v8 = vld [vmem:[#allocation11 + $0x38] sm:$0xff]  ;;  %v12475_v40 = vld [vmem:[#allocation43_spill] sm:$0xff] }
 0x539   : > { %v5204_v14 = vmul.f32 %v12471_v34, %v12470_v11  ;;  %v5273_v29 = vmul.f32 %v12473_v5, %v12472_v60  ;;  %v5463_v36 = vadd.f32 %v5447_v56, %v5428_v62  ;;  %v5482_v3 = vmul.f32 %v12474_v57, %v12338_v25  ;;  %v5626_v27 = vld [vmem:[#allocation11 + $0x30] sm:$0xff] }
 0x53a   : > { %v5116_v20 = vadd.f32 %v5100_v42, %v5081_v51  ;;  %v5135_v0 = vmul.f32 %v10069_v45, %v12385_v17  ;;  %v5517_v50 = vmul.f32 %v12475_v40, %v12438_v46  ;;  %v4518_v15 = vadd.f32 %v4502_v47, %v4417_v2  ;;  %v10800_v63 = vld [vmem:[#allocation10 + $0x20] sm:$0xff]  ;;  %v12478_v42 = vld [vmem:[#allocation70_spill] sm:$0xff] }
 0x53b   : > { %12476 = vst [vmem:[#allocation74_spill] sm:$0xff] %v10800_v63  ;;  %v4537_v19 = vmul.f32 %v10800_v63, %v12412_v61  ;;  %v7553_v62 = vpack.c.bf16 %v5627_v8, %v5626_v27  ;;  %v12477_v25 = vrot.slane %v12412_v61, 1  ;;  %v5012_v56 = vadd.f32 %v4996_v23, %v4927_v43  ;;  %v12479_v63 = vld [vmem:[#allocation88_spill] sm:$0xff]  ;;  %v12480_v40 = vld [vmem:[#allocation66_spill] sm:$0xff]  ;;  %v10818_v27 = vpop.f32.mrb[90].mxu0  ;;  %v5628_v23 = vld [vmem:[#allocation11 + $0x40] sm:$0xff] }
 0x53c   : > { %v5031_v46 = vmul.f32 %v12362_v1, %v10747_v10  ;;  %v5220_v51 = vadd.f32 %v5204_v14, %v5185_v41  ;;  %v5239_v2 = vmul.f32 %v12478_v42, %v12470_v11  ;;  %v5289_v47 = vadd.f32 %v5273_v29, %v5254_v55  ;;  %12481 = vst [vmem:[#allocation21_spill] sm:$0xff] %v10818_v27  ;;  %v10826_v14 = vpop.f32.mrb[91].mxu0  ;;  %v5629_v29 = vld [vmem:[#allocation11 + $0x48] sm:$0xff]  ;;  %v10828_v41 = vld [vmem:[#allocation10 + $0x30] sm:$0xff]  ;;  %v12487_v27 = vld [vmem:[#allocation69_spill] sm:$0xff] }
 0x53d   : > { %v10810_v45 = vsel %vm4563_vm1, %v12477_v25, %v12089_v39  ;;  %v5308_v60 = vmul.f32 %v12480_v40, %v12479_v63  ;;  %7554 = vmatprep.subr.bf16.mxu0 %v7553_v62  ;;  %v5498_v8 = vadd.f32 %v5482_v3, %v5463_v36  ;;  %v10822_v25 = vmul.f32 %v10673_v13, %v10486_v53 }
 0x53e   : > { %v5151_v43 = vadd.f32 %v5135_v0, %v5116_v20  ;;  %v5170_v1 = vmul.f32 %v12439_v54, %v10624_v30  ;;  %12482 = vst [vmem:[#allocation84_spill] sm:$0xff] %v10826_v14  ;;  %7556 = vmatpush3.bf16.msra.mxu0 %v7553_v62  ;;  %v4553_v55 = vadd.f32 %v4537_v19, %v4518_v15  ;;  %12483 = vst [vmem:[#allocation59_spill] sm:$0xff] %v10828_v41  ;;  %v12486_v14 = vld [vmem:[#allocation56_spill] sm:$0xff] }
 0x53f   : > { %v4622_v63 = vmul.f32 %v10828_v41, %v10810_v45  ;;  %v7557_v3 = vpack.c.bf16 %v5629_v29, %v5628_v23  ;;  %v12484_v20 = vrot.slane %v12469_v26, 2  ;;  %v12485_v54 = vrot.slane %v12412_v61, 2 }
 0x540   : > { %v5047_v62 = vadd.f32 %v5031_v46, %v5012_v56  ;;  %v5066_v15 = vmul.f32 %v12434_v16, %v10747_v10  ;;  %v5255_v19 = vadd.f32 %v5239_v2, %v5220_v51  ;;  %v5324_v39 = vadd.f32 %v5308_v60, %v5289_v47  ;;  %v5630_v56 = vld [vmem:[#allocation11 + $0x50] sm:$0xff]  ;;  %v5631_v46 = vld [vmem:[#allocation11 + $0x58] sm:$0xff] }
 0x541   : > { %v10839_v0 = vsel %vm4648_vm2, %v12485_v54, %v12484_v20  ;;  %v5343_v41 = vmul.f32 %v12487_v27, %v12486_v14  ;;  %v5274_v53 = vmul.f32 %v12420_v21, %v10612_v24  ;;  %7558 = vmatprep.subr.bf16.mxu0 %v7557_v3  ;;  %v5533_v23 = vadd.f32 %v5517_v50, %v5498_v8  ;;  %v10850_v51 = vld [vmem:[#allocation10 + $0x40] sm:$0xff] }
 0x542   : > { %v5186_v29 = vadd.f32 %v5170_v1, %v5151_v43  ;;  %v5205_v36 = vmul.f32 %v12448_v7, %v10653_v31  ;;  %7560 = vmatpush3.bf16.msra.mxu0 %v7557_v3  ;;  %v4638_v16 = vadd.f32 %v4622_v63, %v4553_v55  ;;  %12488 = vst [vmem:[#allocation86_spill] sm:$0xff] %v10850_v51  ;;  %v12489_v2 = vrot.slane %v12469_v26, 6  ;;  %v12493_v1 = vld [vmem:[#allocation71_spill] sm:$0xff] }
 0x543   : > { %v4707_v60 = vmul.f32 %v10850_v51, %v10839_v0  ;;  %v12490_v24 = vrot.slane %v12412_v61, 6  ;;  %v12491_v7 = vrot.slane %v12469_v26, 7  ;;  %v12492_v47 = vrot.slane %v12412_v61, 7 }
 0x544   : > { %v7561_v43 = vpack.c.bf16 %v5631_v46, %v5630_v56  ;;  %v5378_v14 = vmul.f32 %v12493_v1, %v10479_v49  ;;  %v5082_v55 = vadd.f32 %v5066_v15, %v5047_v62  ;;  %v5101_v63 = vmul.f32 %v12443_v4, %v10754_v18  ;;  %v10883_v62 = vld [vmem:[#allocation10 + $0x8] sm:$0xff] }
 0x545   : > { %v10859_v50 = vsel %vm4343_vm15, %v12490_v24, %v12489_v2  ;;  %v10866_v8 = vsel %vm4441_vm0, %v12492_v47, %v12491_v7  ;;  %v5359_v3 = vadd.f32 %v5343_v41, %v5324_v39  ;;  %v5240_v54 = vmul.f32 %v12455_v48, %v10653_v31  ;;  %v10887_v39 = vld [vmem:[#allocation10 + $0x18] sm:$0xff] }
 0x546   : > { %v5290_v2 = vadd.f32 %v5274_v53, %v5255_v19  ;;  %v5309_v24 = vmul.f32 %v12427_v12, %v10636_v35  ;;  %7562 = vmatprep.subr.bf16.mxu0 %v7561_v43  ;;  %v5221_v20 = vadd.f32 %v5205_v36, %v5186_v29  ;;  %v12494_v7 = vrot.slane %v12469_v26, 3  ;;  %12496 = vst [vmem:[#allocation19_spill] sm:$0xff] %v10887_v39  ;;  %v5632_v35 = vld [vmem:[#allocation11 + $0x60] sm:$0xff]  ;;  %v5633_v41 = vld [vmem:[#allocation11 + $0x68] sm:$0xff]  ;;  %v12497_v36 = vld [vmem:[#allocation73_spill] sm:$0xff] }
 0x547   : > { %v12495_v56 = vrot.slane %v12412_v61, 3  ;;  %v4418_v4 = vmul.f32 %v10883_v62, %v10859_v50  ;;  %v4503_v48 = vmul.f32 %v10887_v39, %v10866_v8  ;;  %7564 = vmatpush3.bf16.msra.mxu0 %v7561_v43  ;;  %v5413_v53 = vmul.f32 %v12497_v36, %v10479_v49  ;;  %v10893_v19 = vld [vmem:[#allocation10 + $0x50] sm:$0xff]  ;;  %v12499_v47 = vld [vmem:[#allocation28_spill] sm:$0xff] }
 0x548   : > { %v4723_v15 = vadd.f32 %v4707_v60, %v4638_v16  ;;  %12498 = vst [vmem:[#allocation62_spill] sm:$0xff] %v10893_v19  ;;  %v4742_v29 = vmul.f32 %v10893_v19, %v10839_v0  ;;  %v5117_v51 = vadd.f32 %v5101_v63, %v5082_v55  ;;  %v5136_v13 = vmul.f32 %v12449_v6, %v12412_v61  ;;  %v10903_v16 = vld [vmem:[#allocation10 + $0x60] sm:$0xff] }
 0x549   : > { %v10881_v46 = vsel %vm4768_vm3, %v12495_v56, %v12494_v7  ;;  %v12102_v7 = vrot.slane %v12499_v47, 1  ;;  %v7565_v56 = vpack.c.bf16 %v5633_v41, %v5632_v35  ;;  %v12104_v43 = vrot.slane %v12469_v26, 4  ;;  %v10909_v35 = vld [vmem:[#allocation10 + $0x28] sm:$0xff] }
 0x54a   : > { %v5394_v31 = vadd.f32 %v5378_v14, %v5359_v3  ;;  %v5325_v39 = vadd.f32 %v5309_v24, %v5290_v2  ;;  %v5344_v49 = vmul.f32 %v12435_v22, %v10668_v58  ;;  %v4827_v60 = vmul.f32 %v10903_v16, %v10881_v46  ;;  %v5634_v14 = vld [vmem:[#allocation11 + $0x70] sm:$0xff]  ;;  %v5635_v3 = vld [vmem:[#allocation11 + $0x78] sm:$0xff] }
 0x54b   : > { %7566 = vmatprep.subr.bf16.mxu0 %v7565_v56  ;;  %v5256_v19 = vadd.f32 %v5240_v54, %v5221_v20  ;;  %v5275_v55 = vmul.f32 %v12473_v5, %v10708_v59  ;;  %v4519_v63 = vadd.f32 %v4503_v48, %v4418_v4  ;;  %v4538_v6 = vmul.f32 %v10909_v35, %v12469_v26 }
 0x54c   : > { %7568 = vmatpush3.bf16.msra.mxu0 %v7565_v56  ;;  %v4758_v58 = vadd.f32 %v4742_v29, %v4723_v15  ;;  %v5171_v2 = vmul.f32 %v12461_v52, %v10810_v45  ;;  %v12500_v20 = vrot.slane %v12469_v26, 1  ;;  %v12101_v59 = vrot.slane %v12499_v47, 2 }
 0x54d   : > { %v7569_v5 = vpack.c.bf16 %v5635_v3, %v5634_v14  ;;  %v5152_v24 = vadd.f32 %v5136_v13, %v5117_v51  ;;  %v12501_v4 = vrot.slane %v12412_v61, 4  ;;  %v12103_v52 = vrot.slane %v12469_v26, 5  ;;  %v10938_v3 = vld [vmem:[#allocation10 + $0x38] sm:$0xff] }
 0x54e   : > { %v10920_v54 = vsel %vm4563_vm1, %v12500_v20, %v12102_v7  ;;  %v5567_v41 = vadd.f32 %v10775_v9, %v10785_v32  ;;  %v5568_v15 = vadd.f32 %v10822_v25, %v5533_v23  ;;  %v5429_v29 = vadd.f32 %v5413_v53, %v5394_v31  ;;  %v12502_v9 = vld [vmem:[#allocation79_spill] sm:$0xff] }
 0x54f   : > { %v10928_v48 = vsel %vm4853_vm4, %v12501_v4, %v12104_v43  ;;  %v5448_v56 = vmul.f32 %v12437_v37, %v12442_v28  ;;  %7570 = vmatprep.subr.bf16.mxu0 %v7569_v5  ;;  %v5291_v13 = vadd.f32 %v5275_v55, %v5256_v19  ;;  %v5310_v51 = vmul.f32 %v12480_v40, %v10730_v44  ;;  %v10951_v23 = vld [vmem:[#allocation10 + $0x70] sm:$0xff]  ;;  %v12516_v43 = vld [vmem:[#allocation57_spill] sm:$0xff] }
 0x550   : > { %v4554_v14 = vadd.f32 %v4538_v6, %v4519_v63  ;;  %v4623_v20 = vmul.f32 %v10938_v3, %v10920_v54  ;;  %7572 = vmatpush3.bf16.msra.mxu0 %v7569_v5  ;;  %v5379_v32 = vmul.f32 %v12502_v9, %v10566_v38  ;;  %v4843_v25 = vadd.f32 %v4827_v60, %v4758_v58  ;;  %v12505_v63 = vld [vmem:[#allocation67_spill] sm:$0xff]  ;;  %v12506_v6 = vld [vmem:[#allocation77_spill] sm:$0xff] }
 0x551   : > { %v12503_v31 = vrot.slane %v12469_v26, 2  ;;  %v4912_v44 = vmul.f32 %v10951_v23, %v10928_v48  ;;  %v5360_v40 = vadd.f32 %v5344_v49, %v5325_v39  ;;  %v5187_v53 = vadd.f32 %v5171_v2, %v5152_v24  ;;  %v12509_v39 = vld [vmem:[#allocation23_spill] sm:$0xff] }
 0x552   : > { %v5206_v19 = vmul.f32 %v12471_v34, %v10839_v0  ;;  %v12504_v60 = vrot.slane %v12412_v61, 5  ;;  %v10966_v58 = vadd.f32 %v12506_v6, %v12505_v63  ;;  %v10969_v5 = vadd.f32 %v12506_v6, %v5567_v41  ;;  %v12510_v49 = vld [vmem:[#allocation39_spill] sm:$0xff]  ;;  %v12517_v41 = vld [vmem:[#allocation82_spill] sm:$0xff] }
 0x553   : > { %v10949_v28 = vsel %vm4648_vm2, %v12503_v31, %v12101_v59  ;;  %v5464_v4 = vadd.f32 %v5448_v56, %v5429_v29  ;;  %v5483_v2 = vmul.f32 %v12510_v49, %v12509_v39  ;;  %v5326_v24 = vadd.f32 %v5310_v51, %v5291_v13  ;;  %v10975_v59 = vld [vmem:[#allocation10 + $0x48] sm:$0xff]  ;;  %v10983_v29 = vld [vmem:[#allocation10 + $0x80] sm:$0xff]  ;;  %v12514_v39 = vld [vmem:[#allocation27_spill] sm:$0xff] }
 0x554   : > { %v10962_v55 = vsel %vm4938_vm5, %v12504_v60, %v12103_v52  ;;  %12507 = vst [vmem:[#allocation61_spill] sm:$0xff] %v10966_v58  ;;  %12508 = vst [vmem:[#allocation35_spill] sm:$0xff] %v10969_v5  ;;  %v5345_v34 = vmul.f32 %v12487_v27, %v10765_v33  ;;  %v4639_v31 = vadd.f32 %v4623_v20, %v4554_v14  ;;  %v12513_v33 = vld [vmem:[#allocation81_spill] sm:$0xff]  ;;  %v12530_v58 = vld [vmem:[#allocation78_spill] sm:$0xff] }
 0x555   : > { %v4708_v60 = vmul.f32 %v10975_v59, %v10949_v28  ;;  %v10980_v63 = vadd.f32 %v12506_v6, %v5568_v15  ;;  %v4928_v7 = vadd.f32 %v4912_v44, %v4843_v25  ;;  %12512 = vst [vmem:[#allocation41_spill] sm:$0xff] %v10983_v29  ;;  %v4997_v56 = vmul.f32 %v10983_v29, %v10962_v55  ;;  %v12515_v15 = vld [vmem:[#allocation33_spill] sm:$0xff] }
 0x556   : > { %v5395_v13 = vadd.f32 %v5379_v32, %v5360_v40  ;;  %v5414_v27 = vmul.f32 %v12513_v33, %v10566_v38  ;;  %v5222_v51 = vadd.f32 %v5206_v19, %v5187_v53  ;;  %v5241_v14 = vmul.f32 %v12478_v42, %v10839_v0  ;;  %v10997_v32 = vld [vmem:[#allocation10 + $0x58] sm:$0xff] }
 0x557   : > { %12511 = vst [vmem:[#allocation87_spill] sm:$0xff] %v10980_v63  ;;  %v5499_v20 = vadd.f32 %v5483_v2, %v5464_v4  ;;  %v5518_v52 = vmul.f32 %v12515_v15, %v12514_v39  ;;  %v5449_v25 = vmul.f32 %v12517_v41, %v12516_v43  ;;  %v5380_v44 = vmul.f32 %v12493_v1, %v10747_v10  ;;  %v11009_v4 = vld [vmem:[#allocation10 + $0x90] sm:$0xff] }
 0x558   : > { %v5361_v63 = vadd.f32 %v5345_v34, %v5326_v24  ;;  %v4724_v5 = vadd.f32 %v4708_v60, %v4639_v31  ;;  %v4743_v38 = vmul.f32 %v10997_v32, %v10949_v28  ;;  %v4464_v40 = vrot.slane %v12499_v47, 7  ;;  %12520 = vst [vmem:[#allocation63_spill] sm:$0xff] %v11009_v4 }
 0x559   : > { %v12518_v42 = vrot.slane %v12499_v47, 3  ;;  %v12519_v53 = vrot.slane %v12469_v26, 3  ;;  %v5013_v43 = vadd.f32 %v4997_v56, %v4928_v7  ;;  %v5032_v1 = vmul.f32 %v11009_v4, %v10859_v50 }
 0x55a   : > { %v5430_v24 = vadd.f32 %v5414_v27, %v5395_v13  ;;  %v5257_v34 = vadd.f32 %v5241_v14, %v5222_v51  ;;  %v5276_v31 = vmul.f32 %v12420_v21, %v10881_v46  ;;  %v4380_v60 = vrot.slane %v12499_v47, 6  ;;  %v11027_v27 = vld [vmem:[#allocation10 + $0x68] sm:$0xff]  ;;  %v11036_v51 = vld [vmem:[#allocation10 + $0xa0] sm:$0xff] }
 0x55b   : > { %v11007_v19 = vsel %vm4768_vm3, %v12519_v53, %v12518_v42  ;;  %v11017_v39 = vadd.f32 %v5518_v52, %v5499_v20  ;;  %v12521_v42 = vld [vmem:[#allocation40_spill] sm:$0xff]  ;;  %v5484_v7 = vmul.f32 %v12474_v57, %v12385_v17  ;;  %v5415_v56 = vmul.f32 %v12497_v36, %v10747_v10  ;;  %12524 = vst [vmem:[#allocation29_spill] sm:$0xff] %v11036_v51 }
 0x55c   : > { %v11021_v53 = vmul.f32 %v12521_v42, %v12470_v11  ;;  %v5396_v2 = vadd.f32 %v5380_v44, %v5361_v63  ;;  %v4759_v13 = vadd.f32 %v4743_v38, %v4724_v5  ;;  %v4828_v21 = vmul.f32 %v11027_v27, %v11007_v19  ;;  %v11072_v4 = vpop.f32.mrb[92].mxu1  ;;  %v11074_v63 = vld [vmem:[#allocation10 + $0xb0] sm:$0xff] }
 0x55d   : > { %v12522_v46 = vrot.slane %v12469_v26, 7  ;;  %v5048_v11 = vadd.f32 %v5032_v1, %v5013_v43  ;;  %v5067_v17 = vmul.f32 %v11036_v51, %v10859_v50  ;;  %v12525_v10 = vrot.slane %v12499_v47, 4  ;;  %v12529_v1 = vld [vmem:[#allocation60_spill] sm:$0xff]  ;;  %12535 = vst [vmem:[#allocation85_spill] sm:$0xff] %v11072_v4  ;;  %12536 = vst [vmem:[#allocation70_spill] sm:$0xff] %v11074_v63 }
 0x55e   : > { %v12526_v36 = vrot.slane %v12469_v26, 4  ;;  %v5465_v14 = vadd.f32 %v5449_v25, %v5430_v24  ;;  %v5292_v20 = vadd.f32 %v5276_v31, %v5257_v34  ;;  %v5311_v44 = vmul.f32 %v12427_v12, %v10928_v48  ;;  %v11061_v25 = vpop.f32.mrb[92].mxu0  ;;  %v11066_v34 = vld [vmem:[#allocation10 + $0x78] sm:$0xff] }
 0x55f   : > { %v11034_v52 = vsel %vm4441_vm0, %v12522_v46, %v4464_v40  ;;  %v12527_v38 = vrot.slane %v12469_v26, 6  ;;  %12532 = vst [vmem:[#allocation68_spill] sm:$0xff] %v11061_v25  ;;  %v5450_v12 = vmul.f32 %v12437_v37, %v10754_v18  ;;  %v4844_v48 = vadd.f32 %v4828_v21, %v4759_v13  ;;  %12533 = vst [vmem:[#allocation54_spill] sm:$0xff] %v11066_v34  ;;  %v11085_v21 = vpop.f32.mrb[93].mxu1 }
 0x560   : > { %12523 = vst [vmem:[#allocation65_spill] sm:$0xff] %v11034_v52  ;;  %v11045_v5 = vsel %vm4853_vm4, %v12526_v36, %v12525_v10  ;;  %v4504_v51 = vmul.f32 %v12530_v58, %v11034_v52  ;;  %v12531_v10 = vld [vmem:[#allocation31_spill] sm:$0xff]  ;;  %v5431_v36 = vadd.f32 %v5415_v56, %v5396_v2  ;;  %v5083_v29 = vadd.f32 %v5067_v17, %v5048_v11  ;;  %v12542_v17 = vld [vmem:[#allocation74_spill] sm:$0xff] }
 0x561   : > { %v11053_v43 = vsel %vm4343_vm15, %v12527_v38, %v4380_v60  ;;  %v4583_v24 = vrot.slane %v12531_v10, 1  ;;  %v4913_v31 = vmul.f32 %v11066_v34, %v11045_v5  ;;  %v11070_v38 = vpop.f32.mrb[93].mxu0  ;;  %v5102_v25 = vmul.f32 %v11074_v63, %v10866_v8  ;;  %12540 = vst [vmem:[#allocation66_spill] sm:$0xff] %v11085_v21 }
 0x562   : > { %12528 = vst [vmem:[#allocation22_spill] sm:$0xff] %v11053_v43  ;;  %v4419_v46 = vmul.f32 %v12529_v1, %v11053_v43  ;;  %12534 = vst [vmem:[#allocation64_spill] sm:$0xff] %v11070_v38  ;;  %v12537_v37 = vrot.slane %v12499_v47, 5  ;;  %v12538_v18 = vrot.slane %v12469_v26, 5  ;;  %v5500_v34 = vadd.f32 %v5484_v7, %v5465_v14  ;;  %v12541_v38 = vld [vmem:[#allocation43_spill] sm:$0xff] }
 0x563   : > { %v5519_v4 = vmul.f32 %v12541_v38, %v10624_v30  ;;  %v5327_v2 = vadd.f32 %v5311_v44, %v5292_v20  ;;  %v5346_v56 = vmul.f32 %v12435_v22, %v10962_v55  ;;  %v4539_v63 = vmul.f32 %v12542_v17, %v12499_v47 }
 0x564   : > { %v11083_v13 = vsel %vm4938_vm5, %v12538_v18, %v12537_v37  ;;  %v4520_v11 = vadd.f32 %v4504_v51, %v4419_v46  ;;  %v12543_v58 = vrot.slane %v12531_v10, 6  ;;  %v12545_v37 = vrot.slane %v12531_v10, 7  ;;  %v11109_v51 = vld [vmem:[#allocation10 + $0x88] sm:$0xff] }
 0x565   : > { %12539 = vst [vmem:[#allocation88_spill] sm:$0xff] %v11083_v13  ;;  %v12547_v30 = vrot.slane %v12499_v47, 1  ;;  %v4668_v22 = vrot.slane %v12531_v10, 2  ;;  %v4929_v55 = vadd.f32 %v4913_v31, %v4844_v48  ;;  %12549 = vst [vmem:[#allocation73_spill] sm:$0xff] %v11109_v51  ;;  %v4998_v20 = vmul.f32 %v11109_v51, %v11083_v13  ;;  %v12551_v31 = vld [vmem:[#allocation19_spill] sm:$0xff] }
 0x566   : > { %v11096_v1 = vsel %vm4343_vm15, %v4380_v60, %v12543_v58  ;;  %v11101_v7 = vsel %vm4441_vm0, %v4464_v40, %v12545_v37  ;;  %v5466_v58 = vadd.f32 %v5450_v12, %v5431_v36  ;;  %v5485_v60 = vmul.f32 %v12510_v49, %v12412_v61  ;;  %v11115_v40 = vld [vmem:[#allocation10 + $0xc0] sm:$0xff]  ;;  %v12554_v49 = vld [vmem:[#allocation59_spill] sm:$0xff] }
 0x567   : > { %12544 = vst [vmem:[#allocation56_spill] sm:$0xff] %v11096_v1  ;;  %12546 = vst [vmem:[#allocation69_spill] sm:$0xff] %v11101_v7  ;;  %v11106_v14 = vsel %vm4563_vm1, %v12547_v30, %v4583_v24  ;;  %v5118_v44 = vadd.f32 %v5102_v25, %v5083_v29  ;;  %v5137_v46 = vmul.f32 %v11115_v40, %v12469_v26  ;;  %v12552_v36 = vld [vmem:[#allocation45_spill] sm:$0xff]  ;;  %v12555_v25 = vld [vmem:[#allocation30_spill] sm:$0xff] }
 0x568   : > { %12548 = vst [vmem:[#allocation71_spill] sm:$0xff] %v11106_v14  ;;  %12550 = vst [vmem:[#allocation79_spill] sm:$0xff] %v11115_v40  ;;  %v5362_v18 = vadd.f32 %v5346_v56, %v5327_v2  ;;  %v5381_v37 = vmul.f32 %v12502_v9, %v10859_v50  ;;  %v4420_v48 = vmul.f32 %v10883_v62, %v11096_v1  ;;  %v12553_v12 = vld [vmem:[#allocation25_spill] sm:$0xff]  ;;  %v12556_v2 = vrot.slane %v12499_v47, 2  ;;  %v11135_v1 = vld [vmem:[#allocation10 + $0x98] sm:$0xff] }
 0x569   : > { %v4505_v30 = vmul.f32 %v12551_v31, %v11101_v7  ;;  %v5554_v21 = vmul.f32 %v12553_v12, %v12552_v36  ;;  %v4555_v61 = vadd.f32 %v4539_v63, %v4520_v11  ;;  %v4624_v29 = vmul.f32 %v12554_v49, %v11106_v14  ;;  %v11141_v36 = vld [vmem:[#allocation10 + $0xd0] sm:$0xff] }
 0x56a   : > { %v5535_v40 = vadd.f32 %v5519_v4, %v5500_v34  ;;  %v11133_v9 = vsel %vm4648_vm2, %v12556_v2, %v4668_v22  ;;  %v5014_v56 = vadd.f32 %v4998_v20, %v4929_v55  ;;  %v5033_v7 = vmul.f32 %v11135_v1, %v11053_v43 }
 0x56b   : > { %12557 = vst [vmem:[#allocation67_spill] sm:$0xff] %v11133_v9  ;;  %v5501_v13 = vadd.f32 %v5485_v60, %v5466_v58  ;;  %v5520_v63 = vmul.f32 %v12515_v15, %v10810_v45  ;;  %v5153_v11 = vadd.f32 %v5137_v46, %v5118_v44  ;;  %v5172_v4 = vmul.f32 %v11141_v36, %v10920_v54  ;;  %v12558_v58 = vld [vmem:[#allocation86_spill] sm:$0xff] }
 0x56c   : > { %v5397_v34 = vadd.f32 %v5381_v37, %v5362_v18  ;;  %v5416_v2 = vmul.f32 %v12513_v33, %v10859_v50  ;;  %v4521_v55 = vadd.f32 %v4505_v30, %v4420_v48  ;;  %v4540_v20 = vmul.f32 %v10909_v35, %v12531_v10  ;;  %v11160_v18 = vld [vmem:[#allocation10 + $0xa8] sm:$0xff] }
 0x56d   : > { %v4640_v51 = vadd.f32 %v4624_v29, %v4555_v61  ;;  %v4709_v60 = vmul.f32 %v12558_v58, %v11133_v9  ;;  %v12559_v45 = vrot.slane %v12555_v25, 1  ;;  %v5569_v46 = vadd.f32 %v11021_v53, %v11017_v39 }
 0x56e   : > { %v4788_v50 = vrot.slane %v12531_v10, 3  ;;  %v5049_v33 = vadd.f32 %v5033_v7, %v5014_v56  ;;  %v5068_v37 = vmul.f32 %v11160_v18, %v11053_v43  ;;  %v5536_v48 = vadd.f32 %v5520_v63, %v5501_v13  ;;  %v12561_v13 = vld [vmem:[#allocation62_spill] sm:$0xff] }
 0x56f   : > { %v11154_v15 = vsel %vm4563_vm1, %v4583_v24, %v12559_v45  ;;  %v5555_v30 = vmul.f32 %v12521_v42, %v10839_v0  ;;  %v5188_v61 = vadd.f32 %v5172_v4, %v5153_v11  ;;  %v11166_v24 = vld [vmem:[#allocation10 + $0xe0] sm:$0xff]  ;;  %v5432_v45 = vadd.f32 %v5416_v2, %v5397_v34  ;;  %v11189_v34 = vld [vmem:[#allocation10 + $0xb8] sm:$0xff]  ;;  %v11193_v2 = vld [vmem:[#allocation10 + $0xf0] sm:$0xff] }
 0x570   : > { %12560 = vst [vmem:[#allocation77_spill] sm:$0xff] %v11154_v15  ;;  %v5207_v29 = vmul.f32 %v11166_v24, %v10949_v28  ;;  %v5451_v39 = vmul.f32 %v12517_v41, %v10866_v8  ;;  %v4556_v53 = vadd.f32 %v4540_v20, %v4521_v55  ;;  %v4625_v7 = vmul.f32 %v10938_v3, %v11154_v15 }
 0x571   : > { %v5570_v56 = vadd.f32 %v5554_v21, %v5535_v40  ;;  %v4725_v44 = vadd.f32 %v4709_v60, %v4640_v51  ;;  %v4744_v63 = vmul.f32 %v12561_v13, %v11133_v9  ;;  %v12562_v0 = vrot.slane %v12555_v25, 2  ;;  %12566 = vst [vmem:[#allocation81_spill] sm:$0xff] %v11193_v2 }
 0x572   : > { %v11182_v11 = vadd.f32 %v12506_v6, %v5569_v46  ;;  %v12565_v4 = vrot.slane %v12499_v47, 3  ;;  %v5084_v41 = vadd.f32 %v5068_v37, %v5049_v33  ;;  %v5103_v21 = vmul.f32 %v11189_v34, %v11034_v52 }
 0x573   : > { %v11179_v42 = vsel %vm4648_vm2, %v4668_v22, %v12562_v0  ;;  %v5571_v51 = vadd.f32 %v5555_v30, %v5536_v48  ;;  %v5223_v40 = vadd.f32 %v5207_v29, %v5188_v61  ;;  %v5242_v22 = vmul.f32 %v11193_v2, %v10949_v28  ;;  %v11208_v0 = vld [vmem:[#allocation10 + $0xc8] sm:$0xff] }
 0x574   : > { %12563 = vst [vmem:[#allocation23_spill] sm:$0xff] %v11179_v42  ;;  %12564 = vst [vmem:[#allocation39_spill] sm:$0xff] %v11182_v11  ;;  %v11187_v8 = vsel %vm4768_vm3, %v12565_v4, %v4788_v50  ;;  %v5486_v55 = vmul.f32 %v12474_v57, %v12469_v26  ;;  %v5467_v20 = vadd.f32 %v5451_v39, %v5432_v45  ;;  %v4873_v33 = vrot.slane %v12531_v10, 4 }
 0x575   : > { %v4641_v60 = vadd.f32 %v4625_v7, %v4556_v53  ;;  %v4710_v46 = vmul.f32 %v10975_v59, %v11179_v42  ;;  %v11203_v37 = vadd.f32 %v12506_v6, %v5570_v56  ;;  %v4760_v48 = vadd.f32 %v4744_v63, %v4725_v44 }
 0x576   : > { %v4829_v30 = vmul.f32 %v10903_v16, %v11187_v8  ;;  %v12124_v61 = vrot.slane %v12555_v25, 3  ;;  %v5119_v29 = vadd.f32 %v5103_v21, %v5084_v41  ;;  %v5138_v57 = vmul.f32 %v11208_v0, %v12499_v47 }
 0x577   : > { %12567 = vst [vmem:[#allocation27_spill] sm:$0xff] %v11203_v37  ;;  %v4384_v26 = vrot.slane %v12555_v25, 6  ;;  %v4468_v45 = vrot.slane %v12555_v25, 7  ;;  %v11215_v39 = vadd.f32 %v12506_v6, %v5571_v51  ;;  %v5258_v53 = vadd.f32 %v5242_v22, %v5223_v40  ;;  %v11230_v51 = vld [vmem:[#allocation10 + $0xd8] sm:$0xff] }
 0x578   : > { %v5521_v44 = vmul.f32 %v12541_v38, %v10920_v54  ;;  %v11221_v7 = vmul.f32 %v12553_v12, %v10949_v28  ;;  %v5502_v56 = vadd.f32 %v5486_v55, %v5467_v20  ;;  %v4726_v63 = vadd.f32 %v4710_v46, %v4641_v60  ;;  %v11234_v38 = vld [vmem:[#allocation10 + $0x100] sm:$0xff] }
 0x579   : > { %12568 = vst [vmem:[#allocation33_spill] sm:$0xff] %v11215_v39  ;;  %v4745_v4 = vmul.f32 %v10997_v32, %v11179_v42  ;;  %v12570_v41 = vrot.slane %v12499_v47, 4  ;;  %v4845_v6 = vadd.f32 %v4829_v30, %v4760_v48  ;;  %v5173_v54 = vmul.f32 %v11230_v51, %v11106_v14  ;;  %12571 = vst [vmem:[#allocation82_spill] sm:$0xff] %v11234_v38  ;;  %v11272_v39 = vld [vmem:[#allocation10 + $0xe8] sm:$0xff] }
 0x57a   : > { %12569 = vst [vmem:[#allocation57_spill] sm:$0xff] %v11221_v7  ;;  %v5277_v28 = vmul.f32 %v11234_v38, %v11007_v19  ;;  %v11241_v12 = vsel %vm4768_vm3, %v4788_v50, %v12124_v61  ;;  %v5154_v40 = vadd.f32 %v5138_v57, %v5119_v29  ;;  %v12573_v22 = vrot.slane %v12531_v10, 6  ;;  %v12576_v50 = vld [vmem:[#allocation36_spill] sm:$0xff]  ;;  %12582 = vst [vmem:[#allocation25_spill] sm:$0xff] %v11272_v39 }
 0x57b   : > { %v11228_v21 = vsel %vm4853_vm4, %v12570_v41, %v4873_v33  ;;  %12572 = vst [vmem:[#allocation40_spill] sm:$0xff] %v11241_v12  ;;  %v12574_v20 = vrot.slane %v12531_v10, 7  ;;  %v4958_v48 = vrot.slane %v12531_v10, 5  ;;  %v12577_v30 = vrot.slane %v12576_v50, 6 }
 0x57c   : > { %v11246_v55 = vsel %vm4343_vm15, %v12573_v22, %v4384_v26  ;;  %v4914_v19 = vmul.f32 %v10951_v23, %v11228_v21  ;;  %v12579_v57 = vrot.slane %v12576_v50, 7  ;;  %v11267_v22 = vadd.f32 %v5521_v44, %v5502_v56  ;;  %v12585_v56 = vld [vmem:[#allocation78_spill] sm:$0xff] }
 0x57d   : > { %v11251_v60 = vsel %vm4441_vm0, %v12574_v20, %v4468_v45  ;;  %v11260_v29 = vsel %vm4343_vm15, %v4384_v26, %v12577_v30  ;;  %v4761_v20 = vadd.f32 %v4745_v4, %v4726_v63  ;;  %v4830_v61 = vmul.f32 %v11027_v27, %v11241_v12  ;;  %v11276_v26 = vld [vmem:[#allocation10 + $0x110] sm:$0xff] }
 0x57e   : > { %12575 = vst [vmem:[#allocation43_spill] sm:$0xff] %v11251_v60  ;;  %12578 = vst [vmem:[#allocation74_spill] sm:$0xff] %v11260_v29  ;;  %v11265_v41 = vsel %vm4441_vm0, %v4468_v45, %v12579_v57  ;;  %v4587_v46 = vrot.slane %v12576_v50, 1  ;;  %v5208_v37 = vmul.f32 %v11272_v39, %v11133_v9  ;;  %v5312_v30 = vmul.f32 %v11276_v26, %v11045_v5  ;;  %v12584_v45 = vld [vmem:[#allocation60_spill] sm:$0xff] }
 0x57f   : > { %12580 = vst [vmem:[#allocation19_spill] sm:$0xff] %v11265_v41  ;;  %12581 = vst [vmem:[#allocation45_spill] sm:$0xff] %v11267_v22  ;;  %v4421_v44 = vmul.f32 %v12584_v45, %v11246_v55  ;;  %v4506_v63 = vmul.f32 %v12585_v56, %v11251_v60  ;;  %v12586_v4 = vrot.slane %v12555_v25, 4  ;;  %v4422_v7 = vmul.f32 %v10883_v62, %v11260_v29 }
 0x580   : > { %12583 = vst [vmem:[#allocation59_spill] sm:$0xff] %v11276_v26  ;;  %v4507_v22 = vmul.f32 %v12551_v31, %v11265_v41  ;;  %v5189_v5 = vadd.f32 %v5173_v54, %v5154_v40  ;;  %v5293_v14 = vadd.f32 %v5277_v28, %v5258_v53  ;;  %v4930_v26 = vadd.f32 %v4914_v19, %v4845_v6  ;;  %v12592_v53 = vld [vmem:[#allocation54_spill] sm:$0xff]  ;;  %v12595_v40 = vld [vmem:[#allocation32_spill] sm:$0xff] }
 0x581   : > { %v11287_v57 = vsel %vm4853_vm4, %v4873_v33, %v12586_v4  ;;  %v12588_v45 = vrot.slane %v12499_v47, 5  ;;  %v4846_v52 = vadd.f32 %v4830_v61, %v4761_v20  ;;  %v4541_v33 = vmul.f32 %v12542_v17, %v12555_v25  ;;  %v12593_v54 = vld [vmem:[#allocation38_spill] sm:$0xff] }
 0x582   : > { %12587 = vst [vmem:[#allocation86_spill] sm:$0xff] %v11287_v57  ;;  %v12590_v4 = vrot.slane %v12555_v25, 1  ;;  %v4672_v38 = vrot.slane %v12576_v50, 2  ;;  %v4522_v41 = vadd.f32 %v4506_v63, %v4421_v44  ;;  %v4915_v6 = vmul.f32 %v12592_v53, %v11287_v57 }
 0x583   : > { %v11297_v56 = vsel %vm4938_vm5, %v12588_v45, %v4958_v48  ;;  %v12594_v28 = vrot.slane %v12593_v54, 6  ;;  %v12596_v19 = vrot.slane %v12595_v40, 6  ;;  %v12598_v17 = vrot.slane %v12593_v54, 7 }
 0x584   : > { %12589 = vst [vmem:[#allocation62_spill] sm:$0xff] %v11297_v56  ;;  %v11304_v11 = vsel %vm4563_vm1, %v12590_v4, %v4587_v46  ;;  %v12599_v20 = vrot.slane %v12595_v40, 7  ;;  %v12601_v4 = vld [vmem:[#allocation41_spill] sm:$0xff]  ;;  %v12602_v63 = vrot.slane %v12555_v25, 5  ;;  %v4523_v57 = vadd.f32 %v4507_v22, %v4422_v7  ;;  %v12611_v22 = vld [vmem:[#allocation56_spill] sm:$0xff] }
 0x585   : > { %12591 = vst [vmem:[#allocation36_spill] sm:$0xff] %v11304_v11  ;;  %v11314_v61 = vsel %vm4343_vm15, %v12596_v19, %v12594_v28  ;;  %v4999_v44 = vmul.f32 %v12601_v4, %v11297_v56  ;;  %v4542_v28 = vmul.f32 %v10909_v35, %v12576_v50  ;;  %v11332_v19 = vld [vmem:[#allocation10 + $0xf8] sm:$0xff]  ;;  %v11336_v2 = vadd.f32 %v5312_v30, %v5293_v14 }
 0x586   : > { %12597 = vst [vmem:[#allocation60_spill] sm:$0xff] %v11314_v61  ;;  %v11321_v45 = vsel %vm4441_vm0, %v12599_v20, %v12598_v17  ;;  %v11328_v47 = vsel %vm4938_vm5, %v4958_v48, %v12602_v63  ;;  %12604 = vst [vmem:[#allocation38_spill] sm:$0xff] %v11332_v19  ;;  %v5243_v12 = vmul.f32 %v11332_v19, %v11133_v9  ;;  %v11338_v17 = vld [vmem:[#allocation10 + $0x120] sm:$0xff]  ;;  %v12607_v20 = vld [vmem:[#allocation88_spill] sm:$0xff]  ;;  %v12609_v48 = vrot.slane %v12595_v40, 1 }
 0x587   : > { %12600 = vst [vmem:[#allocation78_spill] sm:$0xff] %v11321_v45  ;;  %12603 = vst [vmem:[#allocation54_spill] sm:$0xff] %v11328_v47  ;;  %v11342_v56 = vmul.f32 %v11338_v17, %v12607_v20  ;;  %v12612_v63 = vld [vmem:[#allocation63_spill] sm:$0xff]  ;;  %v4626_v43 = vmul.f32 %v12554_v49, %v11304_v11  ;;  %v4424_v14 = vmul.f32 %v10883_v62, %v11314_v61  ;;  %v12613_v20 = vrot.slane %v12555_v25, 2  ;;  %v12616_v62 = vld [vmem:[#allocation29_spill] sm:$0xff] }
 0x588   : > { %12605 = vst [vmem:[#allocation41_spill] sm:$0xff] %v11336_v2  ;;  %12606 = vst [vmem:[#allocation91_spill] sm:$0xff] %v11338_v17  ;;  %v11347_v7 = vsel %vm4563_vm1, %v4587_v46, %v12609_v48  ;;  %v5034_v39 = vmul.f32 %v12612_v63, %v12611_v22  ;;  %v4509_v30 = vmul.f32 %v12551_v31, %v11321_v45  ;;  %v12615_v48 = vld [vmem:[#allocation73_spill] sm:$0xff]  ;;  %v4792_v45 = vrot.slane %v12576_v50, 3 }
 0x589   : > { %12608 = vst [vmem:[#allocation88_spill] sm:$0xff] %v11342_v56  ;;  %12610 = vst [vmem:[#allocation92_spill] sm:$0xff] %v11347_v7  ;;  %v4557_v9 = vadd.f32 %v4541_v33, %v4522_v41  ;;  %v11360_v17 = vsel %vm4648_vm2, %v12613_v20, %v4672_v38  ;;  %v4931_v46 = vadd.f32 %v4915_v6, %v4846_v52  ;;  %v12617_v31 = vld [vmem:[#allocation69_spill] sm:$0xff]  ;;  %v12618_v41 = vld [vmem:[#allocation70_spill] sm:$0xff]  ;;  %v12619_v20 = vrot.slane %v12595_v40, 2 }
 0x58a   : > { %12614 = vst [vmem:[#allocation93_spill] sm:$0xff] %v11360_v17  ;;  %v5000_v19 = vmul.f32 %v12615_v48, %v11328_v47  ;;  %v5224_v56 = vadd.f32 %v5208_v37, %v5189_v5  ;;  %v5015_v2 = vadd.f32 %v4999_v44, %v4930_v26  ;;  %v4558_v63 = vadd.f32 %v4542_v28, %v4523_v57 }
 0x58b   : > { %v4627_v29 = vmul.f32 %v10938_v3, %v11347_v7  ;;  %v5069_v61 = vmul.f32 %v12616_v62, %v12611_v22  ;;  %v5104_v33 = vmul.f32 %v12618_v41, %v12617_v31  ;;  %v11374_v52 = vsel %vm4648_vm2, %v4672_v38, %v12619_v20  ;;  %v12620_v7 = vld [vmem:[#allocation37_spill] sm:$0xff] }
 0x58c   : > { %v4711_v37 = vmul.f32 %v12558_v58, %v11360_v17  ;;  %v4676_v26 = vrot.slane %v12593_v54, 2  ;;  %v4525_v57 = vadd.f32 %v4509_v30, %v4424_v14  ;;  %v4544_v5 = vmul.f32 %v10909_v35, %v12593_v54  ;;  %v12624_v35 = vld [vmem:[#allocation79_spill] sm:$0xff] }
 0x58d   : > { %v4642_v6 = vadd.f32 %v4626_v43, %v4557_v9  ;;  %v5016_v44 = vadd.f32 %v5000_v19, %v4931_v46  ;;  %v5035_v28 = vmul.f32 %v11135_v1, %v11246_v55  ;;  %v12621_v47 = vrot.slane %v12620_v7, 1 }
 0x58e   : > { %v12622_v31 = vrot.slane %v12593_v54, 1  ;;  %v11390_v20 = vadd.f32 %v5243_v12, %v5224_v56  ;;  %v5050_v41 = vadd.f32 %v5034_v39, %v5015_v2  ;;  %v4643_v22 = vadd.f32 %v4627_v29, %v4558_v63 }
 0x58f   : > { %v4712_v14 = vmul.f32 %v10975_v59, %v11374_v52  ;;  %v5139_v43 = vmul.f32 %v12624_v35, %v12531_v10  ;;  %v11398_v9 = vmul.f32 %v11141_v36, %v11154_v15  ;;  %v12625_v19 = vrot.slane %v12555_v25, 3 }
 0x590   : > { %v11388_v38 = vsel %vm4563_vm1, %v12622_v31, %v12621_v47  ;;  %v12626_v47 = vld [vmem:[#allocation76_spill] sm:$0xff]  ;;  %v4746_v2 = vmul.f32 %v12561_v13, %v11360_v17  ;;  %v12627_v39 = vrot.slane %v12595_v40, 2  ;;  %v4560_v56 = vadd.f32 %v4544_v5, %v4525_v57 }
 0x591   : > { %12623 = vst [vmem:[#allocation73_spill] sm:$0xff] %v11388_v38  ;;  %v11403_v30 = vsel %vm4768_vm3, %v12625_v19, %v4792_v45  ;;  %v4628_v12 = vmul.f32 %v12554_v49, %v12626_v47  ;;  %v4629_v63 = vmul.f32 %v10938_v3, %v11388_v38  ;;  %v4727_v46 = vadd.f32 %v4711_v37, %v4642_v6  ;;  %v12631_v37 = vld [vmem:[#allocation75_spill] sm:$0xff] }
 0x592   : > { %v11412_v29 = vsel %vm4648_vm2, %v12627_v39, %v4676_v26  ;;  %v5051_v31 = vadd.f32 %v5035_v28, %v5016_v44  ;;  %v5070_v19 = vmul.f32 %v11160_v18, %v11246_v55  ;;  %v12628_v15 = vrot.slane %v12620_v7, 2 }
 0x593   : > { %v5085_v10 = vadd.f32 %v5069_v61, %v5050_v41  ;;  %v4728_v47 = vadd.f32 %v4712_v14, %v4643_v22  ;;  %v4747_v39 = vmul.f32 %v10997_v32, %v11374_v52  ;;  %v4877_v57 = vrot.slane %v12576_v50, 4 }
 0x594   : > { %v11421_v49 = vsel %vm4648_vm2, %v4676_v26, %v12628_v15  ;;  %v12629_v5 = vrot.slane %v12595_v40, 3  ;;  %v4644_v6 = vadd.f32 %v4628_v12, %v12631_v37  ;;  %v4713_v44 = vmul.f32 %v12558_v58, %v11412_v29  ;;  %v11435_v26 = vld [vmem:[#allocation10 + $0x108] sm:$0xff] }
 0x595   : > { %v4796_v15 = vrot.slane %v12593_v54, 3  ;;  %v5278_v61 = vmul.f32 %v11435_v26, %v11187_v8  ;;  %v4831_v22 = vmul.f32 %v10903_v16, %v11403_v30  ;;  %v4645_v41 = vadd.f32 %v4629_v63, %v4560_v56 }
 0x596   : > { %v11429_v3 = vsel %vm4768_vm3, %v4792_v45, %v12629_v5  ;;  %v4714_v45 = vmul.f32 %v10975_v59, %v11421_v49  ;;  %v4762_v28 = vadd.f32 %v4746_v2, %v4727_v46  ;;  %v5086_v14 = vadd.f32 %v5070_v19, %v5051_v31 }
 0x597   : > { %12630 = vst [vmem:[#allocation29_spill] sm:$0xff] %v11429_v3  ;;  %v5105_v12 = vmul.f32 %v11189_v34, %v11251_v60  ;;  %v4962_v58 = vrot.slane %v12576_v50, 5  ;;  %v4763_v5 = vadd.f32 %v4747_v39, %v4728_v47  ;;  %v4832_v37 = vmul.f32 %v11027_v27, %v11429_v3 }
 0x598   : > { %v12632_v8 = vrot.slane %v12555_v25, 4  ;;  %v4879_v56 = vrot.slane %v12595_v40, 4  ;;  %v5120_v63 = vadd.f32 %v5104_v33, %v5085_v10  ;;  %v4729_v59 = vadd.f32 %v4713_v44, %v4644_v6 }
 0x599   : > { %v4748_v2 = vmul.f32 %v12561_v13, %v11412_v29  ;;  %v12633_v46 = vrot.slane %v12595_v40, 3  ;;  %v4730_v19 = vadd.f32 %v4714_v45, %v4645_v41  ;;  %v4749_v39 = vmul.f32 %v10997_v32, %v11421_v49 }
 0x59a   : > { %v11451_v38 = vsel %vm4853_vm4, %v12632_v8, %v4877_v57  ;;  %v11462_v47 = vsel %vm4853_vm4, %v4877_v57, %v4879_v56  ;;  %v4881_v8 = vrot.slane %v12593_v54, 4  ;;  %v4847_v3 = vadd.f32 %v4831_v22, %v4762_v28 }
 0x59b   : > { %v11459_v31 = vsel %vm4768_vm3, %v12633_v46, %v4796_v15  ;;  %12635 = vst [vmem:[#allocation79_spill] sm:$0xff] %v11462_v47  ;;  %v4916_v10 = vmul.f32 %v10951_v23, %v11451_v38  ;;  %v4964_v13 = vrot.slane %v12595_v40, 5  ;;  %v12636_v33 = vrot.slane %v12620_v7, 3 }
 0x59c   : > { %12634 = vst [vmem:[#allocation37_spill] sm:$0xff] %v11459_v31  ;;  %v5121_v44 = vadd.f32 %v5105_v12, %v5086_v14  ;;  %v5140_v57 = vmul.f32 %v11208_v0, %v12555_v25  ;;  %v4848_v41 = vadd.f32 %v4832_v37, %v4763_v5  ;;  %v12638_v32 = vrot.slane %v12555_v25, 5 }
 0x59d   : > { %v11473_v6 = vsel %vm4768_vm3, %v4796_v15, %v12636_v33  ;;  %v4764_v22 = vadd.f32 %v4748_v2, %v4729_v59  ;;  %v4833_v28 = vmul.f32 %v10903_v16, %v11459_v31  ;;  %v4917_v46 = vmul.f32 %v12592_v53, %v11462_v47  ;;  %v12666_v31 = vld [vmem:[#allocation70_spill] sm:$0xff] }
 0x59e   : > { %12637 = vst [vmem:[#allocation75_spill] sm:$0xff] %v11473_v6  ;;  %v11480_v45 = vsel %vm4938_vm5, %v12638_v32, %v4962_v58  ;;  %v11487_v15 = vsel %vm4938_vm5, %v4962_v58, %v4964_v13  ;;  %v4765_v14 = vadd.f32 %v4749_v39, %v4730_v19  ;;  %v4834_v12 = vmul.f32 %v11027_v27, %v11473_v6  ;;  %v11504_v19 = vld [vmem:[#allocation10 + $0x118] sm:$0xff] }
 0x59f   : > { %12639 = vst [vmem:[#allocation94_spill] sm:$0xff] %v11487_v15  ;;  %v11492_v5 = vsel %vm4853_vm4, %v4879_v56, %v4881_v8  ;;  %v4966_v37 = vrot.slane %v12593_v54, 5  ;;  %v5155_v33 = vadd.f32 %v5139_v43, %v5120_v63  ;;  %v4932_v59 = vadd.f32 %v4916_v10, %v4847_v3  ;;  %v11514_v10 = vpop.f32.mrb[94].mxu1 }
 0x5a0   : > { %12640 = vst [vmem:[#allocation95_spill] sm:$0xff] %v11492_v5  ;;  %v5001_v16 = vmul.f32 %v12601_v4, %v11480_v45  ;;  %v12641_v2 = vrot.slane %v12620_v7, 4  ;;  %v5209_v58 = vmul.f32 %v11166_v24, %v11179_v42  ;;  %v5313_v27 = vmul.f32 %v11504_v19, %v11228_v21  ;;  %12643 = vst [vmem:[#allocation97_spill] sm:$0xff] %v11514_v10 }
 0x5a1   : > { %v5156_v56 = vadd.f32 %v5140_v57, %v5121_v44  ;;  %v5175_v43 = vmul.f32 %v11230_v51, %v11304_v11  ;;  %v4849_v3 = vadd.f32 %v4833_v28, %v4764_v22  ;;  %v4933_v63 = vadd.f32 %v4917_v46, %v4848_v41  ;;  %v11522_v44 = vpop.f32.mrb[95].mxu1  ;;  %v12646_v22 = vld [vmem:[#allocation74_spill] sm:$0xff]  ;;  %v12647_v28 = vld [vmem:[#allocation63_spill] sm:$0xff] }
 0x5a2   : > { %v11500_v32 = vsel %vm4853_vm4, %v4881_v8, %v12641_v2  ;;  %v5002_v39 = vmul.f32 %v12615_v48, %v11487_v15  ;;  %v4918_v8 = vmul.f32 %v10951_v23, %v11492_v5  ;;  %v5294_v2 = vadd.f32 %v5278_v61, %v11390_v20  ;;  %12645 = vst [vmem:[#allocation99_spill] sm:$0xff] %v11522_v44  ;;  %v12650_v20 = vld [vmem:[#allocation41_spill] sm:$0xff]  ;;  %v12651_v61 = vld [vmem:[#allocation88_spill] sm:$0xff]  ;;  %v11544_v11 = vld [vmem:[#allocation10 + $0x128] sm:$0xff] }
 0x5a3   : > { %12642 = vst [vmem:[#allocation96_spill] sm:$0xff] %v11500_v32  ;;  %v4850_v6 = vadd.f32 %v4834_v12, %v4765_v14  ;;  %v11518_v47 = vsel %vm4938_vm5, %v4964_v13, %v4966_v37  ;;  %v4919_v21 = vmul.f32 %v12592_v53, %v11500_v32  ;;  %v5190_v57 = vadd.f32 %v11398_v9, %v5155_v33  ;;  %v11534_v14 = vld [vmem:[#allocation10 + $0x130] sm:$0xff]  ;;  %v12652_v12 = vld [vmem:[#allocation22_spill] sm:$0xff]  ;;  %v12653_v9 = vld [vmem:[#allocation25_spill] sm:$0xff] }
 0x5a4   : > { %12644 = vst [vmem:[#allocation98_spill] sm:$0xff] %v11518_v47  ;;  %v5017_v41 = vadd.f32 %v5001_v16, %v4932_v59  ;;  %v5036_v46 = vmul.f32 %v12647_v28, %v12646_v22  ;;  %v12648_v23 = vrot.slane %v12620_v7, 5  ;;  %v5363_v13 = vadd.f32 %v12651_v61, %v12650_v20  ;;  %v12654_v16 = vld [vmem:[#allocation72_spill] sm:$0xff]  ;;  %v12655_v20 = vld [vmem:[#allocation62_spill] sm:$0xff] }
 0x5a5   : > { %v5382_v53 = vmul.f32 %v11534_v14, %v12652_v12  ;;  %v5191_v44 = vadd.f32 %v5175_v43, %v5156_v56  ;;  %v5210_v33 = vmul.f32 %v12653_v9, %v11360_v17  ;;  %v5018_v59 = vadd.f32 %v5002_v39, %v4933_v63  ;;  %v12656_v63 = vld [vmem:[#allocation81_spill] sm:$0xff] }
 0x5a6   : > { %v11530_v10 = vsel %vm4938_vm5, %v4966_v37, %v12648_v23  ;;  %v5037_v32 = vmul.f32 %v11135_v1, %v12654_v16  ;;  %v4934_v15 = vadd.f32 %v4918_v8, %v4849_v3  ;;  %v5003_v37 = vmul.f32 %v12601_v4, %v11518_v47  ;;  %v11554_v4 = vld [vmem:[#allocation10 + $0x140] sm:$0xff]  ;;  %v12664_v47 = vld [vmem:[#allocation82_spill] sm:$0xff] }
 0x5a7   : > { %12649 = vst [vmem:[#allocation74_spill] sm:$0xff] %v11530_v10  ;;  %v5329_v23 = vadd.f32 %v5313_v27, %v5294_v2  ;;  %v5348_v61 = vmul.f32 %v11544_v11, %v12655_v20  ;;  %v4935_v5 = vadd.f32 %v4919_v21, %v4850_v6  ;;  %v5004_v56 = vmul.f32 %v12615_v48, %v11530_v10  ;;  %v12657_v6 = vld [vmem:[#allocation38_spill] sm:$0xff]  ;;  %v11560_v20 = vpop.f32.mrb[94].mxu0  ;;  %v11568_v10 = vld [vmem:[#allocation10 + $0x138] sm:$0xff] }
 0x5a8   : > { %v5225_v43 = vadd.f32 %v5209_v58, %v5190_v57  ;;  %v5244_v39 = vmul.f32 %v12656_v63, %v11179_v42  ;;  %v5052_v25 = vadd.f32 %v5036_v46, %v5017_v41  ;;  %v5071_v3 = vmul.f32 %v12616_v62, %v12646_v22  ;;  %12658 = vst [vmem:[#allocation63_spill] sm:$0xff] %v11560_v20  ;;  %v12659_v41 = vld [vmem:[#allocation60_spill] sm:$0xff] }
 0x5a9   : > { %v5398_v8 = vadd.f32 %v5382_v53, %v5363_v13  ;;  %v5417_v27 = vmul.f32 %v11554_v4, %v12652_v12  ;;  %v5226_v2 = vadd.f32 %v5210_v33, %v5191_v44  ;;  %v5245_v21 = vmul.f32 %v12657_v6, %v11360_v17  ;;  %v11566_v13 = vpop.f32.mrb[95].mxu0  ;;  %v12661_v12 = vld [vmem:[#allocation56_spill] sm:$0xff]  ;;  %v12662_v17 = vld [vmem:[#allocation42_spill] sm:$0xff] }
 0x5aa   : > { %v5053_v48 = vadd.f32 %v5037_v32, %v5018_v59  ;;  %v5072_v58 = vmul.f32 %v11160_v18, %v12654_v16  ;;  %v5019_v57 = vadd.f32 %v5003_v37, %v4934_v15  ;;  %v5038_v46 = vmul.f32 %v12647_v28, %v12659_v41  ;;  %12660 = vst [vmem:[#allocation41_spill] sm:$0xff] %v11566_v13  ;;  %v12663_v59 = vld [vmem:[#allocation40_spill] sm:$0xff]  ;;  %v12665_v37 = vld [vmem:[#allocation19_spill] sm:$0xff] }
 0x5ab   : > { %v5364_v53 = vadd.f32 %v5348_v61, %v5329_v23  ;;  %v5383_v44 = vmul.f32 %v11568_v10, %v12661_v12  ;;  %v5020_v33 = vadd.f32 %v5004_v56, %v4935_v5  ;;  %v5039_v20 = vmul.f32 %v11135_v1, %v12662_v17  ;;  %v11578_v13 = vld [vmem:[#allocation10 + $0x150] sm:$0xff]  ;;  %v12667_v23 = vld [vmem:[#allocation65_spill] sm:$0xff]  ;;  %v12668_v1 = vld [vmem:[#allocation24_spill] sm:$0xff] }
 0x5ac   : > { %v5260_v32 = vadd.f32 %v5244_v39, %v5225_v43  ;;  %v5279_v16 = vmul.f32 %v12664_v47, %v12663_v59  ;;  %v5087_v15 = vadd.f32 %v5071_v3, %v5052_v25  ;;  %v5106_v28 = vmul.f32 %v12666_v31, %v12665_v37  ;;  %v11588_v59 = vld [vmem:[#allocation10 + $0x148] sm:$0xff] }
 0x5ad   : > { %v5433_v60 = vadd.f32 %v5417_v27, %v5398_v8  ;;  %v5452_v61 = vmul.f32 %v11578_v13, %v12667_v23  ;;  %v5261_v42 = vadd.f32 %v5245_v21, %v5226_v2  ;;  %v5280_v5 = vmul.f32 %v11435_v26, %v11403_v30  ;;  %v12669_v30 = vld [vmem:[#allocation86_spill] sm:$0xff] }
 0x5ae   : > { %v5088_v56 = vadd.f32 %v5072_v58, %v5053_v48  ;;  %v5107_v43 = vmul.f32 %v11189_v34, %v12668_v1  ;;  %v5054_v39 = vadd.f32 %v5038_v46, %v5019_v57  ;;  %v5073_v25 = vmul.f32 %v12616_v62, %v12659_v41  ;;  %v12670_v48 = vld [vmem:[#allocation59_spill] sm:$0xff]  ;;  %v11598_v62 = vld [vmem:[#allocation10 + $0x160] sm:$0xff] }
 0x5af   : > { %v5399_v3 = vadd.f32 %v5383_v44, %v5364_v53  ;;  %v5418_v8 = vmul.f32 %v11588_v59, %v12661_v12  ;;  %v5055_v27 = vadd.f32 %v5039_v20, %v5020_v33  ;;  %v5074_v2 = vmul.f32 %v11160_v18, %v12662_v17  ;;  %v12671_v53 = vld [vmem:[#allocation28_spill] sm:$0xff]  ;;  %v12672_v33 = vld [vmem:[#allocation78_spill] sm:$0xff] }
 0x5b0   : > { %v5295_v21 = vadd.f32 %v5279_v16, %v5260_v32  ;;  %v5314_v58 = vmul.f32 %v12670_v48, %v12669_v30  ;;  %v5122_v23 = vadd.f32 %v5106_v28, %v5087_v15  ;;  %v5141_v57 = vmul.f32 %v12624_v35, %v12576_v50  ;;  %v11608_v28 = vld [vmem:[#allocation10 + $0x158] sm:$0xff] }
 0x5b1   : > { %v5468_v46 = vadd.f32 %v5452_v61, %v5433_v60  ;;  %v5487_v44 = vmul.f32 %v11598_v62, %v12671_v53  ;;  %v5296_v1 = vadd.f32 %v5280_v5, %v5261_v42  ;;  %v5315_v20 = vmul.f32 %v11504_v19, %v11451_v38  ;;  %v12673_v60 = vld [vmem:[#allocation69_spill] sm:$0xff]  ;;  %v12674_v53 = vld [vmem:[#allocation44_spill] sm:$0xff]  ;;  %v12675_v38 = vld [vmem:[#allocation54_spill] sm:$0xff] }
 0x5b2   : > { %v5123_v12 = vadd.f32 %v5107_v43, %v5088_v56  ;;  %v5142_v18 = vmul.f32 %v11208_v0, %v12595_v40  ;;  %v5089_v16 = vadd.f32 %v5073_v25, %v5054_v39  ;;  %v5108_v32 = vmul.f32 %v12666_v31, %v12672_v33  ;;  %v12676_v56 = vld [vmem:[#allocation91_spill] sm:$0xff]  ;;  %v12677_v40 = vld [vmem:[#allocation92_spill] sm:$0xff] }
 0x5b3   : > { %v5434_v15 = vadd.f32 %v5418_v8, %v5399_v3  ;;  %v5453_v61 = vmul.f32 %v11608_v28, %v12673_v60  ;;  %v5090_v30 = vadd.f32 %v5074_v2, %v5055_v27  ;;  %v5109_v42 = vmul.f32 %v11189_v34, %v12674_v53  ;;  %v11618_v31 = vld [vmem:[#allocation10 + $0x170] sm:$0xff]  ;;  %v12679_v34 = vld [vmem:[#allocation76_spill] sm:$0xff]  ;;  %v11628_v60 = vld [vmem:[#allocation10 + $0x168] sm:$0xff] }
 0x5b4   : > { %v5330_v5 = vadd.f32 %v5314_v58, %v5295_v21  ;;  %v5349_v43 = vmul.f32 %v12676_v56, %v12675_v38  ;;  %v5157_v17 = vadd.f32 %v5141_v57, %v5122_v23  ;;  %v5176_v39 = vmul.f32 %v11141_v36, %v12677_v40  ;;  %v12678_v3 = vld [vmem:[#allocation71_spill] sm:$0xff] }
 0x5b5   : > { %v5503_v25 = vadd.f32 %v5487_v44, %v5468_v46  ;;  %v5522_v8 = vmul.f32 %v11618_v31, %v12678_v3  ;;  %v5331_v33 = vadd.f32 %v5315_v20, %v5296_v1  ;;  %v5350_v27 = vmul.f32 %v11544_v11, %v11480_v45  ;;  %v12680_v46 = vld [vmem:[#allocation31_spill] sm:$0xff]  ;;  %v11648_v3 = vld [vmem:[#allocation10 + $0x178] sm:$0xff] }
 0x5b6   : > { %v5158_v2 = vadd.f32 %v5142_v18, %v5123_v12  ;;  %v5177_v21 = vmul.f32 %v11230_v51, %v12679_v34  ;;  %v5124_v58 = vadd.f32 %v5108_v32, %v5089_v16  ;;  %v5143_v23 = vmul.f32 %v12624_v35, %v12593_v54  ;;  %v11638_v35 = vld [vmem:[#allocation10 + $0x180] sm:$0xff]  ;;  %v12681_v32 = vld [vmem:[#allocation67_spill] sm:$0xff] }
 0x5b7   : > { %v5469_v57 = vadd.f32 %v5453_v61, %v5434_v15  ;;  %v5488_v44 = vmul.f32 %v11628_v60, %v12680_v46  ;;  %v5125_v38 = vadd.f32 %v5109_v42, %v5090_v30  ;;  %v5144_v1 = vmul.f32 %v11208_v0, %v12620_v7 }
 0x5b8   : > { %v5365_v20 = vadd.f32 %v5349_v43, %v5330_v5  ;;  %v5384_v45 = vmul.f32 %v11534_v14, %v11246_v55  ;;  %v5192_v12 = vadd.f32 %v5176_v39, %v5157_v17  ;;  %v5211_v18 = vmul.f32 %v11166_v24, %v11374_v52  ;;  %v12682_v43 = vld [vmem:[#allocation73_spill] sm:$0xff] }
 0x5b9   : > { %v5538_v16 = vadd.f32 %v5522_v8, %v5503_v25  ;;  %v5557_v15 = vmul.f32 %v11638_v35, %v12681_v32  ;;  %v5366_v61 = vadd.f32 %v5350_v27, %v5331_v33  ;;  %v5385_v30 = vmul.f32 %v11568_v10, %v12646_v22  ;;  %v12683_v25 = vld [vmem:[#allocation77_spill] sm:$0xff]  ;;  %v12684_v32 = vld [vmem:[#allocation46_spill] sm:$0xff] }
 0x5ba   : > { %v5193_v42 = vadd.f32 %v5177_v21, %v5158_v2  ;;  %v5212_v0 = vmul.f32 %v12653_v9, %v11412_v29  ;;  %v5159_v5 = vadd.f32 %v5143_v23, %v5124_v58  ;;  %v5178_v17 = vmul.f32 %v11141_v36, %v12682_v43  ;;  %v12685_v23 = vld [vmem:[#allocation45_spill] sm:$0xff] }
 0x5bb   : > { %v5504_v39 = vadd.f32 %v5488_v44, %v5469_v57  ;;  %v5523_v8 = vmul.f32 %v11648_v3, %v12683_v25  ;;  %v5160_v46 = vadd.f32 %v5144_v1, %v5125_v38  ;;  %v5179_v33 = vmul.f32 %v11230_v51, %v12684_v32  ;;  %v12686_v36 = vld [vmem:[#allocation57_spill] sm:$0xff] }
 0x5bc   : > { %v5400_v27 = vadd.f32 %v5384_v45, %v5365_v20  ;;  %v5419_v2 = vmul.f32 %v11554_v4, %v11246_v55  ;;  %v5227_v21 = vadd.f32 %v5211_v18, %v5192_v12  ;;  %v5246_v58 = vmul.f32 %v12656_v63, %v11374_v52  ;;  %v11666_v45 = vld [vmem:[#allocation10 + $0x188] sm:$0xff]  ;;  %v12687_v12 = vld [vmem:[#allocation23_spill] sm:$0xff] }
 0x5bd   : > { %v5572_v57 = vadd.f32 %v12686_v36, %v12685_v23  ;;  %v5573_v44 = vadd.f32 %v5557_v15, %v5538_v16  ;;  %v5401_v43 = vadd.f32 %v5385_v30, %v5366_v61  ;;  %v5420_v25 = vmul.f32 %v11588_v59, %v12646_v22  ;;  %v12688_v16 = vld [vmem:[#allocation49_spill] sm:$0xff]  ;;  %v12689_v22 = vld [vmem:[#allocation43_spill] sm:$0xff] }
 0x5be   : > { %v5228_v38 = vadd.f32 %v5212_v0, %v5193_v42  ;;  %v5247_v51 = vmul.f32 %v12657_v6, %v11412_v29  ;;  %v5194_v1 = vadd.f32 %v5178_v17, %v5159_v5  ;;  %v5213_v55 = vmul.f32 %v11166_v24, %v11421_v49  ;;  %v12690_v0 = vld [vmem:[#allocation29_spill] sm:$0xff]  ;;  %v11679_v24 = vld [vmem:[%s11897_s7] ss:$0 sm:$0xff] }
 0x5bf   : > { %v5539_v20 = vadd.f32 %v5523_v8, %v5504_v39  ;;  %v5558_v18 = vmul.f32 %v11666_v45, %v12687_v12  ;;  %v5195_v23 = vadd.f32 %v5179_v33, %v5160_v46  ;;  %v5214_v15 = vmul.f32 %v12653_v9, %v12688_v16  ;;  %v12692_v12 = vld [vmem:[#allocation30_spill] sm:$0xff] }
 0x5c0   : > { %v5435_v61 = vadd.f32 %v5419_v2, %v5400_v27  ;;  %v5454_v30 = vmul.f32 %v11578_v13, %v12689_v22  ;;  %v5262_v42 = vadd.f32 %v5246_v58, %v5227_v21  ;;  %v5281_v5 = vmul.f32 %v12664_v47, %v12690_v0  ;;  %v12691_v2 = vld [vmem:[#allocation37_spill] sm:$0xff]  ;;  %v7079_v58 = vpop.f32.mrb[96].mxu1 }
 0x5c1   : > { %v11682_v17 = vadd.f32 %v11679_v24, %v5572_v57  ;;  %v11685_v39 = vadd.f32 %v11679_v24, %v5573_v44  ;;  %v5436_v9 = vadd.f32 %v5420_v25, %v5401_v43  ;;  %v5455_v8 = vmul.f32 %v11608_v28, %v12665_v37  ;;  %v4230_v25 = vpop.f32.mrb[97].mxu1 }
 0x5c2   : > { %v5263_v46 = vadd.f32 %v5247_v51, %v5228_v38  ;;  %v5229_v33 = vadd.f32 %v5213_v55, %v5194_v1  ;;  %v5248_v27 = vmul.f32 %v12656_v63, %v11421_v49  ;;  %v5282_v21 = vmul.f32 %v11435_v26, %v12691_v2  ;;  %v12693_v51 = vld [vmem:[#allocation79_spill] sm:$0xff] }
 0x5c3   : > { %v5574_v36 = vadd.f32 %v5558_v18, %v5539_v20  ;;  %v5489_v57 = vmul.f32 %v11598_v62, %v12692_v12  ;;  %v5230_v22 = vadd.f32 %v5214_v15, %v5195_v23  ;;  %v5249_v43 = vmul.f32 %v12657_v6, %v12688_v16  ;;  %v12694_v20 = vld [vmem:[#allocation75_spill] sm:$0xff] }
 0x5c4   : > { %v4236_v44 = vadd.f32 1e-06, %v7079_v58  ;;  %v5470_v37 = vadd.f32 %v5454_v30, %v5435_v61  ;;  %v5297_v38 = vadd.f32 %v5281_v5, %v5262_v42  ;;  %v5316_v1 = vmul.f32 %v12670_v48, %v12693_v51  ;;  %v12695_v2 = vld [vmem:[#allocation95_spill] sm:$0xff]  ;;  %v7082_v61 = vpop.f32.mrb[98].mxu1  ;;  %v12696_v30 = vld [vmem:[#allocation36_spill] sm:$0xff] }
 0x5c5   : > { %v4231_v63 = vadd.f32 1e-06, %v4230_v25  ;;  %v5471_v55 = vadd.f32 %v5455_v8, %v5436_v9  ;;  %v5490_v0 = vmul.f32 %v11628_v60, %v12576_v50  ;;  %v5283_v18 = vmul.f32 %v12664_v47, %v12694_v20  ;;  %v12697_v58 = vld [vmem:[#allocation51_spill] sm:$0xff]  ;;  %v4240_v50 = vpop.f32.mrb[99].mxu1  ;;  %v12698_v47 = vld [vmem:[#allocation94_spill] sm:$0xff]  ;;  %v12702_v20 = vld [vmem:[#allocation53_spill] sm:$0xff] }
 0x5c6   : > { %7807 = vrcp.f32 %v4236_v44  ;;  %v5264_v23 = vadd.f32 %v5248_v27, %v5229_v33  ;;  %v5298_v15 = vadd.f32 %v5282_v21, %v5263_v46  ;;  %v5317_v6 = vmul.f32 %v11504_v19, %v12695_v2  ;;  %v12699_v44 = vld [vmem:[#allocation96_spill] sm:$0xff] }
 0x5c7   : > { %7809 = vrcp.f32 %v4231_v63  ;;  %v5524_v42 = vmul.f32 %v11618_v31, %v12696_v30  ;;  %v5265_v5 = vadd.f32 %v5249_v43, %v5230_v22  ;;  %v5284_v9 = vmul.f32 %v11435_v26, %v12697_v58  ;;  %v12700_v43 = vld [vmem:[#allocation98_spill] sm:$0xff] }
 0x5c8   : > { %v4246_v8 = vadd.f32 1e-06, %v7082_v61  ;;  %v5505_v12 = vadd.f32 %v5489_v57, %v5470_v37  ;;  %v5332_v25 = vadd.f32 %v5316_v1, %v5297_v38  ;;  %v5351_v33 = vmul.f32 %v12676_v56, %v12698_v47  ;;  %v7085_v57 = vpop.f32.mrb[100].mxu1  ;;  %v12701_v37 = vld [vmem:[#allocation93_spill] sm:$0xff] }
 0x5c9   : > { %v4241_v46 = vadd.f32 1e-06, %v4240_v50  ;;  %v5506_v27 = vadd.f32 %v5490_v0, %v5471_v55  ;;  %v5525_v21 = vmul.f32 %v11648_v3, %v12677_v40  ;;  %v5318_v51 = vmul.f32 %v12670_v48, %v12699_v44  ;;  %v4250_v40 = vpop.f32.mrb[101].mxu1  ;;  %v12703_v48 = vld [vmem:[#allocation72_spill] sm:$0xff]  ;;  %v12706_v44 = vld [vmem:[#allocation34_spill] sm:$0xff] }
 0x5ca   : > { %7811 = vrcp.f32 %v4246_v8  ;;  %v5333_v22 = vadd.f32 %v5317_v6, %v5298_v15  ;;  %v5352_v26 = vmul.f32 %v11544_v11, %v12700_v43  ;;  %v5299_v63 = vadd.f32 %v5283_v18, %v5264_v23  ;;  %v12707_v43 = vld [vmem:[#allocation42_spill] sm:$0xff] }
 0x5cb   : > { %7813 = vrcp.f32 %v4241_v46  ;;  %v5559_v38 = vmul.f32 %v11638_v35, %v12701_v37  ;;  %v5300_v1 = vadd.f32 %v5284_v9, %v5265_v5  ;;  %v5319_v55 = vmul.f32 %v11504_v19, %v12702_v20  ;;  %v12704_v9 = vld [vmem:[#allocation74_spill] sm:$0xff]  ;;  %v12709_v37 = vld [vmem:[#allocation47_spill] sm:$0xff] }
 0x5cc   : > { %v4256_v0 = vadd.f32 1e-06, %v7085_v57  ;;  %v5540_v2 = vadd.f32 %v5524_v42, %v5505_v12  ;;  %v5367_v61 = vadd.f32 %v5351_v33, %v5332_v25  ;;  %v5386_v15 = vmul.f32 %v11534_v14, %v12703_v48  ;;  %v7088_v42 = vpop.f32.mrb[102].mxu1  ;;  %v12705_v12 = vld [vmem:[#allocation55_spill] sm:$0xff] }
 0x5cd   : > { %v4251_v6 = vadd.f32 1e-06, %v4250_v40  ;;  %v11724_v30 = vadd.f32 %v11679_v24, %v5574_v36  ;;  %v5541_v18 = vadd.f32 %v5525_v21, %v5506_v27  ;;  %v5560_v23 = vmul.f32 %v11666_v45, %v11374_v52  ;;  %v4260_v33 = vpop.f32.mrb[103].mxu1 }
 0x5ce   : > { %7815 = vrcp.f32 %v4256_v0  ;;  %v5368_v5 = vadd.f32 %v5352_v26, %v5333_v22  ;;  %v5334_v58 = vadd.f32 %v5318_v51, %v5299_v63  ;;  %v5353_v19 = vmul.f32 %v12676_v56, %v12704_v9  ;;  %v12712_v9 = vld [vmem:[#allocation61_spill] sm:$0xff] }
 0x5cf   : > { %7817 = vrcp.f32 %v4251_v6  ;;  %v5387_v8 = vmul.f32 %v11568_v10, %v12659_v41  ;;  %v5335_v50 = vadd.f32 %v5319_v55, %v5300_v1  ;;  %v5354_v36 = vmul.f32 %v11544_v11, %v12705_v12  ;;  %v12708_v11 = vld [vmem:[#allocation80_spill] sm:$0xff]  ;;  %v7091_v1 = vpop.f32.mrb[104].mxu1 }
 0x5d0   : > { %v7808_v25 = vpop.eup %7807  ;;  %v4266_v47 = vadd.f32 1e-06, %v7088_v42  ;;  %v11734_v46 = vadd.f32 %v5559_v38, %v5540_v2  ;;  %v5402_v52 = vadd.f32 %v5386_v15, %v5367_v61  ;;  %v5421_v27 = vmul.f32 %v11554_v4, %v12703_v48  ;;  %v4270_v61 = vpop.f32.mrb[105].mxu1  ;;  %v12710_v48 = vld [vmem:[#allocation83_spill] sm:$0xff]  ;;  %v12711_v6 = vld [vmem:[#allocation24_spill] sm:$0xff] }
 0x5d1   : > { %v7810_v21 = vpop.eup %7809  ;;  %v4261_v56 = vadd.f32 1e-06, %v4260_v33  ;;  %v4312_v51 = vmul.f32 %v7808_v25, %v12706_v44  ;;  %v11739_v22 = vadd.f32 %v5560_v23, %v5541_v18  ;;  %v5388_v26 = vmul.f32 %v11534_v14, %v12707_v43 }
 0x5d2   : > { %7819 = vrcp.f32 %v4266_v47  ;;  %v4310_v63 = vmul.f32 %v7810_v21, %v12708_v11  ;;  %v5369_v57 = vadd.f32 %v5353_v19, %v5334_v58  ;;  %v5389_v38 = vmul.f32 %v11568_v10, %v12709_v37  ;;  %v12713_v19 = vld [vmem:[#allocation26_spill] sm:$0xff] }
 0x5d3   : > { %7821 = vrcp.f32 %v4261_v56  ;;  %v5403_v20 = vadd.f32 %v5387_v8, %v5368_v5  ;;  %v5422_v55 = vmul.f32 %v11588_v59, %v12659_v41  ;;  %v5370_v0 = vadd.f32 %v5354_v36, %v5335_v50  ;;  %v12714_v41 = vld [vmem:[#allocation89_spill] sm:$0xff]  ;;  %v7094_v36 = vpop.f32.mrb[106].mxu1  ;;  %v12715_v47 = vld [vmem:[#allocation78_spill] sm:$0xff] }
 0x5d4   : > { %v7812_v40 = vpop.eup %7811  ;;  %v4276_v2 = vadd.f32 1e-06, %v7091_v1  ;;  %v5604_v15 = vadd.f32 %v12710_v48, %v4310_v63  ;;  %v5437_v14 = vadd.f32 %v5421_v27, %v5402_v52  ;;  %v5456_v18 = vmul.f32 %v11578_v13, %v12711_v6  ;;  %v4280_v56 = vpop.f32.mrb[107].mxu1 }
 0x5d5   : > { %v7814_v23 = vpop.eup %7813  ;;  %v4271_v58 = vadd.f32 1e-06, %v4270_v61  ;;  %v5605_v10 = vadd.f32 %v12712_v9, %v4312_v51  ;;  %v4316_v42 = vmul.f32 %v7812_v40, %v12713_v19  ;;  %v5423_v5 = vmul.f32 %v11554_v4, %v12707_v43  ;;  %v12716_v4 = vld [vmem:[#allocation35_spill] sm:$0xff]  ;;  %v12717_v43 = vld [vmem:[#allocation32_spill] sm:$0xff]  ;;  %v7097_v61 = vpop.f32.mrb[108].mxu1 }
 0x5d6   : > { %7823 = vrcp.f32 %v4276_v2  ;;  %7133 = vmatprep.mubr.f32.mxu0 %v5604_v15  ;;  %v4314_v8 = vmul.f32 %v7814_v23, %v12714_v41  ;;  %v5404_v50 = vadd.f32 %v5388_v26, %v5369_v57  ;;  %v5424_v12 = vmul.f32 %v11588_v59, %v12709_v37  ;;  %v12718_v59 = vld [vmem:[#allocation87_spill] sm:$0xff]  ;;  %v12719_v37 = vld [vmem:[#allocation58_spill] sm:$0xff]  ;;  %v12721_v40 = vld [vmem:[#allocation48_spill] sm:$0xff]  ;;  %v4290_v23 = vpop.f32.mrb[109].mxu1 }
 0x5d7   : > { %7825 = vrcp.f32 %v4271_v58  ;;  %7134 = vmatmul.mubr.f32.vlgmr.msra.gmra.mrb[96].mxu0 %v5605_v10  ;;  %v5438_v25 = vadd.f32 %v5422_v55, %v5403_v20  ;;  %v5457_v33 = vmul.f32 %v11608_v28, %v12715_v47  ;;  %v5405_v52 = vadd.f32 %v5389_v38, %v5370_v0  ;;  %v12720_v38 = vld [vmem:[#allocation90_spill] sm:$0xff]  ;;  %v7100_v47 = vpop.f32.mrb[110].mxu1 }
 0x5d8   : > { %v7816_v27 = vpop.eup %7815  ;;  %v4286_v21 = vadd.f32 1e-06, %v7094_v36  ;;  %v5606_v44 = vadd.f32 %v12716_v4, %v4314_v8  ;;  %v5472_v51 = vadd.f32 %v5456_v18, %v5437_v14  ;;  %v5491_v26 = vmul.f32 %v11598_v62, %v12717_v43  ;;  %v12726_v36 = vld [vmem:[#allocation20_spill] sm:$0xff]  ;;  %v4300_v4 = vpop.f32.mrb[111].mxu1 }
 0x5d9   : > { %v7818_v11 = vpop.eup %7817  ;;  %v4281_v63 = vadd.f32 1e-06, %v4280_v56  ;;  %v5607_v57 = vadd.f32 %v12718_v59, %v4316_v42  ;;  %v4320_v1 = vmul.f32 %v7816_v27, %v12719_v37  ;;  %v5458_v20 = vmul.f32 %v11578_v13, %v12674_v53  ;;  %v12722_v13 = vld [vmem:[#allocation39_spill] sm:$0xff] }
 0x5da   : > { %7827 = vrcp.f32 %v4286_v21  ;;  %7136 = vmatprep.mubr.f32.mxu0 %v5606_v44  ;;  %v4318_v55 = vmul.f32 %v7818_v11, %v12720_v38  ;;  %v5439_v0 = vadd.f32 %v5423_v5, %v5404_v50  ;;  %v5459_v2 = vmul.f32 %v11608_v28, %v12721_v40  ;;  %v12723_v28 = vld [vmem:[#allocation27_spill] sm:$0xff]  ;;  %v12724_v5 = vld [vmem:[#allocation21_spill] sm:$0xff] }
 0x5db   : > { %7829 = vrcp.f32 %v4281_v63  ;;  %7137 = vmatmul.mubr.f32.gmra.mrb[98].mxu0 %v5607_v57  ;;  %v5473_v48 = vadd.f32 %v5457_v33, %v5438_v25  ;;  %v5492_v15 = vmul.f32 %v11628_v60, %v12593_v54  ;;  %v5440_v14 = vadd.f32 %v5424_v12, %v5405_v52  ;;  %v12725_v54 = vld [vmem:[#allocation84_spill] sm:$0xff]  ;;  %v12727_v33 = vld [vmem:[#allocation73_spill] sm:$0xff]  ;;  %v12730_v57 = vld [vmem:[#allocation66_spill] sm:$0xff] }
 0x5dc   : > { %v7820_v6 = vpop.eup %7819  ;;  %v4296_v18 = vadd.f32 1e-06, %v7097_v61  ;;  %v5608_v53 = vadd.f32 %v12722_v13, %v4318_v55  ;;  %v5507_v58 = vadd.f32 %v5491_v26, %v5472_v51  ;;  %v5526_v9 = vmul.f32 %v11618_v31, %v12679_v34  ;;  %v12729_v11 = vld [vmem:[#allocation85_spill] sm:$0xff]  ;;  %v12732_v61 = vld [vmem:[#allocation68_spill] sm:$0xff] }
 0x5dd   : > { %v7822_v10 = vpop.eup %7821  ;;  %v4291_v19 = vadd.f32 1e-06, %v4290_v23  ;;  %v5609_v42 = vadd.f32 %v12723_v28, %v4320_v1  ;;  %v4324_v41 = vmul.f32 %v7820_v6, %v12724_v5  ;;  %v5493_v8 = vmul.f32 %v11598_v62, %v12620_v7  ;;  %v12728_v7 = vld [vmem:[#allocation33_spill] sm:$0xff]  ;;  %v12736_v28 = vld [vmem:[#allocation99_spill] sm:$0xff] }
 0x5de   : > { %7831 = vrcp.f32 %v4296_v18  ;;  %7139 = vmatprep.mubr.f32.mxu0 %v5608_v53  ;;  %v4322_v50 = vmul.f32 %v7822_v10, %v12725_v54  ;;  %v5474_v12 = vadd.f32 %v5458_v20, %v5439_v0  ;;  %v5494_v25 = vmul.f32 %v11628_v60, %v12726_v36  ;;  %v12731_v20 = vld [vmem:[#allocation50_spill] sm:$0xff]  ;;  %v12735_v10 = vld [vmem:[#allocation97_spill] sm:$0xff] }
 0x5df   : > { %7833 = vrcp.f32 %v4291_v19  ;;  %7140 = vmatmul.mubr.f32.gmra.mrb[100].mxu0 %v5609_v42  ;;  %v5508_v34 = vadd.f32 %v5492_v15, %v5473_v48  ;;  %v5527_v52 = vmul.f32 %v11648_v3, %v12727_v33  ;;  %v5475_v27 = vadd.f32 %v5459_v2, %v5440_v14  ;;  %v12738_v36 = vld [vmem:[#allocation41_spill] sm:$0xff] }
 0x5e0   : > { %v7824_v21 = vpop.eup %7823  ;;  %v4306_v56 = vadd.f32 1e-06, %v7100_v47  ;;  %v5610_v62 = vadd.f32 %v12728_v7, %v4322_v50  ;;  %v5542_v44 = vadd.f32 %v5526_v9, %v5507_v58  ;;  %v5561_v51 = vmul.f32 %v11638_v35, %v11412_v29  ;;  %v12737_v50 = vld [vmem:[#allocation63_spill] sm:$0xff] }
 0x5e1   : > { %v7826_v43 = vpop.eup %7825  ;;  %v4301_v26 = vadd.f32 1e-06, %v4300_v4  ;;  %v5611_v60 = vadd.f32 %v11682_v17, %v4324_v41  ;;  %v4328_v63 = vmul.f32 %v7824_v21, %v12729_v11  ;;  %v5528_v59 = vmul.f32 %v11618_v31, %v12684_v32 }
 0x5e2   : > { %7835 = vrcp.f32 %v4306_v56  ;;  %7142 = vmatprep.mubr.f32.mxu0 %v5610_v62  ;;  %v4326_v37 = vmul.f32 %v7826_v43, %v12730_v57  ;;  %v5509_v1 = vadd.f32 %v5493_v8, %v5474_v12  ;;  %v5529_v38 = vmul.f32 %v11648_v3, %v12731_v20  ;;  %v12733_v3 = vld [vmem:[#allocation64_spill] sm:$0xff] }
 0x5e3   : > { %7837 = vrcp.f32 %v4301_v26  ;;  %7143 = vmatmul.mubr.f32.gmra.mrb[102].mxu0 %v5611_v60  ;;  %v5543_v29 = vadd.f32 %v5527_v52, %v5508_v34  ;;  %v5562_v55 = vmul.f32 %v11666_v45, %v11421_v49  ;;  %v5510_v17 = vadd.f32 %v5494_v25, %v5475_v27  ;;  %v6090_v27 = vld [vmem:[%s12739_s30] ss:$0 sm:$0xff] }
 0x5e4   : > { %v7828_v0 = vpop.eup %7827  ;;  %v5612_v40 = vadd.f32 %v11685_v39, %v4326_v37  ;;  %v5613_v31 = vadd.f32 %v11724_v30, %v4328_v63  ;;  %v5598_v32 = vadd.f32 %v11679_v24, %v11734_v46  ;;  %v5577_v14 = vadd.f32 %v5561_v51, %v5542_v44  ;;  %v12734_v30 = vld [vmem:[#allocation52_spill] sm:$0xff] }
 0x5e5   : > { %v7830_v2 = vpop.eup %7829  ;;  %v4332_v48 = vmul.f32 %v7828_v0, %v12732_v61  ;;  %v5544_v6 = vadd.f32 %v5528_v59, %v5509_v1  ;;  %v5563_v49 = vmul.f32 %v11638_v35, %v12688_v16  ;;  %v5599_v39 = vadd.f32 %v11679_v24, %v11739_v22 }
 0x5e6   : > { %7145 = vmatprep.mubr.f32.mxu0 %v5612_v40  ;;  %v4330_v15 = vmul.f32 %v7830_v2, %v12733_v3  ;;  %v5578_v18 = vadd.f32 %v5562_v55, %v5543_v29  ;;  %v5545_v23 = vadd.f32 %v5529_v38, %v5510_v17  ;;  %v5564_v13 = vmul.f32 %v11666_v45, %v12734_v30 }
 0x5e7   : > { %7146 = vmatmul.mubr.f32.gmra.mrb[104].mxu0 %v5613_v31  ;;  %v5615_v9 = vadd.f32 %v5599_v39, %v4332_v48  ;;  %v5600_v35 = vadd.f32 %v11679_v24, %v5577_v14  ;;  %v5579_v16 = vadd.f32 %v5563_v49, %v5544_v6 }
 0x5e8   : > { %v7832_v46 = vpop.eup %7831  ;;  %v5614_v53 = vadd.f32 %v5598_v32, %v4330_v15  ;;  %v5601_v22 = vadd.f32 %v11679_v24, %v5578_v18  ;;  %v5580_v5 = vadd.f32 %v5564_v13, %v5545_v23 }
 0x5e9   : > { %v7834_v58 = vpop.eup %7833  ;;  %v4336_v19 = vmul.f32 %v7832_v46, %v12735_v10  ;;  %v5602_v47 = vadd.f32 %v11679_v24, %v5579_v16 }
 0x5ea   : > { %7148 = vmatprep.mubr.f32.mxu0 %v5614_v53  ;;  %v4334_v42 = vmul.f32 %v7834_v58, %v12736_v28  ;;  %v5603_v34 = vadd.f32 %v11679_v24, %v5580_v5 }
 0x5eb   : > { %7149 = vmatmul.mubr.f32.gmra.mrb[106].mxu0 %v5615_v9  ;;  %v5617_v45 = vadd.f32 %v5601_v22, %v4336_v19 }
 0x5ec   : > { %v7836_v41 = vpop.eup %7835  ;;  %v5616_v8 = vadd.f32 %v5600_v35, %v4334_v42 }
 0x5ed   : > { %v7838_v54 = vpop.eup %7837  ;;  %v4340_v12 = vmul.f32 %v7836_v41, %v12737_v50 }
 0x5ee   : > { %7151 = vmatprep.mubr.f32.mxu0 %v5616_v8  ;;  %v4338_v25 = vmul.f32 %v7838_v54, %v12738_v36 }
 0x5ef   : > { %7152 = vmatmul.mubr.f32.gmra.mrb[108].mxu0 %v5617_v45  ;;  %v5619_v52 = vadd.f32 %v5603_v34, %v4340_v12 }
 0x5f0   : > { %v5618_v33 = vadd.f32 %v5602_v47, %v4338_v25 }
 0x5f2   : > { %7154 = vmatprep.mubr.f32.mxu0 %v5618_v33 }
 0x5f3   : > { %7155 = vmatmul.mubr.f32.gmra.mrb[110].mxu0 %v5619_v52 }
 0x6aa   : > { %v7135_v21 = vpop.f32.mrb[96].mxu0 }
 0x6ab   : > { %v5715_v56 = vadd.f32 %v7135_v21, %v6090_v27  ;;  %v5709_v4 = vpop.f32.mrb[97].mxu0 }
 0x6ac   : > { %v5710_v7 = vadd.f32 %v6090_v27, %v5709_v4 }
 0x6ad   : > { %5789 = vst [vmem:[%s11821_s21 + $0x8] sm:$0xff] %v5715_v56 }
 0x6ae   : > { %5788 = vst [vmem:[%s11821_s21] sm:$0xff] %v5710_v7  ;;  %v7138_v24 = vpop.f32.mrb[98].mxu0 }
 0x6af   : > { %v5725_v62 = vadd.f32 %v7138_v24, %v6090_v27  ;;  %v5719_v44 = vpop.f32.mrb[99].mxu0 }
 0x6b0   : > { %v5720_v51 = vadd.f32 %v6090_v27, %v5719_v44 }
 0x6b1   : > { %5791 = vst [vmem:[%s11821_s21 + $0x18] sm:$0xff] %v5725_v62 }
 0x6b2   : > { %5790 = vst [vmem:[%s11821_s21 + $0x10] sm:$0xff] %v5720_v51  ;;  %v7141_v43 = vpop.f32.mrb[100].mxu0 }
 0x6b3   : > { %v5735_v26 = vadd.f32 %v7141_v43, %v6090_v27  ;;  %v5729_v60 = vpop.f32.mrb[101].mxu0 }
 0x6b4   : > { %v5730_v11 = vadd.f32 %v6090_v27, %v5729_v60 }
 0x6b5   : > { %5793 = vst [vmem:[%s11821_s21 + $0x28] sm:$0xff] %v5735_v26 }
 0x6b6   : > { %5792 = vst [vmem:[%s11821_s21 + $0x20] sm:$0xff] %v5730_v11  ;;  %v7144_v63 = vpop.f32.mrb[102].mxu0 }
 0x6b7   : > { %v5745_v59 = vadd.f32 %v7144_v63, %v6090_v27  ;;  %v5739_v57 = vpop.f32.mrb[103].mxu0 }
 0x6b8   : > { %v5740_v37 = vadd.f32 %v6090_v27, %v5739_v57 }
 0x6b9   : > { %5795 = vst [vmem:[%s11821_s21 + $0x38] sm:$0xff] %v5745_v59 }
 0x6ba   : > { %5794 = vst [vmem:[%s11821_s21 + $0x30] sm:$0xff] %v5740_v37  ;;  %v7147_v1 = vpop.f32.mrb[104].mxu0 }
 0x6bb   : > { %v5755_v20 = vadd.f32 %v7147_v1, %v6090_v27  ;;  %v5749_v38 = vpop.f32.mrb[105].mxu0 }
 0x6bc   : > { %v5750_v29 = vadd.f32 %v6090_v27, %v5749_v38 }
 0x6bd   : > { %5797 = vst [vmem:[%s11821_s21 + $0x48] sm:$0xff] %v5755_v20 }
 0x6be   : > { %5796 = vst [vmem:[%s11821_s21 + $0x40] sm:$0xff] %v5750_v29  ;;  %v7150_v55 = vpop.f32.mrb[106].mxu0 }
 0x6bf   : > { %v5765_v17 = vadd.f32 %v7150_v55, %v6090_v27  ;;  %v5759_v0 = vpop.f32.mrb[107].mxu0 }
 0x6c0   : > { %v5760_v40 = vadd.f32 %v6090_v27, %v5759_v0 }
 0x6c1   : > { %5799 = vst [vmem:[%s11821_s21 + $0x58] sm:$0xff] %v5765_v17 }
 0x6c2   : > { %5798 = vst [vmem:[%s11821_s21 + $0x50] sm:$0xff] %v5760_v40  ;;  %v7153_v2 = vpop.f32.mrb[108].mxu0 }
 0x6c3   : > { %v5775_v31 = vadd.f32 %v7153_v2, %v6090_v27  ;;  %v5769_v32 = vpop.f32.mrb[109].mxu0 }
 0x6c4   : > { %v5770_v61 = vadd.f32 %v6090_v27, %v5769_v32 }
 0x6c5   : > { %5801 = vst [vmem:[%s11821_s21 + $0x68] sm:$0xff] %v5775_v31 }
 0x6c6   : > { %5800 = vst [vmem:[%s11821_s21 + $0x60] sm:$0xff] %v5770_v61  ;;  %v7156_v48 = vpop.f32.mrb[110].mxu0 }
 0x6c7   : > { %v5785_v3 = vadd.f32 %v7156_v48, %v6090_v27  ;;  %v5779_v15 = vpop.f32.mrb[111].mxu0 }
 0x6c8   : > { %v5780_v14 = vadd.f32 %v6090_v27, %v5779_v15 }
 0x6c9   : > { %5803 = vst [vmem:[%s11821_s21 + $0x78] sm:$0xff] %v5785_v3 }
 0x6ca   : > { %5802 = vst [vmem:[%s11821_s21 + $0x70] sm:$0xff] %v5780_v14 }
 0x6cb   : > { %8089 = shalt.err (!%p8086_p8)
}
 0x6cc   : > { %s8090_s10 = scalar_lea.hbm %s11842_s1, 2048  ;;  %s8094_s25 = scalar_lea.hbm %s12740_s27, 4096 }
 0x6cd   : > { %p8091_p6 = scmp.ne.s32.totalorder %s11842_s1, %s8090_s10  ;;  %p8095_p3 = scmp.lt.u32.totalorder %s11842_s1, %s12740_s27 }
 0x6ce   : > { %p8096_p0 = scmp.lt.u32.totalorder %s8094_s25, %s8090_s10  ;;  %p8098_p2 = scmp.lt.u32.totalorder %s8090_s10, %s11842_s1 }
 0x6cf   : > { %p8092_p9 = pnand %p8091_p6, %p12741_p7 }
 0x6d0   : > { %p8097_p5 = por %p8096_p0, %p8095_p3 }
 0x6d1   : > { %p8093_p4 = pneg %p8092_p9 }
 0x6d2   : > { %p8099_p10 = por %p8098_p2, %p8097_p5 }
 0x6d4   : > { %p8100_p1 = pnand %p8099_p10, %p8093_p4 }
 0x6d6   : > { %8103 = shalt.err (!%p8100_p1)
}
 0x6d7   : > { %s8168_s24 = smov 128   ;;  %s8169_s17 = smov 8  }
 0x6d8   : > { %7597 = dma.vmem_to_hbm [thread:$0]  (%p12741_p7), %s11844_s20, 2048, %s11842_s1, %s5805_s19, %s8168_s24, %s8168_s24, %s8169_s17  }
 0x6d9 PF: > { %s5834_s22 = sand.u32 1, %s8142_s13   ;;  %p12742_p11 = scmp.ne.s32.totalorder %s12189_s12, 0 }
 0x6da   : > { %p12743_p12 = scmp.ge.s32.totalorder %s8154_s16, 2  ;;  %s5835_s23 = scalar_lea.sflag [#allocation4], %s5834_s22 }
 0x6dc   : > { %p7620_p13 = pnand %p12743_p12, %p12742_p11 }
 0x6de   : > { %8137 = dma.done.wait (!%p7620_p13), %s5835_s23, 2048  }
 0x6df   : > { %8139 = vsyncadd (!%p7620_p13), %s5835_s23, 4294965248  ;;  %p26_p8 = scmp.ge.s32.totalorder %s8391_s11, 4   ;;  %s12744_s13 = smov %s8146_s14 }
 0x6e0   : > { %s12745_s14 = smov %s8150_s15  ;;  %s12746_s15 = smov %s8403_s26 }
 0x6e1   : > { %s12747_s16 = smov %s8391_s11  ;;  %28 = sbr.rel (!%p26_p8) target bundleno = 12 (0xc), region = 149 }
 0x6e8   :  { %5840 = vsyncpa [#allocation3], 1 }
 0x6e9   :  { %5842 = vsyncpa [#allocation3 + $0x1], 1 }
 0x6ea   :  { %5843 = vsyncpa [#allocation6], 1 }
 0x6eb   :  { %5844 = vsyncpa [#allocation9], 1 }
 0x6ec   :  { %5845 = vsyncpa [#allocation12], 1 }
 0x6ed   :  { %5846 = vsyncpa [#allocation4], 1 }
 0x6ee   :  { %5848 = vsyncpa [#allocation4 + $0x1], 1 }

</bundles_post_ra>
